<compile_context>
chip_gen: v7x
topology: tpu7x:2x2x1
jax: 0.10.0
libtpu: 0.0.40
codegen_flags: <defaults>
</compile_context>

<pallas_src>
import functools

import jax
import jax.numpy as jnp
from jax.experimental import pallas as pl
from jax.experimental.pallas import tpu as pltpu


# ---------------------------------------------------------------------------
# Fused kernel: RoI max pooling + 1x1 conv + ReLU + bin mean + heads
# ---------------------------------------------------------------------------
def _fused_roi_head_kernel(hs_ref, he_ref, ws_ref, we_ref,
                           x_ref, wc_ref, bc_ref, red_ref, wh_ref, bh_ref,
                           out_ref, pool_sc, *, P, GROUP, TR, R_PAD):
    """One grid step = one tile of TR RoIs, all from one image.

    hs/he/ws/we : flat int32 SMEM tables, entry (r*P + p) = bin bound of RoI r
    x_ref       : (1, H, W, C) f32 feature map of this image (resident over j)
    wc_ref      : (C, F)   bf16 stand-in classifier 1x1-conv weight (resident)
    bc_ref      : (1, F)   f32 classifier bias (resident)
    red_ref     : (TR, TR*GROUP*P) f32 masked per-RoI bin-mean matrix (resident)
    wh_ref      : (F, OUT_PAD) bf16 fused cls_loc|score weight (resident)
    bh_ref      : (1, OUT_PAD) f32 fused bias (resident)
    out_ref     : (TR, OUT_PAD) output block
    pool_sc     : (TR*GROUP*P, C) f32 VMEM scratch for the pooled bins
    """
    i = pl.program_id(0)                     # image index
    j = pl.program_id(1)                     # RoI-tile index within the image
    x = x_ref[0]                             # [H, W, C] f32
    H, W, C = x.shape
    PP = GROUP * P                           # padded pool rows per RoI
    neg = jnp.float32(-3.0e38)

    row_ids = jax.lax.broadcasted_iota(jnp.int32, (H, 1, 1), 0)   # [H,1,1]
    col_ids = jax.lax.broadcasted_iota(jnp.int32, (W, 1), 0)      # [W,1]
    grp_ids = jax.lax.broadcasted_iota(jnp.int32, (GROUP, 1), 0)  # [GROUP,1]

    r0 = i * R_PAD + j * TR                  # flat index of this tile's first RoI

    def pool_one_roi(ri, carry):
        base = (r0 + ri) * P
        for ph in range(P):                  # vertical bins (static, P=7)
            h0 = hs_ref[base + ph]
            h1 = he_ref[base + ph]
            mrow = jnp.logical_and(row_ids >= h0, row_ids < h1)   # [H,1,1]
            rmax = jnp.max(jnp.where(mrow, x, neg), axis=0)       # [W, C]
            blk = jnp.zeros((GROUP, C), jnp.float32)
            for pw in range(P):              # horizontal bins (static, P=7)
                w0 = ws_ref[base + pw]
                w1 = we_ref[base + pw]
                mcol = jnp.logical_and(col_ids >= w0, col_ids < w1)  # [W,1]
                bmax = jnp.max(jnp.where(mcol, rmax, neg),
                               axis=0, keepdims=True)             # [1, C]
                valid = jnp.logical_and(h1 > h0, w1 > w0)         # empty bin -> 0
                bmax = jnp.where(valid, bmax, 0.0)
                blk = jnp.where(grp_ids == pw, bmax, blk)         # row pw of group
            start = pl.multiple_of(ri * PP + ph * GROUP, GROUP)
            pool_sc[pl.ds(start, GROUP), :] = blk                 # aligned 8-row store
        return carry

    jax.lax.fori_loop(0, TR, pool_one_roi, 0)

    # --- stand-in classifier: 1x1 conv + ReLU, then masked per-RoI bin mean ---
    pooled = pool_sc[...]                                          # [TR*PP, C]
    h = jnp.dot(pooled.astype(jnp.bfloat16), wc_ref[...],
                preferred_element_type=jnp.float32)                # [TR*PP, F]
    h = jnp.maximum(h + bc_ref[...], 0.0)
    # red folds both the 1/(P*P) average and the pad-row mask; runs on the MXU.
    fc7 = jnp.dot(red_ref[...], h, preferred_element_type=jnp.float32)  # [TR, F]

    # --- fused cls_loc | score heads (lane-dense padded output columns) ---
    out = jnp.dot(fc7.astype(jnp.bfloat16), wh_ref[...],
                  preferred_element_type=jnp.float32) + bh_ref[...]
    out_ref[...] = out                                             # (TR, OUT_PAD)


# ---------------------------------------------------------------------------
# Glue: torchvision-RoIPool bin quantization (round half-away-from-zero)
# ---------------------------------------------------------------------------
def _roi_bin_bounds(rois_fm, P, H, W, spatial_scale):
    x1 = jnp.floor(rois_fm[:, 0] * spatial_scale + 0.5).astype(jnp.int32)
    y1 = jnp.floor(rois_fm[:, 1] * spatial_scale + 0.5).astype(jnp.int32)
    x2 = jnp.floor(rois_fm[:, 2] * spatial_scale + 0.5).astype(jnp.int32)
    y2 = jnp.floor(rois_fm[:, 3] * spatial_scale + 0.5).astype(jnp.int32)
    roi_w = jnp.maximum(x2 - x1 + 1, 1).astype(jnp.float32)
    roi_h = jnp.maximum(y2 - y1 + 1, 1).astype(jnp.float32)
    bin_w = roi_w / P
    bin_h = roi_h / P
    pidx = jnp.arange(P, dtype=jnp.float32)
    h_start = jnp.clip(jnp.floor(pidx[None] * bin_h[:, None]).astype(jnp.int32)
                       + y1[:, None], 0, H).astype(jnp.int32)
    h_end = jnp.clip(jnp.ceil((pidx[None] + 1.0) * bin_h[:, None]).astype(jnp.int32)
                     + y1[:, None], 0, H).astype(jnp.int32)
    w_start = jnp.clip(jnp.floor(pidx[None] * bin_w[:, None]).astype(jnp.int32)
                       + x1[:, None], 0, W).astype(jnp.int32)
    w_end = jnp.clip(jnp.ceil((pidx[None] + 1.0) * bin_w[:, None]).astype(jnp.int32)
                     + x1[:, None], 0, W).astype(jnp.int32)
    return h_start, h_end, w_start, w_end


def resnet50_roi_head_forward(params, x_nchw, rois, roi_indices, img_size,
                              roi_size=7, spatial_scale=1.0, roi_tile=8):
    """x_nchw: [n, C, Hf, Wf] (PyTorch layout); rois: [n, num_rois, 4]
    (x1,y1,x2,y2) in image coords; roi_indices: [n, num_rois];
    img_size: (img_h, img_w)."""
    n, C, Hf, Wf = x_nchw.shape
    num_rois = rois.shape[1]
    P = roi_size
    GROUP = ((P + 7) // 8) * 8               # pool rows per vertical bin (padded)
    PP = GROUP * P                           # pool rows per RoI
    TR = roi_tile                            # RoIs per grid step
    R_pad = ((num_rois + TR - 1) // TR) * TR
    num_tiles = R_pad // TR

    del roi_indices  # see TODO(synk) at top: standard [n, num_rois] layout assumed

    # RoIs (image coords) -> feature-map coords, exactly as in the module.
    rois_flat = rois.reshape(-1, 4)
    sx = Wf / img_size[1]
    sy = Hf / img_size[0]
    rois_fm = jnp.stack([rois_flat[:, 0] * sx, rois_flat[:, 1] * sy,
                         rois_flat[:, 2] * sx, rois_flat[:, 3] * sy], axis=1)

    hs, he, wsb, web = _roi_bin_bounds(rois_fm, P, Hf, Wf, spatial_scale)

    def pad_flat(t):   # [n*num_rois, P] -> flat [n*R_pad*P]; padded RoIs = empty bins
        t = t.reshape(n, num_rois, P)
        t = jnp.pad(t, ((0, 0), (0, R_pad - num_rois), (0, 0)))
        return t.reshape(-1).astype(jnp.int32)

    hs, he, wsb, web = pad_flat(hs), pad_flat(he), pad_flat(wsb), pad_flat(web)

    # TODO(synk): ideally the backbone would emit NHWC (bf16 on v6e/v7x) directly.
    x_nhwc = jnp.transpose(x_nchw, (0, 2, 3, 1)).astype(jnp.float32)

    # Resident weights: classifier conv + fused lane-dense cls_loc|score head.
    F = params["wc"].shape[1]
    wc = params["wc"].astype(jnp.bfloat16)
    bc = params["bc"].astype(jnp.float32).reshape(1, F)
    L4 = params["wl"].shape[1]
    NC = params["ws"].shape[1]
    OUT = L4 + NC
    OUT_PAD = ((OUT + 127) // 128) * 128
    w_head = jnp.zeros((F, OUT_PAD), jnp.float32)
    w_head = w_head.at[:, :L4].set(params["wl"]).at[:, L4:OUT].set(params["ws"])
    w_head = w_head.astype(jnp.bfloat16)
    b_head = jnp.zeros((1, OUT_PAD), jnp.float32)
    b_head = b_head.at[:, :L4].set(params["bl"]).at[:, L4:OUT].set(params["bs"])

    # Constant per-RoI masked bin-mean matrix (folds 1/(P*P) and the pad rows).
    cols = jnp.arange(TR * PP)
    rows = jnp.arange(TR)[:, None]
    same_roi = (cols[None, :] // PP) == rows
    real_row = (cols[None, :] % GROUP) < P
    red = jnp.where(jnp.logical_and(same_roi, real_row),
                    1.0 / (P * P), 0.0).astype(jnp.float32)

    grid_spec = pltpu.PrefetchScalarGridSpec(
        num_scalar_prefetch=4,
        grid=(n, num_tiles),
        in_specs=[
            # feature map of image i; constant over j -> resident across RoI tiles
            pl.BlockSpec((1, Hf, Wf, C), lambda i, j, *_: (i, 0, 0, 0)),
            pl.BlockSpec((C, F), lambda i, j, *_: (0, 0)),            # conv weight
            pl.BlockSpec((1, F), lambda i, j, *_: (0, 0)),            # conv bias
            pl.BlockSpec((TR, TR * PP), lambda i, j, *_: (0, 0)),     # bin-mean mat
            pl.BlockSpec((F, OUT_PAD), lambda i, j, *_: (0, 0)),      # head weight
            pl.BlockSpec((1, OUT_PAD), lambda i, j, *_: (0, 0)),      # head bias
        ],
        out_specs=pl.BlockSpec((TR, OUT_PAD),
                               lambda i, j, *_: (i * num_tiles + j, 0)),
        scratch_shapes=[pltpu.VMEM((TR * PP, C), jnp.float32)],
    )
    out = pl.pallas_call(
        functools.partial(_fused_roi_head_kernel, P=P, GROUP=GROUP, TR=TR,
                          R_PAD=R_pad),
        grid_spec=grid_spec,
        out_shape=jax.ShapeDtypeStruct((n * R_pad, OUT_PAD), jnp.float32),
        compiler_params=pltpu.CompilerParams(
            dimension_semantics=("parallel", "arbitrary"),
            vmem_limit_bytes=48 * 1024 * 1024),     # fits v7x's 64 MiB VMEM
    )(hs, he, wsb, web, x_nhwc, wc, bc, red, w_head, b_head)

    out = out.reshape(n, R_pad, OUT_PAD)
    roi_cls_locs = out[:, :num_rois, :L4]
    roi_scores = out[:, :num_rois, L4:OUT]
    return roi_cls_locs, roi_scores


# ---------------------------------------------------------------------------
# Main
# ---------------------------------------------------------------------------
if __name__ == "__main__":
    key = jax.random.PRNGKey(0)
    k_x, k_rx, k_ry, k_wc, k_wl, k_ws = jax.random.split(key, 6)

    # small synthetic shapes
    n, C, Hf, Wf = 2, 16, 16, 16          # feature map (NCHW like PyTorch input)
    num_rois = 8
    roi_size = 7
    n_class = 8
    FEAT = 128                            # stand-in for the 2048-d classifier output
    img_size = (32, 32)                   # (img_h, img_w)

    x = jax.random.normal(k_x, (n, C, Hf, Wf), dtype=jnp.float32)

    # random boxes in image coords (sorted so x1<=x2, y1<=y2)
    xs = jnp.sort(jax.random.uniform(k_rx, (n, num_rois, 2), minval=0.0,
                                     maxval=float(img_size[1] - 1)), axis=-1)
    ys = jnp.sort(jax.random.uniform(k_ry, (n, num_rois, 2), minval=0.0,
                                     maxval=float(img_size[0] - 1)), axis=-1)
    rois = jnp.stack([xs[..., 0], ys[..., 0], xs[..., 1], ys[..., 1]], axis=-1)
    roi_indices = jnp.tile(jnp.arange(n, dtype=jnp.float32)[:, None], (1, num_rois))

    # deterministic parameter init (normal_init: mean 0, std 0.01, zero bias)
    params = {
        "wc": 0.05 * jax.random.normal(k_wc, (C, FEAT), dtype=jnp.float32),
        "bc": jnp.zeros((1, FEAT), dtype=jnp.float32),
        "wl": 0.01 * jax.random.normal(k_wl, (FEAT, n_class * 4), dtype=jnp.float32),
        "bl": jnp.zeros((1, n_class * 4), dtype=jnp.float32),
        "ws": 0.01 * jax.random.normal(k_ws, (FEAT, n_class), dtype=jnp.float32),
        "bs": jnp.zeros((1, n_class), dtype=jnp.float32),
    }

    roi_cls_locs, roi_scores = resnet50_roi_head_forward(
        params, x, rois, roi_indices, img_size, roi_size=roi_size)
    jax.block_until_ready((roi_cls_locs, roi_scores))

    assert roi_cls_locs.shape == (n, num_rois, n_class * 4)
    assert roi_scores.shape == (n, num_rois, n_class)
    print("KERNEL_OK")
</pallas_src>

<mosaic_0001>
module attributes {stable_mosaic.version = 11 : i64} {
  func.func @_fused_roi_head_kernel(%arg0: i32, %arg1: i32, %arg2: memref<112xi32, #tpu.memory_space<smem>>, %arg3: memref<112xi32, #tpu.memory_space<smem>>, %arg4: memref<112xi32, #tpu.memory_space<smem>>, %arg5: memref<112xi32, #tpu.memory_space<smem>>, %arg6: memref<1x16x16x16xf32, #tpu.memory_space<vmem>>, %arg7: memref<16x128xbf16, #tpu.memory_space<vmem>>, %arg8: memref<1x128xf32, #tpu.memory_space<vmem>>, %arg9: memref<8x448xf32, #tpu.memory_space<vmem>>, %arg10: memref<128x128xbf16, #tpu.memory_space<vmem>>, %arg11: memref<1x128xf32, #tpu.memory_space<vmem>>, %arg12: memref<8x128xf32, #tpu.memory_space<vmem>>, %arg13: memref<448x16xf32, #tpu.memory_space<vmem>>) attributes {dimension_semantics = [#tpu.dimension_semantics<parallel>, #tpu.dimension_semantics<arbitrary>], iteration_bounds = array<i64: 2, 1>, scalar_prefetch = 4 : i64, scratch_operands = 1 : i64, tpu.core_type = #tpu.core_type<tc>, window_params = [{transform_indices = @transform_0, window_bounds = array<i64: 1, 16, 16, 16>}, {pipeline_mode = #tpu.pipeline_mode<synchronous>, transform_indices = @transform_1, window_bounds = array<i64: 16, 128>}, {pipeline_mode = #tpu.pipeline_mode<synchronous>, transform_indices = @transform_2, window_bounds = array<i64: 1, 128>}, {pipeline_mode = #tpu.pipeline_mode<synchronous>, transform_indices = @transform_3, window_bounds = array<i64: 8, 448>}, {pipeline_mode = #tpu.pipeline_mode<synchronous>, transform_indices = @transform_4, window_bounds = array<i64: 128, 128>}, {pipeline_mode = #tpu.pipeline_mode<synchronous>, transform_indices = @transform_5, window_bounds = array<i64: 1, 128>}, {transform_indices = @transform_6, window_bounds = array<i64: 8, 128>}]} {
    %c0 = arith.constant 0 : index
    %c0_0 = arith.constant 0 : index
    %c0_1 = arith.constant 0 : index
    %c0_2 = arith.constant 0 : index
    %0 = vector.load %arg6[%c0, %c0_0, %c0_1, %c0_2] : memref<1x16x16x16xf32, #tpu.memory_space<vmem>>, vector<1x16x16x16xf32>
    %1 = vector.shape_cast %0 : vector<1x16x16x16xf32> to vector<16x16x16xf32>
    %2 = tpu.iota {dimensions = array<i32: 0>} : vector<16x1x1xi32>
    %3 = tpu.iota {dimensions = array<i32: 0>} : vector<16x1xi32>
    %4 = tpu.iota {dimensions = array<i32: 0>} : vector<8x1xi32>
    %c8_i32 = arith.constant 8 : i32
    %5 = arith.muli %arg0, %c8_i32 : i32
    %c8_i32_3 = arith.constant 8 : i32
    %6 = arith.muli %arg1, %c8_i32_3 : i32
    %7 = arith.addi %5, %6 : i32
    %cst = arith.constant -3.000000e+38 : f32
    %c0_i32 = arith.constant 0 : i32
    %c8_i32_4 = arith.constant 8 : i32
    %8 = arith.addi %c0_i32, %c8_i32_4 : i32
    %c1_i32 = arith.constant 1 : i32
    scf.for %arg14 = %c0_i32 to %8 step %c1_i32  : i32 {
      %27 = arith.addi %7, %arg14 : i32
      %c7_i32 = arith.constant 7 : i32
      %28 = arith.muli %27, %c7_i32 : i32
      %c0_i32_24 = arith.constant 0 : i32
      %29 = arith.addi %28, %c0_i32_24 : i32
      %30 = arith.index_cast %29 : i32 to index
      %31 = memref.load %arg2[%30] : memref<112xi32, #tpu.memory_space<smem>>
      %c0_i32_25 = arith.constant 0 : i32
      %32 = arith.addi %28, %c0_i32_25 : i32
      %33 = arith.index_cast %32 : i32 to index
      %34 = memref.load %arg3[%33] : memref<112xi32, #tpu.memory_space<smem>>
      %35 = vector.broadcast %31 : i32 to vector<16x1x1xi32>
      %36 = arith.cmpi sge, %2, %35 : vector<16x1x1xi32>
      %37 = vector.broadcast %34 : i32 to vector<16x1x1xi32>
      %38 = arith.cmpi slt, %2, %37 : vector<16x1x1xi32>
      %39 = arith.andi %36, %38 : vector<16x1x1xi1>
      %40 = vector.shape_cast %39 : vector<16x1x1xi1> to vector<16x1x1xi1>
      %41 = vector.broadcast %40 : vector<16x1x1xi1> to vector<16x16x16xi1>
      %42 = vector.broadcast %cst : f32 to vector<16x16x16xf32>
      %43 = arith.select %41, %1, %42 : vector<16x16x16xi1>, vector<16x16x16xf32>
      %cst_26 = arith.constant dense<0xFF800000> : vector<16x16xf32>
      %44 = vector.multi_reduction <maximumf>, %43, %cst_26 [0] : vector<16x16x16xf32> to vector<16x16xf32>
      %cst_27 = arith.constant 0.000000e+00 : f32
      %45 = vector.broadcast %cst_27 : f32 to vector<8x16xf32>
      %c0_i32_28 = arith.constant 0 : i32
      %46 = arith.addi %28, %c0_i32_28 : i32
      %47 = arith.index_cast %46 : i32 to index
      %48 = memref.load %arg4[%47] : memref<112xi32, #tpu.memory_space<smem>>
      %c0_i32_29 = arith.constant 0 : i32
      %49 = arith.addi %28, %c0_i32_29 : i32
      %50 = arith.index_cast %49 : i32 to index
      %51 = memref.load %arg5[%50] : memref<112xi32, #tpu.memory_space<smem>>
      %52 = vector.broadcast %48 : i32 to vector<16x1xi32>
      %53 = arith.cmpi sge, %3, %52 : vector<16x1xi32>
      %54 = vector.broadcast %51 : i32 to vector<16x1xi32>
      %55 = arith.cmpi slt, %3, %54 : vector<16x1xi32>
      %56 = arith.andi %53, %55 : vector<16x1xi1>
      %57 = vector.shape_cast %56 : vector<16x1xi1> to vector<16x1xi1>
      %58 = vector.broadcast %57 : vector<16x1xi1> to vector<16x16xi1>
      %59 = vector.broadcast %cst : f32 to vector<16x16xf32>
      %60 = arith.select %58, %44, %59 : vector<16x16xi1>, vector<16x16xf32>
      %cst_30 = arith.constant dense<0xFF800000> : vector<16xf32>
      %61 = vector.multi_reduction <maximumf>, %60, %cst_30 [0] : vector<16x16xf32> to vector<16xf32>
      %62 = vector.shape_cast %61 : vector<16xf32> to vector<1x16xf32>
      %63 = arith.cmpi sgt, %34, %31 : i32
      %64 = arith.cmpi sgt, %51, %48 : i32
      %65 = arith.andi %63, %64 : i1
      %cst_31 = arith.constant 0.000000e+00 : f32
      %66 = vector.broadcast %cst_31 : f32 to vector<1x16xf32>
      %67 = arith.select %65, %62, %66 : vector<1x16xf32>
      %c0_i32_32 = arith.constant 0 : i32
      %68 = vector.broadcast %c0_i32_32 : i32 to vector<8x1xi32>
      %69 = arith.cmpi eq, %4, %68 : vector<8x1xi32>
      %70 = vector.shape_cast %69 : vector<8x1xi1> to vector<8x1xi1>
      %71 = vector.broadcast %70 : vector<8x1xi1> to vector<8x16xi1>
      %72 = vector.shape_cast %67 : vector<1x16xf32> to vector<1x16xf32>
      %73 = vector.broadcast %72 : vector<1x16xf32> to vector<8x16xf32>
      %74 = arith.select %71, %73, %45 : vector<8x16xi1>, vector<8x16xf32>
      %c1_i32_33 = arith.constant 1 : i32
      %75 = arith.addi %28, %c1_i32_33 : i32
      %76 = arith.index_cast %75 : i32 to index
      %77 = memref.load %arg4[%76] : memref<112xi32, #tpu.memory_space<smem>>
      %c1_i32_34 = arith.constant 1 : i32
      %78 = arith.addi %28, %c1_i32_34 : i32
      %79 = arith.index_cast %78 : i32 to index
      %80 = memref.load %arg5[%79] : memref<112xi32, #tpu.memory_space<smem>>
      %81 = vector.broadcast %77 : i32 to vector<16x1xi32>
      %82 = arith.cmpi sge, %3, %81 : vector<16x1xi32>
      %83 = vector.broadcast %80 : i32 to vector<16x1xi32>
      %84 = arith.cmpi slt, %3, %83 : vector<16x1xi32>
      %85 = arith.andi %82, %84 : vector<16x1xi1>
      %86 = vector.shape_cast %85 : vector<16x1xi1> to vector<16x1xi1>
      %87 = vector.broadcast %86 : vector<16x1xi1> to vector<16x16xi1>
      %88 = vector.broadcast %cst : f32 to vector<16x16xf32>
      %89 = arith.select %87, %44, %88 : vector<16x16xi1>, vector<16x16xf32>
      %cst_35 = arith.constant dense<0xFF800000> : vector<16xf32>
      %90 = vector.multi_reduction <maximumf>, %89, %cst_35 [0] : vector<16x16xf32> to vector<16xf32>
      %91 = vector.shape_cast %90 : vector<16xf32> to vector<1x16xf32>
      %92 = arith.cmpi sgt, %34, %31 : i32
      %93 = arith.cmpi sgt, %80, %77 : i32
      %94 = arith.andi %92, %93 : i1
      %cst_36 = arith.constant 0.000000e+00 : f32
      %95 = vector.broadcast %cst_36 : f32 to vector<1x16xf32>
      %96 = arith.select %94, %91, %95 : vector<1x16xf32>
      %c1_i32_37 = arith.constant 1 : i32
      %97 = vector.broadcast %c1_i32_37 : i32 to vector<8x1xi32>
      %98 = arith.cmpi eq, %4, %97 : vector<8x1xi32>
      %99 = vector.shape_cast %98 : vector<8x1xi1> to vector<8x1xi1>
      %100 = vector.broadcast %99 : vector<8x1xi1> to vector<8x16xi1>
      %101 = vector.shape_cast %96 : vector<1x16xf32> to vector<1x16xf32>
      %102 = vector.broadcast %101 : vector<1x16xf32> to vector<8x16xf32>
      %103 = arith.select %100, %102, %74 : vector<8x16xi1>, vector<8x16xf32>
      %c2_i32 = arith.constant 2 : i32
      %104 = arith.addi %28, %c2_i32 : i32
      %105 = arith.index_cast %104 : i32 to index
      %106 = memref.load %arg4[%105] : memref<112xi32, #tpu.memory_space<smem>>
      %c2_i32_38 = arith.constant 2 : i32
      %107 = arith.addi %28, %c2_i32_38 : i32
      %108 = arith.index_cast %107 : i32 to index
      %109 = memref.load %arg5[%108] : memref<112xi32, #tpu.memory_space<smem>>
      %110 = vector.broadcast %106 : i32 to vector<16x1xi32>
      %111 = arith.cmpi sge, %3, %110 : vector<16x1xi32>
      %112 = vector.broadcast %109 : i32 to vector<16x1xi32>
      %113 = arith.cmpi slt, %3, %112 : vector<16x1xi32>
      %114 = arith.andi %111, %113 : vector<16x1xi1>
      %115 = vector.shape_cast %114 : vector<16x1xi1> to vector<16x1xi1>
      %116 = vector.broadcast %115 : vector<16x1xi1> to vector<16x16xi1>
      %117 = vector.broadcast %cst : f32 to vector<16x16xf32>
      %118 = arith.select %116, %44, %117 : vector<16x16xi1>, vector<16x16xf32>
      %cst_39 = arith.constant dense<0xFF800000> : vector<16xf32>
      %119 = vector.multi_reduction <maximumf>, %118, %cst_39 [0] : vector<16x16xf32> to vector<16xf32>
      %120 = vector.shape_cast %119 : vector<16xf32> to vector<1x16xf32>
      %121 = arith.cmpi sgt, %34, %31 : i32
      %122 = arith.cmpi sgt, %109, %106 : i32
      %123 = arith.andi %121, %122 : i1
      %cst_40 = arith.constant 0.000000e+00 : f32
      %124 = vector.broadcast %cst_40 : f32 to vector<1x16xf32>
      %125 = arith.select %123, %120, %124 : vector<1x16xf32>
      %c2_i32_41 = arith.constant 2 : i32
      %126 = vector.broadcast %c2_i32_41 : i32 to vector<8x1xi32>
      %127 = arith.cmpi eq, %4, %126 : vector<8x1xi32>
      %128 = vector.shape_cast %127 : vector<8x1xi1> to vector<8x1xi1>
      %129 = vector.broadcast %128 : vector<8x1xi1> to vector<8x16xi1>
      %130 = vector.shape_cast %125 : vector<1x16xf32> to vector<1x16xf32>
      %131 = vector.broadcast %130 : vector<1x16xf32> to vector<8x16xf32>
      %132 = arith.select %129, %131, %103 : vector<8x16xi1>, vector<8x16xf32>
      %c3_i32 = arith.constant 3 : i32
      %133 = arith.addi %28, %c3_i32 : i32
      %134 = arith.index_cast %133 : i32 to index
      %135 = memref.load %arg4[%134] : memref<112xi32, #tpu.memory_space<smem>>
      %c3_i32_42 = arith.constant 3 : i32
      %136 = arith.addi %28, %c3_i32_42 : i32
      %137 = arith.index_cast %136 : i32 to index
      %138 = memref.load %arg5[%137] : memref<112xi32, #tpu.memory_space<smem>>
      %139 = vector.broadcast %135 : i32 to vector<16x1xi32>
      %140 = arith.cmpi sge, %3, %139 : vector<16x1xi32>
      %141 = vector.broadcast %138 : i32 to vector<16x1xi32>
      %142 = arith.cmpi slt, %3, %141 : vector<16x1xi32>
      %143 = arith.andi %140, %142 : vector<16x1xi1>
      %144 = vector.shape_cast %143 : vector<16x1xi1> to vector<16x1xi1>
      %145 = vector.broadcast %144 : vector<16x1xi1> to vector<16x16xi1>
      %146 = vector.broadcast %cst : f32 to vector<16x16xf32>
      %147 = arith.select %145, %44, %146 : vector<16x16xi1>, vector<16x16xf32>
      %cst_43 = arith.constant dense<0xFF800000> : vector<16xf32>
      %148 = vector.multi_reduction <maximumf>, %147, %cst_43 [0] : vector<16x16xf32> to vector<16xf32>
      %149 = vector.shape_cast %148 : vector<16xf32> to vector<1x16xf32>
      %150 = arith.cmpi sgt, %34, %31 : i32
      %151 = arith.cmpi sgt, %138, %135 : i32
      %152 = arith.andi %150, %151 : i1
      %cst_44 = arith.constant 0.000000e+00 : f32
      %153 = vector.broadcast %cst_44 : f32 to vector<1x16xf32>
      %154 = arith.select %152, %149, %153 : vector<1x16xf32>
      %c3_i32_45 = arith.constant 3 : i32
      %155 = vector.broadcast %c3_i32_45 : i32 to vector<8x1xi32>
      %156 = arith.cmpi eq, %4, %155 : vector<8x1xi32>
      %157 = vector.shape_cast %156 : vector<8x1xi1> to vector<8x1xi1>
      %158 = vector.broadcast %157 : vector<8x1xi1> to vector<8x16xi1>
      %159 = vector.shape_cast %154 : vector<1x16xf32> to vector<1x16xf32>
      %160 = vector.broadcast %159 : vector<1x16xf32> to vector<8x16xf32>
      %161 = arith.select %158, %160, %132 : vector<8x16xi1>, vector<8x16xf32>
      %c4_i32 = arith.constant 4 : i32
      %162 = arith.addi %28, %c4_i32 : i32
      %163 = arith.index_cast %162 : i32 to index
      %164 = memref.load %arg4[%163] : memref<112xi32, #tpu.memory_space<smem>>
      %c4_i32_46 = arith.constant 4 : i32
      %165 = arith.addi %28, %c4_i32_46 : i32
      %166 = arith.index_cast %165 : i32 to index
      %167 = memref.load %arg5[%166] : memref<112xi32, #tpu.memory_space<smem>>
      %168 = vector.broadcast %164 : i32 to vector<16x1xi32>
      %169 = arith.cmpi sge, %3, %168 : vector<16x1xi32>
      %170 = vector.broadcast %167 : i32 to vector<16x1xi32>
      %171 = arith.cmpi slt, %3, %170 : vector<16x1xi32>
      %172 = arith.andi %169, %171 : vector<16x1xi1>
      %173 = vector.shape_cast %172 : vector<16x1xi1> to vector<16x1xi1>
      %174 = vector.broadcast %173 : vector<16x1xi1> to vector<16x16xi1>
      %175 = vector.broadcast %cst : f32 to vector<16x16xf32>
      %176 = arith.select %174, %44, %175 : vector<16x16xi1>, vector<16x16xf32>
      %cst_47 = arith.constant dense<0xFF800000> : vector<16xf32>
      %177 = vector.multi_reduction <maximumf>, %176, %cst_47 [0] : vector<16x16xf32> to vector<16xf32>
      %178 = vector.shape_cast %177 : vector<16xf32> to vector<1x16xf32>
      %179 = arith.cmpi sgt, %34, %31 : i32
      %180 = arith.cmpi sgt, %167, %164 : i32
      %181 = arith.andi %179, %180 : i1
      %cst_48 = arith.constant 0.000000e+00 : f32
      %182 = vector.broadcast %cst_48 : f32 to vector<1x16xf32>
      %183 = arith.select %181, %178, %182 : vector<1x16xf32>
      %c4_i32_49 = arith.constant 4 : i32
      %184 = vector.broadcast %c4_i32_49 : i32 to vector<8x1xi32>
      %185 = arith.cmpi eq, %4, %184 : vector<8x1xi32>
      %186 = vector.shape_cast %185 : vector<8x1xi1> to vector<8x1xi1>
      %187 = vector.broadcast %186 : vector<8x1xi1> to vector<8x16xi1>
      %188 = vector.shape_cast %183 : vector<1x16xf32> to vector<1x16xf32>
      %189 = vector.broadcast %188 : vector<1x16xf32> to vector<8x16xf32>
      %190 = arith.select %187, %189, %161 : vector<8x16xi1>, vector<8x16xf32>
      %c5_i32 = arith.constant 5 : i32
      %191 = arith.addi %28, %c5_i32 : i32
      %192 = arith.index_cast %191 : i32 to index
      %193 = memref.load %arg4[%192] : memref<112xi32, #tpu.memory_space<smem>>
      %c5_i32_50 = arith.constant 5 : i32
      %194 = arith.addi %28, %c5_i32_50 : i32
      %195 = arith.index_cast %194 : i32 to index
      %196 = memref.load %arg5[%195] : memref<112xi32, #tpu.memory_space<smem>>
      %197 = vector.broadcast %193 : i32 to vector<16x1xi32>
      %198 = arith.cmpi sge, %3, %197 : vector<16x1xi32>
      %199 = vector.broadcast %196 : i32 to vector<16x1xi32>
      %200 = arith.cmpi slt, %3, %199 : vector<16x1xi32>
      %201 = arith.andi %198, %200 : vector<16x1xi1>
      %202 = vector.shape_cast %201 : vector<16x1xi1> to vector<16x1xi1>
      %203 = vector.broadcast %202 : vector<16x1xi1> to vector<16x16xi1>
      %204 = vector.broadcast %cst : f32 to vector<16x16xf32>
      %205 = arith.select %203, %44, %204 : vector<16x16xi1>, vector<16x16xf32>
      %cst_51 = arith.constant dense<0xFF800000> : vector<16xf32>
      %206 = vector.multi_reduction <maximumf>, %205, %cst_51 [0] : vector<16x16xf32> to vector<16xf32>
      %207 = vector.shape_cast %206 : vector<16xf32> to vector<1x16xf32>
      %208 = arith.cmpi sgt, %34, %31 : i32
      %209 = arith.cmpi sgt, %196, %193 : i32
      %210 = arith.andi %208, %209 : i1
      %cst_52 = arith.constant 0.000000e+00 : f32
      %211 = vector.broadcast %cst_52 : f32 to vector<1x16xf32>
      %212 = arith.select %210, %207, %211 : vector<1x16xf32>
      %c5_i32_53 = arith.constant 5 : i32
      %213 = vector.broadcast %c5_i32_53 : i32 to vector<8x1xi32>
      %214 = arith.cmpi eq, %4, %213 : vector<8x1xi32>
      %215 = vector.shape_cast %214 : vector<8x1xi1> to vector<8x1xi1>
      %216 = vector.broadcast %215 : vector<8x1xi1> to vector<8x16xi1>
      %217 = vector.shape_cast %212 : vector<1x16xf32> to vector<1x16xf32>
      %218 = vector.broadcast %217 : vector<1x16xf32> to vector<8x16xf32>
      %219 = arith.select %216, %218, %190 : vector<8x16xi1>, vector<8x16xf32>
      %c6_i32 = arith.constant 6 : i32
      %220 = arith.addi %28, %c6_i32 : i32
      %221 = arith.index_cast %220 : i32 to index
      %222 = memref.load %arg4[%221] : memref<112xi32, #tpu.memory_space<smem>>
      %c6_i32_54 = arith.constant 6 : i32
      %223 = arith.addi %28, %c6_i32_54 : i32
      %224 = arith.index_cast %223 : i32 to index
      %225 = memref.load %arg5[%224] : memref<112xi32, #tpu.memory_space<smem>>
      %226 = vector.broadcast %222 : i32 to vector<16x1xi32>
      %227 = arith.cmpi sge, %3, %226 : vector<16x1xi32>
      %228 = vector.broadcast %225 : i32 to vector<16x1xi32>
      %229 = arith.cmpi slt, %3, %228 : vector<16x1xi32>
      %230 = arith.andi %227, %229 : vector<16x1xi1>
      %231 = vector.shape_cast %230 : vector<16x1xi1> to vector<16x1xi1>
      %232 = vector.broadcast %231 : vector<16x1xi1> to vector<16x16xi1>
      %233 = vector.broadcast %cst : f32 to vector<16x16xf32>
      %234 = arith.select %232, %44, %233 : vector<16x16xi1>, vector<16x16xf32>
      %cst_55 = arith.constant dense<0xFF800000> : vector<16xf32>
      %235 = vector.multi_reduction <maximumf>, %234, %cst_55 [0] : vector<16x16xf32> to vector<16xf32>
      %236 = vector.shape_cast %235 : vector<16xf32> to vector<1x16xf32>
      %237 = arith.cmpi sgt, %34, %31 : i32
      %238 = arith.cmpi sgt, %225, %222 : i32
      %239 = arith.andi %237, %238 : i1
      %cst_56 = arith.constant 0.000000e+00 : f32
      %240 = vector.broadcast %cst_56 : f32 to vector<1x16xf32>
      %241 = arith.select %239, %236, %240 : vector<1x16xf32>
      %c6_i32_57 = arith.constant 6 : i32
      %242 = vector.broadcast %c6_i32_57 : i32 to vector<8x1xi32>
      %243 = arith.cmpi eq, %4, %242 : vector<8x1xi32>
      %244 = vector.shape_cast %243 : vector<8x1xi1> to vector<8x1xi1>
      %245 = vector.broadcast %244 : vector<8x1xi1> to vector<8x16xi1>
      %246 = vector.shape_cast %241 : vector<1x16xf32> to vector<1x16xf32>
      %247 = vector.broadcast %246 : vector<1x16xf32> to vector<8x16xf32>
      %248 = arith.select %245, %247, %219 : vector<8x16xi1>, vector<8x16xf32>
      %c56_i32 = arith.constant 56 : i32
      %249 = arith.muli %arg14, %c56_i32 : i32
      %c0_i32_58 = arith.constant 0 : i32
      %250 = arith.addi %249, %c0_i32_58 : i32
      %251 = tpu.assume_multiple %250, 8 : i32
      %252 = arith.index_cast %251 : i32 to index
      %c0_59 = arith.constant 0 : index
      %253 = vector.load %arg13[%252, %c0_59] : memref<448x16xf32, #tpu.memory_space<vmem>>, vector<8x16xf32>
      tpu.vector_store %arg13[%252, %c0_59], %248 {strides = array<i32>} : memref<448x16xf32, #tpu.memory_space<vmem>>, vector<8x16xf32>,
      %c1_i32_60 = arith.constant 1 : i32
      %254 = arith.addi %28, %c1_i32_60 : i32
      %255 = arith.index_cast %254 : i32 to index
      %256 = memref.load %arg2[%255] : memref<112xi32, #tpu.memory_space<smem>>
      %c1_i32_61 = arith.constant 1 : i32
      %257 = arith.addi %28, %c1_i32_61 : i32
      %258 = arith.index_cast %257 : i32 to index
      %259 = memref.load %arg3[%258] : memref<112xi32, #tpu.memory_space<smem>>
      %260 = vector.broadcast %256 : i32 to vector<16x1x1xi32>
      %261 = arith.cmpi sge, %2, %260 : vector<16x1x1xi32>
      %262 = vector.broadcast %259 : i32 to vector<16x1x1xi32>
      %263 = arith.cmpi slt, %2, %262 : vector<16x1x1xi32>
      %264 = arith.andi %261, %263 : vector<16x1x1xi1>
      %265 = vector.shape_cast %264 : vector<16x1x1xi1> to vector<16x1x1xi1>
      %266 = vector.broadcast %265 : vector<16x1x1xi1> to vector<16x16x16xi1>
      %267 = vector.broadcast %cst : f32 to vector<16x16x16xf32>
      %268 = arith.select %266, %1, %267 : vector<16x16x16xi1>, vector<16x16x16xf32>
      %cst_62 = arith.constant dense<0xFF800000> : vector<16x16xf32>
      %269 = vector.multi_reduction <maximumf>, %268, %cst_62 [0] : vector<16x16x16xf32> to vector<16x16xf32>
      %cst_63 = arith.constant 0.000000e+00 : f32
      %270 = vector.broadcast %cst_63 : f32 to vector<8x16xf32>
      %c0_i32_64 = arith.constant 0 : i32
      %271 = arith.addi %28, %c0_i32_64 : i32
      %272 = arith.index_cast %271 : i32 to index
      %273 = memref.load %arg4[%272] : memref<112xi32, #tpu.memory_space<smem>>
      %c0_i32_65 = arith.constant 0 : i32
      %274 = arith.addi %28, %c0_i32_65 : i32
      %275 = arith.index_cast %274 : i32 to index
      %276 = memref.load %arg5[%275] : memref<112xi32, #tpu.memory_space<smem>>
      %277 = vector.broadcast %273 : i32 to vector<16x1xi32>
      %278 = arith.cmpi sge, %3, %277 : vector<16x1xi32>
      %279 = vector.broadcast %276 : i32 to vector<16x1xi32>
      %280 = arith.cmpi slt, %3, %279 : vector<16x1xi32>
      %281 = arith.andi %278, %280 : vector<16x1xi1>
      %282 = vector.shape_cast %281 : vector<16x1xi1> to vector<16x1xi1>
      %283 = vector.broadcast %282 : vector<16x1xi1> to vector<16x16xi1>
      %284 = vector.broadcast %cst : f32 to vector<16x16xf32>
      %285 = arith.select %283, %269, %284 : vector<16x16xi1>, vector<16x16xf32>
      %cst_66 = arith.constant dense<0xFF800000> : vector<16xf32>
      %286 = vector.multi_reduction <maximumf>, %285, %cst_66 [0] : vector<16x16xf32> to vector<16xf32>
      %287 = vector.shape_cast %286 : vector<16xf32> to vector<1x16xf32>
      %288 = arith.cmpi sgt, %259, %256 : i32
      %289 = arith.cmpi sgt, %276, %273 : i32
      %290 = arith.andi %288, %289 : i1
      %cst_67 = arith.constant 0.000000e+00 : f32
      %291 = vector.broadcast %cst_67 : f32 to vector<1x16xf32>
      %292 = arith.select %290, %287, %291 : vector<1x16xf32>
      %c0_i32_68 = arith.constant 0 : i32
      %293 = vector.broadcast %c0_i32_68 : i32 to vector<8x1xi32>
      %294 = arith.cmpi eq, %4, %293 : vector<8x1xi32>
      %295 = vector.shape_cast %294 : vector<8x1xi1> to vector<8x1xi1>
      %296 = vector.broadcast %295 : vector<8x1xi1> to vector<8x16xi1>
      %297 = vector.shape_cast %292 : vector<1x16xf32> to vector<1x16xf32>
      %298 = vector.broadcast %297 : vector<1x16xf32> to vector<8x16xf32>
      %299 = arith.select %296, %298, %270 : vector<8x16xi1>, vector<8x16xf32>
      %c1_i32_69 = arith.constant 1 : i32
      %300 = arith.addi %28, %c1_i32_69 : i32
      %301 = arith.index_cast %300 : i32 to index
      %302 = memref.load %arg4[%301] : memref<112xi32, #tpu.memory_space<smem>>
      %c1_i32_70 = arith.constant 1 : i32
      %303 = arith.addi %28, %c1_i32_70 : i32
      %304 = arith.index_cast %303 : i32 to index
      %305 = memref.load %arg5[%304] : memref<112xi32, #tpu.memory_space<smem>>
      %306 = vector.broadcast %302 : i32 to vector<16x1xi32>
      %307 = arith.cmpi sge, %3, %306 : vector<16x1xi32>
      %308 = vector.broadcast %305 : i32 to vector<16x1xi32>
      %309 = arith.cmpi slt, %3, %308 : vector<16x1xi32>
      %310 = arith.andi %307, %309 : vector<16x1xi1>
      %311 = vector.shape_cast %310 : vector<16x1xi1> to vector<16x1xi1>
      %312 = vector.broadcast %311 : vector<16x1xi1> to vector<16x16xi1>
      %313 = vector.broadcast %cst : f32 to vector<16x16xf32>
      %314 = arith.select %312, %269, %313 : vector<16x16xi1>, vector<16x16xf32>
      %cst_71 = arith.constant dense<0xFF800000> : vector<16xf32>
      %315 = vector.multi_reduction <maximumf>, %314, %cst_71 [0] : vector<16x16xf32> to vector<16xf32>
      %316 = vector.shape_cast %315 : vector<16xf32> to vector<1x16xf32>
      %317 = arith.cmpi sgt, %259, %256 : i32
      %318 = arith.cmpi sgt, %305, %302 : i32
      %319 = arith.andi %317, %318 : i1
      %cst_72 = arith.constant 0.000000e+00 : f32
      %320 = vector.broadcast %cst_72 : f32 to vector<1x16xf32>
      %321 = arith.select %319, %316, %320 : vector<1x16xf32>
      %c1_i32_73 = arith.constant 1 : i32
      %322 = vector.broadcast %c1_i32_73 : i32 to vector<8x1xi32>
      %323 = arith.cmpi eq, %4, %322 : vector<8x1xi32>
      %324 = vector.shape_cast %323 : vector<8x1xi1> to vector<8x1xi1>
      %325 = vector.broadcast %324 : vector<8x1xi1> to vector<8x16xi1>
      %326 = vector.shape_cast %321 : vector<1x16xf32> to vector<1x16xf32>
      %327 = vector.broadcast %326 : vector<1x16xf32> to vector<8x16xf32>
      %328 = arith.select %325, %327, %299 : vector<8x16xi1>, vector<8x16xf32>
      %c2_i32_74 = arith.constant 2 : i32
      %329 = arith.addi %28, %c2_i32_74 : i32
      %330 = arith.index_cast %329 : i32 to index
      %331 = memref.load %arg4[%330] : memref<112xi32, #tpu.memory_space<smem>>
      %c2_i32_75 = arith.constant 2 : i32
      %332 = arith.addi %28, %c2_i32_75 : i32
      %333 = arith.index_cast %332 : i32 to index
      %334 = memref.load %arg5[%333] : memref<112xi32, #tpu.memory_space<smem>>
      %335 = vector.broadcast %331 : i32 to vector<16x1xi32>
      %336 = arith.cmpi sge, %3, %335 : vector<16x1xi32>
      %337 = vector.broadcast %334 : i32 to vector<16x1xi32>
      %338 = arith.cmpi slt, %3, %337 : vector<16x1xi32>
      %339 = arith.andi %336, %338 : vector<16x1xi1>
      %340 = vector.shape_cast %339 : vector<16x1xi1> to vector<16x1xi1>
      %341 = vector.broadcast %340 : vector<16x1xi1> to vector<16x16xi1>
      %342 = vector.broadcast %cst : f32 to vector<16x16xf32>
      %343 = arith.select %341, %269, %342 : vector<16x16xi1>, vector<16x16xf32>
      %cst_76 = arith.constant dense<0xFF800000> : vector<16xf32>
      %344 = vector.multi_reduction <maximumf>, %343, %cst_76 [0] : vector<16x16xf32> to vector<16xf32>
      %345 = vector.shape_cast %344 : vector<16xf32> to vector<1x16xf32>
      %346 = arith.cmpi sgt, %259, %256 : i32
      %347 = arith.cmpi sgt, %334, %331 : i32
      %348 = arith.andi %346, %347 : i1
      %cst_77 = arith.constant 0.000000e+00 : f32
      %349 = vector.broadcast %cst_77 : f32 to vector<1x16xf32>
      %350 = arith.select %348, %345, %349 : vector<1x16xf32>
      %c2_i32_78 = arith.constant 2 : i32
      %351 = vector.broadcast %c2_i32_78 : i32 to vector<8x1xi32>
      %352 = arith.cmpi eq, %4, %351 : vector<8x1xi32>
      %353 = vector.shape_cast %352 : vector<8x1xi1> to vector<8x1xi1>
      %354 = vector.broadcast %353 : vector<8x1xi1> to vector<8x16xi1>
      %355 = vector.shape_cast %350 : vector<1x16xf32> to vector<1x16xf32>
      %356 = vector.broadcast %355 : vector<1x16xf32> to vector<8x16xf32>
      %357 = arith.select %354, %356, %328 : vector<8x16xi1>, vector<8x16xf32>
      %c3_i32_79 = arith.constant 3 : i32
      %358 = arith.addi %28, %c3_i32_79 : i32
      %359 = arith.index_cast %358 : i32 to index
      %360 = memref.load %arg4[%359] : memref<112xi32, #tpu.memory_space<smem>>
      %c3_i32_80 = arith.constant 3 : i32
      %361 = arith.addi %28, %c3_i32_80 : i32
      %362 = arith.index_cast %361 : i32 to index
      %363 = memref.load %arg5[%362] : memref<112xi32, #tpu.memory_space<smem>>
      %364 = vector.broadcast %360 : i32 to vector<16x1xi32>
      %365 = arith.cmpi sge, %3, %364 : vector<16x1xi32>
      %366 = vector.broadcast %363 : i32 to vector<16x1xi32>
      %367 = arith.cmpi slt, %3, %366 : vector<16x1xi32>
      %368 = arith.andi %365, %367 : vector<16x1xi1>
      %369 = vector.shape_cast %368 : vector<16x1xi1> to vector<16x1xi1>
      %370 = vector.broadcast %369 : vector<16x1xi1> to vector<16x16xi1>
      %371 = vector.broadcast %cst : f32 to vector<16x16xf32>
      %372 = arith.select %370, %269, %371 : vector<16x16xi1>, vector<16x16xf32>
      %cst_81 = arith.constant dense<0xFF800000> : vector<16xf32>
      %373 = vector.multi_reduction <maximumf>, %372, %cst_81 [0] : vector<16x16xf32> to vector<16xf32>
      %374 = vector.shape_cast %373 : vector<16xf32> to vector<1x16xf32>
      %375 = arith.cmpi sgt, %259, %256 : i32
      %376 = arith.cmpi sgt, %363, %360 : i32
      %377 = arith.andi %375, %376 : i1
      %cst_82 = arith.constant 0.000000e+00 : f32
      %378 = vector.broadcast %cst_82 : f32 to vector<1x16xf32>
      %379 = arith.select %377, %374, %378 : vector<1x16xf32>
      %c3_i32_83 = arith.constant 3 : i32
      %380 = vector.broadcast %c3_i32_83 : i32 to vector<8x1xi32>
      %381 = arith.cmpi eq, %4, %380 : vector<8x1xi32>
      %382 = vector.shape_cast %381 : vector<8x1xi1> to vector<8x1xi1>
      %383 = vector.broadcast %382 : vector<8x1xi1> to vector<8x16xi1>
      %384 = vector.shape_cast %379 : vector<1x16xf32> to vector<1x16xf32>
      %385 = vector.broadcast %384 : vector<1x16xf32> to vector<8x16xf32>
      %386 = arith.select %383, %385, %357 : vector<8x16xi1>, vector<8x16xf32>
      %c4_i32_84 = arith.constant 4 : i32
      %387 = arith.addi %28, %c4_i32_84 : i32
      %388 = arith.index_cast %387 : i32 to index
      %389 = memref.load %arg4[%388] : memref<112xi32, #tpu.memory_space<smem>>
      %c4_i32_85 = arith.constant 4 : i32
      %390 = arith.addi %28, %c4_i32_85 : i32
      %391 = arith.index_cast %390 : i32 to index
      %392 = memref.load %arg5[%391] : memref<112xi32, #tpu.memory_space<smem>>
      %393 = vector.broadcast %389 : i32 to vector<16x1xi32>
      %394 = arith.cmpi sge, %3, %393 : vector<16x1xi32>
      %395 = vector.broadcast %392 : i32 to vector<16x1xi32>
      %396 = arith.cmpi slt, %3, %395 : vector<16x1xi32>
      %397 = arith.andi %394, %396 : vector<16x1xi1>
      %398 = vector.shape_cast %397 : vector<16x1xi1> to vector<16x1xi1>
      %399 = vector.broadcast %398 : vector<16x1xi1> to vector<16x16xi1>
      %400 = vector.broadcast %cst : f32 to vector<16x16xf32>
      %401 = arith.select %399, %269, %400 : vector<16x16xi1>, vector<16x16xf32>
      %cst_86 = arith.constant dense<0xFF800000> : vector<16xf32>
      %402 = vector.multi_reduction <maximumf>, %401, %cst_86 [0] : vector<16x16xf32> to vector<16xf32>
      %403 = vector.shape_cast %402 : vector<16xf32> to vector<1x16xf32>
      %404 = arith.cmpi sgt, %259, %256 : i32
      %405 = arith.cmpi sgt, %392, %389 : i32
      %406 = arith.andi %404, %405 : i1
      %cst_87 = arith.constant 0.000000e+00 : f32
      %407 = vector.broadcast %cst_87 : f32 to vector<1x16xf32>
      %408 = arith.select %406, %403, %407 : vector<1x16xf32>
      %c4_i32_88 = arith.constant 4 : i32
      %409 = vector.broadcast %c4_i32_88 : i32 to vector<8x1xi32>
      %410 = arith.cmpi eq, %4, %409 : vector<8x1xi32>
      %411 = vector.shape_cast %410 : vector<8x1xi1> to vector<8x1xi1>
      %412 = vector.broadcast %411 : vector<8x1xi1> to vector<8x16xi1>
      %413 = vector.shape_cast %408 : vector<1x16xf32> to vector<1x16xf32>
      %414 = vector.broadcast %413 : vector<1x16xf32> to vector<8x16xf32>
      %415 = arith.select %412, %414, %386 : vector<8x16xi1>, vector<8x16xf32>
      %c5_i32_89 = arith.constant 5 : i32
      %416 = arith.addi %28, %c5_i32_89 : i32
      %417 = arith.index_cast %416 : i32 to index
      %418 = memref.load %arg4[%417] : memref<112xi32, #tpu.memory_space<smem>>
      %c5_i32_90 = arith.constant 5 : i32
      %419 = arith.addi %28, %c5_i32_90 : i32
      %420 = arith.index_cast %419 : i32 to index
      %421 = memref.load %arg5[%420] : memref<112xi32, #tpu.memory_space<smem>>
      %422 = vector.broadcast %418 : i32 to vector<16x1xi32>
      %423 = arith.cmpi sge, %3, %422 : vector<16x1xi32>
      %424 = vector.broadcast %421 : i32 to vector<16x1xi32>
      %425 = arith.cmpi slt, %3, %424 : vector<16x1xi32>
      %426 = arith.andi %423, %425 : vector<16x1xi1>
      %427 = vector.shape_cast %426 : vector<16x1xi1> to vector<16x1xi1>
      %428 = vector.broadcast %427 : vector<16x1xi1> to vector<16x16xi1>
      %429 = vector.broadcast %cst : f32 to vector<16x16xf32>
      %430 = arith.select %428, %269, %429 : vector<16x16xi1>, vector<16x16xf32>
      %cst_91 = arith.constant dense<0xFF800000> : vector<16xf32>
      %431 = vector.multi_reduction <maximumf>, %430, %cst_91 [0] : vector<16x16xf32> to vector<16xf32>
      %432 = vector.shape_cast %431 : vector<16xf32> to vector<1x16xf32>
      %433 = arith.cmpi sgt, %259, %256 : i32
      %434 = arith.cmpi sgt, %421, %418 : i32
      %435 = arith.andi %433, %434 : i1
      %cst_92 = arith.constant 0.000000e+00 : f32
      %436 = vector.broadcast %cst_92 : f32 to vector<1x16xf32>
      %437 = arith.select %435, %432, %436 : vector<1x16xf32>
      %c5_i32_93 = arith.constant 5 : i32
      %438 = vector.broadcast %c5_i32_93 : i32 to vector<8x1xi32>
      %439 = arith.cmpi eq, %4, %438 : vector<8x1xi32>
      %440 = vector.shape_cast %439 : vector<8x1xi1> to vector<8x1xi1>
      %441 = vector.broadcast %440 : vector<8x1xi1> to vector<8x16xi1>
      %442 = vector.shape_cast %437 : vector<1x16xf32> to vector<1x16xf32>
      %443 = vector.broadcast %442 : vector<1x16xf32> to vector<8x16xf32>
      %444 = arith.select %441, %443, %415 : vector<8x16xi1>, vector<8x16xf32>
      %c6_i32_94 = arith.constant 6 : i32
      %445 = arith.addi %28, %c6_i32_94 : i32
      %446 = arith.index_cast %445 : i32 to index
      %447 = memref.load %arg4[%446] : memref<112xi32, #tpu.memory_space<smem>>
      %c6_i32_95 = arith.constant 6 : i32
      %448 = arith.addi %28, %c6_i32_95 : i32
      %449 = arith.index_cast %448 : i32 to index
      %450 = memref.load %arg5[%449] : memref<112xi32, #tpu.memory_space<smem>>
      %451 = vector.broadcast %447 : i32 to vector<16x1xi32>
      %452 = arith.cmpi sge, %3, %451 : vector<16x1xi32>
      %453 = vector.broadcast %450 : i32 to vector<16x1xi32>
      %454 = arith.cmpi slt, %3, %453 : vector<16x1xi32>
      %455 = arith.andi %452, %454 : vector<16x1xi1>
      %456 = vector.shape_cast %455 : vector<16x1xi1> to vector<16x1xi1>
      %457 = vector.broadcast %456 : vector<16x1xi1> to vector<16x16xi1>
      %458 = vector.broadcast %cst : f32 to vector<16x16xf32>
      %459 = arith.select %457, %269, %458 : vector<16x16xi1>, vector<16x16xf32>
      %cst_96 = arith.constant dense<0xFF800000> : vector<16xf32>
      %460 = vector.multi_reduction <maximumf>, %459, %cst_96 [0] : vector<16x16xf32> to vector<16xf32>
      %461 = vector.shape_cast %460 : vector<16xf32> to vector<1x16xf32>
      %462 = arith.cmpi sgt, %259, %256 : i32
      %463 = arith.cmpi sgt, %450, %447 : i32
      %464 = arith.andi %462, %463 : i1
      %cst_97 = arith.constant 0.000000e+00 : f32
      %465 = vector.broadcast %cst_97 : f32 to vector<1x16xf32>
      %466 = arith.select %464, %461, %465 : vector<1x16xf32>
      %c6_i32_98 = arith.constant 6 : i32
      %467 = vector.broadcast %c6_i32_98 : i32 to vector<8x1xi32>
      %468 = arith.cmpi eq, %4, %467 : vector<8x1xi32>
      %469 = vector.shape_cast %468 : vector<8x1xi1> to vector<8x1xi1>
      %470 = vector.broadcast %469 : vector<8x1xi1> to vector<8x16xi1>
      %471 = vector.shape_cast %466 : vector<1x16xf32> to vector<1x16xf32>
      %472 = vector.broadcast %471 : vector<1x16xf32> to vector<8x16xf32>
      %473 = arith.select %470, %472, %444 : vector<8x16xi1>, vector<8x16xf32>
      %c56_i32_99 = arith.constant 56 : i32
      %474 = arith.muli %arg14, %c56_i32_99 : i32
      %c8_i32_100 = arith.constant 8 : i32
      %475 = arith.addi %474, %c8_i32_100 : i32
      %476 = tpu.assume_multiple %475, 8 : i32
      %477 = arith.index_cast %476 : i32 to index
      %c0_101 = arith.constant 0 : index
      %478 = vector.load %arg13[%477, %c0_101] : memref<448x16xf32, #tpu.memory_space<vmem>>, vector<8x16xf32>
      tpu.vector_store %arg13[%477, %c0_101], %473 {strides = array<i32>} : memref<448x16xf32, #tpu.memory_space<vmem>>, vector<8x16xf32>,
      %c2_i32_102 = arith.constant 2 : i32
      %479 = arith.addi %28, %c2_i32_102 : i32
      %480 = arith.index_cast %479 : i32 to index
      %481 = memref.load %arg2[%480] : memref<112xi32, #tpu.memory_space<smem>>
      %c2_i32_103 = arith.constant 2 : i32
      %482 = arith.addi %28, %c2_i32_103 : i32
      %483 = arith.index_cast %482 : i32 to index
      %484 = memref.load %arg3[%483] : memref<112xi32, #tpu.memory_space<smem>>
      %485 = vector.broadcast %481 : i32 to vector<16x1x1xi32>
      %486 = arith.cmpi sge, %2, %485 : vector<16x1x1xi32>
      %487 = vector.broadcast %484 : i32 to vector<16x1x1xi32>
      %488 = arith.cmpi slt, %2, %487 : vector<16x1x1xi32>
      %489 = arith.andi %486, %488 : vector<16x1x1xi1>
      %490 = vector.shape_cast %489 : vector<16x1x1xi1> to vector<16x1x1xi1>
      %491 = vector.broadcast %490 : vector<16x1x1xi1> to vector<16x16x16xi1>
      %492 = vector.broadcast %cst : f32 to vector<16x16x16xf32>
      %493 = arith.select %491, %1, %492 : vector<16x16x16xi1>, vector<16x16x16xf32>
      %cst_104 = arith.constant dense<0xFF800000> : vector<16x16xf32>
      %494 = vector.multi_reduction <maximumf>, %493, %cst_104 [0] : vector<16x16x16xf32> to vector<16x16xf32>
      %cst_105 = arith.constant 0.000000e+00 : f32
      %495 = vector.broadcast %cst_105 : f32 to vector<8x16xf32>
      %c0_i32_106 = arith.constant 0 : i32
      %496 = arith.addi %28, %c0_i32_106 : i32
      %497 = arith.index_cast %496 : i32 to index
      %498 = memref.load %arg4[%497] : memref<112xi32, #tpu.memory_space<smem>>
      %c0_i32_107 = arith.constant 0 : i32
      %499 = arith.addi %28, %c0_i32_107 : i32
      %500 = arith.index_cast %499 : i32 to index
      %501 = memref.load %arg5[%500] : memref<112xi32, #tpu.memory_space<smem>>
      %502 = vector.broadcast %498 : i32 to vector<16x1xi32>
      %503 = arith.cmpi sge, %3, %502 : vector<16x1xi32>
      %504 = vector.broadcast %501 : i32 to vector<16x1xi32>
      %505 = arith.cmpi slt, %3, %504 : vector<16x1xi32>
      %506 = arith.andi %503, %505 : vector<16x1xi1>
      %507 = vector.shape_cast %506 : vector<16x1xi1> to vector<16x1xi1>
      %508 = vector.broadcast %507 : vector<16x1xi1> to vector<16x16xi1>
      %509 = vector.broadcast %cst : f32 to vector<16x16xf32>
      %510 = arith.select %508, %494, %509 : vector<16x16xi1>, vector<16x16xf32>
      %cst_108 = arith.constant dense<0xFF800000> : vector<16xf32>
      %511 = vector.multi_reduction <maximumf>, %510, %cst_108 [0] : vector<16x16xf32> to vector<16xf32>
      %512 = vector.shape_cast %511 : vector<16xf32> to vector<1x16xf32>
      %513 = arith.cmpi sgt, %484, %481 : i32
      %514 = arith.cmpi sgt, %501, %498 : i32
      %515 = arith.andi %513, %514 : i1
      %cst_109 = arith.constant 0.000000e+00 : f32
      %516 = vector.broadcast %cst_109 : f32 to vector<1x16xf32>
      %517 = arith.select %515, %512, %516 : vector<1x16xf32>
      %c0_i32_110 = arith.constant 0 : i32
      %518 = vector.broadcast %c0_i32_110 : i32 to vector<8x1xi32>
      %519 = arith.cmpi eq, %4, %518 : vector<8x1xi32>
      %520 = vector.shape_cast %519 : vector<8x1xi1> to vector<8x1xi1>
      %521 = vector.broadcast %520 : vector<8x1xi1> to vector<8x16xi1>
      %522 = vector.shape_cast %517 : vector<1x16xf32> to vector<1x16xf32>
      %523 = vector.broadcast %522 : vector<1x16xf32> to vector<8x16xf32>
      %524 = arith.select %521, %523, %495 : vector<8x16xi1>, vector<8x16xf32>
      %c1_i32_111 = arith.constant 1 : i32
      %525 = arith.addi %28, %c1_i32_111 : i32
      %526 = arith.index_cast %525 : i32 to index
      %527 = memref.load %arg4[%526] : memref<112xi32, #tpu.memory_space<smem>>
      %c1_i32_112 = arith.constant 1 : i32
      %528 = arith.addi %28, %c1_i32_112 : i32
      %529 = arith.index_cast %528 : i32 to index
      %530 = memref.load %arg5[%529] : memref<112xi32, #tpu.memory_space<smem>>
      %531 = vector.broadcast %527 : i32 to vector<16x1xi32>
      %532 = arith.cmpi sge, %3, %531 : vector<16x1xi32>
      %533 = vector.broadcast %530 : i32 to vector<16x1xi32>
      %534 = arith.cmpi slt, %3, %533 : vector<16x1xi32>
      %535 = arith.andi %532, %534 : vector<16x1xi1>
      %536 = vector.shape_cast %535 : vector<16x1xi1> to vector<16x1xi1>
      %537 = vector.broadcast %536 : vector<16x1xi1> to vector<16x16xi1>
      %538 = vector.broadcast %cst : f32 to vector<16x16xf32>
      %539 = arith.select %537, %494, %538 : vector<16x16xi1>, vector<16x16xf32>
      %cst_113 = arith.constant dense<0xFF800000> : vector<16xf32>
      %540 = vector.multi_reduction <maximumf>, %539, %cst_113 [0] : vector<16x16xf32> to vector<16xf32>
      %541 = vector.shape_cast %540 : vector<16xf32> to vector<1x16xf32>
      %542 = arith.cmpi sgt, %484, %481 : i32
      %543 = arith.cmpi sgt, %530, %527 : i32
      %544 = arith.andi %542, %543 : i1
      %cst_114 = arith.constant 0.000000e+00 : f32
      %545 = vector.broadcast %cst_114 : f32 to vector<1x16xf32>
      %546 = arith.select %544, %541, %545 : vector<1x16xf32>
      %c1_i32_115 = arith.constant 1 : i32
      %547 = vector.broadcast %c1_i32_115 : i32 to vector<8x1xi32>
      %548 = arith.cmpi eq, %4, %547 : vector<8x1xi32>
      %549 = vector.shape_cast %548 : vector<8x1xi1> to vector<8x1xi1>
      %550 = vector.broadcast %549 : vector<8x1xi1> to vector<8x16xi1>
      %551 = vector.shape_cast %546 : vector<1x16xf32> to vector<1x16xf32>
      %552 = vector.broadcast %551 : vector<1x16xf32> to vector<8x16xf32>
      %553 = arith.select %550, %552, %524 : vector<8x16xi1>, vector<8x16xf32>
      %c2_i32_116 = arith.constant 2 : i32
      %554 = arith.addi %28, %c2_i32_116 : i32
      %555 = arith.index_cast %554 : i32 to index
      %556 = memref.load %arg4[%555] : memref<112xi32, #tpu.memory_space<smem>>
      %c2_i32_117 = arith.constant 2 : i32
      %557 = arith.addi %28, %c2_i32_117 : i32
      %558 = arith.index_cast %557 : i32 to index
      %559 = memref.load %arg5[%558] : memref<112xi32, #tpu.memory_space<smem>>
      %560 = vector.broadcast %556 : i32 to vector<16x1xi32>
      %561 = arith.cmpi sge, %3, %560 : vector<16x1xi32>
      %562 = vector.broadcast %559 : i32 to vector<16x1xi32>
      %563 = arith.cmpi slt, %3, %562 : vector<16x1xi32>
      %564 = arith.andi %561, %563 : vector<16x1xi1>
      %565 = vector.shape_cast %564 : vector<16x1xi1> to vector<16x1xi1>
      %566 = vector.broadcast %565 : vector<16x1xi1> to vector<16x16xi1>
      %567 = vector.broadcast %cst : f32 to vector<16x16xf32>
      %568 = arith.select %566, %494, %567 : vector<16x16xi1>, vector<16x16xf32>
      %cst_118 = arith.constant dense<0xFF800000> : vector<16xf32>
      %569 = vector.multi_reduction <maximumf>, %568, %cst_118 [0] : vector<16x16xf32> to vector<16xf32>
      %570 = vector.shape_cast %569 : vector<16xf32> to vector<1x16xf32>
      %571 = arith.cmpi sgt, %484, %481 : i32
      %572 = arith.cmpi sgt, %559, %556 : i32
      %573 = arith.andi %571, %572 : i1
      %cst_119 = arith.constant 0.000000e+00 : f32
      %574 = vector.broadcast %cst_119 : f32 to vector<1x16xf32>
      %575 = arith.select %573, %570, %574 : vector<1x16xf32>
      %c2_i32_120 = arith.constant 2 : i32
      %576 = vector.broadcast %c2_i32_120 : i32 to vector<8x1xi32>
      %577 = arith.cmpi eq, %4, %576 : vector<8x1xi32>
      %578 = vector.shape_cast %577 : vector<8x1xi1> to vector<8x1xi1>
      %579 = vector.broadcast %578 : vector<8x1xi1> to vector<8x16xi1>
      %580 = vector.shape_cast %575 : vector<1x16xf32> to vector<1x16xf32>
      %581 = vector.broadcast %580 : vector<1x16xf32> to vector<8x16xf32>
      %582 = arith.select %579, %581, %553 : vector<8x16xi1>, vector<8x16xf32>
      %c3_i32_121 = arith.constant 3 : i32
      %583 = arith.addi %28, %c3_i32_121 : i32
      %584 = arith.index_cast %583 : i32 to index
      %585 = memref.load %arg4[%584] : memref<112xi32, #tpu.memory_space<smem>>
      %c3_i32_122 = arith.constant 3 : i32
      %586 = arith.addi %28, %c3_i32_122 : i32
      %587 = arith.index_cast %586 : i32 to index
      %588 = memref.load %arg5[%587] : memref<112xi32, #tpu.memory_space<smem>>
      %589 = vector.broadcast %585 : i32 to vector<16x1xi32>
      %590 = arith.cmpi sge, %3, %589 : vector<16x1xi32>
      %591 = vector.broadcast %588 : i32 to vector<16x1xi32>
      %592 = arith.cmpi slt, %3, %591 : vector<16x1xi32>
      %593 = arith.andi %590, %592 : vector<16x1xi1>
      %594 = vector.shape_cast %593 : vector<16x1xi1> to vector<16x1xi1>
      %595 = vector.broadcast %594 : vector<16x1xi1> to vector<16x16xi1>
      %596 = vector.broadcast %cst : f32 to vector<16x16xf32>
      %597 = arith.select %595, %494, %596 : vector<16x16xi1>, vector<16x16xf32>
      %cst_123 = arith.constant dense<0xFF800000> : vector<16xf32>
      %598 = vector.multi_reduction <maximumf>, %597, %cst_123 [0] : vector<16x16xf32> to vector<16xf32>
      %599 = vector.shape_cast %598 : vector<16xf32> to vector<1x16xf32>
      %600 = arith.cmpi sgt, %484, %481 : i32
      %601 = arith.cmpi sgt, %588, %585 : i32
      %602 = arith.andi %600, %601 : i1
      %cst_124 = arith.constant 0.000000e+00 : f32
      %603 = vector.broadcast %cst_124 : f32 to vector<1x16xf32>
      %604 = arith.select %602, %599, %603 : vector<1x16xf32>
      %c3_i32_125 = arith.constant 3 : i32
      %605 = vector.broadcast %c3_i32_125 : i32 to vector<8x1xi32>
      %606 = arith.cmpi eq, %4, %605 : vector<8x1xi32>
      %607 = vector.shape_cast %606 : vector<8x1xi1> to vector<8x1xi1>
      %608 = vector.broadcast %607 : vector<8x1xi1> to vector<8x16xi1>
      %609 = vector.shape_cast %604 : vector<1x16xf32> to vector<1x16xf32>
      %610 = vector.broadcast %609 : vector<1x16xf32> to vector<8x16xf32>
      %611 = arith.select %608, %610, %582 : vector<8x16xi1>, vector<8x16xf32>
      %c4_i32_126 = arith.constant 4 : i32
      %612 = arith.addi %28, %c4_i32_126 : i32
      %613 = arith.index_cast %612 : i32 to index
      %614 = memref.load %arg4[%613] : memref<112xi32, #tpu.memory_space<smem>>
      %c4_i32_127 = arith.constant 4 : i32
      %615 = arith.addi %28, %c4_i32_127 : i32
      %616 = arith.index_cast %615 : i32 to index
      %617 = memref.load %arg5[%616] : memref<112xi32, #tpu.memory_space<smem>>
      %618 = vector.broadcast %614 : i32 to vector<16x1xi32>
      %619 = arith.cmpi sge, %3, %618 : vector<16x1xi32>
      %620 = vector.broadcast %617 : i32 to vector<16x1xi32>
      %621 = arith.cmpi slt, %3, %620 : vector<16x1xi32>
      %622 = arith.andi %619, %621 : vector<16x1xi1>
      %623 = vector.shape_cast %622 : vector<16x1xi1> to vector<16x1xi1>
      %624 = vector.broadcast %623 : vector<16x1xi1> to vector<16x16xi1>
      %625 = vector.broadcast %cst : f32 to vector<16x16xf32>
      %626 = arith.select %624, %494, %625 : vector<16x16xi1>, vector<16x16xf32>
      %cst_128 = arith.constant dense<0xFF800000> : vector<16xf32>
      %627 = vector.multi_reduction <maximumf>, %626, %cst_128 [0] : vector<16x16xf32> to vector<16xf32>
      %628 = vector.shape_cast %627 : vector<16xf32> to vector<1x16xf32>
      %629 = arith.cmpi sgt, %484, %481 : i32
      %630 = arith.cmpi sgt, %617, %614 : i32
      %631 = arith.andi %629, %630 : i1
      %cst_129 = arith.constant 0.000000e+00 : f32
      %632 = vector.broadcast %cst_129 : f32 to vector<1x16xf32>
      %633 = arith.select %631, %628, %632 : vector<1x16xf32>
      %c4_i32_130 = arith.constant 4 : i32
      %634 = vector.broadcast %c4_i32_130 : i32 to vector<8x1xi32>
      %635 = arith.cmpi eq, %4, %634 : vector<8x1xi32>
      %636 = vector.shape_cast %635 : vector<8x1xi1> to vector<8x1xi1>
      %637 = vector.broadcast %636 : vector<8x1xi1> to vector<8x16xi1>
      %638 = vector.shape_cast %633 : vector<1x16xf32> to vector<1x16xf32>
      %639 = vector.broadcast %638 : vector<1x16xf32> to vector<8x16xf32>
      %640 = arith.select %637, %639, %611 : vector<8x16xi1>, vector<8x16xf32>
      %c5_i32_131 = arith.constant 5 : i32
      %641 = arith.addi %28, %c5_i32_131 : i32
      %642 = arith.index_cast %641 : i32 to index
      %643 = memref.load %arg4[%642] : memref<112xi32, #tpu.memory_space<smem>>
      %c5_i32_132 = arith.constant 5 : i32
      %644 = arith.addi %28, %c5_i32_132 : i32
      %645 = arith.index_cast %644 : i32 to index
      %646 = memref.load %arg5[%645] : memref<112xi32, #tpu.memory_space<smem>>
      %647 = vector.broadcast %643 : i32 to vector<16x1xi32>
      %648 = arith.cmpi sge, %3, %647 : vector<16x1xi32>
      %649 = vector.broadcast %646 : i32 to vector<16x1xi32>
      %650 = arith.cmpi slt, %3, %649 : vector<16x1xi32>
      %651 = arith.andi %648, %650 : vector<16x1xi1>
      %652 = vector.shape_cast %651 : vector<16x1xi1> to vector<16x1xi1>
      %653 = vector.broadcast %652 : vector<16x1xi1> to vector<16x16xi1>
      %654 = vector.broadcast %cst : f32 to vector<16x16xf32>
      %655 = arith.select %653, %494, %654 : vector<16x16xi1>, vector<16x16xf32>
      %cst_133 = arith.constant dense<0xFF800000> : vector<16xf32>
      %656 = vector.multi_reduction <maximumf>, %655, %cst_133 [0] : vector<16x16xf32> to vector<16xf32>
      %657 = vector.shape_cast %656 : vector<16xf32> to vector<1x16xf32>
      %658 = arith.cmpi sgt, %484, %481 : i32
      %659 = arith.cmpi sgt, %646, %643 : i32
      %660 = arith.andi %658, %659 : i1
      %cst_134 = arith.constant 0.000000e+00 : f32
      %661 = vector.broadcast %cst_134 : f32 to vector<1x16xf32>
      %662 = arith.select %660, %657, %661 : vector<1x16xf32>
      %c5_i32_135 = arith.constant 5 : i32
      %663 = vector.broadcast %c5_i32_135 : i32 to vector<8x1xi32>
      %664 = arith.cmpi eq, %4, %663 : vector<8x1xi32>
      %665 = vector.shape_cast %664 : vector<8x1xi1> to vector<8x1xi1>
      %666 = vector.broadcast %665 : vector<8x1xi1> to vector<8x16xi1>
      %667 = vector.shape_cast %662 : vector<1x16xf32> to vector<1x16xf32>
      %668 = vector.broadcast %667 : vector<1x16xf32> to vector<8x16xf32>
      %669 = arith.select %666, %668, %640 : vector<8x16xi1>, vector<8x16xf32>
      %c6_i32_136 = arith.constant 6 : i32
      %670 = arith.addi %28, %c6_i32_136 : i32
      %671 = arith.index_cast %670 : i32 to index
      %672 = memref.load %arg4[%671] : memref<112xi32, #tpu.memory_space<smem>>
      %c6_i32_137 = arith.constant 6 : i32
      %673 = arith.addi %28, %c6_i32_137 : i32
      %674 = arith.index_cast %673 : i32 to index
      %675 = memref.load %arg5[%674] : memref<112xi32, #tpu.memory_space<smem>>
      %676 = vector.broadcast %672 : i32 to vector<16x1xi32>
      %677 = arith.cmpi sge, %3, %676 : vector<16x1xi32>
      %678 = vector.broadcast %675 : i32 to vector<16x1xi32>
      %679 = arith.cmpi slt, %3, %678 : vector<16x1xi32>
      %680 = arith.andi %677, %679 : vector<16x1xi1>
      %681 = vector.shape_cast %680 : vector<16x1xi1> to vector<16x1xi1>
      %682 = vector.broadcast %681 : vector<16x1xi1> to vector<16x16xi1>
      %683 = vector.broadcast %cst : f32 to vector<16x16xf32>
      %684 = arith.select %682, %494, %683 : vector<16x16xi1>, vector<16x16xf32>
      %cst_138 = arith.constant dense<0xFF800000> : vector<16xf32>
      %685 = vector.multi_reduction <maximumf>, %684, %cst_138 [0] : vector<16x16xf32> to vector<16xf32>
      %686 = vector.shape_cast %685 : vector<16xf32> to vector<1x16xf32>
      %687 = arith.cmpi sgt, %484, %481 : i32
      %688 = arith.cmpi sgt, %675, %672 : i32
      %689 = arith.andi %687, %688 : i1
      %cst_139 = arith.constant 0.000000e+00 : f32
      %690 = vector.broadcast %cst_139 : f32 to vector<1x16xf32>
      %691 = arith.select %689, %686, %690 : vector<1x16xf32>
      %c6_i32_140 = arith.constant 6 : i32
      %692 = vector.broadcast %c6_i32_140 : i32 to vector<8x1xi32>
      %693 = arith.cmpi eq, %4, %692 : vector<8x1xi32>
      %694 = vector.shape_cast %693 : vector<8x1xi1> to vector<8x1xi1>
      %695 = vector.broadcast %694 : vector<8x1xi1> to vector<8x16xi1>
      %696 = vector.shape_cast %691 : vector<1x16xf32> to vector<1x16xf32>
      %697 = vector.broadcast %696 : vector<1x16xf32> to vector<8x16xf32>
      %698 = arith.select %695, %697, %669 : vector<8x16xi1>, vector<8x16xf32>
      %c56_i32_141 = arith.constant 56 : i32
      %699 = arith.muli %arg14, %c56_i32_141 : i32
      %c16_i32 = arith.constant 16 : i32
      %700 = arith.addi %699, %c16_i32 : i32
      %701 = tpu.assume_multiple %700, 8 : i32
      %702 = arith.index_cast %701 : i32 to index
      %c0_142 = arith.constant 0 : index
      %703 = vector.load %arg13[%702, %c0_142] : memref<448x16xf32, #tpu.memory_space<vmem>>, vector<8x16xf32>
      tpu.vector_store %arg13[%702, %c0_142], %698 {strides = array<i32>} : memref<448x16xf32, #tpu.memory_space<vmem>>, vector<8x16xf32>,
      %c3_i32_143 = arith.constant 3 : i32
      %704 = arith.addi %28, %c3_i32_143 : i32
      %705 = arith.index_cast %704 : i32 to index
      %706 = memref.load %arg2[%705] : memref<112xi32, #tpu.memory_space<smem>>
      %c3_i32_144 = arith.constant 3 : i32
      %707 = arith.addi %28, %c3_i32_144 : i32
      %708 = arith.index_cast %707 : i32 to index
      %709 = memref.load %arg3[%708] : memref<112xi32, #tpu.memory_space<smem>>
      %710 = vector.broadcast %706 : i32 to vector<16x1x1xi32>
      %711 = arith.cmpi sge, %2, %710 : vector<16x1x1xi32>
      %712 = vector.broadcast %709 : i32 to vector<16x1x1xi32>
      %713 = arith.cmpi slt, %2, %712 : vector<16x1x1xi32>
      %714 = arith.andi %711, %713 : vector<16x1x1xi1>
      %715 = vector.shape_cast %714 : vector<16x1x1xi1> to vector<16x1x1xi1>
      %716 = vector.broadcast %715 : vector<16x1x1xi1> to vector<16x16x16xi1>
      %717 = vector.broadcast %cst : f32 to vector<16x16x16xf32>
      %718 = arith.select %716, %1, %717 : vector<16x16x16xi1>, vector<16x16x16xf32>
      %cst_145 = arith.constant dense<0xFF800000> : vector<16x16xf32>
      %719 = vector.multi_reduction <maximumf>, %718, %cst_145 [0] : vector<16x16x16xf32> to vector<16x16xf32>
      %cst_146 = arith.constant 0.000000e+00 : f32
      %720 = vector.broadcast %cst_146 : f32 to vector<8x16xf32>
      %c0_i32_147 = arith.constant 0 : i32
      %721 = arith.addi %28, %c0_i32_147 : i32
      %722 = arith.index_cast %721 : i32 to index
      %723 = memref.load %arg4[%722] : memref<112xi32, #tpu.memory_space<smem>>
      %c0_i32_148 = arith.constant 0 : i32
      %724 = arith.addi %28, %c0_i32_148 : i32
      %725 = arith.index_cast %724 : i32 to index
      %726 = memref.load %arg5[%725] : memref<112xi32, #tpu.memory_space<smem>>
      %727 = vector.broadcast %723 : i32 to vector<16x1xi32>
      %728 = arith.cmpi sge, %3, %727 : vector<16x1xi32>
      %729 = vector.broadcast %726 : i32 to vector<16x1xi32>
      %730 = arith.cmpi slt, %3, %729 : vector<16x1xi32>
      %731 = arith.andi %728, %730 : vector<16x1xi1>
      %732 = vector.shape_cast %731 : vector<16x1xi1> to vector<16x1xi1>
      %733 = vector.broadcast %732 : vector<16x1xi1> to vector<16x16xi1>
      %734 = vector.broadcast %cst : f32 to vector<16x16xf32>
      %735 = arith.select %733, %719, %734 : vector<16x16xi1>, vector<16x16xf32>
      %cst_149 = arith.constant dense<0xFF800000> : vector<16xf32>
      %736 = vector.multi_reduction <maximumf>, %735, %cst_149 [0] : vector<16x16xf32> to vector<16xf32>
      %737 = vector.shape_cast %736 : vector<16xf32> to vector<1x16xf32>
      %738 = arith.cmpi sgt, %709, %706 : i32
      %739 = arith.cmpi sgt, %726, %723 : i32
      %740 = arith.andi %738, %739 : i1
      %cst_150 = arith.constant 0.000000e+00 : f32
      %741 = vector.broadcast %cst_150 : f32 to vector<1x16xf32>
      %742 = arith.select %740, %737, %741 : vector<1x16xf32>
      %c0_i32_151 = arith.constant 0 : i32
      %743 = vector.broadcast %c0_i32_151 : i32 to vector<8x1xi32>
      %744 = arith.cmpi eq, %4, %743 : vector<8x1xi32>
      %745 = vector.shape_cast %744 : vector<8x1xi1> to vector<8x1xi1>
      %746 = vector.broadcast %745 : vector<8x1xi1> to vector<8x16xi1>
      %747 = vector.shape_cast %742 : vector<1x16xf32> to vector<1x16xf32>
      %748 = vector.broadcast %747 : vector<1x16xf32> to vector<8x16xf32>
      %749 = arith.select %746, %748, %720 : vector<8x16xi1>, vector<8x16xf32>
      %c1_i32_152 = arith.constant 1 : i32
      %750 = arith.addi %28, %c1_i32_152 : i32
      %751 = arith.index_cast %750 : i32 to index
      %752 = memref.load %arg4[%751] : memref<112xi32, #tpu.memory_space<smem>>
      %c1_i32_153 = arith.constant 1 : i32
      %753 = arith.addi %28, %c1_i32_153 : i32
      %754 = arith.index_cast %753 : i32 to index
      %755 = memref.load %arg5[%754] : memref<112xi32, #tpu.memory_space<smem>>
      %756 = vector.broadcast %752 : i32 to vector<16x1xi32>
      %757 = arith.cmpi sge, %3, %756 : vector<16x1xi32>
      %758 = vector.broadcast %755 : i32 to vector<16x1xi32>
      %759 = arith.cmpi slt, %3, %758 : vector<16x1xi32>
      %760 = arith.andi %757, %759 : vector<16x1xi1>
      %761 = vector.shape_cast %760 : vector<16x1xi1> to vector<16x1xi1>
      %762 = vector.broadcast %761 : vector<16x1xi1> to vector<16x16xi1>
      %763 = vector.broadcast %cst : f32 to vector<16x16xf32>
      %764 = arith.select %762, %719, %763 : vector<16x16xi1>, vector<16x16xf32>
      %cst_154 = arith.constant dense<0xFF800000> : vector<16xf32>
      %765 = vector.multi_reduction <maximumf>, %764, %cst_154 [0] : vector<16x16xf32> to vector<16xf32>
      %766 = vector.shape_cast %765 : vector<16xf32> to vector<1x16xf32>
      %767 = arith.cmpi sgt, %709, %706 : i32
      %768 = arith.cmpi sgt, %755, %752 : i32
      %769 = arith.andi %767, %768 : i1
      %cst_155 = arith.constant 0.000000e+00 : f32
      %770 = vector.broadcast %cst_155 : f32 to vector<1x16xf32>
      %771 = arith.select %769, %766, %770 : vector<1x16xf32>
      %c1_i32_156 = arith.constant 1 : i32
      %772 = vector.broadcast %c1_i32_156 : i32 to vector<8x1xi32>
      %773 = arith.cmpi eq, %4, %772 : vector<8x1xi32>
      %774 = vector.shape_cast %773 : vector<8x1xi1> to vector<8x1xi1>
      %775 = vector.broadcast %774 : vector<8x1xi1> to vector<8x16xi1>
      %776 = vector.shape_cast %771 : vector<1x16xf32> to vector<1x16xf32>
      %777 = vector.broadcast %776 : vector<1x16xf32> to vector<8x16xf32>
      %778 = arith.select %775, %777, %749 : vector<8x16xi1>, vector<8x16xf32>
      %c2_i32_157 = arith.constant 2 : i32
      %779 = arith.addi %28, %c2_i32_157 : i32
      %780 = arith.index_cast %779 : i32 to index
      %781 = memref.load %arg4[%780] : memref<112xi32, #tpu.memory_space<smem>>
      %c2_i32_158 = arith.constant 2 : i32
      %782 = arith.addi %28, %c2_i32_158 : i32
      %783 = arith.index_cast %782 : i32 to index
      %784 = memref.load %arg5[%783] : memref<112xi32, #tpu.memory_space<smem>>
      %785 = vector.broadcast %781 : i32 to vector<16x1xi32>
      %786 = arith.cmpi sge, %3, %785 : vector<16x1xi32>
      %787 = vector.broadcast %784 : i32 to vector<16x1xi32>
      %788 = arith.cmpi slt, %3, %787 : vector<16x1xi32>
      %789 = arith.andi %786, %788 : vector<16x1xi1>
      %790 = vector.shape_cast %789 : vector<16x1xi1> to vector<16x1xi1>
      %791 = vector.broadcast %790 : vector<16x1xi1> to vector<16x16xi1>
      %792 = vector.broadcast %cst : f32 to vector<16x16xf32>
      %793 = arith.select %791, %719, %792 : vector<16x16xi1>, vector<16x16xf32>
      %cst_159 = arith.constant dense<0xFF800000> : vector<16xf32>
      %794 = vector.multi_reduction <maximumf>, %793, %cst_159 [0] : vector<16x16xf32> to vector<16xf32>
      %795 = vector.shape_cast %794 : vector<16xf32> to vector<1x16xf32>
      %796 = arith.cmpi sgt, %709, %706 : i32
      %797 = arith.cmpi sgt, %784, %781 : i32
      %798 = arith.andi %796, %797 : i1
      %cst_160 = arith.constant 0.000000e+00 : f32
      %799 = vector.broadcast %cst_160 : f32 to vector<1x16xf32>
      %800 = arith.select %798, %795, %799 : vector<1x16xf32>
      %c2_i32_161 = arith.constant 2 : i32
      %801 = vector.broadcast %c2_i32_161 : i32 to vector<8x1xi32>
      %802 = arith.cmpi eq, %4, %801 : vector<8x1xi32>
      %803 = vector.shape_cast %802 : vector<8x1xi1> to vector<8x1xi1>
      %804 = vector.broadcast %803 : vector<8x1xi1> to vector<8x16xi1>
      %805 = vector.shape_cast %800 : vector<1x16xf32> to vector<1x16xf32>
      %806 = vector.broadcast %805 : vector<1x16xf32> to vector<8x16xf32>
      %807 = arith.select %804, %806, %778 : vector<8x16xi1>, vector<8x16xf32>
      %c3_i32_162 = arith.constant 3 : i32
      %808 = arith.addi %28, %c3_i32_162 : i32
      %809 = arith.index_cast %808 : i32 to index
      %810 = memref.load %arg4[%809] : memref<112xi32, #tpu.memory_space<smem>>
      %c3_i32_163 = arith.constant 3 : i32
      %811 = arith.addi %28, %c3_i32_163 : i32
      %812 = arith.index_cast %811 : i32 to index
      %813 = memref.load %arg5[%812] : memref<112xi32, #tpu.memory_space<smem>>
      %814 = vector.broadcast %810 : i32 to vector<16x1xi32>
      %815 = arith.cmpi sge, %3, %814 : vector<16x1xi32>
      %816 = vector.broadcast %813 : i32 to vector<16x1xi32>
      %817 = arith.cmpi slt, %3, %816 : vector<16x1xi32>
      %818 = arith.andi %815, %817 : vector<16x1xi1>
      %819 = vector.shape_cast %818 : vector<16x1xi1> to vector<16x1xi1>
      %820 = vector.broadcast %819 : vector<16x1xi1> to vector<16x16xi1>
      %821 = vector.broadcast %cst : f32 to vector<16x16xf32>
      %822 = arith.select %820, %719, %821 : vector<16x16xi1>, vector<16x16xf32>
      %cst_164 = arith.constant dense<0xFF800000> : vector<16xf32>
      %823 = vector.multi_reduction <maximumf>, %822, %cst_164 [0] : vector<16x16xf32> to vector<16xf32>
      %824 = vector.shape_cast %823 : vector<16xf32> to vector<1x16xf32>
      %825 = arith.cmpi sgt, %709, %706 : i32
      %826 = arith.cmpi sgt, %813, %810 : i32
      %827 = arith.andi %825, %826 : i1
      %cst_165 = arith.constant 0.000000e+00 : f32
      %828 = vector.broadcast %cst_165 : f32 to vector<1x16xf32>
      %829 = arith.select %827, %824, %828 : vector<1x16xf32>
      %c3_i32_166 = arith.constant 3 : i32
      %830 = vector.broadcast %c3_i32_166 : i32 to vector<8x1xi32>
      %831 = arith.cmpi eq, %4, %830 : vector<8x1xi32>
      %832 = vector.shape_cast %831 : vector<8x1xi1> to vector<8x1xi1>
      %833 = vector.broadcast %832 : vector<8x1xi1> to vector<8x16xi1>
      %834 = vector.shape_cast %829 : vector<1x16xf32> to vector<1x16xf32>
      %835 = vector.broadcast %834 : vector<1x16xf32> to vector<8x16xf32>
      %836 = arith.select %833, %835, %807 : vector<8x16xi1>, vector<8x16xf32>
      %c4_i32_167 = arith.constant 4 : i32
      %837 = arith.addi %28, %c4_i32_167 : i32
      %838 = arith.index_cast %837 : i32 to index
      %839 = memref.load %arg4[%838] : memref<112xi32, #tpu.memory_space<smem>>
      %c4_i32_168 = arith.constant 4 : i32
      %840 = arith.addi %28, %c4_i32_168 : i32
      %841 = arith.index_cast %840 : i32 to index
      %842 = memref.load %arg5[%841] : memref<112xi32, #tpu.memory_space<smem>>
      %843 = vector.broadcast %839 : i32 to vector<16x1xi32>
      %844 = arith.cmpi sge, %3, %843 : vector<16x1xi32>
      %845 = vector.broadcast %842 : i32 to vector<16x1xi32>
      %846 = arith.cmpi slt, %3, %845 : vector<16x1xi32>
      %847 = arith.andi %844, %846 : vector<16x1xi1>
      %848 = vector.shape_cast %847 : vector<16x1xi1> to vector<16x1xi1>
      %849 = vector.broadcast %848 : vector<16x1xi1> to vector<16x16xi1>
      %850 = vector.broadcast %cst : f32 to vector<16x16xf32>
      %851 = arith.select %849, %719, %850 : vector<16x16xi1>, vector<16x16xf32>
      %cst_169 = arith.constant dense<0xFF800000> : vector<16xf32>
      %852 = vector.multi_reduction <maximumf>, %851, %cst_169 [0] : vector<16x16xf32> to vector<16xf32>
      %853 = vector.shape_cast %852 : vector<16xf32> to vector<1x16xf32>
      %854 = arith.cmpi sgt, %709, %706 : i32
      %855 = arith.cmpi sgt, %842, %839 : i32
      %856 = arith.andi %854, %855 : i1
      %cst_170 = arith.constant 0.000000e+00 : f32
      %857 = vector.broadcast %cst_170 : f32 to vector<1x16xf32>
      %858 = arith.select %856, %853, %857 : vector<1x16xf32>
      %c4_i32_171 = arith.constant 4 : i32
      %859 = vector.broadcast %c4_i32_171 : i32 to vector<8x1xi32>
      %860 = arith.cmpi eq, %4, %859 : vector<8x1xi32>
      %861 = vector.shape_cast %860 : vector<8x1xi1> to vector<8x1xi1>
      %862 = vector.broadcast %861 : vector<8x1xi1> to vector<8x16xi1>
      %863 = vector.shape_cast %858 : vector<1x16xf32> to vector<1x16xf32>
      %864 = vector.broadcast %863 : vector<1x16xf32> to vector<8x16xf32>
      %865 = arith.select %862, %864, %836 : vector<8x16xi1>, vector<8x16xf32>
      %c5_i32_172 = arith.constant 5 : i32
      %866 = arith.addi %28, %c5_i32_172 : i32
      %867 = arith.index_cast %866 : i32 to index
      %868 = memref.load %arg4[%867] : memref<112xi32, #tpu.memory_space<smem>>
      %c5_i32_173 = arith.constant 5 : i32
      %869 = arith.addi %28, %c5_i32_173 : i32
      %870 = arith.index_cast %869 : i32 to index
      %871 = memref.load %arg5[%870] : memref<112xi32, #tpu.memory_space<smem>>
      %872 = vector.broadcast %868 : i32 to vector<16x1xi32>
      %873 = arith.cmpi sge, %3, %872 : vector<16x1xi32>
      %874 = vector.broadcast %871 : i32 to vector<16x1xi32>
      %875 = arith.cmpi slt, %3, %874 : vector<16x1xi32>
      %876 = arith.andi %873, %875 : vector<16x1xi1>
      %877 = vector.shape_cast %876 : vector<16x1xi1> to vector<16x1xi1>
      %878 = vector.broadcast %877 : vector<16x1xi1> to vector<16x16xi1>
      %879 = vector.broadcast %cst : f32 to vector<16x16xf32>
      %880 = arith.select %878, %719, %879 : vector<16x16xi1>, vector<16x16xf32>
      %cst_174 = arith.constant dense<0xFF800000> : vector<16xf32>
      %881 = vector.multi_reduction <maximumf>, %880, %cst_174 [0] : vector<16x16xf32> to vector<16xf32>
      %882 = vector.shape_cast %881 : vector<16xf32> to vector<1x16xf32>
      %883 = arith.cmpi sgt, %709, %706 : i32
      %884 = arith.cmpi sgt, %871, %868 : i32
      %885 = arith.andi %883, %884 : i1
      %cst_175 = arith.constant 0.000000e+00 : f32
      %886 = vector.broadcast %cst_175 : f32 to vector<1x16xf32>
      %887 = arith.select %885, %882, %886 : vector<1x16xf32>
      %c5_i32_176 = arith.constant 5 : i32
      %888 = vector.broadcast %c5_i32_176 : i32 to vector<8x1xi32>
      %889 = arith.cmpi eq, %4, %888 : vector<8x1xi32>
      %890 = vector.shape_cast %889 : vector<8x1xi1> to vector<8x1xi1>
      %891 = vector.broadcast %890 : vector<8x1xi1> to vector<8x16xi1>
      %892 = vector.shape_cast %887 : vector<1x16xf32> to vector<1x16xf32>
      %893 = vector.broadcast %892 : vector<1x16xf32> to vector<8x16xf32>
      %894 = arith.select %891, %893, %865 : vector<8x16xi1>, vector<8x16xf32>
      %c6_i32_177 = arith.constant 6 : i32
      %895 = arith.addi %28, %c6_i32_177 : i32
      %896 = arith.index_cast %895 : i32 to index
      %897 = memref.load %arg4[%896] : memref<112xi32, #tpu.memory_space<smem>>
      %c6_i32_178 = arith.constant 6 : i32
      %898 = arith.addi %28, %c6_i32_178 : i32
      %899 = arith.index_cast %898 : i32 to index
      %900 = memref.load %arg5[%899] : memref<112xi32, #tpu.memory_space<smem>>
      %901 = vector.broadcast %897 : i32 to vector<16x1xi32>
      %902 = arith.cmpi sge, %3, %901 : vector<16x1xi32>
      %903 = vector.broadcast %900 : i32 to vector<16x1xi32>
      %904 = arith.cmpi slt, %3, %903 : vector<16x1xi32>
      %905 = arith.andi %902, %904 : vector<16x1xi1>
      %906 = vector.shape_cast %905 : vector<16x1xi1> to vector<16x1xi1>
      %907 = vector.broadcast %906 : vector<16x1xi1> to vector<16x16xi1>
      %908 = vector.broadcast %cst : f32 to vector<16x16xf32>
      %909 = arith.select %907, %719, %908 : vector<16x16xi1>, vector<16x16xf32>
      %cst_179 = arith.constant dense<0xFF800000> : vector<16xf32>
      %910 = vector.multi_reduction <maximumf>, %909, %cst_179 [0] : vector<16x16xf32> to vector<16xf32>
      %911 = vector.shape_cast %910 : vector<16xf32> to vector<1x16xf32>
      %912 = arith.cmpi sgt, %709, %706 : i32
      %913 = arith.cmpi sgt, %900, %897 : i32
      %914 = arith.andi %912, %913 : i1
      %cst_180 = arith.constant 0.000000e+00 : f32
      %915 = vector.broadcast %cst_180 : f32 to vector<1x16xf32>
      %916 = arith.select %914, %911, %915 : vector<1x16xf32>
      %c6_i32_181 = arith.constant 6 : i32
      %917 = vector.broadcast %c6_i32_181 : i32 to vector<8x1xi32>
      %918 = arith.cmpi eq, %4, %917 : vector<8x1xi32>
      %919 = vector.shape_cast %918 : vector<8x1xi1> to vector<8x1xi1>
      %920 = vector.broadcast %919 : vector<8x1xi1> to vector<8x16xi1>
      %921 = vector.shape_cast %916 : vector<1x16xf32> to vector<1x16xf32>
      %922 = vector.broadcast %921 : vector<1x16xf32> to vector<8x16xf32>
      %923 = arith.select %920, %922, %894 : vector<8x16xi1>, vector<8x16xf32>
      %c56_i32_182 = arith.constant 56 : i32
      %924 = arith.muli %arg14, %c56_i32_182 : i32
      %c24_i32 = arith.constant 24 : i32
      %925 = arith.addi %924, %c24_i32 : i32
      %926 = tpu.assume_multiple %925, 8 : i32
      %927 = arith.index_cast %926 : i32 to index
      %c0_183 = arith.constant 0 : index
      %928 = vector.load %arg13[%927, %c0_183] : memref<448x16xf32, #tpu.memory_space<vmem>>, vector<8x16xf32>
      tpu.vector_store %arg13[%927, %c0_183], %923 {strides = array<i32>} : memref<448x16xf32, #tpu.memory_space<vmem>>, vector<8x16xf32>,
      %c4_i32_184 = arith.constant 4 : i32
      %929 = arith.addi %28, %c4_i32_184 : i32
      %930 = arith.index_cast %929 : i32 to index
      %931 = memref.load %arg2[%930] : memref<112xi32, #tpu.memory_space<smem>>
      %c4_i32_185 = arith.constant 4 : i32
      %932 = arith.addi %28, %c4_i32_185 : i32
      %933 = arith.index_cast %932 : i32 to index
      %934 = memref.load %arg3[%933] : memref<112xi32, #tpu.memory_space<smem>>
      %935 = vector.broadcast %931 : i32 to vector<16x1x1xi32>
      %936 = arith.cmpi sge, %2, %935 : vector<16x1x1xi32>
      %937 = vector.broadcast %934 : i32 to vector<16x1x1xi32>
      %938 = arith.cmpi slt, %2, %937 : vector<16x1x1xi32>
      %939 = arith.andi %936, %938 : vector<16x1x1xi1>
      %940 = vector.shape_cast %939 : vector<16x1x1xi1> to vector<16x1x1xi1>
      %941 = vector.broadcast %940 : vector<16x1x1xi1> to vector<16x16x16xi1>
      %942 = vector.broadcast %cst : f32 to vector<16x16x16xf32>
      %943 = arith.select %941, %1, %942 : vector<16x16x16xi1>, vector<16x16x16xf32>
      %cst_186 = arith.constant dense<0xFF800000> : vector<16x16xf32>
      %944 = vector.multi_reduction <maximumf>, %943, %cst_186 [0] : vector<16x16x16xf32> to vector<16x16xf32>
      %cst_187 = arith.constant 0.000000e+00 : f32
      %945 = vector.broadcast %cst_187 : f32 to vector<8x16xf32>
      %c0_i32_188 = arith.constant 0 : i32
      %946 = arith.addi %28, %c0_i32_188 : i32
      %947 = arith.index_cast %946 : i32 to index
      %948 = memref.load %arg4[%947] : memref<112xi32, #tpu.memory_space<smem>>
      %c0_i32_189 = arith.constant 0 : i32
      %949 = arith.addi %28, %c0_i32_189 : i32
      %950 = arith.index_cast %949 : i32 to index
      %951 = memref.load %arg5[%950] : memref<112xi32, #tpu.memory_space<smem>>
      %952 = vector.broadcast %948 : i32 to vector<16x1xi32>
      %953 = arith.cmpi sge, %3, %952 : vector<16x1xi32>
      %954 = vector.broadcast %951 : i32 to vector<16x1xi32>
      %955 = arith.cmpi slt, %3, %954 : vector<16x1xi32>
      %956 = arith.andi %953, %955 : vector<16x1xi1>
      %957 = vector.shape_cast %956 : vector<16x1xi1> to vector<16x1xi1>
      %958 = vector.broadcast %957 : vector<16x1xi1> to vector<16x16xi1>
      %959 = vector.broadcast %cst : f32 to vector<16x16xf32>
      %960 = arith.select %958, %944, %959 : vector<16x16xi1>, vector<16x16xf32>
      %cst_190 = arith.constant dense<0xFF800000> : vector<16xf32>
      %961 = vector.multi_reduction <maximumf>, %960, %cst_190 [0] : vector<16x16xf32> to vector<16xf32>
      %962 = vector.shape_cast %961 : vector<16xf32> to vector<1x16xf32>
      %963 = arith.cmpi sgt, %934, %931 : i32
      %964 = arith.cmpi sgt, %951, %948 : i32
      %965 = arith.andi %963, %964 : i1
      %cst_191 = arith.constant 0.000000e+00 : f32
      %966 = vector.broadcast %cst_191 : f32 to vector<1x16xf32>
      %967 = arith.select %965, %962, %966 : vector<1x16xf32>
      %c0_i32_192 = arith.constant 0 : i32
      %968 = vector.broadcast %c0_i32_192 : i32 to vector<8x1xi32>
      %969 = arith.cmpi eq, %4, %968 : vector<8x1xi32>
      %970 = vector.shape_cast %969 : vector<8x1xi1> to vector<8x1xi1>
      %971 = vector.broadcast %970 : vector<8x1xi1> to vector<8x16xi1>
      %972 = vector.shape_cast %967 : vector<1x16xf32> to vector<1x16xf32>
      %973 = vector.broadcast %972 : vector<1x16xf32> to vector<8x16xf32>
      %974 = arith.select %971, %973, %945 : vector<8x16xi1>, vector<8x16xf32>
      %c1_i32_193 = arith.constant 1 : i32
      %975 = arith.addi %28, %c1_i32_193 : i32
      %976 = arith.index_cast %975 : i32 to index
      %977 = memref.load %arg4[%976] : memref<112xi32, #tpu.memory_space<smem>>
      %c1_i32_194 = arith.constant 1 : i32
      %978 = arith.addi %28, %c1_i32_194 : i32
      %979 = arith.index_cast %978 : i32 to index
      %980 = memref.load %arg5[%979] : memref<112xi32, #tpu.memory_space<smem>>
      %981 = vector.broadcast %977 : i32 to vector<16x1xi32>
      %982 = arith.cmpi sge, %3, %981 : vector<16x1xi32>
      %983 = vector.broadcast %980 : i32 to vector<16x1xi32>
      %984 = arith.cmpi slt, %3, %983 : vector<16x1xi32>
      %985 = arith.andi %982, %984 : vector<16x1xi1>
      %986 = vector.shape_cast %985 : vector<16x1xi1> to vector<16x1xi1>
      %987 = vector.broadcast %986 : vector<16x1xi1> to vector<16x16xi1>
      %988 = vector.broadcast %cst : f32 to vector<16x16xf32>
      %989 = arith.select %987, %944, %988 : vector<16x16xi1>, vector<16x16xf32>
      %cst_195 = arith.constant dense<0xFF800000> : vector<16xf32>
      %990 = vector.multi_reduction <maximumf>, %989, %cst_195 [0] : vector<16x16xf32> to vector<16xf32>
      %991 = vector.shape_cast %990 : vector<16xf32> to vector<1x16xf32>
      %992 = arith.cmpi sgt, %934, %931 : i32
      %993 = arith.cmpi sgt, %980, %977 : i32
      %994 = arith.andi %992, %993 : i1
      %cst_196 = arith.constant 0.000000e+00 : f32
      %995 = vector.broadcast %cst_196 : f32 to vector<1x16xf32>
      %996 = arith.select %994, %991, %995 : vector<1x16xf32>
      %c1_i32_197 = arith.constant 1 : i32
      %997 = vector.broadcast %c1_i32_197 : i32 to vector<8x1xi32>
      %998 = arith.cmpi eq, %4, %997 : vector<8x1xi32>
      %999 = vector.shape_cast %998 : vector<8x1xi1> to vector<8x1xi1>
      %1000 = vector.broadcast %999 : vector<8x1xi1> to vector<8x16xi1>
      %1001 = vector.shape_cast %996 : vector<1x16xf32> to vector<1x16xf32>
      %1002 = vector.broadcast %1001 : vector<1x16xf32> to vector<8x16xf32>
      %1003 = arith.select %1000, %1002, %974 : vector<8x16xi1>, vector<8x16xf32>
      %c2_i32_198 = arith.constant 2 : i32
      %1004 = arith.addi %28, %c2_i32_198 : i32
      %1005 = arith.index_cast %1004 : i32 to index
      %1006 = memref.load %arg4[%1005] : memref<112xi32, #tpu.memory_space<smem>>
      %c2_i32_199 = arith.constant 2 : i32
      %1007 = arith.addi %28, %c2_i32_199 : i32
      %1008 = arith.index_cast %1007 : i32 to index
      %1009 = memref.load %arg5[%1008] : memref<112xi32, #tpu.memory_space<smem>>
      %1010 = vector.broadcast %1006 : i32 to vector<16x1xi32>
      %1011 = arith.cmpi sge, %3, %1010 : vector<16x1xi32>
      %1012 = vector.broadcast %1009 : i32 to vector<16x1xi32>
      %1013 = arith.cmpi slt, %3, %1012 : vector<16x1xi32>
      %1014 = arith.andi %1011, %1013 : vector<16x1xi1>
      %1015 = vector.shape_cast %1014 : vector<16x1xi1> to vector<16x1xi1>
      %1016 = vector.broadcast %1015 : vector<16x1xi1> to vector<16x16xi1>
      %1017 = vector.broadcast %cst : f32 to vector<16x16xf32>
      %1018 = arith.select %1016, %944, %1017 : vector<16x16xi1>, vector<16x16xf32>
      %cst_200 = arith.constant dense<0xFF800000> : vector<16xf32>
      %1019 = vector.multi_reduction <maximumf>, %1018, %cst_200 [0] : vector<16x16xf32> to vector<16xf32>
      %1020 = vector.shape_cast %1019 : vector<16xf32> to vector<1x16xf32>
      %1021 = arith.cmpi sgt, %934, %931 : i32
      %1022 = arith.cmpi sgt, %1009, %1006 : i32
      %1023 = arith.andi %1021, %1022 : i1
      %cst_201 = arith.constant 0.000000e+00 : f32
      %1024 = vector.broadcast %cst_201 : f32 to vector<1x16xf32>
      %1025 = arith.select %1023, %1020, %1024 : vector<1x16xf32>
      %c2_i32_202 = arith.constant 2 : i32
      %1026 = vector.broadcast %c2_i32_202 : i32 to vector<8x1xi32>
      %1027 = arith.cmpi eq, %4, %1026 : vector<8x1xi32>
      %1028 = vector.shape_cast %1027 : vector<8x1xi1> to vector<8x1xi1>
      %1029 = vector.broadcast %1028 : vector<8x1xi1> to vector<8x16xi1>
      %1030 = vector.shape_cast %1025 : vector<1x16xf32> to vector<1x16xf32>
      %1031 = vector.broadcast %1030 : vector<1x16xf32> to vector<8x16xf32>
      %1032 = arith.select %1029, %1031, %1003 : vector<8x16xi1>, vector<8x16xf32>
      %c3_i32_203 = arith.constant 3 : i32
      %1033 = arith.addi %28, %c3_i32_203 : i32
      %1034 = arith.index_cast %1033 : i32 to index
      %1035 = memref.load %arg4[%1034] : memref<112xi32, #tpu.memory_space<smem>>
      %c3_i32_204 = arith.constant 3 : i32
      %1036 = arith.addi %28, %c3_i32_204 : i32
      %1037 = arith.index_cast %1036 : i32 to index
      %1038 = memref.load %arg5[%1037] : memref<112xi32, #tpu.memory_space<smem>>
      %1039 = vector.broadcast %1035 : i32 to vector<16x1xi32>
      %1040 = arith.cmpi sge, %3, %1039 : vector<16x1xi32>
      %1041 = vector.broadcast %1038 : i32 to vector<16x1xi32>
      %1042 = arith.cmpi slt, %3, %1041 : vector<16x1xi32>
      %1043 = arith.andi %1040, %1042 : vector<16x1xi1>
      %1044 = vector.shape_cast %1043 : vector<16x1xi1> to vector<16x1xi1>
      %1045 = vector.broadcast %1044 : vector<16x1xi1> to vector<16x16xi1>
      %1046 = vector.broadcast %cst : f32 to vector<16x16xf32>
      %1047 = arith.select %1045, %944, %1046 : vector<16x16xi1>, vector<16x16xf32>
      %cst_205 = arith.constant dense<0xFF800000> : vector<16xf32>
      %1048 = vector.multi_reduction <maximumf>, %1047, %cst_205 [0] : vector<16x16xf32> to vector<16xf32>
      %1049 = vector.shape_cast %1048 : vector<16xf32> to vector<1x16xf32>
      %1050 = arith.cmpi sgt, %934, %931 : i32
      %1051 = arith.cmpi sgt, %1038, %1035 : i32
      %1052 = arith.andi %1050, %1051 : i1
      %cst_206 = arith.constant 0.000000e+00 : f32
      %1053 = vector.broadcast %cst_206 : f32 to vector<1x16xf32>
      %1054 = arith.select %1052, %1049, %1053 : vector<1x16xf32>
      %c3_i32_207 = arith.constant 3 : i32
      %1055 = vector.broadcast %c3_i32_207 : i32 to vector<8x1xi32>
      %1056 = arith.cmpi eq, %4, %1055 : vector<8x1xi32>
      %1057 = vector.shape_cast %1056 : vector<8x1xi1> to vector<8x1xi1>
      %1058 = vector.broadcast %1057 : vector<8x1xi1> to vector<8x16xi1>
      %1059 = vector.shape_cast %1054 : vector<1x16xf32> to vector<1x16xf32>
      %1060 = vector.broadcast %1059 : vector<1x16xf32> to vector<8x16xf32>
      %1061 = arith.select %1058, %1060, %1032 : vector<8x16xi1>, vector<8x16xf32>
      %c4_i32_208 = arith.constant 4 : i32
      %1062 = arith.addi %28, %c4_i32_208 : i32
      %1063 = arith.index_cast %1062 : i32 to index
      %1064 = memref.load %arg4[%1063] : memref<112xi32, #tpu.memory_space<smem>>
      %c4_i32_209 = arith.constant 4 : i32
      %1065 = arith.addi %28, %c4_i32_209 : i32
      %1066 = arith.index_cast %1065 : i32 to index
      %1067 = memref.load %arg5[%1066] : memref<112xi32, #tpu.memory_space<smem>>
      %1068 = vector.broadcast %1064 : i32 to vector<16x1xi32>
      %1069 = arith.cmpi sge, %3, %1068 : vector<16x1xi32>
      %1070 = vector.broadcast %1067 : i32 to vector<16x1xi32>
      %1071 = arith.cmpi slt, %3, %1070 : vector<16x1xi32>
      %1072 = arith.andi %1069, %1071 : vector<16x1xi1>
      %1073 = vector.shape_cast %1072 : vector<16x1xi1> to vector<16x1xi1>
      %1074 = vector.broadcast %1073 : vector<16x1xi1> to vector<16x16xi1>
      %1075 = vector.broadcast %cst : f32 to vector<16x16xf32>
      %1076 = arith.select %1074, %944, %1075 : vector<16x16xi1>, vector<16x16xf32>
      %cst_210 = arith.constant dense<0xFF800000> : vector<16xf32>
      %1077 = vector.multi_reduction <maximumf>, %1076, %cst_210 [0] : vector<16x16xf32> to vector<16xf32>
      %1078 = vector.shape_cast %1077 : vector<16xf32> to vector<1x16xf32>
      %1079 = arith.cmpi sgt, %934, %931 : i32
      %1080 = arith.cmpi sgt, %1067, %1064 : i32
      %1081 = arith.andi %1079, %1080 : i1
      %cst_211 = arith.constant 0.000000e+00 : f32
      %1082 = vector.broadcast %cst_211 : f32 to vector<1x16xf32>
      %1083 = arith.select %1081, %1078, %1082 : vector<1x16xf32>
      %c4_i32_212 = arith.constant 4 : i32
      %1084 = vector.broadcast %c4_i32_212 : i32 to vector<8x1xi32>
      %1085 = arith.cmpi eq, %4, %1084 : vector<8x1xi32>
      %1086 = vector.shape_cast %1085 : vector<8x1xi1> to vector<8x1xi1>
      %1087 = vector.broadcast %1086 : vector<8x1xi1> to vector<8x16xi1>
      %1088 = vector.shape_cast %1083 : vector<1x16xf32> to vector<1x16xf32>
      %1089 = vector.broadcast %1088 : vector<1x16xf32> to vector<8x16xf32>
      %1090 = arith.select %1087, %1089, %1061 : vector<8x16xi1>, vector<8x16xf32>
      %c5_i32_213 = arith.constant 5 : i32
      %1091 = arith.addi %28, %c5_i32_213 : i32
      %1092 = arith.index_cast %1091 : i32 to index
      %1093 = memref.load %arg4[%1092] : memref<112xi32, #tpu.memory_space<smem>>
      %c5_i32_214 = arith.constant 5 : i32
      %1094 = arith.addi %28, %c5_i32_214 : i32
      %1095 = arith.index_cast %1094 : i32 to index
      %1096 = memref.load %arg5[%1095] : memref<112xi32, #tpu.memory_space<smem>>
      %1097 = vector.broadcast %1093 : i32 to vector<16x1xi32>
      %1098 = arith.cmpi sge, %3, %1097 : vector<16x1xi32>
      %1099 = vector.broadcast %1096 : i32 to vector<16x1xi32>
      %1100 = arith.cmpi slt, %3, %1099 : vector<16x1xi32>
      %1101 = arith.andi %1098, %1100 : vector<16x1xi1>
      %1102 = vector.shape_cast %1101 : vector<16x1xi1> to vector<16x1xi1>
      %1103 = vector.broadcast %1102 : vector<16x1xi1> to vector<16x16xi1>
      %1104 = vector.broadcast %cst : f32 to vector<16x16xf32>
      %1105 = arith.select %1103, %944, %1104 : vector<16x16xi1>, vector<16x16xf32>
      %cst_215 = arith.constant dense<0xFF800000> : vector<16xf32>
      %1106 = vector.multi_reduction <maximumf>, %1105, %cst_215 [0] : vector<16x16xf32> to vector<16xf32>
      %1107 = vector.shape_cast %1106 : vector<16xf32> to vector<1x16xf32>
      %1108 = arith.cmpi sgt, %934, %931 : i32
      %1109 = arith.cmpi sgt, %1096, %1093 : i32
      %1110 = arith.andi %1108, %1109 : i1
      %cst_216 = arith.constant 0.000000e+00 : f32
      %1111 = vector.broadcast %cst_216 : f32 to vector<1x16xf32>
      %1112 = arith.select %1110, %1107, %1111 : vector<1x16xf32>
      %c5_i32_217 = arith.constant 5 : i32
      %1113 = vector.broadcast %c5_i32_217 : i32 to vector<8x1xi32>
      %1114 = arith.cmpi eq, %4, %1113 : vector<8x1xi32>
      %1115 = vector.shape_cast %1114 : vector<8x1xi1> to vector<8x1xi1>
      %1116 = vector.broadcast %1115 : vector<8x1xi1> to vector<8x16xi1>
      %1117 = vector.shape_cast %1112 : vector<1x16xf32> to vector<1x16xf32>
      %1118 = vector.broadcast %1117 : vector<1x16xf32> to vector<8x16xf32>
      %1119 = arith.select %1116, %1118, %1090 : vector<8x16xi1>, vector<8x16xf32>
      %c6_i32_218 = arith.constant 6 : i32
      %1120 = arith.addi %28, %c6_i32_218 : i32
      %1121 = arith.index_cast %1120 : i32 to index
      %1122 = memref.load %arg4[%1121] : memref<112xi32, #tpu.memory_space<smem>>
      %c6_i32_219 = arith.constant 6 : i32
      %1123 = arith.addi %28, %c6_i32_219 : i32
      %1124 = arith.index_cast %1123 : i32 to index
      %1125 = memref.load %arg5[%1124] : memref<112xi32, #tpu.memory_space<smem>>
      %1126 = vector.broadcast %1122 : i32 to vector<16x1xi32>
      %1127 = arith.cmpi sge, %3, %1126 : vector<16x1xi32>
      %1128 = vector.broadcast %1125 : i32 to vector<16x1xi32>
      %1129 = arith.cmpi slt, %3, %1128 : vector<16x1xi32>
      %1130 = arith.andi %1127, %1129 : vector<16x1xi1>
      %1131 = vector.shape_cast %1130 : vector<16x1xi1> to vector<16x1xi1>
      %1132 = vector.broadcast %1131 : vector<16x1xi1> to vector<16x16xi1>
      %1133 = vector.broadcast %cst : f32 to vector<16x16xf32>
      %1134 = arith.select %1132, %944, %1133 : vector<16x16xi1>, vector<16x16xf32>
      %cst_220 = arith.constant dense<0xFF800000> : vector<16xf32>
      %1135 = vector.multi_reduction <maximumf>, %1134, %cst_220 [0] : vector<16x16xf32> to vector<16xf32>
      %1136 = vector.shape_cast %1135 : vector<16xf32> to vector<1x16xf32>
      %1137 = arith.cmpi sgt, %934, %931 : i32
      %1138 = arith.cmpi sgt, %1125, %1122 : i32
      %1139 = arith.andi %1137, %1138 : i1
      %cst_221 = arith.constant 0.000000e+00 : f32
      %1140 = vector.broadcast %cst_221 : f32 to vector<1x16xf32>
      %1141 = arith.select %1139, %1136, %1140 : vector<1x16xf32>
      %c6_i32_222 = arith.constant 6 : i32
      %1142 = vector.broadcast %c6_i32_222 : i32 to vector<8x1xi32>
      %1143 = arith.cmpi eq, %4, %1142 : vector<8x1xi32>
      %1144 = vector.shape_cast %1143 : vector<8x1xi1> to vector<8x1xi1>
      %1145 = vector.broadcast %1144 : vector<8x1xi1> to vector<8x16xi1>
      %1146 = vector.shape_cast %1141 : vector<1x16xf32> to vector<1x16xf32>
      %1147 = vector.broadcast %1146 : vector<1x16xf32> to vector<8x16xf32>
      %1148 = arith.select %1145, %1147, %1119 : vector<8x16xi1>, vector<8x16xf32>
      %c56_i32_223 = arith.constant 56 : i32
      %1149 = arith.muli %arg14, %c56_i32_223 : i32
      %c32_i32 = arith.constant 32 : i32
      %1150 = arith.addi %1149, %c32_i32 : i32
      %1151 = tpu.assume_multiple %1150, 8 : i32
      %1152 = arith.index_cast %1151 : i32 to index
      %c0_224 = arith.constant 0 : index
      %1153 = vector.load %arg13[%1152, %c0_224] : memref<448x16xf32, #tpu.memory_space<vmem>>, vector<8x16xf32>
      tpu.vector_store %arg13[%1152, %c0_224], %1148 {strides = array<i32>} : memref<448x16xf32, #tpu.memory_space<vmem>>, vector<8x16xf32>,
      %c5_i32_225 = arith.constant 5 : i32
      %1154 = arith.addi %28, %c5_i32_225 : i32
      %1155 = arith.index_cast %1154 : i32 to index
      %1156 = memref.load %arg2[%1155] : memref<112xi32, #tpu.memory_space<smem>>
      %c5_i32_226 = arith.constant 5 : i32
      %1157 = arith.addi %28, %c5_i32_226 : i32
      %1158 = arith.index_cast %1157 : i32 to index
      %1159 = memref.load %arg3[%1158] : memref<112xi32, #tpu.memory_space<smem>>
      %1160 = vector.broadcast %1156 : i32 to vector<16x1x1xi32>
      %1161 = arith.cmpi sge, %2, %1160 : vector<16x1x1xi32>
      %1162 = vector.broadcast %1159 : i32 to vector<16x1x1xi32>
      %1163 = arith.cmpi slt, %2, %1162 : vector<16x1x1xi32>
      %1164 = arith.andi %1161, %1163 : vector<16x1x1xi1>
      %1165 = vector.shape_cast %1164 : vector<16x1x1xi1> to vector<16x1x1xi1>
      %1166 = vector.broadcast %1165 : vector<16x1x1xi1> to vector<16x16x16xi1>
      %1167 = vector.broadcast %cst : f32 to vector<16x16x16xf32>
      %1168 = arith.select %1166, %1, %1167 : vector<16x16x16xi1>, vector<16x16x16xf32>
      %cst_227 = arith.constant dense<0xFF800000> : vector<16x16xf32>
      %1169 = vector.multi_reduction <maximumf>, %1168, %cst_227 [0] : vector<16x16x16xf32> to vector<16x16xf32>
      %cst_228 = arith.constant 0.000000e+00 : f32
      %1170 = vector.broadcast %cst_228 : f32 to vector<8x16xf32>
      %c0_i32_229 = arith.constant 0 : i32
      %1171 = arith.addi %28, %c0_i32_229 : i32
      %1172 = arith.index_cast %1171 : i32 to index
      %1173 = memref.load %arg4[%1172] : memref<112xi32, #tpu.memory_space<smem>>
      %c0_i32_230 = arith.constant 0 : i32
      %1174 = arith.addi %28, %c0_i32_230 : i32
      %1175 = arith.index_cast %1174 : i32 to index
      %1176 = memref.load %arg5[%1175] : memref<112xi32, #tpu.memory_space<smem>>
      %1177 = vector.broadcast %1173 : i32 to vector<16x1xi32>
      %1178 = arith.cmpi sge, %3, %1177 : vector<16x1xi32>
      %1179 = vector.broadcast %1176 : i32 to vector<16x1xi32>
      %1180 = arith.cmpi slt, %3, %1179 : vector<16x1xi32>
      %1181 = arith.andi %1178, %1180 : vector<16x1xi1>
      %1182 = vector.shape_cast %1181 : vector<16x1xi1> to vector<16x1xi1>
      %1183 = vector.broadcast %1182 : vector<16x1xi1> to vector<16x16xi1>
      %1184 = vector.broadcast %cst : f32 to vector<16x16xf32>
      %1185 = arith.select %1183, %1169, %1184 : vector<16x16xi1>, vector<16x16xf32>
      %cst_231 = arith.constant dense<0xFF800000> : vector<16xf32>
      %1186 = vector.multi_reduction <maximumf>, %1185, %cst_231 [0] : vector<16x16xf32> to vector<16xf32>
      %1187 = vector.shape_cast %1186 : vector<16xf32> to vector<1x16xf32>
      %1188 = arith.cmpi sgt, %1159, %1156 : i32
      %1189 = arith.cmpi sgt, %1176, %1173 : i32
      %1190 = arith.andi %1188, %1189 : i1
      %cst_232 = arith.constant 0.000000e+00 : f32
      %1191 = vector.broadcast %cst_232 : f32 to vector<1x16xf32>
      %1192 = arith.select %1190, %1187, %1191 : vector<1x16xf32>
      %c0_i32_233 = arith.constant 0 : i32
      %1193 = vector.broadcast %c0_i32_233 : i32 to vector<8x1xi32>
      %1194 = arith.cmpi eq, %4, %1193 : vector<8x1xi32>
      %1195 = vector.shape_cast %1194 : vector<8x1xi1> to vector<8x1xi1>
      %1196 = vector.broadcast %1195 : vector<8x1xi1> to vector<8x16xi1>
      %1197 = vector.shape_cast %1192 : vector<1x16xf32> to vector<1x16xf32>
      %1198 = vector.broadcast %1197 : vector<1x16xf32> to vector<8x16xf32>
      %1199 = arith.select %1196, %1198, %1170 : vector<8x16xi1>, vector<8x16xf32>
      %c1_i32_234 = arith.constant 1 : i32
      %1200 = arith.addi %28, %c1_i32_234 : i32
      %1201 = arith.index_cast %1200 : i32 to index
      %1202 = memref.load %arg4[%1201] : memref<112xi32, #tpu.memory_space<smem>>
      %c1_i32_235 = arith.constant 1 : i32
      %1203 = arith.addi %28, %c1_i32_235 : i32
      %1204 = arith.index_cast %1203 : i32 to index
      %1205 = memref.load %arg5[%1204] : memref<112xi32, #tpu.memory_space<smem>>
      %1206 = vector.broadcast %1202 : i32 to vector<16x1xi32>
      %1207 = arith.cmpi sge, %3, %1206 : vector<16x1xi32>
      %1208 = vector.broadcast %1205 : i32 to vector<16x1xi32>
      %1209 = arith.cmpi slt, %3, %1208 : vector<16x1xi32>
      %1210 = arith.andi %1207, %1209 : vector<16x1xi1>
      %1211 = vector.shape_cast %1210 : vector<16x1xi1> to vector<16x1xi1>
      %1212 = vector.broadcast %1211 : vector<16x1xi1> to vector<16x16xi1>
      %1213 = vector.broadcast %cst : f32 to vector<16x16xf32>
      %1214 = arith.select %1212, %1169, %1213 : vector<16x16xi1>, vector<16x16xf32>
      %cst_236 = arith.constant dense<0xFF800000> : vector<16xf32>
      %1215 = vector.multi_reduction <maximumf>, %1214, %cst_236 [0] : vector<16x16xf32> to vector<16xf32>
      %1216 = vector.shape_cast %1215 : vector<16xf32> to vector<1x16xf32>
      %1217 = arith.cmpi sgt, %1159, %1156 : i32
      %1218 = arith.cmpi sgt, %1205, %1202 : i32
      %1219 = arith.andi %1217, %1218 : i1
      %cst_237 = arith.constant 0.000000e+00 : f32
      %1220 = vector.broadcast %cst_237 : f32 to vector<1x16xf32>
      %1221 = arith.select %1219, %1216, %1220 : vector<1x16xf32>
      %c1_i32_238 = arith.constant 1 : i32
      %1222 = vector.broadcast %c1_i32_238 : i32 to vector<8x1xi32>
      %1223 = arith.cmpi eq, %4, %1222 : vector<8x1xi32>
      %1224 = vector.shape_cast %1223 : vector<8x1xi1> to vector<8x1xi1>
      %1225 = vector.broadcast %1224 : vector<8x1xi1> to vector<8x16xi1>
      %1226 = vector.shape_cast %1221 : vector<1x16xf32> to vector<1x16xf32>
      %1227 = vector.broadcast %1226 : vector<1x16xf32> to vector<8x16xf32>
      %1228 = arith.select %1225, %1227, %1199 : vector<8x16xi1>, vector<8x16xf32>
      %c2_i32_239 = arith.constant 2 : i32
      %1229 = arith.addi %28, %c2_i32_239 : i32
      %1230 = arith.index_cast %1229 : i32 to index
      %1231 = memref.load %arg4[%1230] : memref<112xi32, #tpu.memory_space<smem>>
      %c2_i32_240 = arith.constant 2 : i32
      %1232 = arith.addi %28, %c2_i32_240 : i32
      %1233 = arith.index_cast %1232 : i32 to index
      %1234 = memref.load %arg5[%1233] : memref<112xi32, #tpu.memory_space<smem>>
      %1235 = vector.broadcast %1231 : i32 to vector<16x1xi32>
      %1236 = arith.cmpi sge, %3, %1235 : vector<16x1xi32>
      %1237 = vector.broadcast %1234 : i32 to vector<16x1xi32>
      %1238 = arith.cmpi slt, %3, %1237 : vector<16x1xi32>
      %1239 = arith.andi %1236, %1238 : vector<16x1xi1>
      %1240 = vector.shape_cast %1239 : vector<16x1xi1> to vector<16x1xi1>
      %1241 = vector.broadcast %1240 : vector<16x1xi1> to vector<16x16xi1>
      %1242 = vector.broadcast %cst : f32 to vector<16x16xf32>
      %1243 = arith.select %1241, %1169, %1242 : vector<16x16xi1>, vector<16x16xf32>
      %cst_241 = arith.constant dense<0xFF800000> : vector<16xf32>
      %1244 = vector.multi_reduction <maximumf>, %1243, %cst_241 [0] : vector<16x16xf32> to vector<16xf32>
      %1245 = vector.shape_cast %1244 : vector<16xf32> to vector<1x16xf32>
      %1246 = arith.cmpi sgt, %1159, %1156 : i32
      %1247 = arith.cmpi sgt, %1234, %1231 : i32
      %1248 = arith.andi %1246, %1247 : i1
      %cst_242 = arith.constant 0.000000e+00 : f32
      %1249 = vector.broadcast %cst_242 : f32 to vector<1x16xf32>
      %1250 = arith.select %1248, %1245, %1249 : vector<1x16xf32>
      %c2_i32_243 = arith.constant 2 : i32
      %1251 = vector.broadcast %c2_i32_243 : i32 to vector<8x1xi32>
      %1252 = arith.cmpi eq, %4, %1251 : vector<8x1xi32>
      %1253 = vector.shape_cast %1252 : vector<8x1xi1> to vector<8x1xi1>
      %1254 = vector.broadcast %1253 : vector<8x1xi1> to vector<8x16xi1>
      %1255 = vector.shape_cast %1250 : vector<1x16xf32> to vector<1x16xf32>
      %1256 = vector.broadcast %1255 : vector<1x16xf32> to vector<8x16xf32>
      %1257 = arith.select %1254, %1256, %1228 : vector<8x16xi1>, vector<8x16xf32>
      %c3_i32_244 = arith.constant 3 : i32
      %1258 = arith.addi %28, %c3_i32_244 : i32
      %1259 = arith.index_cast %1258 : i32 to index
      %1260 = memref.load %arg4[%1259] : memref<112xi32, #tpu.memory_space<smem>>
      %c3_i32_245 = arith.constant 3 : i32
      %1261 = arith.addi %28, %c3_i32_245 : i32
      %1262 = arith.index_cast %1261 : i32 to index
      %1263 = memref.load %arg5[%1262] : memref<112xi32, #tpu.memory_space<smem>>
      %1264 = vector.broadcast %1260 : i32 to vector<16x1xi32>
      %1265 = arith.cmpi sge, %3, %1264 : vector<16x1xi32>
      %1266 = vector.broadcast %1263 : i32 to vector<16x1xi32>
      %1267 = arith.cmpi slt, %3, %1266 : vector<16x1xi32>
      %1268 = arith.andi %1265, %1267 : vector<16x1xi1>
      %1269 = vector.shape_cast %1268 : vector<16x1xi1> to vector<16x1xi1>
      %1270 = vector.broadcast %1269 : vector<16x1xi1> to vector<16x16xi1>
      %1271 = vector.broadcast %cst : f32 to vector<16x16xf32>
      %1272 = arith.select %1270, %1169, %1271 : vector<16x16xi1>, vector<16x16xf32>
      %cst_246 = arith.constant dense<0xFF800000> : vector<16xf32>
      %1273 = vector.multi_reduction <maximumf>, %1272, %cst_246 [0] : vector<16x16xf32> to vector<16xf32>
      %1274 = vector.shape_cast %1273 : vector<16xf32> to vector<1x16xf32>
      %1275 = arith.cmpi sgt, %1159, %1156 : i32
      %1276 = arith.cmpi sgt, %1263, %1260 : i32
      %1277 = arith.andi %1275, %1276 : i1
      %cst_247 = arith.constant 0.000000e+00 : f32
      %1278 = vector.broadcast %cst_247 : f32 to vector<1x16xf32>
      %1279 = arith.select %1277, %1274, %1278 : vector<1x16xf32>
      %c3_i32_248 = arith.constant 3 : i32
      %1280 = vector.broadcast %c3_i32_248 : i32 to vector<8x1xi32>
      %1281 = arith.cmpi eq, %4, %1280 : vector<8x1xi32>
      %1282 = vector.shape_cast %1281 : vector<8x1xi1> to vector<8x1xi1>
      %1283 = vector.broadcast %1282 : vector<8x1xi1> to vector<8x16xi1>
      %1284 = vector.shape_cast %1279 : vector<1x16xf32> to vector<1x16xf32>
      %1285 = vector.broadcast %1284 : vector<1x16xf32> to vector<8x16xf32>
      %1286 = arith.select %1283, %1285, %1257 : vector<8x16xi1>, vector<8x16xf32>
      %c4_i32_249 = arith.constant 4 : i32
      %1287 = arith.addi %28, %c4_i32_249 : i32
      %1288 = arith.index_cast %1287 : i32 to index
      %1289 = memref.load %arg4[%1288] : memref<112xi32, #tpu.memory_space<smem>>
      %c4_i32_250 = arith.constant 4 : i32
      %1290 = arith.addi %28, %c4_i32_250 : i32
      %1291 = arith.index_cast %1290 : i32 to index
      %1292 = memref.load %arg5[%1291] : memref<112xi32, #tpu.memory_space<smem>>
      %1293 = vector.broadcast %1289 : i32 to vector<16x1xi32>
      %1294 = arith.cmpi sge, %3, %1293 : vector<16x1xi32>
      %1295 = vector.broadcast %1292 : i32 to vector<16x1xi32>
      %1296 = arith.cmpi slt, %3, %1295 : vector<16x1xi32>
      %1297 = arith.andi %1294, %1296 : vector<16x1xi1>
      %1298 = vector.shape_cast %1297 : vector<16x1xi1> to vector<16x1xi1>
      %1299 = vector.broadcast %1298 : vector<16x1xi1> to vector<16x16xi1>
      %1300 = vector.broadcast %cst : f32 to vector<16x16xf32>
      %1301 = arith.select %1299, %1169, %1300 : vector<16x16xi1>, vector<16x16xf32>
      %cst_251 = arith.constant dense<0xFF800000> : vector<16xf32>
      %1302 = vector.multi_reduction <maximumf>, %1301, %cst_251 [0] : vector<16x16xf32> to vector<16xf32>
      %1303 = vector.shape_cast %1302 : vector<16xf32> to vector<1x16xf32>
      %1304 = arith.cmpi sgt, %1159, %1156 : i32
      %1305 = arith.cmpi sgt, %1292, %1289 : i32
      %1306 = arith.andi %1304, %1305 : i1
      %cst_252 = arith.constant 0.000000e+00 : f32
      %1307 = vector.broadcast %cst_252 : f32 to vector<1x16xf32>
      %1308 = arith.select %1306, %1303, %1307 : vector<1x16xf32>
      %c4_i32_253 = arith.constant 4 : i32
      %1309 = vector.broadcast %c4_i32_253 : i32 to vector<8x1xi32>
      %1310 = arith.cmpi eq, %4, %1309 : vector<8x1xi32>
      %1311 = vector.shape_cast %1310 : vector<8x1xi1> to vector<8x1xi1>
      %1312 = vector.broadcast %1311 : vector<8x1xi1> to vector<8x16xi1>
      %1313 = vector.shape_cast %1308 : vector<1x16xf32> to vector<1x16xf32>
      %1314 = vector.broadcast %1313 : vector<1x16xf32> to vector<8x16xf32>
      %1315 = arith.select %1312, %1314, %1286 : vector<8x16xi1>, vector<8x16xf32>
      %c5_i32_254 = arith.constant 5 : i32
      %1316 = arith.addi %28, %c5_i32_254 : i32
      %1317 = arith.index_cast %1316 : i32 to index
      %1318 = memref.load %arg4[%1317] : memref<112xi32, #tpu.memory_space<smem>>
      %c5_i32_255 = arith.constant 5 : i32
      %1319 = arith.addi %28, %c5_i32_255 : i32
      %1320 = arith.index_cast %1319 : i32 to index
      %1321 = memref.load %arg5[%1320] : memref<112xi32, #tpu.memory_space<smem>>
      %1322 = vector.broadcast %1318 : i32 to vector<16x1xi32>
      %1323 = arith.cmpi sge, %3, %1322 : vector<16x1xi32>
      %1324 = vector.broadcast %1321 : i32 to vector<16x1xi32>
      %1325 = arith.cmpi slt, %3, %1324 : vector<16x1xi32>
      %1326 = arith.andi %1323, %1325 : vector<16x1xi1>
      %1327 = vector.shape_cast %1326 : vector<16x1xi1> to vector<16x1xi1>
      %1328 = vector.broadcast %1327 : vector<16x1xi1> to vector<16x16xi1>
      %1329 = vector.broadcast %cst : f32 to vector<16x16xf32>
      %1330 = arith.select %1328, %1169, %1329 : vector<16x16xi1>, vector<16x16xf32>
      %cst_256 = arith.constant dense<0xFF800000> : vector<16xf32>
      %1331 = vector.multi_reduction <maximumf>, %1330, %cst_256 [0] : vector<16x16xf32> to vector<16xf32>
      %1332 = vector.shape_cast %1331 : vector<16xf32> to vector<1x16xf32>
      %1333 = arith.cmpi sgt, %1159, %1156 : i32
      %1334 = arith.cmpi sgt, %1321, %1318 : i32
      %1335 = arith.andi %1333, %1334 : i1
      %cst_257 = arith.constant 0.000000e+00 : f32
      %1336 = vector.broadcast %cst_257 : f32 to vector<1x16xf32>
      %1337 = arith.select %1335, %1332, %1336 : vector<1x16xf32>
      %c5_i32_258 = arith.constant 5 : i32
      %1338 = vector.broadcast %c5_i32_258 : i32 to vector<8x1xi32>
      %1339 = arith.cmpi eq, %4, %1338 : vector<8x1xi32>
      %1340 = vector.shape_cast %1339 : vector<8x1xi1> to vector<8x1xi1>
      %1341 = vector.broadcast %1340 : vector<8x1xi1> to vector<8x16xi1>
      %1342 = vector.shape_cast %1337 : vector<1x16xf32> to vector<1x16xf32>
      %1343 = vector.broadcast %1342 : vector<1x16xf32> to vector<8x16xf32>
      %1344 = arith.select %1341, %1343, %1315 : vector<8x16xi1>, vector<8x16xf32>
      %c6_i32_259 = arith.constant 6 : i32
      %1345 = arith.addi %28, %c6_i32_259 : i32
      %1346 = arith.index_cast %1345 : i32 to index
      %1347 = memref.load %arg4[%1346] : memref<112xi32, #tpu.memory_space<smem>>
      %c6_i32_260 = arith.constant 6 : i32
      %1348 = arith.addi %28, %c6_i32_260 : i32
      %1349 = arith.index_cast %1348 : i32 to index
      %1350 = memref.load %arg5[%1349] : memref<112xi32, #tpu.memory_space<smem>>
      %1351 = vector.broadcast %1347 : i32 to vector<16x1xi32>
      %1352 = arith.cmpi sge, %3, %1351 : vector<16x1xi32>
      %1353 = vector.broadcast %1350 : i32 to vector<16x1xi32>
      %1354 = arith.cmpi slt, %3, %1353 : vector<16x1xi32>
      %1355 = arith.andi %1352, %1354 : vector<16x1xi1>
      %1356 = vector.shape_cast %1355 : vector<16x1xi1> to vector<16x1xi1>
      %1357 = vector.broadcast %1356 : vector<16x1xi1> to vector<16x16xi1>
      %1358 = vector.broadcast %cst : f32 to vector<16x16xf32>
      %1359 = arith.select %1357, %1169, %1358 : vector<16x16xi1>, vector<16x16xf32>
      %cst_261 = arith.constant dense<0xFF800000> : vector<16xf32>
      %1360 = vector.multi_reduction <maximumf>, %1359, %cst_261 [0] : vector<16x16xf32> to vector<16xf32>
      %1361 = vector.shape_cast %1360 : vector<16xf32> to vector<1x16xf32>
      %1362 = arith.cmpi sgt, %1159, %1156 : i32
      %1363 = arith.cmpi sgt, %1350, %1347 : i32
      %1364 = arith.andi %1362, %1363 : i1
      %cst_262 = arith.constant 0.000000e+00 : f32
      %1365 = vector.broadcast %cst_262 : f32 to vector<1x16xf32>
      %1366 = arith.select %1364, %1361, %1365 : vector<1x16xf32>
      %c6_i32_263 = arith.constant 6 : i32
      %1367 = vector.broadcast %c6_i32_263 : i32 to vector<8x1xi32>
      %1368 = arith.cmpi eq, %4, %1367 : vector<8x1xi32>
      %1369 = vector.shape_cast %1368 : vector<8x1xi1> to vector<8x1xi1>
      %1370 = vector.broadcast %1369 : vector<8x1xi1> to vector<8x16xi1>
      %1371 = vector.shape_cast %1366 : vector<1x16xf32> to vector<1x16xf32>
      %1372 = vector.broadcast %1371 : vector<1x16xf32> to vector<8x16xf32>
      %1373 = arith.select %1370, %1372, %1344 : vector<8x16xi1>, vector<8x16xf32>
      %c56_i32_264 = arith.constant 56 : i32
      %1374 = arith.muli %arg14, %c56_i32_264 : i32
      %c40_i32 = arith.constant 40 : i32
      %1375 = arith.addi %1374, %c40_i32 : i32
      %1376 = tpu.assume_multiple %1375, 8 : i32
      %1377 = arith.index_cast %1376 : i32 to index
      %c0_265 = arith.constant 0 : index
      %1378 = vector.load %arg13[%1377, %c0_265] : memref<448x16xf32, #tpu.memory_space<vmem>>, vector<8x16xf32>
      tpu.vector_store %arg13[%1377, %c0_265], %1373 {strides = array<i32>} : memref<448x16xf32, #tpu.memory_space<vmem>>, vector<8x16xf32>,
      %c6_i32_266 = arith.constant 6 : i32
      %1379 = arith.addi %28, %c6_i32_266 : i32
      %1380 = arith.index_cast %1379 : i32 to index
      %1381 = memref.load %arg2[%1380] : memref<112xi32, #tpu.memory_space<smem>>
      %c6_i32_267 = arith.constant 6 : i32
      %1382 = arith.addi %28, %c6_i32_267 : i32
      %1383 = arith.index_cast %1382 : i32 to index
      %1384 = memref.load %arg3[%1383] : memref<112xi32, #tpu.memory_space<smem>>
      %1385 = vector.broadcast %1381 : i32 to vector<16x1x1xi32>
      %1386 = arith.cmpi sge, %2, %1385 : vector<16x1x1xi32>
      %1387 = vector.broadcast %1384 : i32 to vector<16x1x1xi32>
      %1388 = arith.cmpi slt, %2, %1387 : vector<16x1x1xi32>
      %1389 = arith.andi %1386, %1388 : vector<16x1x1xi1>
      %1390 = vector.shape_cast %1389 : vector<16x1x1xi1> to vector<16x1x1xi1>
      %1391 = vector.broadcast %1390 : vector<16x1x1xi1> to vector<16x16x16xi1>
      %1392 = vector.broadcast %cst : f32 to vector<16x16x16xf32>
      %1393 = arith.select %1391, %1, %1392 : vector<16x16x16xi1>, vector<16x16x16xf32>
      %cst_268 = arith.constant dense<0xFF800000> : vector<16x16xf32>
      %1394 = vector.multi_reduction <maximumf>, %1393, %cst_268 [0] : vector<16x16x16xf32> to vector<16x16xf32>
      %cst_269 = arith.constant 0.000000e+00 : f32
      %1395 = vector.broadcast %cst_269 : f32 to vector<8x16xf32>
      %c0_i32_270 = arith.constant 0 : i32
      %1396 = arith.addi %28, %c0_i32_270 : i32
      %1397 = arith.index_cast %1396 : i32 to index
      %1398 = memref.load %arg4[%1397] : memref<112xi32, #tpu.memory_space<smem>>
      %c0_i32_271 = arith.constant 0 : i32
      %1399 = arith.addi %28, %c0_i32_271 : i32
      %1400 = arith.index_cast %1399 : i32 to index
      %1401 = memref.load %arg5[%1400] : memref<112xi32, #tpu.memory_space<smem>>
      %1402 = vector.broadcast %1398 : i32 to vector<16x1xi32>
      %1403 = arith.cmpi sge, %3, %1402 : vector<16x1xi32>
      %1404 = vector.broadcast %1401 : i32 to vector<16x1xi32>
      %1405 = arith.cmpi slt, %3, %1404 : vector<16x1xi32>
      %1406 = arith.andi %1403, %1405 : vector<16x1xi1>
      %1407 = vector.shape_cast %1406 : vector<16x1xi1> to vector<16x1xi1>
      %1408 = vector.broadcast %1407 : vector<16x1xi1> to vector<16x16xi1>
      %1409 = vector.broadcast %cst : f32 to vector<16x16xf32>
      %1410 = arith.select %1408, %1394, %1409 : vector<16x16xi1>, vector<16x16xf32>
      %cst_272 = arith.constant dense<0xFF800000> : vector<16xf32>
      %1411 = vector.multi_reduction <maximumf>, %1410, %cst_272 [0] : vector<16x16xf32> to vector<16xf32>
      %1412 = vector.shape_cast %1411 : vector<16xf32> to vector<1x16xf32>
      %1413 = arith.cmpi sgt, %1384, %1381 : i32
      %1414 = arith.cmpi sgt, %1401, %1398 : i32
      %1415 = arith.andi %1413, %1414 : i1
      %cst_273 = arith.constant 0.000000e+00 : f32
      %1416 = vector.broadcast %cst_273 : f32 to vector<1x16xf32>
      %1417 = arith.select %1415, %1412, %1416 : vector<1x16xf32>
      %c0_i32_274 = arith.constant 0 : i32
      %1418 = vector.broadcast %c0_i32_274 : i32 to vector<8x1xi32>
      %1419 = arith.cmpi eq, %4, %1418 : vector<8x1xi32>
      %1420 = vector.shape_cast %1419 : vector<8x1xi1> to vector<8x1xi1>
      %1421 = vector.broadcast %1420 : vector<8x1xi1> to vector<8x16xi1>
      %1422 = vector.shape_cast %1417 : vector<1x16xf32> to vector<1x16xf32>
      %1423 = vector.broadcast %1422 : vector<1x16xf32> to vector<8x16xf32>
      %1424 = arith.select %1421, %1423, %1395 : vector<8x16xi1>, vector<8x16xf32>
      %c1_i32_275 = arith.constant 1 : i32
      %1425 = arith.addi %28, %c1_i32_275 : i32
      %1426 = arith.index_cast %1425 : i32 to index
      %1427 = memref.load %arg4[%1426] : memref<112xi32, #tpu.memory_space<smem>>
      %c1_i32_276 = arith.constant 1 : i32
      %1428 = arith.addi %28, %c1_i32_276 : i32
      %1429 = arith.index_cast %1428 : i32 to index
      %1430 = memref.load %arg5[%1429] : memref<112xi32, #tpu.memory_space<smem>>
      %1431 = vector.broadcast %1427 : i32 to vector<16x1xi32>
      %1432 = arith.cmpi sge, %3, %1431 : vector<16x1xi32>
      %1433 = vector.broadcast %1430 : i32 to vector<16x1xi32>
      %1434 = arith.cmpi slt, %3, %1433 : vector<16x1xi32>
      %1435 = arith.andi %1432, %1434 : vector<16x1xi1>
      %1436 = vector.shape_cast %1435 : vector<16x1xi1> to vector<16x1xi1>
      %1437 = vector.broadcast %1436 : vector<16x1xi1> to vector<16x16xi1>
      %1438 = vector.broadcast %cst : f32 to vector<16x16xf32>
      %1439 = arith.select %1437, %1394, %1438 : vector<16x16xi1>, vector<16x16xf32>
      %cst_277 = arith.constant dense<0xFF800000> : vector<16xf32>
      %1440 = vector.multi_reduction <maximumf>, %1439, %cst_277 [0] : vector<16x16xf32> to vector<16xf32>
      %1441 = vector.shape_cast %1440 : vector<16xf32> to vector<1x16xf32>
      %1442 = arith.cmpi sgt, %1384, %1381 : i32
      %1443 = arith.cmpi sgt, %1430, %1427 : i32
      %1444 = arith.andi %1442, %1443 : i1
      %cst_278 = arith.constant 0.000000e+00 : f32
      %1445 = vector.broadcast %cst_278 : f32 to vector<1x16xf32>
      %1446 = arith.select %1444, %1441, %1445 : vector<1x16xf32>
      %c1_i32_279 = arith.constant 1 : i32
      %1447 = vector.broadcast %c1_i32_279 : i32 to vector<8x1xi32>
      %1448 = arith.cmpi eq, %4, %1447 : vector<8x1xi32>
      %1449 = vector.shape_cast %1448 : vector<8x1xi1> to vector<8x1xi1>
      %1450 = vector.broadcast %1449 : vector<8x1xi1> to vector<8x16xi1>
      %1451 = vector.shape_cast %1446 : vector<1x16xf32> to vector<1x16xf32>
      %1452 = vector.broadcast %1451 : vector<1x16xf32> to vector<8x16xf32>
      %1453 = arith.select %1450, %1452, %1424 : vector<8x16xi1>, vector<8x16xf32>
      %c2_i32_280 = arith.constant 2 : i32
      %1454 = arith.addi %28, %c2_i32_280 : i32
      %1455 = arith.index_cast %1454 : i32 to index
      %1456 = memref.load %arg4[%1455] : memref<112xi32, #tpu.memory_space<smem>>
      %c2_i32_281 = arith.constant 2 : i32
      %1457 = arith.addi %28, %c2_i32_281 : i32
      %1458 = arith.index_cast %1457 : i32 to index
      %1459 = memref.load %arg5[%1458] : memref<112xi32, #tpu.memory_space<smem>>
      %1460 = vector.broadcast %1456 : i32 to vector<16x1xi32>
      %1461 = arith.cmpi sge, %3, %1460 : vector<16x1xi32>
      %1462 = vector.broadcast %1459 : i32 to vector<16x1xi32>
      %1463 = arith.cmpi slt, %3, %1462 : vector<16x1xi32>
      %1464 = arith.andi %1461, %1463 : vector<16x1xi1>
      %1465 = vector.shape_cast %1464 : vector<16x1xi1> to vector<16x1xi1>
      %1466 = vector.broadcast %1465 : vector<16x1xi1> to vector<16x16xi1>
      %1467 = vector.broadcast %cst : f32 to vector<16x16xf32>
      %1468 = arith.select %1466, %1394, %1467 : vector<16x16xi1>, vector<16x16xf32>
      %cst_282 = arith.constant dense<0xFF800000> : vector<16xf32>
      %1469 = vector.multi_reduction <maximumf>, %1468, %cst_282 [0] : vector<16x16xf32> to vector<16xf32>
      %1470 = vector.shape_cast %1469 : vector<16xf32> to vector<1x16xf32>
      %1471 = arith.cmpi sgt, %1384, %1381 : i32
      %1472 = arith.cmpi sgt, %1459, %1456 : i32
      %1473 = arith.andi %1471, %1472 : i1
      %cst_283 = arith.constant 0.000000e+00 : f32
      %1474 = vector.broadcast %cst_283 : f32 to vector<1x16xf32>
      %1475 = arith.select %1473, %1470, %1474 : vector<1x16xf32>
      %c2_i32_284 = arith.constant 2 : i32
      %1476 = vector.broadcast %c2_i32_284 : i32 to vector<8x1xi32>
      %1477 = arith.cmpi eq, %4, %1476 : vector<8x1xi32>
      %1478 = vector.shape_cast %1477 : vector<8x1xi1> to vector<8x1xi1>
      %1479 = vector.broadcast %1478 : vector<8x1xi1> to vector<8x16xi1>
      %1480 = vector.shape_cast %1475 : vector<1x16xf32> to vector<1x16xf32>
      %1481 = vector.broadcast %1480 : vector<1x16xf32> to vector<8x16xf32>
      %1482 = arith.select %1479, %1481, %1453 : vector<8x16xi1>, vector<8x16xf32>
      %c3_i32_285 = arith.constant 3 : i32
      %1483 = arith.addi %28, %c3_i32_285 : i32
      %1484 = arith.index_cast %1483 : i32 to index
      %1485 = memref.load %arg4[%1484] : memref<112xi32, #tpu.memory_space<smem>>
      %c3_i32_286 = arith.constant 3 : i32
      %1486 = arith.addi %28, %c3_i32_286 : i32
      %1487 = arith.index_cast %1486 : i32 to index
      %1488 = memref.load %arg5[%1487] : memref<112xi32, #tpu.memory_space<smem>>
      %1489 = vector.broadcast %1485 : i32 to vector<16x1xi32>
      %1490 = arith.cmpi sge, %3, %1489 : vector<16x1xi32>
      %1491 = vector.broadcast %1488 : i32 to vector<16x1xi32>
      %1492 = arith.cmpi slt, %3, %1491 : vector<16x1xi32>
      %1493 = arith.andi %1490, %1492 : vector<16x1xi1>
      %1494 = vector.shape_cast %1493 : vector<16x1xi1> to vector<16x1xi1>
      %1495 = vector.broadcast %1494 : vector<16x1xi1> to vector<16x16xi1>
      %1496 = vector.broadcast %cst : f32 to vector<16x16xf32>
      %1497 = arith.select %1495, %1394, %1496 : vector<16x16xi1>, vector<16x16xf32>
      %cst_287 = arith.constant dense<0xFF800000> : vector<16xf32>
      %1498 = vector.multi_reduction <maximumf>, %1497, %cst_287 [0] : vector<16x16xf32> to vector<16xf32>
      %1499 = vector.shape_cast %1498 : vector<16xf32> to vector<1x16xf32>
      %1500 = arith.cmpi sgt, %1384, %1381 : i32
      %1501 = arith.cmpi sgt, %1488, %1485 : i32
      %1502 = arith.andi %1500, %1501 : i1
      %cst_288 = arith.constant 0.000000e+00 : f32
      %1503 = vector.broadcast %cst_288 : f32 to vector<1x16xf32>
      %1504 = arith.select %1502, %1499, %1503 : vector<1x16xf32>
      %c3_i32_289 = arith.constant 3 : i32
      %1505 = vector.broadcast %c3_i32_289 : i32 to vector<8x1xi32>
      %1506 = arith.cmpi eq, %4, %1505 : vector<8x1xi32>
      %1507 = vector.shape_cast %1506 : vector<8x1xi1> to vector<8x1xi1>
      %1508 = vector.broadcast %1507 : vector<8x1xi1> to vector<8x16xi1>
      %1509 = vector.shape_cast %1504 : vector<1x16xf32> to vector<1x16xf32>
      %1510 = vector.broadcast %1509 : vector<1x16xf32> to vector<8x16xf32>
      %1511 = arith.select %1508, %1510, %1482 : vector<8x16xi1>, vector<8x16xf32>
      %c4_i32_290 = arith.constant 4 : i32
      %1512 = arith.addi %28, %c4_i32_290 : i32
      %1513 = arith.index_cast %1512 : i32 to index
      %1514 = memref.load %arg4[%1513] : memref<112xi32, #tpu.memory_space<smem>>
      %c4_i32_291 = arith.constant 4 : i32
      %1515 = arith.addi %28, %c4_i32_291 : i32
      %1516 = arith.index_cast %1515 : i32 to index
      %1517 = memref.load %arg5[%1516] : memref<112xi32, #tpu.memory_space<smem>>
      %1518 = vector.broadcast %1514 : i32 to vector<16x1xi32>
      %1519 = arith.cmpi sge, %3, %1518 : vector<16x1xi32>
      %1520 = vector.broadcast %1517 : i32 to vector<16x1xi32>
      %1521 = arith.cmpi slt, %3, %1520 : vector<16x1xi32>
      %1522 = arith.andi %1519, %1521 : vector<16x1xi1>
      %1523 = vector.shape_cast %1522 : vector<16x1xi1> to vector<16x1xi1>
      %1524 = vector.broadcast %1523 : vector<16x1xi1> to vector<16x16xi1>
      %1525 = vector.broadcast %cst : f32 to vector<16x16xf32>
      %1526 = arith.select %1524, %1394, %1525 : vector<16x16xi1>, vector<16x16xf32>
      %cst_292 = arith.constant dense<0xFF800000> : vector<16xf32>
      %1527 = vector.multi_reduction <maximumf>, %1526, %cst_292 [0] : vector<16x16xf32> to vector<16xf32>
      %1528 = vector.shape_cast %1527 : vector<16xf32> to vector<1x16xf32>
      %1529 = arith.cmpi sgt, %1384, %1381 : i32
      %1530 = arith.cmpi sgt, %1517, %1514 : i32
      %1531 = arith.andi %1529, %1530 : i1
      %cst_293 = arith.constant 0.000000e+00 : f32
      %1532 = vector.broadcast %cst_293 : f32 to vector<1x16xf32>
      %1533 = arith.select %1531, %1528, %1532 : vector<1x16xf32>
      %c4_i32_294 = arith.constant 4 : i32
      %1534 = vector.broadcast %c4_i32_294 : i32 to vector<8x1xi32>
      %1535 = arith.cmpi eq, %4, %1534 : vector<8x1xi32>
      %1536 = vector.shape_cast %1535 : vector<8x1xi1> to vector<8x1xi1>
      %1537 = vector.broadcast %1536 : vector<8x1xi1> to vector<8x16xi1>
      %1538 = vector.shape_cast %1533 : vector<1x16xf32> to vector<1x16xf32>
      %1539 = vector.broadcast %1538 : vector<1x16xf32> to vector<8x16xf32>
      %1540 = arith.select %1537, %1539, %1511 : vector<8x16xi1>, vector<8x16xf32>
      %c5_i32_295 = arith.constant 5 : i32
      %1541 = arith.addi %28, %c5_i32_295 : i32
      %1542 = arith.index_cast %1541 : i32 to index
      %1543 = memref.load %arg4[%1542] : memref<112xi32, #tpu.memory_space<smem>>
      %c5_i32_296 = arith.constant 5 : i32
      %1544 = arith.addi %28, %c5_i32_296 : i32
      %1545 = arith.index_cast %1544 : i32 to index
      %1546 = memref.load %arg5[%1545] : memref<112xi32, #tpu.memory_space<smem>>
      %1547 = vector.broadcast %1543 : i32 to vector<16x1xi32>
      %1548 = arith.cmpi sge, %3, %1547 : vector<16x1xi32>
      %1549 = vector.broadcast %1546 : i32 to vector<16x1xi32>
      %1550 = arith.cmpi slt, %3, %1549 : vector<16x1xi32>
      %1551 = arith.andi %1548, %1550 : vector<16x1xi1>
      %1552 = vector.shape_cast %1551 : vector<16x1xi1> to vector<16x1xi1>
      %1553 = vector.broadcast %1552 : vector<16x1xi1> to vector<16x16xi1>
      %1554 = vector.broadcast %cst : f32 to vector<16x16xf32>
      %1555 = arith.select %1553, %1394, %1554 : vector<16x16xi1>, vector<16x16xf32>
      %cst_297 = arith.constant dense<0xFF800000> : vector<16xf32>
      %1556 = vector.multi_reduction <maximumf>, %1555, %cst_297 [0] : vector<16x16xf32> to vector<16xf32>
      %1557 = vector.shape_cast %1556 : vector<16xf32> to vector<1x16xf32>
      %1558 = arith.cmpi sgt, %1384, %1381 : i32
      %1559 = arith.cmpi sgt, %1546, %1543 : i32
      %1560 = arith.andi %1558, %1559 : i1
      %cst_298 = arith.constant 0.000000e+00 : f32
      %1561 = vector.broadcast %cst_298 : f32 to vector<1x16xf32>
      %1562 = arith.select %1560, %1557, %1561 : vector<1x16xf32>
      %c5_i32_299 = arith.constant 5 : i32
      %1563 = vector.broadcast %c5_i32_299 : i32 to vector<8x1xi32>
      %1564 = arith.cmpi eq, %4, %1563 : vector<8x1xi32>
      %1565 = vector.shape_cast %1564 : vector<8x1xi1> to vector<8x1xi1>
      %1566 = vector.broadcast %1565 : vector<8x1xi1> to vector<8x16xi1>
      %1567 = vector.shape_cast %1562 : vector<1x16xf32> to vector<1x16xf32>
      %1568 = vector.broadcast %1567 : vector<1x16xf32> to vector<8x16xf32>
      %1569 = arith.select %1566, %1568, %1540 : vector<8x16xi1>, vector<8x16xf32>
      %c6_i32_300 = arith.constant 6 : i32
      %1570 = arith.addi %28, %c6_i32_300 : i32
      %1571 = arith.index_cast %1570 : i32 to index
      %1572 = memref.load %arg4[%1571] : memref<112xi32, #tpu.memory_space<smem>>
      %c6_i32_301 = arith.constant 6 : i32
      %1573 = arith.addi %28, %c6_i32_301 : i32
      %1574 = arith.index_cast %1573 : i32 to index
      %1575 = memref.load %arg5[%1574] : memref<112xi32, #tpu.memory_space<smem>>
      %1576 = vector.broadcast %1572 : i32 to vector<16x1xi32>
      %1577 = arith.cmpi sge, %3, %1576 : vector<16x1xi32>
      %1578 = vector.broadcast %1575 : i32 to vector<16x1xi32>
      %1579 = arith.cmpi slt, %3, %1578 : vector<16x1xi32>
      %1580 = arith.andi %1577, %1579 : vector<16x1xi1>
      %1581 = vector.shape_cast %1580 : vector<16x1xi1> to vector<16x1xi1>
      %1582 = vector.broadcast %1581 : vector<16x1xi1> to vector<16x16xi1>
      %1583 = vector.broadcast %cst : f32 to vector<16x16xf32>
      %1584 = arith.select %1582, %1394, %1583 : vector<16x16xi1>, vector<16x16xf32>
      %cst_302 = arith.constant dense<0xFF800000> : vector<16xf32>
      %1585 = vector.multi_reduction <maximumf>, %1584, %cst_302 [0] : vector<16x16xf32> to vector<16xf32>
      %1586 = vector.shape_cast %1585 : vector<16xf32> to vector<1x16xf32>
      %1587 = arith.cmpi sgt, %1384, %1381 : i32
      %1588 = arith.cmpi sgt, %1575, %1572 : i32
      %1589 = arith.andi %1587, %1588 : i1
      %cst_303 = arith.constant 0.000000e+00 : f32
      %1590 = vector.broadcast %cst_303 : f32 to vector<1x16xf32>
      %1591 = arith.select %1589, %1586, %1590 : vector<1x16xf32>
      %c6_i32_304 = arith.constant 6 : i32
      %1592 = vector.broadcast %c6_i32_304 : i32 to vector<8x1xi32>
      %1593 = arith.cmpi eq, %4, %1592 : vector<8x1xi32>
      %1594 = vector.shape_cast %1593 : vector<8x1xi1> to vector<8x1xi1>
      %1595 = vector.broadcast %1594 : vector<8x1xi1> to vector<8x16xi1>
      %1596 = vector.shape_cast %1591 : vector<1x16xf32> to vector<1x16xf32>
      %1597 = vector.broadcast %1596 : vector<1x16xf32> to vector<8x16xf32>
      %1598 = arith.select %1595, %1597, %1569 : vector<8x16xi1>, vector<8x16xf32>
      %c56_i32_305 = arith.constant 56 : i32
      %1599 = arith.muli %arg14, %c56_i32_305 : i32
      %c48_i32 = arith.constant 48 : i32
      %1600 = arith.addi %1599, %c48_i32 : i32
      %1601 = tpu.assume_multiple %1600, 8 : i32
      %1602 = arith.index_cast %1601 : i32 to index
      %c0_306 = arith.constant 0 : index
      %1603 = vector.load %arg13[%1602, %c0_306] : memref<448x16xf32, #tpu.memory_space<vmem>>, vector<8x16xf32>
      tpu.vector_store %arg13[%1602, %c0_306], %1598 {strides = array<i32>} : memref<448x16xf32, #tpu.memory_space<vmem>>, vector<8x16xf32>,
    }
    %c8_i32_5 = arith.constant 8 : i32
    %c0_6 = arith.constant 0 : index
    %c0_7 = arith.constant 0 : index
    %9 = vector.load %arg13[%c0_6, %c0_7] : memref<448x16xf32, #tpu.memory_space<vmem>>, vector<448x16xf32>
    %10 = arith.truncf %9 : vector<448x16xf32> to vector<448x16xbf16>
    %c0_8 = arith.constant 0 : index
    %c0_9 = arith.constant 0 : index
    %11 = vector.load %arg7[%c0_8, %c0_9] : memref<16x128xbf16, #tpu.memory_space<vmem>>, vector<16x128xbf16>
    %cst_10 = arith.constant dense<0.000000e+00> : vector<448x128xf32>
    %12 = tpu.matmul %10, %11, %cst_10 {dimension_numbers = #tpu.dot_dimension_numbers<[1], [0], [0], [1], [0, 0, 1, 1], [], []>} : vector<448x16xbf16>, vector<16x128xbf16>, vector<448x128xf32> -> vector<448x128xf32>
    %c0_11 = arith.constant 0 : index
    %c0_12 = arith.constant 0 : index
    %13 = vector.load %arg8[%c0_11, %c0_12] : memref<1x128xf32, #tpu.memory_space<vmem>>, vector<1x128xf32>
    %14 = vector.broadcast %13 : vector<1x128xf32> to vector<448x128xf32>
    %15 = arith.addf %12, %14 : vector<448x128xf32>
    %cst_13 = arith.constant 0.000000e+00 : f32
    %16 = vector.broadcast %cst_13 : f32 to vector<448x128xf32>
    %17 = arith.maximumf %15, %16 : vector<448x128xf32>
    %c0_14 = arith.constant 0 : index
    %c0_15 = arith.constant 0 : index
    %18 = vector.load %arg9[%c0_14, %c0_15] : memref<8x448xf32, #tpu.memory_space<vmem>>, vector<8x448xf32>
    %cst_16 = arith.constant dense<0.000000e+00> : vector<8x128xf32>
    %19 = tpu.matmul %18, %17, %cst_16 {dimension_numbers = #tpu.dot_dimension_numbers<[1], [0], [0], [1], [0, 0, 1, 1], [], []>} : vector<8x448xf32>, vector<448x128xf32>, vector<8x128xf32> -> vector<8x128xf32>
    %20 = arith.truncf %19 : vector<8x128xf32> to vector<8x128xbf16>
    %c0_17 = arith.constant 0 : index
    %c0_18 = arith.constant 0 : index
    %21 = vector.load %arg10[%c0_17, %c0_18] : memref<128x128xbf16, #tpu.memory_space<vmem>>, vector<128x128xbf16>
    %cst_19 = arith.constant dense<0.000000e+00> : vector<8x128xf32>
    %22 = tpu.matmul %20, %21, %cst_19 {dimension_numbers = #tpu.dot_dimension_numbers<[1], [0], [0], [1], [0, 0, 1, 1], [], []>} : vector<8x128xbf16>, vector<128x128xbf16>, vector<8x128xf32> -> vector<8x128xf32>
    %c0_20 = arith.constant 0 : index
    %c0_21 = arith.constant 0 : index
    %23 = vector.load %arg11[%c0_20, %c0_21] : memref<1x128xf32, #tpu.memory_space<vmem>>, vector<1x128xf32>
    %24 = vector.broadcast %23 : vector<1x128xf32> to vector<8x128xf32>
    %25 = arith.addf %22, %24 : vector<8x128xf32>
    %c0_22 = arith.constant 0 : index
    %c0_23 = arith.constant 0 : index
    %26 = vector.load %arg12[%c0_22, %c0_23] : memref<8x128xf32, #tpu.memory_space<vmem>>, vector<8x128xf32>
    tpu.vector_store %arg12[%c0_22, %c0_23], %25 {strides = array<i32>} : memref<8x128xf32, #tpu.memory_space<vmem>>, vector<8x128xf32>,
    return
  }
  func.func @transform_0(%arg0: i32, %arg1: i32, %arg2: memref<112xi32, #tpu.memory_space<smem>>, %arg3: memref<112xi32, #tpu.memory_space<smem>>, %arg4: memref<112xi32, #tpu.memory_space<smem>>, %arg5: memref<112xi32, #tpu.memory_space<smem>>) -> (i32, i32, i32, i32) {
    %c0_i32 = arith.constant 0 : i32
    %c0_i32_0 = arith.constant 0 : i32
    %c0_i32_1 = arith.constant 0 : i32
    %c0_i32_2 = arith.constant 0 : i32
    return %arg0, %c0_i32, %c0_i32_0, %c0_i32_1 : i32, i32, i32, i32
  }
  func.func @transform_1(%arg0: i32, %arg1: i32, %arg2: memref<112xi32, #tpu.memory_space<smem>>, %arg3: memref<112xi32, #tpu.memory_space<smem>>, %arg4: memref<112xi32, #tpu.memory_space<smem>>, %arg5: memref<112xi32, #tpu.memory_space<smem>>) -> (i32, i32) {
    %c0_i32 = arith.constant 0 : i32
    %c0_i32_0 = arith.constant 0 : i32
    %c0_i32_1 = arith.constant 0 : i32
    return %c0_i32, %c0_i32_0 : i32, i32
  }
  func.func @transform_2(%arg0: i32, %arg1: i32, %arg2: memref<112xi32, #tpu.memory_space<smem>>, %arg3: memref<112xi32, #tpu.memory_space<smem>>, %arg4: memref<112xi32, #tpu.memory_space<smem>>, %arg5: memref<112xi32, #tpu.memory_space<smem>>) -> (i32, i32) {
    %c0_i32 = arith.constant 0 : i32
    %c0_i32_0 = arith.constant 0 : i32
    %c0_i32_1 = arith.constant 0 : i32
    return %c0_i32, %c0_i32_0 : i32, i32
  }
  func.func @transform_3(%arg0: i32, %arg1: i32, %arg2: memref<112xi32, #tpu.memory_space<smem>>, %arg3: memref<112xi32, #tpu.memory_space<smem>>, %arg4: memref<112xi32, #tpu.memory_space<smem>>, %arg5: memref<112xi32, #tpu.memory_space<smem>>) -> (i32, i32) {
    %c0_i32 = arith.constant 0 : i32
    %c0_i32_0 = arith.constant 0 : i32
    %c0_i32_1 = arith.constant 0 : i32
    return %c0_i32, %c0_i32_0 : i32, i32
  }
  func.func @transform_4(%arg0: i32, %arg1: i32, %arg2: memref<112xi32, #tpu.memory_space<smem>>, %arg3: memref<112xi32, #tpu.memory_space<smem>>, %arg4: memref<112xi32, #tpu.memory_space<smem>>, %arg5: memref<112xi32, #tpu.memory_space<smem>>) -> (i32, i32) {
    %c0_i32 = arith.constant 0 : i32
    %c0_i32_0 = arith.constant 0 : i32
    %c0_i32_1 = arith.constant 0 : i32
    return %c0_i32, %c0_i32_0 : i32, i32
  }
  func.func @transform_5(%arg0: i32, %arg1: i32, %arg2: memref<112xi32, #tpu.memory_space<smem>>, %arg3: memref<112xi32, #tpu.memory_space<smem>>, %arg4: memref<112xi32, #tpu.memory_space<smem>>, %arg5: memref<112xi32, #tpu.memory_space<smem>>) -> (i32, i32) {
    %c0_i32 = arith.constant 0 : i32
    %c0_i32_0 = arith.constant 0 : i32
    %c0_i32_1 = arith.constant 0 : i32
    return %c0_i32, %c0_i32_0 : i32, i32
  }
  func.func @transform_6(%arg0: i32, %arg1: i32, %arg2: memref<112xi32, #tpu.memory_space<smem>>, %arg3: memref<112xi32, #tpu.memory_space<smem>>, %arg4: memref<112xi32, #tpu.memory_space<smem>>, %arg5: memref<112xi32, #tpu.memory_space<smem>>) -> (i32, i32) {
    %c1_i32 = arith.constant 1 : i32
    %0 = arith.muli %arg0, %c1_i32 : i32
    %1 = arith.addi %0, %arg1 : i32
    %c0_i32 = arith.constant 0 : i32
    %c0_i32_0 = arith.constant 0 : i32
    return %1, %c0_i32 : i32, i32
  }
}

</mosaic_0001>

<bundles_post_ra>
// kernel: tpu_custom_call.1
= control target key start
LH: loop header
LB: loop body
LE: loop exit
PB: predicated region body
PF: predicated region fallthrough
CT: control target
= control target key end

     0   :  { %s10461_s0 = inlined_call_operand.hbm [shape: s32[112], index: 0, kind: input, shape index: {}]   ;;  %s10462_s4 = inlined_call_operand.hbm [shape: f32[2,16,16,16], index: 4, kind: input, shape index: {}]   ;;  %s10463_s5 = inlined_call_operand.vmem [shape: bf16[16,128], index: 5, kind: input, shape index: {}]   ;;  %s10464_s6 = inlined_call_operand.vmem [shape: f32[1,128], index: 6, kind: input, shape index: {}]   ;;  %s10465_s7 = inlined_call_operand.hbm [shape: f32[8,448], index: 7, kind: input, shape index: {}]   ;;  %s10466_s8 = inlined_call_operand.hbm [shape: bf16[128,128], index: 8, kind: input, shape index: {}]   ;;  %s10467_s9 = inlined_call_operand.vmem [shape: f32[1,128], index: 9, kind: input, shape index: {}]   ;;  %s10468_s10 = inlined_call_operand.hbm [shape: f32[16,128], index: 10, kind: output, shape index: {}]   ;;  %s10469_s1 = inlined_call_operand.vmem [shape: s32[112], index: 1, kind: input, shape index: {}]   ;;  %s10470_s2 = inlined_call_operand.vmem [shape: s32[112], index: 2, kind: input, shape index: {}]   ;;  %s10471_s3 = inlined_call_operand.vmem [shape: s32[112], index: 3, kind: input, shape index: {}]  }
   0x1   :  { %10542 = sst [smem:[#allocation40_spill]] %s10462_s4  ;;  %s4639_s15 = scalar_lea.hbm %s10461_s0, 16 }
   0x2   :  { %10543 = sst [smem:[#allocation41_spill]] %s10465_s7  ;;  %p4640_p0 = scmp.ne.s32.totalorder %s10461_s0, %s4639_s15 }
   0x3   :  { %10544 = sst [smem:[#allocation42_spill]] %s10466_s8  ;;  %p4643_p1 = scmp.lt.u32.totalorder %s4639_s15, %s10461_s0 }
   0x5   :  { %p4645_p2 = pnand %p4643_p1, %p4640_p0 }
   0x7   :  { %4648 = shalt.err (!%p4645_p2)  }
   0x8   :  { %s4869_s20 = smov [#allocation4]   ;;  %s17_s25 = sshll.u32 %s10469_s1, 4  ;;  %s18_s25 = int_to_ptr.vmem [resolvable:$true] %s17_s25 }
   0x9   :  { %16 = dma.hbm_to_smem %s10461_s0, 16, %s4869_s20, [#allocation3] }
   0xa   :  { %s21_s28 = sshll.u32 %s10470_s2, 4  ;;  %s4649_s29 = scalar_lea.vmem %s18_s25, 16  ;;  %s22_s28 = int_to_ptr.vmem [resolvable:$true] %s21_s28 }
   0xb   :  { %p4650_p3 = scmp.ne.s32.totalorder %s18_s25, %s4649_s29  ;;  %p4654_p4 = scmp.lt.s32.totalorder %s18_s25, %s18_s25 }
   0xc   :  { %p4655_p5 = scmp.lt.s32.totalorder %s4649_s29, %s4649_s29 }
   0xe   :  { %p4656_p6 = por %p4655_p5, %p4654_p4 }
  0x10   :  { %p4657_p7 = pnand %p4656_p6, %p4650_p3 }
  0x12   :  { %4660 = shalt.err (!%p4657_p7)  }
  0x13   :  { %s4870_s30 = smov [#allocation5]   ;;  %s25_s12 = sshll.u32 %s10471_s3, 4  ;;  %s26_s12 = int_to_ptr.vmem [resolvable:$true] %s25_s12 }
  0x14   :  { %20 = dma.vmem_to_smem %s18_s25, 16, %s4870_s30, [#allocation3] }
  0x15   :  { %s4661_s1 = scalar_lea.vmem %s22_s28, 16  ;;  %p4666_p9 = scmp.lt.s32.totalorder %s22_s28, %s22_s28 }
  0x16   :  { %p4662_p8 = scmp.ne.s32.totalorder %s22_s28, %s4661_s1  ;;  %p4667_p10 = scmp.lt.s32.totalorder %s4661_s1, %s4661_s1 }
  0x18   :  { %p4668_p11 = por %p4667_p10, %p4666_p9 }
  0x1a   :  { %p4669_p12 = pnand %p4668_p11, %p4662_p8 }
  0x1c   :  { %4672 = shalt.err (!%p4669_p12)  }
  0x1d   :  { %s4871_s2 = smov [#allocation6]   ;;  %s4673_s13 = scalar_lea.vmem %s26_s12, 16 }
  0x1e   :  { %24 = dma.vmem_to_smem %s22_s28, 16, %s4871_s2, [#allocation3] }
  0x1f   :  { %p4674_p13 = scmp.ne.s32.totalorder %s26_s12, %s4673_s13  ;;  %p4678_p0 = scmp.lt.s32.totalorder %s26_s12, %s26_s12 }
  0x20   :  { %p4679_p1 = scmp.lt.s32.totalorder %s4673_s13, %s4673_s13 }
  0x22   :  { %p4680_p2 = por %p4679_p1, %p4678_p0 }
  0x24   :  { %p4681_p3 = pnand %p4680_p2, %p4674_p13 }
  0x26   :  { %4684 = shalt.err (!%p4681_p3)  }
  0x27   :  { %s4872_s14 = smov [#allocation7]  }
  0x28   :  { %28 = dma.vmem_to_smem %s26_s12, 16, %s4872_s14, [#allocation3] }
  0x29   :  { %4827 = dma.done.wait [#allocation3], 64 }
  0x2a   :  { %4828 = vsyncadd [#allocation3], 4294967232 }
  0x2b   :  { %30 = sfence }
  0x2c   :  { %31 = vsyncpa [#allocation9], 0 }
  0x2d   :  { %33 = vsyncpa [#allocation9 + $0x1], 0 }
  0x2e   :  { %34 = vsyncpa [#allocation12], 0 }
  0x2f   :  { %35 = vsyncpa [#allocation10], 0 }
  0x30   :  { %37 = vsyncpa [#allocation10 + $0x1], 0  ;;  %s4960_s3 = smov 0   ;;  %s4962_s15 = smov 0  }
  0x31   :  { %s4964_s16 = smov 0   ;;  %s4966_s17 = smov 0  }
  0x32   :  { %s4968_s18 = smov 0   ;;  %s4970_s19 = smov 0  }
  0x33 LB: > { %10545 = sst [smem:[#allocation19_spill]] %s4851_s16  ;;  %s4194_s20 = sadd.s32 4294967295, %s4863_s19   ;;  %s4863_s19 = sphi %s4970_s19, %s43_s19   ;;  %s4859_s18 = sphi %s4968_s18, %s11778_s18   ;;  %s4855_s17 = sphi %s4966_s17, %s11777_s17   ;;  %s4851_s16 = sphi %s4964_s16, %s11776_s16   ;;  %s4847_s15 = sphi %s4962_s15, %s11780_s15   ;;  %s4843_s3 = sphi %s4960_s3, %s11779_s3  }
  0x34   : > { %10546 = sst [smem:[#allocation20_spill]] %s4859_s18  ;;  %s4195_s21 = sadd.s32 4294967294, %s4863_s19  }
  0x35   : > { %10547 = sst [smem:[#allocation21_spill]] %s4863_s19  ;;  %p69_p4 = scmp.ne.s32.totalorder %s4851_s16, %s4847_s15 }
  0x36   : > { %p70_p5 = scmp.eq.s32.totalorder %s4863_s19, 0  ;;  %p75_p6 = scmp.ne.s32.totalorder %s4847_s15, %s4843_s3 }
  0x37   : > { %p4998_p7 = scmp.eq.s32.totalorder %s4194_s20, 0  ;;  %p206_p8 = scmp.eq.s32.totalorder %s4194_s20, 1 }
  0x38   : > { %p5002_p9 = por %p70_p5, %p69_p4  ;;  %p212_p10 = scmp.eq.s32.totalorder %s4195_s21, 1 }
  0x39   : > { %s10548_s23 = scalar_select %p4998_p7, 1, 0 }
  0x3a   : > { %p5008_p11 = por %p4998_p7, %p75_p6  ;;  %p5012_p12 = por %p206_p8, %p69_p4 }
  0x3b   : > { %p5016_p13 = por %p212_p10, %p75_p6  ;;  %p4196_p0 = scmp.ge.s32.totalorder %s4863_s19, 1 }
  0x3c   : > { %s10550_s25 = scalar_select %p5008_p11, 1, 0 }
  0x3d   : > { %s10551_s26 = scalar_select %p5012_p12, 1, 0 }
  0x3e   : > { %s10552_s27 = scalar_select %p5016_p13, 1, 0 }
  0x3f   : > { %p219_p1 = scmp.lt.s32.totalorder %s4863_s19, 3  ;;  %s4873_s29 = smov [#allocation11]  }
  0x40   : > { %s238_s30 = sshll.u32 %s4873_s29, 4  ;;  %p4557_p5 = scmp.lt.s32.totalorder %s4863_s19, 2  ;;  %s239_s30 = int_to_ptr.vmem [resolvable:$true] %s238_s30 }
  0x41   : > { %p5023_p3 = pnand %p4196_p0, %p219_p1  ;;  %s4874_s11 = smov [#allocation13]  }
  0x42   : > { %p5032_p8 = pnand %p4557_p5, %p5002_p9  ;;  %s248_s12 = sshll.u32 %s4874_s11, 4  ;;  %s5042_s12 = int_to_ptr.vmem [resolvable:$true] %s248_s12 }
  0x43   : > { %s10553_s28 = scalar_select %p5023_p3, 1, 0 }
  0x44   : > { %p4540_p4 = pneg %p5023_p3  ;;  %s10556_s7 = sld [smem:[#allocation41_spill]] }
  0x45   : > { %s10554_s0 = scalar_select %p5032_p8, 1, 0 }
  0x46   : > { %p5038_p6 = pnand %p4540_p4, %p4998_p7 }
  0x48   : > { %p4687_p10 = pneg %p5038_p6 }
  0x4a   : > { %s4685_s14 = scalar_lea.hbm %s10556_s7, 512 }
  0x4b   : > { %p4686_p9 = scmp.ne.s32.totalorder %s10556_s7, %s4685_s14  ;;  %p4692_p5 = scmp.lt.u32.totalorder %s4685_s14, %s10556_s7 }
  0x4d   : > { %p4688_p0 = pnand %p4687_p10, %p4686_p9 }
  0x4f   : > { %p4689_p1 = pneg %p4688_p0 }
  0x51   : > { %p4694_p4 = pnand %p4692_p5, %p4689_p1 }
  0x53   : > { %4697 = shalt.err (!%p4694_p4)
}
  0x54   : > { %s4698_s11 = scalar_lea.vmem %s239_s30, 512  ;;  %p4706_p7 = scmp.lt.s32.totalorder %s239_s30, %s239_s30 }
  0x55   : > { %p4699_p2 = scmp.ne.s32.totalorder %s239_s30, %s4698_s11  ;;  %p4707_p11 = scmp.lt.s32.totalorder %s4698_s11, %s4698_s11 }
  0x57   : > { %p4701_p13 = pnand %p4699_p2, %p4687_p10  ;;  %p4708_p3 = por %p4707_p11, %p4706_p7 }
  0x59   : > { %p4702_p12 = pneg %p4701_p13 }
  0x5b   : > { %p4709_p8 = pnand %p4708_p3, %p4702_p12 }
  0x5d   : > { %4712 = shalt.err (!%p4709_p8)
}
  0x5e   : > { %4543 = dma.hbm_to_vmem [thread:$0]  (!%p5038_p6), %s10556_s7, 512, %s239_s30, [#allocation12]  }
  0x5f   : > { %s10557_s8 = sld [smem:[#allocation42_spill]] }
  0x65   : > { %s4713_s21 = scalar_lea.hbm %s10557_s8, 1024 }
  0x66   : > { %p4714_p13 = scmp.ne.s32.totalorder %s10557_s8, %s4713_s21  ;;  %p4720_p12 = scmp.lt.u32.totalorder %s4713_s21, %s10557_s8 }
  0x68   : > { %p4716_p7 = pnand %p4714_p13, %p4687_p10 }
  0x6a   : > { %p4717_p11 = pneg %p4716_p7 }
  0x6c   : > { %p4722_p2 = pnand %p4720_p12, %p4717_p11 }
  0x6e   : > { %4725 = shalt.err (!%p4722_p2)
}
  0x6f   : > { %s4726_s30 = scalar_lea.vmem %s5042_s12, 1024  ;;  %p4734_p0 = scmp.lt.s32.totalorder %s5042_s12, %s5042_s12 }
  0x70   : > { %p4727_p3 = scmp.ne.s32.totalorder %s5042_s12, %s4726_s30  ;;  %p4735_p1 = scmp.lt.s32.totalorder %s4726_s30, %s4726_s30 }
  0x72   : > { %p4729_p8 = pnand %p4727_p3, %p4687_p10  ;;  %p4736_p5 = por %p4735_p1, %p4734_p0 }
  0x74   : > { %p4730_p9 = pneg %p4729_p8 }
  0x76   : > { %p4737_p4 = pnand %p4736_p5, %p4730_p9 }
  0x78   : > { %4740 = shalt.err (!%p4737_p4)
}
  0x79   : > { %s4875_s22 = smov 64   ;;  %s4876_s2 = smov 4  }
  0x7a   : > { %4546 = dma.hbm_to_vmem [thread:$0]  (!%p5038_p6), %s10557_s8, 1024, %s5042_s12, [#allocation12], %s4875_s22, %s4875_s22, %s4876_s2  }
  0x7b   : > { %s265_s20 = sand.u32 1, %s4851_s16   ;;  %s55_s21 = sadd.s32 1, %s4859_s18 }
  0x7c   : > { %s4200_s24 = sshll.u32 %s265_s20, 8  ;;  %p57_p10 = scmp.ge.s32.totalorder %s55_s21, 2 }
  0x7d   : > { %s4308_s29 = sshll.u32 %s4859_s18, 12  ;;  %s269_s11 = scalar_lea.vmem [#allocation8], %s4200_s24 }
  0x7e   : > { %s276_s30 = sshll.u32 %s269_s11, 4  ;;  %s11782_s21 = smov (%p57_p10, %s55_s21), 0  ;;  %s5101_s30 = int_to_ptr.vmem [resolvable:$true] %s276_s30 }
  0x7f   : > { %10558 = sst [smem:[#allocation22_spill]] %s11782_s21  ;;  %s10559_s4 = sld [smem:[#allocation40_spill]] }
  0x80   : > { %s59_s12 = ssub.s32 %s4859_s18, %s11782_s21  ;;  %s5109_s2 = scalar_lea.sflag [#allocation9], %s265_s20 }
  0x81   : > { %p5105_p6 = scmp.eq.s32.totalorder %s59_s12, 0  ;;  %p10561_p7 = scmp.ne.s32.totalorder %s10554_s0, 0 }
  0x83   : > { %p4743_p11 = pneg %p10561_p7 }
  0x85   : > { %s5099_s1 = scalar_lea.hbm %s10559_s4, %s4308_s29  ;;  %s4746_s14 = scalar_lea.hbm %s10559_s4, 8192 }
  0x86   : > { %s4741_s13 = scalar_lea.hbm %s5099_s1, 4096  ;;  %p4747_p3 = scmp.lt.u32.totalorder %s5099_s1, %s10559_s4 }
  0x87   : > { %p4742_p13 = scmp.ne.s32.totalorder %s5099_s1, %s4741_s13  ;;  %p4748_p8 = scmp.lt.u32.totalorder %s4746_s14, %s4741_s13 }
  0x88   : > { %p4750_p0 = scmp.lt.u32.totalorder %s4741_s13, %s5099_s1 }
  0x89   : > { %p4744_p12 = pnand %p4743_p11, %p4742_p13  ;;  %p4749_p9 = por %p4748_p8, %p4747_p3 }
  0x8b   : > { %p4745_p2 = pneg %p4744_p12  ;;  %p4751_p1 = por %p4750_p0, %p4749_p9 }
  0x8d   : > { %p4752_p5 = pnand %p4751_p1, %p4745_p2 }
  0x8f   : > { %4755 = shalt.err (!%p4752_p5)
}
  0x90   : > { %s4756_s20 = scalar_lea.vmem %s5101_s30, 4096  ;;  %s4877_s11 = smov [#allocation8]  }
  0x91   : > { %p4757_p4 = scmp.ne.s32.totalorder %s5101_s30, %s4756_s20  ;;  %s4761_s12 = sshll.u32 %s4877_s11, 4  ;;  %s4762_s12 = int_to_ptr.vmem [resolvable:$false] %s4761_s12 }
  0x92   : > { %s4763_s7 = scalar_lea.vmem %s4762_s12, 8192  ;;  %p4764_p12 = scmp.lt.s32.totalorder %s5101_s30, %s4762_s12 }
  0x93   : > { %p4759_p10 = pnand %p4757_p4, %p4743_p11  ;;  %p4765_p3 = scmp.lt.s32.totalorder %s4763_s7, %s4756_s20 }
  0x95   : > { %p4760_p13 = pneg %p4759_p10  ;;  %p4766_p8 = por %p4765_p3, %p4764_p12 }
  0x97   : > { %p4767_p9 = pnand %p4766_p8, %p4760_p13 }
  0x99   : > { %4770 = shalt.err (!%p4767_p9)
}
  0x9a   : > { %s4878_s13 = smov 128   ;;  %s4879_s19 = smov 8  }
  0x9b   : > { %4550 = dma.hbm_to_vmem [thread:$0]  (!%p10561_p7), %s5099_s1, 4096, %s5101_s30, %s5109_s2, %s4878_s13, %s4878_s13, %s4879_s19  }
  0x9c   : > { %s10562_s14 = sadd.s32 1, %s4851_s16  ;;  %p10564_p11 = scmp.ne.s32.totalorder %s10553_s28, 0 }
  0x9d   : > { %s5142_s24 = scalar_select %p5105_p6, %s4851_s16, %s10562_s14  }
  0x9e   : > { %288 = sbr.rel (%p10564_p11) target bundleno = 1569 (0x621), region = 44 }
  0x9f   : > { %10563 = sst [smem:[#allocation23_spill]] %s5142_s24 }
  0xa5   : > { %s5147_s29 = sand.u32 1, %s4847_s15   ;;  %p10565_p2 = scmp.ne.s32.totalorder %s10550_s25, 0 }
  0xa6   : > { %s4204_s20 = sshll.u32 %s5147_s29, 8  ;;  %s291_s11 = scalar_lea.sflag [#allocation9], %s5147_s29 }
  0xa7   : > { %s5151_s12 = scalar_lea.vmem [#allocation8], %s4204_s20 }
  0xa8   : > { %4830 = dma.done.wait (%p10565_p2), %s291_s11, 4096  }
  0xa9   : > { %4832 = vsyncadd (%p10565_p2), %s291_s11, 4294963200  ;;  %p10566_p6 = scmp.ne.s32.totalorder %s10548_s23, 0 }
  0xab   : > { %4834 = dma.done.wait (%p10566_p6), [#allocation12], 1536  }
  0xac   : > { %4836 = vsyncadd (%p10566_p6), [#allocation12], 4294965760  ;;  %s4207_s25 = sshll.u32 %s5147_s29, 3  ;;  %v365_v0 = vlaneseq  ;;  %v5169_v3 = vld [vmem:[%s5151_s12] sm:$0xff]  ;;  %v5172_v4 = vld [vmem:[%s5151_s12 + $0x8] sm:$0xff]  ;;  %s5268_s0 = smov 0  }
  0xad   : > { %v5175_v5 = vld [vmem:[%s5151_s12 + $0x10] sm:$0xff]  ;;  %v5178_v6 = vld [vmem:[%s5151_s12 + $0x18] sm:$0xff]  ;;  %v5181_v7 = vld [vmem:[%s5151_s12 + $0x20] sm:$0xff]  ;;  %s5266_s23 = scalar_lea.vmem [#allocation14], %s4207_s25 }
  0xae   : > { %v5163_v1 = vshrl.u32 %v365_v0, 7  ;;  %v5184_v8 = vld [vmem:[%s5151_s12 + $0x28] sm:$0xff]  ;;  %v5187_v9 = vld [vmem:[%s5151_s12 + $0x30] sm:$0xff]  ;;  %v5190_v10 = vld [vmem:[%s5151_s12 + $0x38] sm:$0xff] }
  0xaf   : > { %v5193_v11 = vld [vmem:[%s5151_s12 + $0x40] sm:$0xff]  ;;  %v5196_v12 = vld [vmem:[%s5151_s12 + $0x48] sm:$0xff]  ;;  %v5199_v13 = vld [vmem:[%s5151_s12 + $0x50] sm:$0xff] }
  0xb0   : > { %v5166_v2 = vadd.s32 8, %v5163_v1  ;;  %10567 = vst [vmem:[#allocation24_spill] sm:$0xff] %v5199_v13  ;;  %v5202_v14 = vld [vmem:[%s5151_s12 + $0x58] sm:$0xff]  ;;  %v5205_v15 = vld [vmem:[%s5151_s12 + $0x60] sm:$0xff]  ;;  %v5208_v16 = vld [vmem:[%s5151_s12 + $0x68] sm:$0xff] }
  0xb1   : > { %10568 = vst [vmem:[#allocation25_spill] sm:$0xff] %v5202_v14  ;;  %10569 = vst [vmem:[#allocation26_spill] sm:$0xff] %v5205_v15  ;;  %v5211_v17 = vld [vmem:[%s5151_s12 + $0x70] sm:$0xff]  ;;  %v5214_v18 = vld [vmem:[%s5151_s12 + $0x78] sm:$0xff] }
  0xb2   : > { %10570 = vst [vmem:[#allocation27_spill] sm:$0xff] %v5208_v16  ;;  %10571 = vst [vmem:[#allocation28_spill] sm:$0xff] %v5211_v17  ;;  %v5217_v19 = vld [vmem:[%s5151_s12 + $0x80] sm:$0xff]  ;;  %v5220_v20 = vld [vmem:[%s5151_s12 + $0x88] sm:$0xff] }
  0xb3   : > { %10572 = vst [vmem:[#allocation29_spill] sm:$0xff] %v5214_v18  ;;  %10573 = vst [vmem:[#allocation30_spill] sm:$0xff] %v5217_v19  ;;  %v5223_v21 = vld [vmem:[%s5151_s12 + $0x90] sm:$0xff]  ;;  %v5226_v22 = vld [vmem:[%s5151_s12 + $0x98] sm:$0xff] }
  0xb4   : > { %10574 = vst [vmem:[#allocation31_spill] sm:$0xff] %v5223_v21  ;;  %10575 = vst [vmem:[#allocation32_spill] sm:$0xff] %v5226_v22  ;;  %v5229_v23 = vld [vmem:[%s5151_s12 + $0xa0] sm:$0xff]  ;;  %v5232_v24 = vld [vmem:[%s5151_s12 + $0xa8] sm:$0xff] }
  0xb5   : > { %10576 = vst [vmem:[#allocation33_spill] sm:$0xff] %v5229_v23  ;;  %v5235_v25 = vld [vmem:[%s5151_s12 + $0xb0] sm:$0xff]  ;;  %v5238_v26 = vld [vmem:[%s5151_s12 + $0xb8] sm:$0xff]  ;;  %v5241_v27 = vld [vmem:[%s5151_s12 + $0xc0] sm:$0xff] }
  0xb6   : > { %10577 = vst [vmem:[#allocation34_spill] sm:$0xff] %v5235_v25  ;;  %10578 = vst [vmem:[#allocation35_spill] sm:$0xff] %v5238_v26  ;;  %v5244_v28 = vld [vmem:[%s5151_s12 + $0xc8] sm:$0xff]  ;;  %v5247_v29 = vld [vmem:[%s5151_s12 + $0xd0] sm:$0xff] }
  0xb7   : > { %10579 = vst [vmem:[#allocation36_spill] sm:$0xff] %v5241_v27  ;;  %10580 = vst [vmem:[#allocation37_spill] sm:$0xff] %v5247_v29  ;;  %v5250_v30 = vld [vmem:[%s5151_s12 + $0xd8] sm:$0xff]  ;;  %v5253_v31 = vld [vmem:[%s5151_s12 + $0xe0] sm:$0xff] }
  0xb8   : > { %10581 = vst [vmem:[#allocation38_spill] sm:$0xff] %v5250_v30  ;;  %v5256_v32 = vld [vmem:[%s5151_s12 + $0xe8] sm:$0xff]  ;;  %v5259_v33 = vld [vmem:[%s5151_s12 + $0xf0] sm:$0xff]  ;;  %v5262_v34 = vld [vmem:[%s5151_s12 + $0xf8] sm:$0xff] }
  0xb9   : > { %10582 = vst [vmem:[#allocation39_spill] sm:$0xff] %v5259_v33 }
  0xba LB: >> { %v10583_v13 = vld [vmem:[#allocation24_spill] sm:$0xff]  ;;  %v10587_v14 = vld [vmem:[#allocation25_spill] sm:$0xff]  ;;  %v10588_v15 = vld [vmem:[#allocation26_spill] sm:$0xff]  ;;  %s10597_s28 = sshll.u32 %s4855_s17, 3  ;;  %v10606_v41 = vmov 0  ;;  %v10610_v44 = vmov 0  ;;  %s4867_s0 = sphi %s5268_s0, %s376_s0  }
  0xbb   : >> { %v10589_v16 = vld [vmem:[#allocation27_spill] sm:$0xff]  ;;  %v10590_v17 = vld [vmem:[#allocation28_spill] sm:$0xff]  ;;  %v10591_v18 = vld [vmem:[#allocation29_spill] sm:$0xff]  ;;  %s377_s30 = sadd.s32 %s4867_s0, %s10597_s28 }
  0xbc   : >> { %v10593_v19 = vld [vmem:[#allocation30_spill] sm:$0xff]  ;;  %v10594_v21 = vld [vmem:[#allocation31_spill] sm:$0xff]  ;;  %v10595_v22 = vld [vmem:[#allocation32_spill] sm:$0xff]  ;;  %s5276_s1 = smul.u32 7, %s377_s30 }
  0xbd   : >> { %v10586_v26 = vld [vmem:[#allocation35_spill] sm:$0xff]  ;;  %v10592_v25 = vld [vmem:[#allocation34_spill] sm:$0xff]  ;;  %v10596_v23 = vld [vmem:[#allocation33_spill] sm:$0xff] }
  0xbe   : >> { %s5279_s22 = sld [smem:[#allocation4 + %s5276_s1]]  ;;  %s5510_s19 = sadd.s32 1, %s5276_s1  ;;  %v10653_v27 = vld [vmem:[#allocation36_spill] sm:$0xff]  ;;  %v10654_v29 = vld [vmem:[#allocation37_spill] sm:$0xff] }
  0xbf   : >> { %v10584_v30 = vld [vmem:[#allocation38_spill] sm:$0xff]  ;;  %s5282_s2 = sld [smem:[#allocation5 + %s5276_s1]]  ;;  %s5566_s11 = sadd.s32 2, %s5276_s1 }
  0xc0   : >> { %v10585_v33 = vld [vmem:[#allocation39_spill] sm:$0xff]  ;;  %s5298_s7 = sld [smem:[#allocation6 + %s5276_s1]] }
  0xc1   : >> { %s5338_s13 = sld [smem:[#allocation7 + %s5276_s1]] }
  0xc2   : >> { %s5543_s14 = sld [smem:[#allocation6 + %s5510_s19]] }
  0xc3   : >> { %s5546_s20 = sld [smem:[#allocation7 + %s5510_s19]] }
  0xc4   : >> { %v5285_v35 = vstv %s5279_s22  ;;  %s5581_s12 = sld [smem:[#allocation6 + %s5566_s11]] }
  0xc5   : >> { %v5288_v36 = vstv %s5282_s2  ;;  %vm382_vm0 = vcmp.le.s32.totalorder %v5285_v35, 0  ;;  %vm383_vm1 = vcmp.le.s32.totalorder %v5285_v35, 1  ;;  %vm384_vm2 = vcmp.le.s32.totalorder %v5285_v35, 2  ;;  %p5602_p7 = scmp.gt.s32.totalorder %s5282_s2, %s5279_s22  ;;  %s5619_s30 = sld [smem:[#allocation7 + %s5566_s11]] }
  0xc6   : >> { %vm385_vm4 = vcmp.le.s32.totalorder %v5285_v35, 3  ;;  %vm386_vm5 = vcmp.le.s32.totalorder %v5285_v35, 4  ;;  %vm399_vm9 = vcmp.gt.s32.totalorder %v5288_v36, 0  ;;  %vm400_vm10 = vcmp.gt.s32.totalorder %v5288_v36, 1  ;;  %s5622_s22 = sadd.s32 3, %s5276_s1 }
  0xc7   : >> { %vm401_vm11 = vcmp.gt.s32.totalorder %v5288_v36, 2  ;;  %vm402_vm15 = vcmp.gt.s32.totalorder %v5288_v36, 3  ;;  %vm5310_vm3 = vmand %vm382_vm0, %vm399_vm9  ;;  %vm403_vm6 = vcmp.gt.s32.totalorder %v5288_v36, 4  ;;  %vm405_vm0 = vcmp.gt.s32.totalorder %v5288_v36, 6  ;;  %p584_p0 = scmp.gt.s32.totalorder %s5338_s13, %s5298_s7  ;;  %s5627_s2 = sld [smem:[#allocation6 + %s5622_s22]] }
  0xc8   : >> { %vm5320_vm13 = vmand %vm383_vm1, %vm400_vm10  ;;  %vm406_vm9 = vcmp.gt.s32.totalorder %v5288_v36, 7  ;;  %vm410_vm14 = vcmp.gt.s32.totalorder %v5288_v36, 11  ;;  %v463_v42 = vsel %vm5310_vm3, %v5169_v3, -3e+38  ;;  %vm10620_vm10 = vcmp.gt.s32.totalorder %v5288_v36, 8  ;;  %s5638_s28 = sld [smem:[#allocation7 + %s5622_s22]] }
  0xc9   : >> { %vm5333_vm12 = vmand %vm384_vm2, %vm401_vm11  ;;  %v465_v43 = vsel %vm5320_vm13, %v5175_v5, -3e+38  ;;  %vm10627_vm8 = vcmp.le.s32.totalorder %v5285_v35, 9  ;;  %p621_p1 = scmp.gt.s32.totalorder %s5546_s20, %s5543_s14  ;;  %p5653_p5 = pnand %p584_p0, %p5602_p7 }
  0xca   : >> { %vm5349_vm2 = vmand %vm385_vm4, %vm402_vm15  ;;  %vm10608_vm4 = vcmp.gt.s32.totalorder %v5288_v36, 5  ;;  %vm10609_vm15 = vcmp.le.s32.totalorder %v5285_v35, 5  ;;  %v467_v46 = vsel %vm5333_vm12, %v5181_v7, -3e+38  ;;  %s6426_s18 = sld [smem:[#allocation7 + %s5622_s22]] }
  0xcb   : >> { %vm5360_vm7 = vmand %vm386_vm5, %vm403_vm6  ;;  %v469_v47 = vsel %vm5349_vm2, %v5187_v9, -3e+38  ;;  %vm10612_vm5 = vcmp.le.s32.totalorder %v5285_v35, 6  ;;  %p5682_p4 = pnand %p621_p1, %p5602_p7  ;;  %p658_p10 = scmp.gt.s32.totalorder %s5619_s30, %s5581_s12 }
  0xcc   : >> { %v10607_v41 = vsel %vm5360_vm7, 4294967295, %v10606_v41  ;;  %vm5374_vm11 = vmand %vm10609_vm15, %vm10608_vm4  ;;  %v471_v54 = vsel %vm5360_vm7, %v5193_v11, -3e+38  ;;  %vm10618_vm15 = vcmask 130048  }
  0xcd   : >> { %v10611_v44 = vsel %vm5374_vm11, 4294967295, %v10610_v44  ;;  %vm5391_vm6 = vmand %vm10612_vm5, %vm405_vm0  ;;  %vm10615_vm0 = vcmp.le.s32.totalorder %v5285_v35, 7  ;;  %v473_v55 = vsel %vm5374_vm11, %v10583_v13, -3e+38  ;;  %v496_v56 = vsel %vm10618_vm15, %v463_v42, -inf  ;;  %p5765_p12 = pnand %p658_p10, %p5602_p7 }
  0xce   : >> { %vm5409_vm4 = vmand %vm10615_vm0, %vm406_vm9  ;;  %vm10621_vm9 = vcmp.le.s32.totalorder %v5285_v35, 8  ;;  %v475_v0 = vsel %vm5391_vm6, %v10588_v15, -3e+38  ;;  %v476_v60 = vsel %vm5391_vm6, %v10589_v16, -3e+38  ;;  %vm10636_vm11 = vcmp.le.s32.totalorder %v5285_v35, 11  ;;  %p695_p13 = scmp.gt.s32.totalorder %s5638_s28, %s5627_s2 }
  0xcf   : >> { %vm10619_vm5 = vmmov %vm10618_vm15  ;;  %v477_v42 = vsel %vm5409_vm4, %v10590_v17, -3e+38  ;;  %vm10639_vm6 = vcmp.gt.s32.totalorder %v5288_v36, 12 }
  0xd0   : >> { %v497_v57 = vsel %vm10619_vm5, %v465_v43, -inf  ;;  %vm5425_vm0 = vmand %vm10621_vm9, %vm10620_vm10  ;;  %vm10631_vm9 = vcmp.le.s32.totalorder %v5285_v35, 10  ;;  %p5819_p3 = pnand %p695_p13, %p5602_p7 }
  0xd1   : >> { %vm10624_vm15 = vmmov %vm10619_vm5  ;;  %v480_v50 = vsel %vm5425_vm0, %v5220_v20, -3e+38 }
  0xd2   : >> { %v498_v61 = vsel %vm10624_vm15, %v467_v46, -inf  ;;  %vm10625_vm1 = vmmov %vm10619_vm5  ;;  %vm10626_vm5 = vcmp.gt.s32.totalorder %v5288_v36, 9 }
  0xd3   : >> { %v500_v62 = vsel %vm10625_vm1, %v469_v47, -inf  ;;  %vm5441_vm10 = vmand %vm10627_vm8, %vm10626_vm5  ;;  %v499_v43 = vmax.f32 %v496_v56, %v498_v61  ;;  %vm10630_vm1 = vcmp.gt.s32.totalorder %v5288_v36, 10  ;;  %vm10634_vm8 = vcmask 130048  }
  0xd4   : >> { %v501_v46 = vmax.f32 %v497_v57, %v500_v62  ;;  %vm5455_vm15 = vmand %vm10631_vm9, %vm10630_vm1  ;;  %v502_v59 = vsel %vm10634_vm8, %v471_v54, -inf  ;;  %v479_v57 = vsel %vm5425_vm0, %v10593_v19, -3e+38  ;;  %v481_v48 = vsel %vm5441_vm10, %v10594_v21, -3e+38 }
  0xd5   : >> { %vm10635_vm5 = vmmov %vm10634_vm8  ;;  %v503_v54 = vmax.f32 %v499_v43, %v502_v59  ;;  %vm10640_vm1 = vcmp.le.s32.totalorder %v5285_v35, 12  ;;  %v478_v62 = vsel %vm5409_vm4, %v10591_v18, -3e+38  ;;  %vm10645_vm8 = vcmp.gt.s32.totalorder %v5288_v36, 13 }
  0xd6   : >> { %v504_v51 = vsel %vm10635_vm5, %v473_v55, -inf  ;;  %vm5469_vm7 = vmand %vm10636_vm11, %vm410_vm14  ;;  %v483_v53 = vsel %vm5455_vm15, %v10596_v23, -3e+38  ;;  %vm10649_vm4 = vcmp.gt.s32.totalorder %v5288_v36, 14  ;;  %vm10650_vm0 = vcmp.le.s32.totalorder %v5285_v35, 14 }
  0xd7   : >> { %v505_v55 = vmax.f32 %v501_v46, %v504_v51  ;;  %vm5483_vm9 = vmand %vm10640_vm1, %vm10639_vm6  ;;  %v485_v58 = vsel %vm5469_vm7, %v10592_v25, -3e+38  ;;  %v482_v45 = vsel %vm5441_vm10, %v10595_v22, -3e+38 }
  0xd8   : >> { %vm10643_vm14 = vmmov %vm10635_vm5  ;;  %v487_v46 = vsel %vm5483_vm9, %v10653_v27, -3e+38  ;;  %v10662_v27 = vstv %s5298_s7 }
  0xd9   : >> { %v506_v49 = vsel %vm10643_vm14, %v475_v0, -inf  ;;  %vm10644_vm11 = vmmov %vm10635_vm5  ;;  %vm10646_vm5 = vcmp.le.s32.totalorder %v5285_v35, 13 }
  0xda   : >> { %v508_v51 = vsel %vm10644_vm11, %v477_v42, -inf  ;;  %vm5499_vm6 = vmand %vm10646_vm5, %vm10645_vm8  ;;  %v507_v43 = vmax.f32 %v503_v54, %v506_v49  ;;  %vm10656_vm8 = vcmp.gt.s32.totalorder %v5288_v36, 15  ;;  %vm10657_vm5 = vcmp.le.s32.totalorder %v5285_v35, 15 }
  0xdb   : >> { %v509_v0 = vmax.f32 %v505_v55, %v508_v51  ;;  %vm5516_vm1 = vmand %vm10650_vm0, %vm10649_vm4  ;;  %v489_v49 = vsel %vm5499_vm6, %v10654_v29, -3e+38  ;;  %v512_v55 = vsel %vm10644_vm11, %v481_v48, -inf  ;;  %v484_v35 = vsel %vm5455_vm15, %v5232_v24, -3e+38 }
  0xdc   : >> { %vm10655_vm14 = vmmov %vm10644_vm11  ;;  %v491_v52 = vsel %vm5516_vm1, %v5253_v31, -3e+38  ;;  %v492_v56 = vsel %vm5516_vm1, %v5256_v32, -3e+38 }
  0xdd   : >> { %v510_v54 = vsel %vm10655_vm14, %v479_v57, -inf  ;;  %vm5532_vm4 = vmand %vm10657_vm5, %vm10656_vm8  ;;  %v513_v29 = vmax.f32 %v509_v0, %v512_v55  ;;  %vm5559_vm14 = vcmp.ge.s32.totalorder %v5163_v1, %v10662_v27 }
  0xde   : >> { %v511_v57 = vmax.f32 %v507_v43, %v510_v54  ;;  %v493_v36 = vsel %vm5532_vm4, %v10585_v33, -3e+38  ;;  %vm10660_vm0 = vmmov %vm10644_vm11  ;;  %v494_v59 = vsel %vm5532_vm4, %v5262_v34, -3e+38 }
  0xdf   : >> { %v514_v63 = vsel %vm10660_vm0, %v483_v53, -inf  ;;  %vm10661_vm10 = vmmov %vm10660_vm0 }
  0xe0   : >> { %v516_v48 = vsel %vm10661_vm10, %v485_v58, -inf  ;;  %v515_v0 = vmax.f32 %v511_v57, %v514_v63  ;;  %vm10665_vm15 = vmmov %vm10660_vm0  ;;  %v10669_v58 = vsel %vm5310_vm3, %v5172_v4, -3e+38  ;;  %v10674_v63 = vsel %vm5349_vm2, %v5190_v10, -3e+38 }
  0xe1   : >> { %v517_v47 = vmax.f32 %v513_v29, %v516_v48  ;;  %v518_v54 = vsel %vm10665_vm15, %v487_v46, -inf  ;;  %vm10666_vm11 = vmmov %vm10660_vm0  ;;  %v527_v57 = vsel %vm10660_vm0, %v10669_v58, -inf  ;;  %v10670_v29 = vsel %vm5320_vm13, %v5178_v6, -3e+38 }
  0xe2   : >> { %v520_v55 = vsel %vm10666_vm11, %v489_v49, -inf  ;;  %vm10667_vm8 = vmmov %vm10660_vm0  ;;  %v519_v49 = vmax.f32 %v515_v0, %v518_v54  ;;  %v10676_v48 = vstv %s5298_s7  ;;  %vm10683_vm11 = vnez %v10611_v44  ;;  %s5673_s7 = sadd.s32 4, %s5276_s1 }
  0xe3   : >> { %v522_v53 = vsel %vm10667_vm8, %v491_v52, -inf  ;;  %vm10668_vm5 = vmmov %vm10660_vm0  ;;  %v521_v52 = vmax.f32 %v517_v47, %v520_v55  ;;  %vm5596_vm13 = vcmp.ge.s32.totalorder %v5166_v2, %v10676_v48  ;;  %v10684_v54 = vsel %vm10683_vm11, %v10587_v14, -3e+38  ;;  %s5719_s4 = sld [smem:[#allocation6 + %s5673_s7]] }
  0xe4   : >> { %v524_v27 = vsel %vm10668_vm5, %v493_v36, -inf  ;;  %vm10671_vm10 = vmmov %vm10660_vm0  ;;  %v10672_v36 = vsel %vm5333_vm12, %v5184_v8, -3e+38  ;;  %vm10680_vm12 = vnez %v10607_v41  ;;  %v523_v41 = vmax.f32 %v519_v49, %v522_v53  ;;  %s6429_s24 = sld [smem:[#allocation6 + %s5673_s7]] }
  0xe5   : >> { %v528_v46 = vsel %vm10671_vm10, %v10670_v29, -inf  ;;  %vm10673_vm15 = vmmov %vm10660_vm0  ;;  %v10681_v40 = vsel %vm10680_vm12, %v5196_v12, -3e+38  ;;  %v486_v44 = vsel %vm5469_vm7, %v10586_v26, -3e+38 }
  0xe6   : >> { %v529_v37 = vsel %vm10673_vm15, %v10672_v36, -inf  ;;  %vm10675_vm3 = vmmov %vm10660_vm0  ;;  %v488_v36 = vsel %vm5483_vm9, %v5244_v28, -3e+38 }
  0xe7   : >> { %v531_v38 = vsel %vm10675_vm3, %v10674_v63, -inf  ;;  %v530_v39 = vmax.f32 %v527_v57, %v529_v37  ;;  %vm10682_vm2 = vmmov %vm10660_vm0  ;;  %v525_v57 = vmax.f32 %v521_v52, %v524_v27  ;;  %v10693_v52 = vstv %s5338_s13  ;;  %s4210_s13 = scalar_select %p5682_p4, 0, 1 }
  0xe8   : >> { %v532_v0 = vmax.f32 %v528_v46, %v531_v38  ;;  %v533_v47 = vsel %vm10682_vm2, %v10681_v40, -inf  ;;  %vm10685_vm8 = vmmov %vm10660_vm0  ;;  %v539_v46 = vsel %vm10660_vm0, %v478_v62, -inf  ;;  %vm5668_vm15 = vcmp.lt.s32.totalorder %v5163_v1, %v10693_v52 }
  0xe9   : >> { %v535_v55 = vsel %vm10685_vm8, %v10684_v54, -inf  ;;  %vm10686_vm5 = vmmov %vm10660_vm0  ;;  %v534_v37 = vmax.f32 %v530_v39, %v533_v47  ;;  %v5660_v42 = vmax.f32 %v523_v41, %v525_v57  ;;  %v10699_v40 = vmov %v10693_v52 }
  0xea   : >> { %v537_v29 = vsel %vm10686_vm5, %v476_v60, -inf  ;;  %v536_v63 = vmax.f32 %v532_v0, %v535_v55  ;;  %v490_v60 = vsel %vm5499_vm6, %v10584_v30, -3e+38  ;;  %vm10687_vm7 = vmmov %vm10660_vm0  ;;  %v598_v0 = vstv %s5543_s14  ;;  %s4209_s14 = scalar_select %p5653_p5, 0, 1 }
  0xeb   : >> { %v541_v62 = vsel %vm10687_vm7, %v480_v50, -inf  ;;  %vm10688_vm10 = vmmov %vm10660_vm0  ;;  %v538_v50 = vmax.f32 %v534_v37, %v537_v29  ;;  %vm5692_vm12 = vcmp.lt.s32.totalorder %v5166_v2, %v10699_v40  ;;  %vm5703_vm11 = vcmp.ge.s32.totalorder %v5163_v1, %v598_v0 }
  0xec   : >> { %v543_v61 = vsel %vm10688_vm10, %v482_v45, -inf  ;;  %v540_v53 = vmax.f32 %v536_v63, %v539_v46  ;;  %vm10690_vm9 = vmmov %vm10660_vm0  ;;  %v601_v55 = vstv %s5546_s20  ;;  %vm5709_vm8 = vcmp.ge.s32.totalorder %v5166_v2, %v598_v0  ;;  %s5781_s20 = sld [smem:[#allocation7 + %s5673_s7]] }
  0xed   : >> { %v545_v45 = vsel %vm10690_vm9, %v484_v35, -inf  ;;  %vm10691_vm6 = vmmov %vm10660_vm0  ;;  %v542_v51 = vmax.f32 %v538_v50, %v541_v62  ;;  %vm5714_vm5 = vcmp.lt.s32.totalorder %v5163_v1, %v601_v55  ;;  %vm5723_vm7 = vcmp.lt.s32.totalorder %v5166_v2, %v601_v55 }
  0xee   : >> { %v547_v27 = vsel %vm10691_vm6, %v486_v44, -inf  ;;  %vm10692_vm1 = vmmov %vm10660_vm0  ;;  %v544_v48 = vmax.f32 %v540_v53, %v543_v61  ;;  %v555_v44 = vsel %vm10660_vm0, %v494_v59, -inf  ;;  %v635_v37 = vstv %s5581_s12  ;;  %s5784_s12 = sadd.s32 5, %s5276_s1 }
  0xef   : >> { %v549_v49 = vsel %vm10692_vm1, %v488_v36, -inf  ;;  %vm10696_vm4 = vmmov %vm10660_vm0  ;;  %v546_v41 = vmax.f32 %v542_v51, %v545_v45  ;;  %v638_v63 = vstv %s5619_s30  ;;  %v5747_v61 = vstv %s4209_s14  ;;  %s5795_s30 = sld [smem:[#allocation6 + %s5784_s12]] }
  0xf0   : >> { %v551_v39 = vsel %vm10696_vm4, %v490_v60, -inf  ;;  %vm10698_vm3 = vmmov %vm10660_vm0  ;;  %v548_v57 = vmax.f32 %v544_v48, %v547_v27  ;;  %vm636_vm1 = vcmp.ge.s32.totalorder %v5163_v1, %v635_v37  ;;  %vm5755_vm4 = vcmp.ge.s32.totalorder %v5166_v2, %v635_v37  ;;  %s5798_s14 = sld [smem:[#allocation7 + %s5784_s12]] }
  0xf1   : >> { %v553_v35 = vsel %vm10698_vm3, %v492_v56, -inf  ;;  %vm566_vm2 = vmand %vm5559_vm14, %vm5668_vm15  ;;  %v550_v60 = vmax.f32 %v546_v41, %v549_v49  ;;  %vm639_vm14 = vcmp.lt.s32.totalorder %v5163_v1, %v638_v63  ;;  %vm5776_vm15 = vcmp.lt.s32.totalorder %v5166_v2, %v638_v63 }
  0xf2   : >> { %vm604_vm10 = vmand %vm5703_vm11, %vm5714_vm5  ;;  %v552_v56 = vmax.f32 %v548_v57, %v551_v39  ;;  %v572_v62 = vsel %vm566_vm2, %v5660_v42, -3e+38  ;;  %v672_v52 = vstv %s5627_s2  ;;  %v675_v38 = vstv %s5638_s28  ;;  %p732_p8 = scmp.gt.s32.totalorder %s5781_s20, %s5719_s4  ;;  %s5871_s2 = sadd.s32 6, %s5276_s1 }
  0xf3   : >> { %vm567_vm9 = vmand %vm5596_vm13, %vm5692_vm12  ;;  %v554_v59 = vmax.f32 %v550_v60, %v553_v35  ;;  %v610_v53 = vsel %vm604_vm10, %v5660_v42, -3e+38  ;;  %v5802_v48 = vstv %s4210_s13  ;;  %vm5805_vm5 = vcmp.ge.s32.totalorder %v5163_v1, %v672_v52  ;;  %s4211_s13 = scalar_select %p5765_p12, 0, 1 }
  0xf4   : >> { %vm605_vm6 = vmand %vm5709_vm8, %vm5723_vm7  ;;  %v556_v50 = vmax.f32 %v552_v56, %v555_v44  ;;  %v709_v58 = vstv %s5719_s4  ;;  %s4212_s28 = scalar_select %p5819_p3, 0, 1 }
  0xf5   : >> { %vm641_vm3 = vmand %vm636_vm1, %vm639_vm14  ;;  %vm676_vm14 = vcmp.lt.s32.totalorder %v5163_v1, %v675_v38  ;;  %v5859_v60 = vstv %s4211_s13  ;;  %s5884_s21 = sld [smem:[#allocation6 + %s5871_s2]]  ;;  %p5895_p9 = pnand %p732_p8, %p5602_p7 }
  0xf6   : >> { %vm10715_vm2 = vmmov %vm10660_vm0  ;;  %v647_v49 = vsel %vm641_vm3, %v5660_v42, -3e+38  ;;  %v5800_v51 = vmax.f32 %v554_v59, %v556_v50  ;;  %vm5810_vm0 = vcmp.ge.s32.totalorder %v5166_v2, %v672_v52  ;;  %vm677_vm3 = vcmp.lt.s32.totalorder %v5166_v2, %v675_v38  ;;  %s5887_s8 = sld [smem:[#allocation7 + %s5871_s2]]  ;;  %p769_p11 = scmp.gt.s32.totalorder %s5798_s14, %s5795_s30 }
  0xf7   : >> { %v574_v27 = vsel %vm10715_vm2, %v572_v62, -inf  ;;  %vm642_vm11 = vmand %vm5755_vm4, %vm5776_vm15  ;;  %vm5866_vm4 = vcmp.ge.s32.totalorder %v5163_v1, %v709_v58  ;;  %vm589_vm15 = vcmp.eq.s32.totalorder %v5747_v61, 1  ;;  %v746_v52 = vstv %s5795_s30  ;;  %s4213_s4 = scalar_select %p5895_p9, 0, 1 }
  0xf8   : >> { %vm10721_vm10 = vmmov %vm10715_vm2  ;;  %v573_v54 = vsel %vm567_vm9, %v5800_v51, -3e+38  ;;  %v611_v55 = vsel %vm605_vm6, %v5800_v51, -3e+38  ;;  %v648_v41 = vsel %vm642_vm11, %v5800_v51, -3e+38  ;;  %v749_v38 = vstv %s5798_s14  ;;  %p5953_p6 = pnand %p769_p11, %p5602_p7 }
  0xf9   : >> { %v612_v35 = vsel %vm10721_vm10, %v610_v53, -inf  ;;  %vm10722_vm1 = vmmov %vm10715_vm2  ;;  %vm626_vm11 = vcmp.eq.s32.totalorder %v5802_v48, 1  ;;  %vm10487_vm10 = vcmp.eq.s32.totalorder %v5163_v1, 1  ;;  %s6102_s13 = sld [smem:[#allocation6 + %s5276_s1]] }
  0xfa   : >> { %v649_v40 = vsel %vm10722_vm1, %v647_v49, -inf  ;;  %vm678_vm2 = vmand %vm5805_vm5, %vm676_vm14  ;;  %vm5876_vm5 = vcmp.ge.s32.totalorder %v5166_v2, %v709_v58  ;;  %v712_v49 = vstv %s5781_s20  ;;  %s4214_s14 = scalar_select %p5953_p6, 0, 1 }
  0xfb   : >> { %vm10723_vm13 = vmmov %vm10722_vm1  ;;  %v684_v46 = vsel %vm678_vm2, %v5660_v42, -3e+38  ;;  %vm5904_vm14 = vcmp.lt.s32.totalorder %v5166_v2, %v712_v49  ;;  %s6304_s30 = sld [smem:[#allocation6 + %s5510_s19]] }
  0xfc   : >> { %v575_v47 = vsel %vm10723_vm13, %v573_v54, -inf  ;;  %vm10724_vm12 = vmmov %vm10722_vm1  ;;  %v5900_v54 = vstv %s4212_s28  ;;  %vm10486_vm13 = vcmp.eq.s32.totalorder %v5163_v1, 2  ;;  %p806_p2 = scmp.gt.s32.totalorder %s5887_s8, %s5884_s21  ;;  %s5962_s28 = sld [smem:[#allocation4 + %s5510_s19]] }
  0xfd   : >> { %v613_v57 = vsel %vm10724_vm12, %v611_v55, -inf  ;;  %vm10725_vm9 = vmmov %vm10722_vm1  ;;  %v576_v44 = vmax.f32 %v574_v27, %v575_v47 }
  0xfe   : >> { %v650_v29 = vsel %vm10725_vm9, %v648_v41, -inf  ;;  %vm679_vm8 = vmand %vm5810_vm0, %vm677_vm3  ;;  %v614_v36 = vmax.f32 %v612_v35, %v613_v57  ;;  %vm10488_vm0 = vcmp.eq.s32.totalorder %v5163_v1, 0  ;;  %vm5909_vm3 = vcmp.ge.s32.totalorder %v5163_v1, %v746_v52  ;;  %p5972_p0 = pnand %p806_p2, %p5602_p7 }
  0xff   : >> { %v651_v37 = vmax.f32 %v649_v40, %v650_v29  ;;  %v685_v63 = vsel %vm679_vm8, %v5800_v51, -3e+38  ;;  %vm10726_vm7 = vmmov %vm10722_vm1  ;;  %v577_v59 = vrot.slane %v576_v44, 4  ;;  %vm5924_vm9 = vcmp.ge.s32.totalorder %v5166_v2, %v746_v52 }
 0x100   : >> { %v686_v56 = vsel %vm10726_vm7, %v684_v46, -inf  ;;  %vm10727_vm6 = vmmov %vm10722_vm1  ;;  %v615_v50 = vrot.slane %v614_v36, 4  ;;  %vm713_vm1 = vcmp.lt.s32.totalorder %v5163_v1, %v712_v49  ;;  %vm750_vm8 = vcmp.lt.s32.totalorder %v5163_v1, %v749_v38  ;;  %s4215_s25 = scalar_select %p5972_p0, 0, 1 }
 0x101   : >> { %v687_v62 = vsel %vm10727_vm6, %v685_v63, -inf  ;;  %v652_v53 = vrot.slane %v651_v37, 4  ;;  %v578_v39 = vmax.f32 %v576_v44, %v577_v59  ;;  %vm715_vm2 = vmand %vm5866_vm4, %vm713_vm1  ;;  %vm5930_vm7 = vcmp.lt.s32.totalorder %v5166_v2, %v749_v38 }
 0x102   : >> { %v688_v45 = vmax.f32 %v686_v56, %v687_v62  ;;  %v616_v0 = vmax.f32 %v614_v36, %v615_v50  ;;  %vm716_vm12 = vmand %vm5876_vm5, %vm5904_vm14  ;;  %v721_v46 = vsel %vm715_vm2, %v5660_v42, -3e+38  ;;  %vm663_vm4 = vcmp.eq.s32.totalorder %v5859_v60, 1 }
 0x103   : >> { %v653_v35 = vmax.f32 %v651_v37, %v652_v53  ;;  %v579_v58 = vrot.slane %v578_v39, 2  ;;  %vm752_vm6 = vmand %vm5909_vm3, %vm750_vm8  ;;  %v722_v43 = vsel %vm716_vm12, %v5800_v51, -3e+38  ;;  %vm10741_vm5 = vcmask 130048  }
 0x104   : >> { %v689_v40 = vrot.slane %v688_v45, 4  ;;  %v617_v47 = vrot.slane %v616_v0, 2  ;;  %v723_v59 = vsel %vm10741_vm5, %v721_v46, -inf  ;;  %vm753_vm1 = vmand %vm5924_vm9, %vm5930_vm7  ;;  %v758_v50 = vsel %vm752_vm6, %v5660_v42, -3e+38 }
 0x105   : >> { %v654_v57 = vrot.slane %v653_v35, 2  ;;  %v580_v37 = vmax.f32 %v578_v39, %v579_v58  ;;  %vm700_vm14 = vcmp.eq.s32.totalorder %v5900_v54, 1  ;;  %vm10743_vm3 = vmmov %vm10741_vm5  ;;  %v759_v38 = vsel %vm753_vm1, %v5800_v51, -3e+38 }
 0x106   : >> { %v690_v29 = vmax.f32 %v688_v45, %v689_v40  ;;  %v618_v63 = vmax.f32 %v616_v0, %v617_v47  ;;  %v724_v52 = vsel %vm10743_vm3, %v722_v43, -inf  ;;  %vm10744_vm2 = vmmov %vm10743_vm3  ;;  %v783_v47 = vstv %s5884_s21  ;;  %s6016_s21 = sld [smem:[#allocation5 + %s5510_s19]] }
 0x107   : >> { %v655_v56 = vmax.f32 %v653_v35, %v654_v57  ;;  %v581_v53 = vrot.slane %v580_v37, 1  ;;  %v760_v39 = vsel %vm10744_vm2, %v758_v50, -inf  ;;  %v725_v41 = vmax.f32 %v723_v59, %v724_v52  ;;  %vm10745_vm12 = vmmov %vm10744_vm2 }
 0x108   : >> { %v691_v62 = vrot.slane %v690_v29, 2  ;;  %v619_v45 = vrot.slane %v618_v63, 1  ;;  %v761_v58 = vsel %vm10745_vm12, %v759_v38, -inf  ;;  %v786_v57 = vstv %s5887_s8  ;;  %vm10751_vm5 = vmmov %vm10744_vm2  ;;  %s817_s8 = smul.u32 56, %s4867_s0  ;;  %s376_s0 = sadd.s32 1, %s4867_s0  }
 0x109   : >> { %v656_v27 = vrot.slane %v655_v56, 1  ;;  %v582_v0 = vmax.f32 %v580_v37, %v581_v53  ;;  %vm5987_vm9 = vcmp.ge.s32.totalorder %v5163_v1, %v783_v47  ;;  %vm787_vm8 = vcmp.lt.s32.totalorder %v5163_v1, %v786_v57  ;;  %vm10752_vm3 = vmmov %vm10744_vm2 }
 0x10a   : >> { %v692_v49 = vmax.f32 %v690_v29, %v691_v62  ;;  %v620_v35 = vmax.f32 %v618_v63, %v619_v45  ;;  %v726_v63 = vrot.slane %v725_v41, 4  ;;  %v736_v43 = vstv %s4213_s4  ;;  %vm789_vm6 = vmand %vm5987_vm9, %vm787_vm8  ;;  %s6116_s4 = sld [smem:[#allocation7 + %s5276_s1]]  ;;  %s6172_s20 = scalar_lea.vmem [#allocation2], %s817_s8 }
 0x10b   : >> { %v657_v40 = vmax.f32 %v655_v56, %v656_v27  ;;  %v590_v29 = vsel %vm589_vm15, %v582_v0, 0.0  ;;  %v762_v56 = vmax.f32 %v760_v39, %v761_v58  ;;  %vm10485_vm15 = vcmp.eq.s32.totalorder %v5163_v1, 3  ;;  %s6395_s8 = sld [smem:[#allocation7 + %s5566_s11]] }
 0x10c   : >> { %v693_v55 = vrot.slane %v692_v49, 1  ;;  %v627_v46 = vsel %vm626_vm11, %v620_v35, 0.0  ;;  %v594_v37 = vsel %vm10488_vm0, %v590_v29, 0.0  ;;  %vm5995_vm11 = vcmp.ge.s32.totalorder %v5166_v2, %v783_v47  ;;  %p6349_p7 = scmp.gt.s32.totalorder %s6016_s21, %s5962_s28 }
 0x10d   : >> { %v664_v44 = vsel %vm663_vm4, %v657_v40, 0.0  ;;  %v631_v61 = vsel %vm10487_vm10, %v627_v46, %v594_v37  ;;  %v727_v60 = vmax.f32 %v725_v41, %v726_v63  ;;  %v763_v59 = vrot.slane %v762_v56, 4 }
 0x10e   : >> { %v694_v36 = vmax.f32 %v692_v49, %v693_v55  ;;  %vm788_vm7 = vcmp.lt.s32.totalorder %v5166_v2, %v786_v57  ;;  %v668_v50 = vsel %vm10486_vm13, %v664_v44, %v631_v61  ;;  %v773_v45 = vstv %s4214_s14  ;;  %s6307_s14 = sld [smem:[#allocation7 + %s5510_s19]] }
 0x10f   : >> { %vm790_vm4 = vmand %vm5995_vm11, %vm788_vm7  ;;  %v795_v27 = vsel %vm789_vm6, %v5660_v42, -3e+38  ;;  %v728_v49 = vrot.slane %v727_v60, 2  ;;  %v764_v52 = vmax.f32 %v762_v56, %v763_v59  ;;  %vm10489_vm1 = vcmp.eq.s32.totalorder %v5163_v1, 4 }
 0x110   : >> { %v701_v53 = vsel %vm700_vm14, %v694_v36, 0.0  ;;  %v796_v38 = vsel %vm790_vm4, %v5800_v51, -3e+38  ;;  %v797_v39 = vsel %vm10751_vm5, %v795_v27, -inf  ;;  %v6023_v54 = vstv %s5962_s28  ;;  %p1024_p1 = scmp.gt.s32.totalorder %s6116_s4, %s6102_s13  ;;  %s6373_s28 = sld [smem:[#allocation6 + %s5566_s11]] }
 0x111   : >> { %v798_v0 = vsel %vm10752_vm3, %v796_v38, -inf  ;;  %v729_v35 = vmax.f32 %v727_v60, %v728_v49  ;;  %v765_v40 = vrot.slane %v764_v52, 2  ;;  %v6025_v41 = vstv %s4215_s25  ;;  %s6708_s25 = sld [smem:[#allocation5 + %s5566_s11]] }
 0x112   : >> { %v799_v55 = vmax.f32 %v797_v39, %v798_v0  ;;  %v705_v42 = vsel %vm10485_vm15, %v701_v53, %v668_v50  ;;  %vm737_vm14 = vcmp.eq.s32.totalorder %v736_v43, 1  ;;  %vm774_vm2 = vcmp.eq.s32.totalorder %v773_v45, 1  ;;  %p6387_p4 = pnand %p1024_p1, %p6349_p7 }
 0x113   : >> { %vm10490_vm12 = vcmp.eq.s32.totalorder %v5163_v1, 5  ;;  %v730_v51 = vrot.slane %v729_v35, 1  ;;  %v766_v58 = vmax.f32 %v764_v52, %v765_v40  ;;  %vm823_vm9 = vcmp.le.s32.totalorder %v6023_v54, 0 }
 0x114   : >> { %v800_v47 = vrot.slane %v799_v55, 4  ;;  %vm824_vm8 = vcmp.le.s32.totalorder %v6023_v54, 1  ;;  %vm825_vm7 = vcmp.le.s32.totalorder %v6023_v54, 2  ;;  %vm826_vm6 = vcmp.le.s32.totalorder %v6023_v54, 3  ;;  %p1057_p5 = scmp.gt.s32.totalorder %s6307_s14, %s6304_s30 }
 0x115   : >> { %vm827_vm4 = vcmp.le.s32.totalorder %v6023_v54, 4  ;;  %v731_v57 = vmax.f32 %v729_v35, %v730_v51  ;;  %v767_v29 = vrot.slane %v766_v58, 1  ;;  %v6042_v44 = vstv %s6016_s21  ;;  %s4216_s16 = scalar_select %p6387_p4, 0, 1 }
 0x116   : >> { %v801_v46 = vmax.f32 %v799_v55, %v800_v47  ;;  %vm840_vm0 = vcmp.gt.s32.totalorder %v6042_v44, 0  ;;  %vm841_vm5 = vcmp.gt.s32.totalorder %v6042_v44, 1  ;;  %vm842_vm3 = vcmp.gt.s32.totalorder %v6042_v44, 2  ;;  %p6415_p10 = pnand %p1057_p5, %p6349_p7  ;;  %p1090_p13 = scmp.gt.s32.totalorder %s6395_s8, %s6373_s28 }
 0x117   : >> { %v738_v36 = vsel %vm737_vm14, %v731_v57, 0.0  ;;  %v768_v37 = vmax.f32 %v766_v58, %v767_v29  ;;  %vm843_vm15 = vcmp.gt.s32.totalorder %v6042_v44, 3  ;;  %vm6052_vm13 = vmand %vm823_vm9, %vm840_vm0  ;;  %vm844_vm14 = vcmp.gt.s32.totalorder %v6042_v44, 4  ;;  %s6534_s21 = sld [smem:[#allocation6 + %s5784_s12]] }
 0x118   : >> { %v802_v63 = vrot.slane %v801_v46, 2  ;;  %v742_v62 = vsel %vm10489_vm1, %v738_v36, %v705_v42  ;;  %vm6063_vm11 = vmand %vm824_vm8, %vm841_vm5  ;;  %vm845_vm1 = vcmp.gt.s32.totalorder %v6042_v44, 5  ;;  %vm846_vm0 = vcmp.gt.s32.totalorder %v6042_v44, 6  ;;  %p6522_p12 = pnand %p1090_p13, %p6349_p7 }
 0x119   : >> { %v775_v61 = vsel %vm774_vm2, %v768_v37, 0.0  ;;  %vm6073_vm2 = vmand %vm825_vm7, %vm842_vm3  ;;  %vm847_vm3 = vcmp.gt.s32.totalorder %v6042_v44, 7  ;;  %vm848_vm8 = vcmp.gt.s32.totalorder %v6042_v44, 8  ;;  %vm10763_vm7 = vcmp.le.s32.totalorder %v6023_v54, 5 }
 0x11a   : >> { %v803_v48 = vmax.f32 %v801_v46, %v802_v63  ;;  %vm6084_vm10 = vmand %vm826_vm6, %vm843_vm15  ;;  %v779_v53 = vsel %vm10490_vm12, %v775_v61, %v742_v62  ;;  %vm849_vm15 = vcmp.gt.s32.totalorder %v6042_v44, 9  ;;  %vm10766_vm6 = vcmp.le.s32.totalorder %v6023_v54, 6 }
 0x11b   : >> { %vm6097_vm5 = vmand %vm827_vm4, %vm844_vm14  ;;  %v904_v38 = vsel %vm6052_vm13, %v5169_v3, -3e+38  ;;  %v906_v40 = vsel %vm6063_vm11, %v5175_v5, -3e+38  ;;  %v908_v51 = vsel %vm6073_vm2, %v5181_v7, -3e+38  ;;  %v1003_v58 = vstv %s6116_s4 }
 0x11c   : >> { %v804_v59 = vrot.slane %v803_v48, 1  ;;  %vm6111_vm9 = vmand %vm10763_vm7, %vm845_vm1  ;;  %vm10769_vm1 = vcmp.eq.s32.totalorder %v6025_v41, 1  ;;  %vm10774_vm7 = vcmp.le.s32.totalorder %v6023_v54, 8  ;;  %v910_v47 = vsel %vm6084_vm10, %v5187_v9, -3e+38  ;;  %s6420_s4 = sld [smem:[#allocation6 + %s5622_s22]] }
 0x11d   : >> { %vm6124_vm12 = vmand %vm10766_vm6, %vm846_vm0  ;;  %vm10770_vm0 = vcmp.le.s32.totalorder %v6023_v54, 7  ;;  %v911_v29 = vsel %vm6084_vm10, %v5190_v10, -3e+38  ;;  %v912_v46 = vsel %vm6097_vm5, %v5193_v11, -3e+38  ;;  %vm10786_vm10 = vcmp.gt.s32.totalorder %v6042_v44, 11 }
 0x11e   : >> { %v805_v27 = vmax.f32 %v803_v48, %v804_v59  ;;  %vm6141_vm6 = vmand %vm10770_vm0, %vm847_vm3  ;;  %vm10777_vm3 = vcmask 130048   ;;  %v913_v63 = vsel %vm6097_vm5, %v5196_v12, -3e+38  ;;  %v914_v62 = vsel %vm6111_vm9, %v10583_v13, -3e+38 }
 0x11f   : >> { %vm6157_vm14 = vmand %vm10774_vm7, %vm848_vm8  ;;  %vm10778_vm7 = vcmp.le.s32.totalorder %v6023_v54, 9  ;;  %vm10783_vm8 = vcmp.le.s32.totalorder %v6023_v54, 10  ;;  %v915_v61 = vsel %vm6111_vm9, %v10587_v14, -3e+38  ;;  %v916_v59 = vsel %vm6124_vm12, %v10588_v15, -3e+38 }
 0x120   : >> { %v812_v0 = vsel %vm10769_vm1, %v805_v27, 0.0  ;;  %vm10773_vm1 = vcmp.eq.s32.totalorder %v5163_v1, 6  ;;  %vm6181_vm0 = vmand %vm10778_vm7, %vm849_vm15  ;;  %vm10787_vm15 = vcmp.le.s32.totalorder %v6023_v54, 11  ;;  %v917_v50 = vsel %vm6124_vm12, %v10589_v16, -3e+38 }
 0x121   : >> { %v816_v41 = vsel %vm10773_vm1, %v812_v0, %v779_v53  ;;  %vm10781_vm1 = vmmov %vm10777_vm3  ;;  %v918_v53 = vsel %vm6141_vm6, %v10590_v17, -3e+38  ;;  %vm10790_vm9 = vcmp.gt.s32.totalorder %v6042_v44, 12  ;;  %vm10791_vm5 = vcmp.le.s32.totalorder %v6023_v54, 12 }
 0x122   : >> { %819 = vst.msk [vmem:[%s6172_s20] sm:$0xff] %vm10777_vm3, %v816_v41  ;;  %v936_v36 = vsel %vm10781_vm1, %v904_v38, -inf  ;;  %vm10782_vm3 = vcmp.gt.s32.totalorder %v6042_v44, 10  ;;  %vm6230_vm7 = vmand %vm10791_vm5, %vm10790_vm9  ;;  %v919_v27 = vsel %vm6141_vm6, %v10591_v18, -3e+38  ;;  %v1000_v38 = vstv %s6102_s13  ;;  %p1123_p3 = scmp.gt.s32.totalorder %s6426_s18, %s6420_s4 }
 0x123   : >> { %vm6196_vm4 = vmand %vm10783_vm8, %vm10782_vm3  ;;  %v920_v49 = vsel %vm6157_vm14, %v10593_v19, -3e+38  ;;  %vm10794_vm12 = vcmp.gt.s32.totalorder %v6042_v44, 13  ;;  %vm10795_vm1 = vcmp.le.s32.totalorder %v6023_v54, 13  ;;  %v922_v35 = vsel %vm6181_vm0, %v10594_v21, -3e+38 }
 0x124   : >> { %vm6213_vm8 = vmand %vm10787_vm15, %vm10786_vm10  ;;  %v923_v41 = vsel %vm6181_vm0, %v10595_v22, -3e+38  ;;  %v924_v52 = vsel %vm6196_vm4, %v10596_v23, -3e+38  ;;  %vm10798_vm6 = vcmp.gt.s32.totalorder %v6042_v44, 14  ;;  %vm10799_vm10 = vcmp.le.s32.totalorder %v6023_v54, 14  ;;  %p6578_p8 = pnand %p1123_p3, %p6349_p7 }
 0x125   : >> { %vm6248_vm3 = vmand %vm10795_vm1, %vm10794_vm12  ;;  %v926_v57 = vsel %vm6213_vm8, %v10592_v25, -3e+38  ;;  %vm10802_vm0 = vcmask 130048   ;;  %vm10804_vm5 = vcmp.gt.s32.totalorder %v6042_v44, 15  ;;  %vm10805_vm12 = vcmp.le.s32.totalorder %v6023_v54, 15  ;;  %v10808_v19 = vld [vmem:[#allocation36_spill] sm:$0xff] }
 0x126   : >> { %vm6266_vm15 = vmand %vm10799_vm10, %vm10798_vm6  ;;  %v937_v23 = vsel %vm10802_vm0, %v906_v40, -inf  ;;  %v928_v25 = vsel %vm6230_vm7, %v10808_v19, -3e+38  ;;  %v929_v44 = vsel %vm6230_vm7, %v5244_v28, -3e+38  ;;  %v10810_v54 = vld [vmem:[#allocation37_spill] sm:$0xff]  ;;  %v1034_v21 = vstv %s6304_s30 }
 0x127   : >> { %vm10803_vm9 = vmmov %vm10802_vm0  ;;  %v944_v39 = vsel %vm10802_vm0, %v914_v62, -inf  ;;  %v971_v56 = vsel %vm10802_vm0, %v911_v29, -inf  ;;  %v10843_v0 = vsel %vm6196_vm4, %v5232_v24, -3e+38  ;;  %s4217_s30 = scalar_select %p6415_p10, 0, 1 }
 0x128   : >> { %v938_v22 = vsel %vm10803_vm9, %v908_v51, -inf  ;;  %vm6282_vm1 = vmand %vm10805_vm12, %vm10804_vm5  ;;  %v930_v51 = vsel %vm6248_vm3, %v10810_v54, -3e+38 }
 0x129   : >> { %v939_v40 = vmax.f32 %v936_v36, %v938_v22  ;;  %vm10809_vm6 = vmmov %vm10802_vm0  ;;  %v935_v55 = vsel %vm6282_vm1, %v5262_v34, -3e+38 }
 0x12a   : >> { %v940_v18 = vsel %vm10809_vm6, %v910_v47, -inf  ;;  %vm10811_vm10 = vmmov %vm10802_vm0  ;;  %v932_v47 = vsel %vm6266_vm15, %v5253_v31, -3e+38 }
 0x12b   : >> { %v941_v17 = vmax.f32 %v937_v23, %v940_v18  ;;  %v942_v16 = vsel %vm10811_vm10, %v912_v46, -inf  ;;  %vm10812_vm9 = vmmov %vm10802_vm0  ;;  %v934_v18 = vsel %vm6282_vm1, %v10585_v33, -3e+38 }
 0x12c   : >> { %v943_v15 = vmax.f32 %v939_v40, %v942_v16  ;;  %v946_v14 = vsel %vm10812_vm9, %v916_v59, -inf  ;;  %vm10813_vm5 = vmmov %vm10802_vm0  ;;  %v956_v59 = vsel %vm10802_vm0, %v926_v57, -inf  ;;  %vm6320_vm9 = vcmp.ge.s32.totalorder %v5163_v1, %v1000_v38 }
 0x12d   : >> { %v948_v22 = vsel %vm10813_vm5, %v918_v53, -inf  ;;  %v945_v23 = vmax.f32 %v941_v17, %v944_v39  ;;  %vm10814_vm12 = vmmov %vm10802_vm0  ;;  %vm6325_vm5 = vcmp.lt.s32.totalorder %v5163_v1, %v1003_v58  ;;  %v10825_v57 = vsel %vm6063_vm11, %v5178_v6, -3e+38 }
 0x12e   : >> { %v950_v16 = vsel %vm10814_vm12, %v920_v49, -inf  ;;  %v947_v46 = vmax.f32 %v943_v15, %v946_v14  ;;  %vm10815_vm6 = vmmov %vm10802_vm0  ;;  %v10823_v15 = vsel %vm6052_vm13, %v5172_v4, -3e+38 }
 0x12f   : >> { %v952_v36 = vsel %vm10815_vm6, %v922_v35, -inf  ;;  %vm10816_vm10 = vmmov %vm10802_vm0  ;;  %v949_v39 = vmax.f32 %v945_v23, %v948_v22 }
 0x130   : >> { %v954_v62 = vsel %vm10816_vm10, %v924_v52, -inf  ;;  %vm10821_vm12 = vmmov %vm10802_vm0  ;;  %v951_v35 = vmax.f32 %v947_v46, %v950_v16 }
 0x131   : >> { %v958_v49 = vsel %vm10821_vm12, %v928_v25, -inf  ;;  %vm10822_vm7 = vmmov %vm10802_vm0  ;;  %v10827_v25 = vsel %vm6073_vm2, %v5184_v8, -3e+38  ;;  %v953_v60 = vmax.f32 %v949_v39, %v952_v36 }
 0x132   : >> { %v960_v14 = vsel %vm10822_vm7, %v930_v51, -inf  ;;  %vm10824_vm6 = vmmov %vm10802_vm0  ;;  %v955_v46 = vmax.f32 %v951_v35, %v954_v62 }
 0x133   : >> { %v967_v52 = vsel %vm10824_vm6, %v10823_v15, -inf  ;;  %vm10826_vm10 = vmmov %vm10802_vm0  ;;  %vm6360_vm6 = vcmp.ge.s32.totalorder %v5166_v2, %v1000_v38 }
 0x134   : >> { %v968_v40 = vsel %vm10826_vm10, %v10825_v57, -inf  ;;  %vm10828_vm7 = vmmov %vm10802_vm0  ;;  %vm6365_vm10 = vcmp.lt.s32.totalorder %v5166_v2, %v1003_v58  ;;  %v10839_v58 = vsel %vm6157_vm14, %v5220_v20, -3e+38 }
 0x135   : >> { %v969_v51 = vsel %vm10828_vm7, %v10827_v25, -inf  ;;  %v972_v23 = vmax.f32 %v968_v40, %v971_v56  ;;  %vm10830_vm13 = vmmov %vm10802_vm0 }
 0x136   : >> { %v970_v22 = vmax.f32 %v967_v52, %v969_v51  ;;  %v973_v16 = vsel %vm10830_vm13, %v913_v63, -inf  ;;  %vm10831_vm11 = vmmov %vm10802_vm0  ;;  %v957_v63 = vmax.f32 %v953_v60, %v956_v59  ;;  %v1037_v60 = vstv %s6307_s14  ;;  %s7024_s14 = sld [smem:[#allocation7 + %s5510_s19]] }
 0x137   : >> { %v975_v43 = vsel %vm10831_vm11, %v915_v61, -inf  ;;  %vm10832_vm2 = vmmov %vm10802_vm0 }
 0x138   : >> { %v977_v15 = vsel %vm10832_vm2, %v917_v50, -inf  ;;  %vm10833_vm12 = vmmov %vm10802_vm0  ;;  %v974_v61 = vmax.f32 %v970_v22, %v973_v16  ;;  %v976_v39 = vmax.f32 %v972_v23, %v975_v43  ;;  %v959_v50 = vmax.f32 %v955_v46, %v958_v49 }
 0x139   : >> { %v979_v29 = vsel %vm10833_vm12, %v919_v27, -inf  ;;  %vm10838_vm7 = vmmov %vm10802_vm0  ;;  %v964_v27 = vsel %vm10802_vm0, %v934_v18, -inf  ;;  %v961_v18 = vmax.f32 %v957_v63, %v960_v14  ;;  %v10845_v14 = vsel %vm6213_vm8, %v10586_v26, -3e+38 }
 0x13a   : >> { %v962_v62 = vsel %vm10838_vm7, %v932_v47, -inf  ;;  %vm10840_vm13 = vmmov %vm10802_vm0  ;;  %v931_v47 = vsel %vm6248_vm3, %v10584_v30, -3e+38  ;;  %v978_v42 = vmax.f32 %v974_v61, %v977_v15  ;;  %v980_v49 = vmax.f32 %v976_v39, %v979_v29 }
 0x13b   : >> { %v981_v38 = vsel %vm10840_vm13, %v10839_v58, -inf  ;;  %vm10841_vm11 = vmmov %vm10802_vm0  ;;  %v963_v52 = vmax.f32 %v959_v50, %v962_v62  ;;  %v965_v37 = vmax.f32 %v961_v18, %v964_v27  ;;  %vm1035_vm2 = vcmp.ge.s32.totalorder %v5163_v1, %v1034_v21 }
 0x13c   : >> { %v983_v59 = vsel %vm10841_vm11, %v923_v41, -inf  ;;  %v933_v41 = vsel %vm6266_vm15, %v5256_v32, -3e+38  ;;  %vm10844_vm14 = vmmov %vm10802_vm0  ;;  %v982_v25 = vmax.f32 %v978_v42, %v981_v38  ;;  %vm1038_vm13 = vcmp.lt.s32.totalorder %v5163_v1, %v1037_v60 }
 0x13d   : >> { %v985_v35 = vsel %vm10844_vm14, %v10843_v0, -inf  ;;  %vm10846_vm3 = vmmov %vm10802_vm0  ;;  %v984_v51 = vmax.f32 %v980_v49, %v983_v59  ;;  %v6441_v22 = vmax.f32 %v963_v52, %v965_v37  ;;  %v1067_v15 = vstv %s6373_s28  ;;  %s6559_s28 = sld [smem:[#allocation7 + %s5784_s12]] }
 0x13e   : >> { %v987_v40 = vsel %vm10846_vm3, %v10845_v14, -inf  ;;  %vm10849_vm8 = vmmov %vm10802_vm0  ;;  %v986_v23 = vmax.f32 %v982_v25, %v985_v35  ;;  %v6465_v63 = vstv %s4216_s16  ;;  %vm6469_vm11 = vcmp.ge.s32.totalorder %v5163_v1, %v1067_v15  ;;  %s6499_s16 = sld [smem:[#allocation7 + %s5673_s7]] }
 0x13f   : >> { %v989_v48 = vsel %vm10849_vm8, %v929_v44, -inf  ;;  %vm10850_vm15 = vmmov %vm10802_vm0  ;;  %v988_v16 = vmax.f32 %v984_v51, %v987_v40  ;;  %vm6480_vm3 = vcmp.ge.s32.totalorder %v5166_v2, %v1067_v15  ;;  %v1070_v58 = vstv %s6395_s8  ;;  %s4218_s8 = scalar_select %p6522_p12, 0, 1 }
 0x140   : >> { %v991_v56 = vsel %vm10850_vm15, %v931_v47, -inf  ;;  %vm1006_vm1 = vmand %vm6320_vm9, %vm6325_vm5  ;;  %v990_v53 = vmax.f32 %v986_v23, %v989_v48  ;;  %vm6459_vm9 = vcmp.lt.s32.totalorder %v5166_v2, %v1037_v60  ;;  %v6489_v38 = vstv %s4217_s30  ;;  %s4219_s30 = scalar_select %p6578_p8, 0, 1 }
 0x141   : >> { %vm10851_vm12 = vmmov %vm10802_vm0  ;;  %v992_v17 = vmax.f32 %v988_v16, %v991_v56  ;;  %v1012_v29 = vsel %vm1006_vm1, %v6441_v22, -3e+38  ;;  %vm1071_vm8 = vcmp.lt.s32.totalorder %v5163_v1, %v1070_v58  ;;  %vm6493_vm15 = vcmp.lt.s32.totalorder %v5166_v2, %v1070_v58 }
 0x142   : >> { %v993_v45 = vsel %vm10851_vm12, %v933_v41, -inf  ;;  %vm10852_vm7 = vmmov %vm10802_vm0  ;;  %vm6451_vm0 = vcmp.ge.s32.totalorder %v5166_v2, %v1034_v21  ;;  %v1100_v47 = vstv %s6420_s4  ;;  %v1103_v35 = vstv %s6426_s18  ;;  %s6593_s18 = sld [smem:[#allocation6 + %s5871_s2]] }
 0x143   : >> { %v995_v44 = vsel %vm10852_vm7, %v935_v55, -inf  ;;  %vm1040_vm5 = vmand %vm1035_vm2, %vm1038_vm13  ;;  %v994_v39 = vmax.f32 %v990_v53, %v993_v45  ;;  %v1133_v14 = vstv %s6429_s24  ;;  %s6596_s4 = sld [smem:[#allocation7 + %s5871_s2]]  ;;  %v1166_v58 = vstv %s6534_s21  ;;  %p1189_p11 = scmp.gt.s32.totalorder %s6559_s28, %s6534_s21 }
 0x144   : >> { %v1046_v62 = vsel %vm1040_vm5, %v6441_v22, -3e+38  ;;  %v996_v50 = vmax.f32 %v992_v17, %v995_v44  ;;  %vm1007_vm14 = vmand %vm6360_vm6, %vm6365_vm10  ;;  %vm6527_vm5 = vcmp.ge.s32.totalorder %v5166_v2, %v1100_v47  ;;  %v1136_v15 = vstv %s6499_s16  ;;  %p1156_p9 = scmp.gt.s32.totalorder %s6499_s16, %s6429_s24  ;;  %s6666_s16 = sld [smem:[#allocation4 + %s5566_s11]] }
 0x145   : >> { %vm1041_vm4 = vmand %vm6451_vm0, %vm6459_vm9  ;;  %vm1105_vm0 = vcmp.lt.s32.totalorder %v5166_v2, %v1103_v35  ;;  %p6661_p0 = pnand %p1189_p11, %p6349_p7  ;;  %s7314_s21 = sld [smem:[#allocation7 + %s5871_s2]] }
 0x146   : >> { %v6501_v18 = vmax.f32 %v994_v39, %v996_v50  ;;  %vm10863_vm1 = vmmov %vm10852_vm7  ;;  %vm6508_vm7 = vcmp.ge.s32.totalorder %v5163_v1, %v1100_v47  ;;  %v1094_v50 = vstv %s4218_s8  ;;  %p6636_p2 = pnand %p1156_p9, %p6349_p7  ;;  %s7410_s24 = sld [smem:[#allocation5 + %s5622_s22]] }
 0x147   : >> { %v1014_v42 = vsel %vm10863_vm1, %v1012_v29, -inf  ;;  %vm10864_vm2 = vmmov %vm10863_vm1 }
 0x148   : >> { %v1048_v49 = vsel %vm10864_vm2, %v1046_v62, -inf  ;;  %vm1073_vm12 = vmand %vm6469_vm11, %vm1071_vm8  ;;  %v1013_v40 = vsel %vm1007_vm14, %v6501_v18, -3e+38  ;;  %v1047_v55 = vsel %vm1041_vm4, %v6501_v18, -3e+38  ;;  %vm1104_vm11 = vcmp.lt.s32.totalorder %v5163_v1, %v1103_v35 }
 0x149   : >> { %vm1074_vm13 = vmand %vm6480_vm3, %vm6493_vm15  ;;  %v1079_v52 = vsel %vm1073_vm12, %v6441_v22, -3e+38  ;;  %vm6568_vm14 = vcmp.ge.s32.totalorder %v5163_v1, %v1133_v14  ;;  %vm1029_vm4 = vcmp.eq.s32.totalorder %v6465_v63, 1  ;;  %v1169_v35 = vstv %s6559_s28  ;;  %p1222_p6 = scmp.gt.s32.totalorder %s6596_s4, %s6593_s18 }
 0x14a   : >> { %v1080_v37 = vsel %vm1074_vm13, %v6501_v18, -3e+38  ;;  %vm10870_vm3 = vmmov %vm10863_vm1  ;;  %vm1137_vm13 = vcmp.lt.s32.totalorder %v5163_v1, %v1136_v15  ;;  %s4220_s8 = scalar_select %p6636_p2, 0, 1  ;;  %v1202_v0 = vstv %s6596_s4 }
 0x14b   : >> { %v1015_v25 = vsel %vm10870_vm3, %v1013_v40, -inf  ;;  %vm10871_vm8 = vmmov %vm10863_vm1  ;;  %p6682_p1 = pnand %p1222_p6, %p6349_p7  ;;  %s6819_s4 = sld [smem:[#allocation7 + %s5276_s1]] }
 0x14c   : >> { %v1049_v57 = vsel %vm10871_vm8, %v1047_v55, -inf  ;;  %vm10872_vm15 = vmmov %vm10863_vm1  ;;  %v1016_v48 = vmax.f32 %v1014_v42, %v1015_v25  ;;  %vm6617_vm8 = vcmp.ge.s32.totalorder %v5163_v1, %v1166_v58  ;;  %s4221_s28 = scalar_select %p6661_p0, 0, 1 }
 0x14d   : >> { %v1081_v36 = vsel %vm10872_vm15, %v1079_v52, -inf  ;;  %vm10873_vm6 = vmmov %vm10863_vm1  ;;  %v1050_v56 = vmax.f32 %v1048_v49, %v1049_v57  ;;  %vm1062_vm1 = vcmp.eq.s32.totalorder %v6489_v38, 1  ;;  %vm6622_vm15 = vcmp.ge.s32.totalorder %v5166_v2, %v1166_v58  ;;  %s4222_s13 = scalar_select %p6682_p1, 0, 1 }
 0x14e   : >> { %v1082_v51 = vsel %vm10873_vm6, %v1080_v37, -inf  ;;  %vm1106_vm10 = vmand %vm6508_vm7, %vm1104_vm11  ;;  %v1017_v16 = vrot.slane %v1016_v48, 4  ;;  %vm6587_vm7 = vcmp.ge.s32.totalorder %v5166_v2, %v1133_v14  ;;  %p7056_p7 = scmp.gt.s32.totalorder %s6708_s25, %s6666_s16 }
 0x14f   : >> { %v1083_v21 = vmax.f32 %v1081_v36, %v1082_v51  ;;  %vm1107_vm9 = vmand %vm6527_vm5, %vm1105_vm0  ;;  %v1112_v60 = vsel %vm1106_vm10, %v6441_v22, -3e+38  ;;  %v1051_v45 = vrot.slane %v1050_v56, 4  ;;  %vm6600_vm5 = vcmp.lt.s32.totalorder %v5166_v2, %v1136_v15 }
 0x150   : >> { %v1113_v46 = vsel %vm1107_vm9, %v6501_v18, -3e+38  ;;  %v1114_v53 = vsel %vm10864_vm2, %v1112_v60, -inf  ;;  %vm10877_vm12 = vmmov %vm10864_vm2  ;;  %v1018_v29 = vmax.f32 %v1016_v48, %v1017_v16  ;;  %vm1170_vm10 = vcmp.lt.s32.totalorder %v5163_v1, %v1169_v35 }
 0x151   : >> { %v1084_v44 = vrot.slane %v1083_v21, 4  ;;  %v1115_v17 = vsel %vm10877_vm12, %v1113_v46, -inf  ;;  %v1052_v62 = vmax.f32 %v1050_v56, %v1051_v45  ;;  %vm1139_vm11 = vmand %vm6568_vm14, %vm1137_vm13  ;;  %vm6642_vm0 = vcmp.lt.s32.totalorder %v5166_v2, %v1169_v35 }
 0x152   : >> { %v1116_v39 = vmax.f32 %v1114_v53, %v1115_v17  ;;  %v1019_v59 = vrot.slane %v1018_v29, 2  ;;  %vm1140_vm3 = vmand %vm6587_vm7, %vm6600_vm5  ;;  %v1145_v41 = vsel %vm1139_vm11, %v6441_v22, -3e+38  ;;  %vm1095_vm14 = vcmp.eq.s32.totalorder %v1094_v50, 1 }
 0x153   : >> { %v1085_v61 = vmax.f32 %v1083_v21, %v1084_v44  ;;  %v1053_v47 = vrot.slane %v1052_v62, 2  ;;  %v1146_v25 = vsel %vm1140_vm3, %v6501_v18, -3e+38  ;;  %vm10886_vm6 = vmmov %vm10864_vm2  ;;  %v1127_v60 = vstv %s4219_s30  ;;  %s7021_s30 = sld [smem:[#allocation6 + %s5510_s19]] }
 0x154   : >> { %v1117_v49 = vrot.slane %v1116_v39, 4  ;;  %v1020_v14 = vmax.f32 %v1018_v29, %v1019_v59  ;;  %v1147_v57 = vsel %vm10886_vm6, %v1145_v41, -inf  ;;  %vm1172_vm9 = vmand %vm6617_vm8, %vm1170_vm10  ;;  %v1148_v23 = vsel %vm10864_vm2, %v1146_v25, -inf }
 0x155   : >> { %v1086_v42 = vrot.slane %v1085_v61, 2  ;;  %v1054_v40 = vmax.f32 %v1052_v62, %v1053_v47  ;;  %vm1173_vm12 = vmand %vm6622_vm15, %vm6642_vm0  ;;  %v1178_v16 = vsel %vm1172_vm9, %v6441_v22, -3e+38  ;;  %v1149_v17 = vmax.f32 %v1147_v57, %v1148_v23 }
 0x156   : >> { %v1118_v37 = vmax.f32 %v1116_v39, %v1117_v49  ;;  %v1021_v51 = vrot.slane %v1020_v14, 1  ;;  %v1179_v43 = vsel %vm1173_vm12, %v6501_v18, -3e+38  ;;  %vm10891_vm7 = vmmov %vm10864_vm2  ;;  %v1199_v29 = vstv %s6593_s18  ;;  %s6802_s18 = sld [smem:[#allocation6 + %s5276_s1]] }
 0x157   : >> { %v1087_v55 = vmax.f32 %v1085_v61, %v1086_v42  ;;  %v1055_v48 = vrot.slane %v1054_v40, 1  ;;  %v1180_v15 = vsel %vm10891_vm7, %v1178_v16, -inf  ;;  %vm10893_vm13 = vcmp.eq.s32.totalorder %v5163_v1, 0  ;;  %vm10894_vm11 = vmmov %vm10864_vm2 }
 0x158   : >> { %v1119_v21 = vrot.slane %v1118_v37, 2  ;;  %v1022_v45 = vmax.f32 %v1020_v14, %v1021_v51  ;;  %vm1128_vm5 = vcmp.eq.s32.totalorder %v1127_v60, 1  ;;  %v1150_v58 = vrot.slane %v1149_v17, 4  ;;  %vm10901_vm9 = vmmov %vm10864_vm2 }
 0x159   : >> { %v1088_v56 = vrot.slane %v1087_v55, 1  ;;  %v1056_v44 = vmax.f32 %v1054_v40, %v1055_v48  ;;  %v1181_v63 = vsel %vm10894_vm11, %v1179_v43, -inf  ;;  %vm6700_vm3 = vcmp.ge.s32.totalorder %v5166_v2, %v1199_v29  ;;  %vm10902_vm12 = vmmov %vm10891_vm7  ;;  %p1470_p4 = scmp.gt.s32.totalorder %s7024_s14, %s7021_s30 }
 0x15a   : >> { %v1120_v53 = vmax.f32 %v1118_v37, %v1119_v21  ;;  %v1030_v62 = vsel %vm1029_vm4, %v1022_v45, 0.0  ;;  %v1182_v47 = vmax.f32 %v1180_v15, %v1181_v63  ;;  %vm6693_vm4 = vcmp.ge.s32.totalorder %v5163_v1, %v1199_v29 }
 0x15b   : >> { %v1089_v46 = vmax.f32 %v1087_v55, %v1088_v56  ;;  %v1063_v61 = vsel %vm1062_vm1, %v1056_v44, 0.0  ;;  %v1031_v27 = vsel %vm10893_vm13, %v1030_v62, 0.0  ;;  %vm10897_vm1 = vcmp.eq.s32.totalorder %v5163_v1, 1  ;;  %p7142_p13 = pnand %p1470_p4, %p7056_p7 }
 0x15c   : >> { %v1121_v39 = vrot.slane %v1120_v53, 1  ;;  %v1064_v49 = vsel %vm10897_vm1, %v1063_v61, %v1031_v27  ;;  %v1151_v41 = vmax.f32 %v1149_v17, %v1150_v58  ;;  %v1183_v50 = vrot.slane %v1182_v47, 4  ;;  %p1437_p5 = scmp.gt.s32.totalorder %s6819_s4, %s6802_s18 }
 0x15d   : >> { %v1096_v38 = vsel %vm1095_vm14, %v1089_v46, 0.0  ;;  %vm1203_vm8 = vcmp.lt.s32.totalorder %v5163_v1, %v1202_v0  ;;  %vm1204_vm15 = vcmp.lt.s32.totalorder %v5166_v2, %v1202_v0  ;;  %v1160_v14 = vstv %s4220_s8  ;;  %s7089_s8 = sld [smem:[#allocation7 + %s5566_s11]] }
 0x15e   : >> { %v1122_v59 = vmax.f32 %v1120_v53, %v1121_v39  ;;  %v1152_v35 = vrot.slane %v1151_v41, 2  ;;  %v1193_v40 = vstv %s4221_s28  ;;  %vm1205_vm6 = vmand %vm6693_vm4, %vm1203_vm8  ;;  %vm10900_vm10 = vcmp.eq.s32.totalorder %v5163_v1, 2  ;;  %p7099_p10 = pnand %p1437_p5, %p7056_p7  ;;  %s7113_s28 = sld [smem:[#allocation6 + %s5622_s22]] }
 0x15f   : >> { %v1097_v55 = vsel %vm10900_vm10, %v1096_v38, %v1064_v49  ;;  %v1184_v25 = vmax.f32 %v1182_v47, %v1183_v50  ;;  %vm1206_vm0 = vmand %vm6700_vm3, %vm1204_vm15  ;;  %v1211_v57 = vsel %vm1205_vm6, %v6441_v22, -3e+38  ;;  %v6723_v56 = vstv %s6666_s16  ;;  %s7071_s16 = sld [smem:[#allocation6 + %s5566_s11]] }
 0x160   : >> { %v1129_v37 = vsel %vm1128_vm5, %v1122_v59, 0.0  ;;  %v1153_v36 = vmax.f32 %v1151_v41, %v1152_v35  ;;  %v1212_v51 = vsel %vm1206_vm0, %v6501_v18, -3e+38  ;;  %v1213_v48 = vsel %vm10901_vm9, %v1211_v57, -inf }
 0x161   : >> { %vm1161_vm14 = vcmp.eq.s32.totalorder %v1160_v14, 1  ;;  %v1185_v21 = vrot.slane %v1184_v25, 2  ;;  %vm1194_vm2 = vcmp.eq.s32.totalorder %v1193_v40, 1  ;;  %v1214_v23 = vsel %vm10902_vm12, %v1212_v51, -inf }
 0x162   : >> { %vm10903_vm7 = vcmp.eq.s32.totalorder %v5163_v1, 3  ;;  %v1154_v16 = vrot.slane %v1153_v36, 1  ;;  %v1215_v45 = vmax.f32 %v1213_v48, %v1214_v23  ;;  %v6728_v44 = vstv %s4222_s13 }
 0x163   : >> { %v1130_v60 = vsel %vm10903_vm7, %v1129_v37, %v1097_v55  ;;  %v1186_v22 = vmax.f32 %v1184_v25, %v1185_v21  ;;  %vm1236_vm13 = vcmp.le.s32.totalorder %v6723_v56, 0  ;;  %vm1237_vm5 = vcmp.le.s32.totalorder %v6723_v56, 1  ;;  %v10958_v25 = vld [vmem:[#allocation33_spill] sm:$0xff] }
 0x164   : >> { %vm1238_vm11 = vcmp.le.s32.totalorder %v6723_v56, 2  ;;  %v1155_v18 = vmax.f32 %v1153_v36, %v1154_v16  ;;  %v1216_v46 = vrot.slane %v1215_v45, 4  ;;  %vm1239_vm4 = vcmp.le.s32.totalorder %v6723_v56, 3 }
 0x165   : >> { %vm1240_vm1 = vcmp.le.s32.totalorder %v6723_v56, 4  ;;  %v1187_v53 = vrot.slane %v1186_v22, 1  ;;  %vm1241_vm8 = vcmp.le.s32.totalorder %v6723_v56, 5  ;;  %v6742_v15 = vstv %s6708_s25  ;;  %s7116_s25 = sld [smem:[#allocation7 + %s5622_s22]]  ;;  %p1503_p12 = scmp.gt.s32.totalorder %s7089_s8, %s7071_s16 }
 0x166   : >> { %v1162_v17 = vsel %vm1161_vm14, %v1155_v18, 0.0  ;;  %v1217_v43 = vmax.f32 %v1215_v45, %v1216_v46  ;;  %vm1253_vm9 = vcmp.gt.s32.totalorder %v6742_v15, 0  ;;  %vm1254_vm12 = vcmp.gt.s32.totalorder %v6742_v15, 1  ;;  %v10939_v46 = vld [vmem:[#allocation26_spill] sm:$0xff] }
 0x167   : >> { %v1188_v29 = vmax.f32 %v1186_v22, %v1187_v53  ;;  %vm10904_vm7 = vcmp.eq.s32.totalorder %v5163_v1, 4  ;;  %vm1255_vm3 = vcmp.gt.s32.totalorder %v6742_v15, 2  ;;  %vm1256_vm14 = vcmp.gt.s32.totalorder %v6742_v15, 3  ;;  %vm6753_vm10 = vmand %vm1236_vm13, %vm1253_vm9  ;;  %p7234_p3 = pnand %p1503_p12, %p7056_p7 }
 0x168   : >> { %v1163_v62 = vsel %vm10904_vm7, %v1162_v17, %v1130_v60  ;;  %v1218_v61 = vrot.slane %v1217_v43, 2  ;;  %vm1257_vm15 = vcmp.gt.s32.totalorder %v6742_v15, 4  ;;  %vm6763_vm7 = vmand %vm1237_vm5, %vm1254_vm12  ;;  %vm10911_vm6 = vcmp.eq.s32.totalorder %v5163_v1, 5  ;;  %v10940_v17 = vld [vmem:[#allocation27_spill] sm:$0xff] }
 0x169   : >> { %v1195_v27 = vsel %vm1194_vm2, %v1188_v29, 0.0  ;;  %vm1258_vm2 = vcmp.gt.s32.totalorder %v6742_v15, 5  ;;  %vm6772_vm0 = vmand %vm1238_vm11, %vm1255_vm3  ;;  %vm1259_vm12 = vcmp.gt.s32.totalorder %v6742_v15, 6  ;;  %vm1261_vm3 = vcmp.gt.s32.totalorder %v6742_v15, 8  ;;  %s4226_s13 = scalar_select %p7234_p3, 0, 1 }
 0x16a   : >> { %v1219_v63 = vmax.f32 %v1217_v43, %v1218_v61  ;;  %v1196_v59 = vsel %vm10911_vm6, %v1195_v27, %v1163_v62  ;;  %vm6785_vm9 = vmand %vm1239_vm4, %vm1256_vm14  ;;  %vm1262_vm6 = vcmp.gt.s32.totalorder %v6742_v15, 9  ;;  %vm1264_vm4 = vcmp.gt.s32.totalorder %v6742_v15, 11  ;;  %v10945_v61 = vld [vmem:[#allocation28_spill] sm:$0xff] }
 0x16b   : >> { %vm6797_vm13 = vmand %vm1240_vm1, %vm1257_vm15  ;;  %v1317_v52 = vsel %vm6753_vm10, %v5169_v3, -3e+38  ;;  %vm10918_vm1 = vcmp.le.s32.totalorder %v6723_v56, 6  ;;  %v1319_v14 = vsel %vm6763_vm7, %v5175_v5, -3e+38  ;;  %v10927_v51 = vmov 0  ;;  %p1536_p8 = scmp.gt.s32.totalorder %s7116_s25, %s7113_s28 }
 0x16c   : >> { %v1220_v42 = vrot.slane %v1219_v63, 1  ;;  %vm6811_vm5 = vmand %vm1241_vm8, %vm1258_vm2  ;;  %vm10921_vm8 = vcmp.gt.s32.totalorder %v6742_v15, 7  ;;  %vm10922_vm2 = vcmp.le.s32.totalorder %v6723_v56, 7  ;;  %v1321_v37 = vsel %vm6772_vm0, %v5181_v7, -3e+38 }
 0x16d   : >> { %vm6825_vm15 = vmand %vm10918_vm1, %vm1259_vm12  ;;  %v1323_v57 = vsel %vm6785_vm9, %v5187_v9, -3e+38  ;;  %vm10925_vm1 = vcmp.eq.s32.totalorder %v6728_v44, 1  ;;  %v1325_v21 = vsel %vm6797_vm13, %v5193_v11, -3e+38  ;;  %v10931_v60 = vmov 0  ;;  %p7298_p9 = pnand %p1536_p8, %p7056_p7 }
 0x16e   : >> { %v1221_v0 = vmax.f32 %v1219_v63, %v1220_v42  ;;  %vm6842_vm12 = vmand %vm10922_vm2, %vm10921_vm8  ;;  %vm10926_vm2 = vcmp.le.s32.totalorder %v6723_v56, 8  ;;  %vm10930_vm8 = vcmp.le.s32.totalorder %v6723_v56, 9  ;;  %v1326_v16 = vsel %vm6797_vm13, %v5196_v12, -3e+38  ;;  %v10933_v44 = vld [vmem:[#allocation25_spill] sm:$0xff]  ;;  %v10947_v42 = vld [vmem:[#allocation30_spill] sm:$0xff] }
 0x16f   : >> { %vm6862_vm11 = vmand %vm10926_vm2, %vm1261_vm3  ;;  %v1327_v45 = vsel %vm6811_vm5, %v10583_v13, -3e+38  ;;  %v1328_v22 = vsel %vm6811_vm5, %v10933_v44, -3e+38  ;;  %vm10934_vm3 = vcmask 130048   ;;  %vm10936_vm2 = vcmp.le.s32.totalorder %v6723_v56, 10 }
 0x170   : >> { %v1228_v36 = vsel %vm10925_vm1, %v1221_v0, 0.0  ;;  %v10928_v51 = vsel %vm6862_vm11, 4294967295, %v10927_v51  ;;  %vm10929_vm1 = vcmp.eq.s32.totalorder %v5163_v1, 6  ;;  %vm6878_vm14 = vmand %vm10930_vm8, %vm1262_vm6  ;;  %vm10935_vm8 = vcmp.gt.s32.totalorder %v6742_v15, 10  ;;  %v10946_v63 = vld [vmem:[#allocation29_spill] sm:$0xff]  ;;  %v10952_v0 = vld [vmem:[#allocation31_spill] sm:$0xff] }
 0x171   : >> { %v1229_v23 = vsel %vm10929_vm1, %v1228_v36, %v1196_v59  ;;  %v10932_v60 = vsel %vm6878_vm14, 4294967295, %v10931_v60  ;;  %vm6898_vm1 = vmand %vm10936_vm2, %vm10935_vm8  ;;  %v1329_v53 = vsel %vm6825_vm15, %v10939_v46, -3e+38  ;;  %vm10942_vm5 = vcmp.le.s32.totalorder %v6723_v56, 11  ;;  %v10953_v36 = vld [vmem:[#allocation32_spill] sm:$0xff] }
 0x172   : >> { %4223 = vst.msk [vmem:[%s6172_s20 + $0x8] sm:$0xff] %vm10934_vm3, %v1229_v23  ;;  %vm10941_vm13 = vmmov %vm10934_vm3  ;;  %v1331_v27 = vsel %vm6842_vm12, %v10945_v61, -3e+38  ;;  %v1332_v59 = vsel %vm6842_vm12, %v10946_v63, -3e+38  ;;  %vm10948_vm8 = vcmp.gt.s32.totalorder %v6742_v15, 12  ;;  %v1413_v43 = vstv %s6802_s18 }
 0x173   : >> { %v1349_v29 = vsel %vm10941_vm13, %v1317_v52, -inf  ;;  %vm6913_vm3 = vmand %vm10942_vm5, %vm1264_vm4  ;;  %v1333_v49 = vsel %vm6862_vm11, %v10947_v42, -3e+38  ;;  %vm10949_vm2 = vcmp.le.s32.totalorder %v6723_v56, 12  ;;  %v1335_v55 = vsel %vm6878_vm14, %v10952_v0, -3e+38 }
 0x174   : >> { %vm6930_vm4 = vmand %vm10949_vm2, %vm10948_vm8  ;;  %vm10954_vm12 = vcmp.gt.s32.totalorder %v6742_v15, 13  ;;  %vm10955_vm13 = vcmp.le.s32.totalorder %v6723_v56, 13  ;;  %v1337_v52 = vsel %vm6898_vm1, %v10958_v25, -3e+38  ;;  %vm10959_vm8 = vcmask 130048   ;;  %v10965_v63 = vld [vmem:[#allocation34_spill] sm:$0xff] }
 0x175   : >> { %vm6948_vm5 = vmand %vm10955_vm13, %vm10954_vm12  ;;  %v1350_v40 = vsel %vm10959_vm8, %v1319_v14, -inf  ;;  %vm10961_vm6 = vcmp.gt.s32.totalorder %v6742_v15, 14  ;;  %vm10962_vm14 = vcmp.le.s32.totalorder %v6723_v56, 14  ;;  %v1339_v25 = vsel %vm6913_vm3, %v10965_v63, -3e+38 }
 0x176   : >> { %vm10960_vm2 = vmmov %vm10959_vm8  ;;  %vm10967_vm13 = vcmp.gt.s32.totalorder %v6742_v15, 15  ;;  %vm10968_vm8 = vcmp.le.s32.totalorder %v6723_v56, 15  ;;  %v1340_v61 = vsel %vm6913_vm3, %v10586_v26, -3e+38  ;;  %v1341_v42 = vsel %vm6930_vm4, %v10808_v19, -3e+38 }
 0x177   : >> { %v1351_v35 = vsel %vm10960_vm2, %v1321_v37, -inf  ;;  %vm6962_vm11 = vmand %vm10962_vm14, %vm10961_vm6  ;;  %v1343_v15 = vsel %vm6948_vm5, %v10810_v54, -3e+38  ;;  %v10990_v39 = vsel %vm6785_vm9, %v5190_v10, -3e+38 }
 0x178   : >> { %v1352_v14 = vmax.f32 %v1349_v29, %v1351_v35  ;;  %vm10966_vm12 = vmmov %vm10960_vm2  ;;  %v1344_v50 = vsel %vm6948_vm5, %v10584_v30, -3e+38  ;;  %v1346_v48 = vsel %vm6962_vm11, %v5256_v32, -3e+38  ;;  %v11009_v23 = vsel %vm6898_vm1, %v5232_v24, -3e+38 }
 0x179   : >> { %v1353_v37 = vsel %vm10966_vm12, %v1323_v57, -inf  ;;  %vm6977_vm2 = vmand %vm10968_vm8, %vm10967_vm13  ;;  %s4224_s18 = scalar_select %p7099_p10, 0, 1 }
 0x17a   : >> { %v1354_v35 = vmax.f32 %v1350_v40, %v1353_v37  ;;  %vm10971_vm14 = vmmov %vm10966_vm12  ;;  %v1345_v37 = vsel %vm6962_vm11, %v5253_v31, -3e+38  ;;  %v1347_v56 = vsel %vm6977_vm2, %v10585_v33, -3e+38 }
 0x17b   : >> { %v1355_v57 = vsel %vm10971_vm14, %v1325_v21, -inf  ;;  %vm10972_vm6 = vmmov %vm10966_vm12  ;;  %vm7006_vm14 = vcmp.ge.s32.totalorder %v5163_v1, %v1413_v43 }
 0x17c   : >> { %v1356_v29 = vmax.f32 %v1352_v14, %v1355_v57  ;;  %v1357_v62 = vsel %vm10972_vm6, %v1327_v45, -inf  ;;  %vm10973_vm3 = vmmov %vm10972_vm6  ;;  %v1450_v45 = vstv %s7024_s14  ;;  %s7213_s14 = sld [smem:[#allocation7 + %s5673_s7]] }
 0x17d   : >> { %v1358_v26 = vmax.f32 %v1354_v35, %v1357_v62  ;;  %v1359_v19 = vsel %vm10973_vm3, %v1329_v53, -inf  ;;  %vm10974_vm12 = vmmov %vm10973_vm3  ;;  %v10979_v53 = vstv %s6819_s4  ;;  %v1367_v35 = vsel %vm10973_vm3, %v1337_v52, -inf }
 0x17e   : >> { %v1361_v40 = vsel %vm10974_vm12, %v1331_v27, -inf  ;;  %vm10975_vm13 = vmmov %vm10973_vm3  ;;  %v1360_v14 = vmax.f32 %v1356_v29, %v1359_v19  ;;  %vm7013_vm6 = vcmp.lt.s32.totalorder %v5163_v1, %v10979_v53  ;;  %v10988_v53 = vsel %vm6772_vm0, %v5184_v8, -3e+38 }
 0x17f   : >> { %v1363_v21 = vsel %vm10975_vm13, %v1333_v49, -inf  ;;  %vm10976_vm8 = vmmov %vm10973_vm3  ;;  %v1362_v49 = vmax.f32 %v1358_v26, %v1361_v40  ;;  %v10985_v26 = vsel %vm6753_vm10, %v5172_v4, -3e+38 }
 0x180   : >> { %v1365_v57 = vsel %vm10976_vm8, %v1335_v55, -inf  ;;  %vm10982_vm12 = vmmov %vm10973_vm3  ;;  %v1364_v55 = vmax.f32 %v1360_v14, %v1363_v21  ;;  %v1380_v52 = vsel %vm10973_vm3, %v10985_v26, -inf }
 0x181   : >> { %v1369_v62 = vsel %vm10982_vm12, %v1339_v25, -inf  ;;  %vm10983_vm13 = vmmov %vm10973_vm3  ;;  %v10986_v25 = vsel %vm6763_vm7, %v5178_v6, -3e+38  ;;  %v1366_v40 = vmax.f32 %v1362_v49, %v1365_v57 }
 0x182   : >> { %v1371_v19 = vsel %vm10983_vm13, %v1341_v42, -inf  ;;  %vm10984_vm8 = vmmov %vm10973_vm3  ;;  %v1368_v58 = vmax.f32 %v1364_v55, %v1367_v35 }
 0x183   : >> { %v1373_v29 = vsel %vm10984_vm8, %v1343_v15, -inf  ;;  %vm10987_vm12 = vmmov %vm10973_vm3  ;;  %v1370_v47 = vmax.f32 %v1366_v40, %v1369_v62 }
 0x184   : >> { %v1381_v42 = vsel %vm10987_vm12, %v10986_v25, -inf  ;;  %vm10989_vm13 = vmmov %vm10973_vm3  ;;  %v1372_v35 = vmax.f32 %v1368_v58, %v1371_v19 }
 0x185   : >> { %v1382_v21 = vsel %vm10989_vm13, %v10988_v53, -inf  ;;  %vm10991_vm10 = vmmov %vm10973_vm3 }
 0x186   : >> { %v1384_v15 = vsel %vm10991_vm10, %v10990_v39, -inf  ;;  %vm10992_vm8 = vmmov %vm10973_vm3  ;;  %v1383_v26 = vmax.f32 %v1380_v52, %v1382_v21  ;;  %v11012_v39 = vsel %vm6930_vm4, %v5244_v28, -3e+38 }
 0x187   : >> { %v1386_v14 = vsel %vm10992_vm8, %v1326_v16, -inf  ;;  %v1385_v33 = vmax.f32 %v1381_v42, %v1384_v15  ;;  %vm10993_vm7 = vmmov %vm10973_vm3  ;;  %vm7050_vm3 = vcmp.ge.s32.totalorder %v5166_v2, %v1413_v43  ;;  %vm11005_vm8 = vnez %v10932_v60 }
 0x188   : >> { %v1388_v57 = vsel %vm10993_vm7, %v1328_v22, -inf  ;;  %vm10997_vm0 = vmmov %vm10993_vm7  ;;  %v10998_v22 = vsel %vm6825_vm15, %v10940_v17, -3e+38  ;;  %v1387_v52 = vmax.f32 %v1383_v26, %v1386_v14  ;;  %vm11002_vm15 = vnez %v10928_v51 }
 0x189   : >> { %v1375_v16 = vsel %vm10997_vm0, %v1345_v37, -inf  ;;  %vm10999_vm9 = vmmov %vm10997_vm0  ;;  %v1389_v25 = vmax.f32 %v1385_v33, %v1388_v57  ;;  %v1374_v37 = vmax.f32 %v1370_v47, %v1373_v29  ;;  %v1348_v60 = vsel %vm6977_vm2, %v5262_v34, -3e+38 }
 0x18a   : >> { %v1390_v43 = vsel %vm10999_vm9, %v10998_v22, -inf  ;;  %vm11000_vm12 = vmmov %vm10997_vm0  ;;  %v1376_v19 = vmax.f32 %v1372_v35, %v1375_v16  ;;  %v1447_v15 = vstv %s7021_s30  ;;  %v11018_v47 = vstv %s6819_s4  ;;  %s7191_s4 = sld [smem:[#allocation6 + %s5673_s7]] }
 0x18b   : >> { %v1392_v49 = vsel %vm11000_vm12, %v1332_v59, -inf  ;;  %vm11001_vm13 = vmmov %vm10997_vm0  ;;  %v11003_v59 = vsel %vm11002_vm15, %v5220_v20, -3e+38  ;;  %v1391_v51 = vmax.f32 %v1387_v52, %v1390_v43  ;;  %vm7133_vm12 = vcmp.ge.s32.totalorder %v5163_v1, %v1447_v15  ;;  %s4225_s30 = scalar_select %p7142_p13, 0, 1 }
 0x18c   : >> { %v1377_v55 = vsel %vm11001_vm13, %v1347_v56, -inf  ;;  %vm11004_vm10 = vmmov %vm10997_vm0  ;;  %v11006_v56 = vsel %vm11005_vm8, %v10953_v36, -3e+38  ;;  %v1393_v29 = vmax.f32 %v1389_v25, %v1392_v49  ;;  %vm7149_vm4 = vcmp.lt.s32.totalorder %v5166_v2, %v11018_v47 }
 0x18d   : >> { %v1394_v62 = vsel %vm11004_vm10, %v11003_v59, -inf  ;;  %vm11007_vm7 = vmmov %vm10997_vm0  ;;  %v1378_v42 = vmax.f32 %v1374_v37, %v1377_v55  ;;  %vm1451_vm13 = vcmp.lt.s32.totalorder %v5163_v1, %v1450_v45  ;;  %vm7164_vm15 = vcmp.lt.s32.totalorder %v5166_v2, %v1450_v45 }
 0x18e   : >> { %v1396_v33 = vsel %vm11007_vm7, %v11006_v56, -inf  ;;  %vm11010_vm11 = vmmov %vm10997_vm0  ;;  %v1395_v0 = vmax.f32 %v1391_v51, %v1394_v62  ;;  %v1480_v52 = vstv %s7071_s16  ;;  %v1483_v59 = vstv %s7089_s8  ;;  %s7250_s16 = sld [smem:[#allocation6 + %s5784_s12]] }
 0x18f   : >> { %v1398_v40 = vsel %vm11010_vm11, %v11009_v23, -inf  ;;  %vm11011_vm5 = vmmov %vm10997_vm0  ;;  %v1397_v21 = vmax.f32 %v1393_v29, %v1396_v33  ;;  %v7124_v14 = vmax.f32 %v1376_v19, %v1378_v42  ;;  %vm7178_vm7 = vcmp.ge.s32.totalorder %v5163_v1, %v1480_v52  ;;  %s7280_s8 = sld [smem:[#allocation7 + %s5784_s12]] }
 0x190   : >> { %v1400_v53 = vsel %vm11011_vm5, %v1340_v61, -inf  ;;  %vm11013_vm2 = vmmov %vm10997_vm0  ;;  %v1406_v61 = vsel %vm10997_vm0, %v1346_v48, -inf  ;;  %v1399_v26 = vmax.f32 %v1395_v0, %v1398_v40  ;;  %vm7183_vm11 = vcmp.ge.s32.totalorder %v5166_v2, %v1480_v52  ;;  %p1569_p11 = scmp.gt.s32.totalorder %s7213_s14, %s7191_s4 }
 0x191   : >> { %v1402_v18 = vsel %vm11013_vm2, %v11012_v39, -inf  ;;  %vm11014_vm1 = vmmov %vm10997_vm0  ;;  %v1401_v57 = vmax.f32 %v1397_v21, %v1400_v53  ;;  %v7193_v33 = vstv %s4224_s18  ;;  %vm1484_vm2 = vcmp.lt.s32.totalorder %v5163_v1, %v1483_v59  ;;  %s7289_s18 = sld [smem:[#allocation6 + %s5871_s2]] }
 0x192   : >> { %v1404_v58 = vsel %vm11014_vm1, %v1344_v50, -inf  ;;  %vm1419_vm9 = vmand %vm7006_vm14, %vm7013_vm6  ;;  %vm7158_vm6 = vcmp.ge.s32.totalorder %v5166_v2, %v1447_v15  ;;  %v1403_v49 = vmax.f32 %v1399_v26, %v1402_v18  ;;  %v1513_v51 = vstv %s7113_s28  ;;  %s4227_s28 = scalar_select %p7298_p9, 0, 1 }
 0x193   : >> { %vm11021_vm14 = vmmov %vm10997_vm0  ;;  %v1405_v35 = vmax.f32 %v1401_v57, %v1404_v58  ;;  %v1425_v55 = vsel %vm1419_vm9, %v7124_v14, -3e+38  ;;  %v1516_v29 = vstv %s7116_s25  ;;  %v7264_v15 = vstv %s4225_s30  ;;  %p7352_p6 = pnand %p1569_p11, %p7056_p7  ;;  %s7528_s30 = sld [smem:[#allocation6 + %s5276_s1]] }
 0x194   : >> { %v1408_v16 = vsel %vm11021_vm14, %v1348_v60, -inf  ;;  %vm1453_vm10 = vmand %vm7133_vm12, %vm1451_vm13  ;;  %v1407_v62 = vmax.f32 %v1403_v49, %v1406_v61  ;;  %vm7224_vm13 = vcmp.ge.s32.totalorder %v5163_v1, %v1513_v51  ;;  %v1546_v43 = vstv %s7191_s4  ;;  %s7768_s25 = sld [smem:[#allocation7 + %s5510_s19]] }
 0x195   : >> { %vm1420_vm8 = vmand %vm7050_vm3, %vm7149_vm4  ;;  %v1459_v25 = vsel %vm1453_vm10, %v7124_v14, -3e+38  ;;  %v1409_v56 = vmax.f32 %v1405_v35, %v1408_v16  ;;  %v1549_v37 = vstv %s7213_s14  ;;  %v1507_v19 = vstv %s4226_s13  ;;  %p1602_p2 = scmp.gt.s32.totalorder %s7280_s8, %s7250_s16  ;;  %s7384_s14 = sld [smem:[#allocation4 + %s5622_s22]] }
 0x196   : >> { %vm1454_vm5 = vmand %vm7158_vm6, %vm7164_vm15  ;;  %s7783_s4 = sld [smem:[#allocation6 + %s5566_s11]] }
 0x197   : >> { %vm11030_vm1 = vmmov %vm10997_vm0  ;;  %vm7204_vm0 = vcmp.lt.s32.totalorder %v5166_v2, %v1483_v59  ;;  %v7215_v60 = vmax.f32 %v1407_v62, %v1409_v56  ;;  %p1635_p0 = scmp.gt.s32.totalorder %s7314_s21, %s7289_s18  ;;  %p7373_p1 = pnand %p1602_p2, %p7056_p7 }
 0x198   : >> { %v1427_v48 = vsel %vm11030_vm1, %v1425_v55, -inf  ;;  %vm1486_vm9 = vmand %vm7178_vm7, %vm1484_vm2  ;;  %vm7239_vm7 = vcmp.ge.s32.totalorder %v5166_v2, %v1513_v51  ;;  %vm7245_vm2 = vcmp.lt.s32.totalorder %v5166_v2, %v1516_v29 }
 0x199   : >> { %vm11033_vm12 = vmmov %vm11030_vm1  ;;  %v1492_v23 = vsel %vm1486_vm9, %v7124_v14, -3e+38  ;;  %v1426_v39 = vsel %vm1420_vm8, %v7215_v60, -3e+38  ;;  %v1460_v18 = vsel %vm1454_vm5, %v7215_v60, -3e+38  ;;  %p7396_p5 = pnand %p1635_p0, %p7056_p7 }
 0x19a   : >> { %v1461_v42 = vsel %vm11033_vm12, %v1459_v25, -inf  ;;  %vm1487_vm14 = vmand %vm7183_vm11, %vm7204_vm0  ;;  %vm1517_vm11 = vcmp.lt.s32.totalorder %v5163_v1, %v1516_v29  ;;  %vm1442_vm5 = vcmp.eq.s32.totalorder %v7193_v33, 1  ;;  %vm1475_vm9 = vcmp.eq.s32.totalorder %v7264_v15, 1  ;;  %s4229_s13 = scalar_select %p7373_p1, 0, 1 }
 0x19b   : >> { %vm11036_vm10 = vmmov %vm11030_vm1  ;;  %v1493_v58 = vsel %vm1487_vm14, %v7215_v60, -3e+38  ;;  %vm7303_vm12 = vcmp.ge.s32.totalorder %v5163_v1, %v1546_v43  ;;  %vm7308_vm14 = vcmp.ge.s32.totalorder %v5166_v2, %v1546_v43  ;;  %v1579_v29 = vstv %s7250_s16  ;;  %s4228_s16 = scalar_select %p7352_p6, 0, 1 }
 0x19c   : >> { %v1494_v53 = vsel %vm11036_vm10, %v1492_v23, -inf  ;;  %vm1519_vm1 = vmand %vm7224_vm13, %vm1517_vm11  ;;  %vm1550_vm13 = vcmp.lt.s32.totalorder %v5163_v1, %v1549_v37  ;;  %v1540_v43 = vstv %s4227_s28  ;;  %s7759_s28 = sld [smem:[#allocation6 + %s5510_s19]]  ;;  %p7796_p7 = scmp.gt.s32.totalorder %s7410_s24, %s7384_s14 }
 0x19d   : >> { %vm11042_vm0 = vmmov %vm11036_vm10  ;;  %v1525_v26 = vsel %vm1519_vm1, %v7124_v14, -3e+38  ;;  %vm7320_vm10 = vcmp.lt.s32.totalorder %v5166_v2, %v1549_v37  ;;  %vm7342_vm1 = vcmp.ge.s32.totalorder %v5166_v2, %v1579_v29 }
 0x19e   : >> { %v1428_v38 = vsel %vm11042_vm0, %v1426_v39, -inf  ;;  %vm11043_vm3 = vmmov %vm11042_vm0  ;;  %v1573_v39 = vstv %s4228_s16  ;;  %s7786_s16 = sld [smem:[#allocation7 + %s5566_s11]] }
 0x19f   : >> { %v1462_v61 = vsel %vm11043_vm3, %v1460_v18, -inf  ;;  %vm11044_vm4 = vmmov %vm11042_vm0  ;;  %v1429_v57 = vmax.f32 %v1427_v48, %v1428_v38  ;;  %v1582_v18 = vstv %s7280_s8 }
 0x1a0   : >> { %v1495_v41 = vsel %vm11044_vm4, %v1493_v58, -inf  ;;  %vm1520_vm6 = vmand %vm7239_vm7, %vm7245_vm2  ;;  %v1463_v47 = vmax.f32 %v1461_v42, %v1462_v61  ;;  %vm7337_vm2 = vcmp.ge.s32.totalorder %v5163_v1, %v1579_v29  ;;  %vm1583_vm3 = vcmp.lt.s32.totalorder %v5163_v1, %v1582_v18 }
 0x1a1   : >> { %v1496_v27 = vmax.f32 %v1494_v53, %v1495_v41  ;;  %v1526_v45 = vsel %vm1520_vm6, %v7215_v60, -3e+38  ;;  %vm11045_vm15 = vmmov %vm11042_vm0  ;;  %v1430_v49 = vrot.slane %v1429_v57, 4  ;;  %vm7360_vm4 = vcmp.lt.s32.totalorder %v5166_v2, %v1582_v18 }
 0x1a2   : >> { %v1527_v16 = vsel %vm11045_vm15, %v1525_v26, -inf  ;;  %vm11046_vm8 = vmmov %vm11042_vm0  ;;  %v1464_v35 = vrot.slane %v1463_v47, 4  ;;  %vm1508_vm15 = vcmp.eq.s32.totalorder %v1507_v19, 1  ;;  %p1883_p13 = scmp.gt.s32.totalorder %s7768_s25, %s7759_s28 }
 0x1a3   : >> { %v1528_v22 = vsel %vm11046_vm8, %v1526_v45, -inf  ;;  %v1497_v55 = vrot.slane %v1496_v27, 4  ;;  %v1431_v59 = vmax.f32 %v1429_v57, %v1430_v49  ;;  %vm1552_vm7 = vmand %vm7303_vm12, %vm1550_vm13  ;;  %vm1541_vm13 = vcmp.eq.s32.totalorder %v1540_v43, 1 }
 0x1a4   : >> { %v1529_v52 = vmax.f32 %v1527_v16, %v1528_v22  ;;  %v1465_v62 = vmax.f32 %v1463_v47, %v1464_v35  ;;  %vm1553_vm11 = vmand %vm7308_vm14, %vm7320_vm10  ;;  %v1558_v0 = vsel %vm1552_vm7, %v7124_v14, -3e+38  ;;  %vm11065_vm10 = vcmp.eq.s32.totalorder %v5163_v1, 0  ;;  %p7888_p12 = pnand %p1883_p13, %p7796_p7  ;;  %p1916_p3 = scmp.gt.s32.totalorder %s7786_s16, %s7783_s4 }
 0x1a5   : >> { %v1498_v56 = vmax.f32 %v1496_v27, %v1497_v55  ;;  %v1432_v42 = vrot.slane %v1431_v59, 2  ;;  %v1559_v26 = vsel %vm1553_vm11, %v7215_v60, -3e+38  ;;  %v1560_v57 = vsel %vm11042_vm0, %v1558_v0, -inf  ;;  %vm1585_vm6 = vmand %vm7337_vm2, %vm1583_vm3 }
 0x1a6   : >> { %v1530_v48 = vrot.slane %v1529_v52, 4  ;;  %v1466_v23 = vrot.slane %v1465_v62, 2  ;;  %vm11062_vm8 = vmmov %vm11042_vm0  ;;  %v1591_v35 = vsel %vm1585_vm6, %v7124_v14, -3e+38  ;;  %vm11067_vm11 = vcmp.eq.s32.totalorder %v5163_v1, 1  ;;  %p7955_p9 = pnand %p1916_p3, %p7796_p7 }
 0x1a7   : >> { %v1499_v40 = vrot.slane %v1498_v56, 2  ;;  %v1433_v58 = vmax.f32 %v1431_v59, %v1432_v42  ;;  %v1561_v49 = vsel %vm11062_vm8, %v1559_v26, -inf  ;;  %vm1586_vm12 = vmand %vm7342_vm1, %vm7360_vm4  ;;  %vm1574_vm4 = vcmp.eq.s32.totalorder %v1573_v39, 1 }
 0x1a8   : >> { %v1531_v53 = vmax.f32 %v1529_v52, %v1530_v48  ;;  %v1467_v38 = vmax.f32 %v1465_v62, %v1466_v23  ;;  %v1562_v37 = vmax.f32 %v1560_v57, %v1561_v49  ;;  %v1592_v59 = vsel %vm1586_vm12, %v7215_v60, -3e+38  ;;  %vm11063_vm14 = vmmov %vm11042_vm0 }
 0x1a9   : >> { %v1500_v61 = vmax.f32 %v1498_v56, %v1499_v40  ;;  %v1434_v27 = vrot.slane %v1433_v58, 1  ;;  %v1593_v62 = vsel %vm11063_vm14, %v1591_v35, -inf  ;;  %v1612_v56 = vstv %s7289_s18  ;;  %vm11066_vm7 = vmmov %vm11042_vm0  ;;  %s4230_s18 = scalar_select %p7396_p5, 0, 1 }
 0x1aa   : >> { %v1532_v41 = vrot.slane %v1531_v53, 2  ;;  %v1468_v45 = vrot.slane %v1467_v38, 1  ;;  %v1563_v23 = vrot.slane %v1562_v37, 4  ;;  %v1594_v40 = vsel %vm11066_vm7, %v1592_v59, -inf  ;;  %vm11073_vm8 = vmmov %vm11066_vm7 }
 0x1ab   : >> { %v1501_v16 = vrot.slane %v1500_v61, 1  ;;  %v1435_v55 = vmax.f32 %v1433_v58, %v1434_v27  ;;  %v1615_v58 = vstv %s7314_s21  ;;  %vm11072_vm0 = vcmp.eq.s32.totalorder %v5163_v1, 2  ;;  %vm11075_vm14 = vmmov %vm11066_vm7  ;;  %s7531_s21 = sld [smem:[#allocation7 + %s5276_s1]] }
 0x1ac   : >> { %v1533_v22 = vmax.f32 %v1531_v53, %v1532_v41  ;;  %v1469_v52 = vmax.f32 %v1467_v38, %v1468_v45  ;;  %v1595_v53 = vmax.f32 %v1593_v62, %v1594_v40  ;;  %v1564_v21 = vmax.f32 %v1562_v37, %v1563_v23 }
 0x1ad   : >> { %v1502_v25 = vmax.f32 %v1500_v61, %v1501_v16  ;;  %v1443_v48 = vsel %vm1442_vm5, %v1435_v55, 0.0  ;;  %vm7416_vm5 = vcmp.ge.s32.totalorder %v5163_v1, %v1612_v56  ;;  %v1606_v61 = vstv %s4229_s13  ;;  %s4233_s13 = scalar_select %p7888_p12, 0, 1 }
 0x1ae   : >> { %v1534_v50 = vrot.slane %v1533_v22, 1  ;;  %v1476_v51 = vsel %vm1475_vm9, %v1469_v52, 0.0  ;;  %v1444_v29 = vsel %vm11065_vm10, %v1443_v48, 0.0  ;;  %vm7421_vm9 = vcmp.ge.s32.totalorder %v5166_v2, %v1612_v56 }
 0x1af   : >> { %v1477_v33 = vsel %vm11067_vm11, %v1476_v51, %v1444_v29  ;;  %v1509_v15 = vsel %vm1508_vm15, %v1502_v25, 0.0  ;;  %v1596_v38 = vrot.slane %v1595_v53, 4  ;;  %vm1616_vm2 = vcmp.lt.s32.totalorder %v5163_v1, %v1615_v58 }
 0x1b0   : >> { %v1535_v42 = vmax.f32 %v1533_v22, %v1534_v50  ;;  %vm1617_vm1 = vcmp.lt.s32.totalorder %v5166_v2, %v1615_v58  ;;  %v1510_v19 = vsel %vm11072_vm0, %v1509_v15, %v1477_v33  ;;  %v1565_v26 = vrot.slane %v1564_v21, 2  ;;  %vm1618_vm3 = vmand %vm7416_vm5, %vm1616_vm2  ;;  %v11123_v58 = vld [vmem:[#allocation31_spill] sm:$0xff] }
 0x1b1   : >> { %v1597_v57 = vmax.f32 %v1595_v53, %v1596_v38  ;;  %vm1619_vm6 = vmand %vm7421_vm9, %vm1617_vm1  ;;  %v1624_v47 = vsel %vm1618_vm3, %v7124_v14, -3e+38  ;;  %v7439_v27 = vstv %s7384_s14  ;;  %vm1607_vm15 = vcmp.eq.s32.totalorder %v1606_v61, 1  ;;  %p1850_p4 = scmp.gt.s32.totalorder %s7531_s21, %s7528_s30  ;;  %s7825_s14 = sld [smem:[#allocation6 + %s5622_s22]] }
 0x1b2   : >> { %v1542_v41 = vsel %vm1541_vm13, %v1535_v42, 0.0  ;;  %v1566_v45 = vmax.f32 %v1564_v21, %v1565_v26  ;;  %v1625_v16 = vsel %vm1619_vm6, %v7215_v60, -3e+38  ;;  %v1626_v22 = vsel %vm11073_vm8, %v1624_v47, -inf }
 0x1b3   : >> { %vm11074_vm12 = vcmp.eq.s32.totalorder %v5163_v1, 3  ;;  %v1598_v49 = vrot.slane %v1597_v57, 2  ;;  %v1627_v35 = vsel %vm11075_vm14, %v1625_v16, -inf  ;;  %v7446_v55 = vstv %s4230_s18  ;;  %p7838_p10 = pnand %p1850_p4, %p7796_p7  ;;  %s7869_s18 = sld [smem:[#allocation6 + %s5673_s7]] }
 0x1b4   : >> { %v1543_v43 = vsel %vm11074_vm12, %v1542_v41, %v1510_v19  ;;  %v1567_v52 = vrot.slane %v1566_v45, 1  ;;  %v1628_v25 = vmax.f32 %v1626_v22, %v1627_v35  ;;  %vm1649_vm13 = vcmp.le.s32.totalorder %v7439_v27, 0 }
 0x1b5   : >> { %v7450_v14 = vstv %s7410_s24  ;;  %v1599_v50 = vmax.f32 %v1597_v57, %v1598_v49  ;;  %vm1650_vm10 = vcmp.le.s32.totalorder %v7439_v27, 1  ;;  %vm1651_vm7 = vcmp.le.s32.totalorder %v7439_v27, 2  ;;  %v11133_v57 = vld [vmem:[#allocation35_spill] sm:$0xff]  ;;  %s7843_s24 = sld [smem:[#allocation7 + %s5622_s22]] }
 0x1b6   : >> { %vm1652_vm11 = vcmp.le.s32.totalorder %v7439_v27, 3  ;;  %v1568_v60 = vmax.f32 %v1566_v45, %v1567_v52  ;;  %v1629_v37 = vrot.slane %v1628_v25, 4  ;;  %vm1653_vm5 = vcmp.le.s32.totalorder %v7439_v27, 4 }
 0x1b7   : >> { %v1600_v59 = vrot.slane %v1599_v50, 1  ;;  %vm1666_vm8 = vcmp.gt.s32.totalorder %v7450_v14, 0  ;;  %vm1667_vm14 = vcmp.gt.s32.totalorder %v7450_v14, 1  ;;  %vm1668_vm2 = vcmp.gt.s32.totalorder %v7450_v14, 2 }
 0x1b8   : >> { %v1575_v62 = vsel %vm1574_vm4, %v1568_v60, 0.0  ;;  %v1630_v56 = vmax.f32 %v1628_v25, %v1629_v37  ;;  %vm7469_vm1 = vmand %vm1649_vm13, %vm1666_vm8  ;;  %vm1669_vm6 = vcmp.gt.s32.totalorder %v7450_v14, 3  ;;  %vm1670_vm3 = vcmp.gt.s32.totalorder %v7450_v14, 4 }
 0x1b9   : >> { %v1601_v48 = vmax.f32 %v1599_v50, %v1600_v59  ;;  %vm7478_vm12 = vmand %vm1650_vm10, %vm1667_vm14  ;;  %vm11080_vm0 = vcmp.eq.s32.totalorder %v5163_v1, 4  ;;  %vm1671_vm9 = vcmp.gt.s32.totalorder %v7450_v14, 5  ;;  %vm11087_vm13 = vcmp.le.s32.totalorder %v7439_v27, 5 }
 0x1ba   : >> { %v1631_v29 = vrot.slane %v1630_v56, 2  ;;  %v1576_v23 = vsel %vm11080_vm0, %v1575_v62, %v1543_v43  ;;  %vm7489_vm4 = vmand %vm1651_vm7, %vm1668_vm2  ;;  %vm1672_vm0 = vcmp.gt.s32.totalorder %v7450_v14, 6  ;;  %vm1674_vm2 = vcmp.gt.s32.totalorder %v7450_v14, 8 }
 0x1bb   : >> { %v1608_v33 = vsel %vm1607_vm15, %v1601_v48, 0.0  ;;  %vm7499_vm8 = vmand %vm1652_vm11, %vm1669_vm6  ;;  %vm1675_vm15 = vcmp.gt.s32.totalorder %v7450_v14, 9  ;;  %v1730_v38 = vsel %vm7469_vm1, %v5169_v3, -3e+38  ;;  %v1732_v19 = vsel %vm7478_vm12, %v5175_v5, -3e+38  ;;  %p1949_p8 = scmp.gt.s32.totalorder %s7843_s24, %s7825_s14 }
 0x1bc   : >> { %v1632_v15 = vmax.f32 %v1630_v56, %v1631_v29  ;;  %vm7512_vm14 = vmand %vm1653_vm5, %vm1670_vm3  ;;  %vm11090_vm5 = vcmp.eq.s32.totalorder %v5163_v1, 5  ;;  %vm11091_vm3 = vcmp.le.s32.totalorder %v7439_v27, 6  ;;  %v1734_v47 = vsel %vm7489_vm4, %v5181_v7, -3e+38  ;;  %v11116_v29 = vld [vmem:[#allocation28_spill] sm:$0xff] }
 0x1bd   : >> { %vm7523_vm10 = vmand %vm11087_vm13, %vm1671_vm9  ;;  %v1609_v18 = vsel %vm11090_vm5, %v1608_v33, %v1576_v23  ;;  %vm11094_vm9 = vcmp.gt.s32.totalorder %v7450_v14, 7  ;;  %vm11095_vm13 = vcmp.le.s32.totalorder %v7439_v27, 7  ;;  %vm11098_vm5 = vcmp.le.s32.totalorder %v7439_v27, 8  ;;  %v11117_v33 = vld [vmem:[#allocation29_spill] sm:$0xff]  ;;  %p8003_p11 = pnand %p1949_p8, %p7796_p7 }
 0x1be   : >> { %v1633_v21 = vrot.slane %v1632_v15, 1  ;;  %vm7539_vm7 = vmand %vm11091_vm3, %vm1672_vm0  ;;  %v1736_v22 = vsel %vm7499_vm8, %v5187_v9, -3e+38  ;;  %v1738_v49 = vsel %vm7512_vm14, %v5193_v11, -3e+38  ;;  %vm11107_vm6 = vcmp.le.s32.totalorder %v7439_v27, 10 }
 0x1bf   : >> { %vm7556_vm0 = vmand %vm11095_vm13, %vm11094_vm9  ;;  %vm11101_vm9 = vcmp.eq.s32.totalorder %v7446_v55, 1  ;;  %vm11102_vm13 = vcmp.le.s32.totalorder %v7439_v27, 9  ;;  %v1739_v25 = vsel %vm7512_vm14, %v5196_v12, -3e+38  ;;  %v1740_v50 = vsel %vm7523_vm10, %v10583_v13, -3e+38 }
 0x1c0   : >> { %v1634_v41 = vmax.f32 %v1632_v15, %v1633_v21  ;;  %vm7573_vm3 = vmand %vm11098_vm5, %vm1674_vm2  ;;  %vm11106_vm2 = vcmp.gt.s32.totalorder %v7450_v14, 10  ;;  %v11108_v60 = vmov 0  ;;  %v1741_v37 = vsel %vm7523_vm10, %v10933_v44, -3e+38  ;;  %v11122_v21 = vld [vmem:[#allocation30_spill] sm:$0xff] }
 0x1c1   : >> { %vm7593_vm5 = vmand %vm11102_vm13, %vm1675_vm15  ;;  %v1742_v59 = vsel %vm7539_vm7, %v10939_v46, -3e+38  ;;  %vm11110_vm14 = vcmask 130048   ;;  %vm11112_vm13 = vcmp.gt.s32.totalorder %v7450_v14, 11  ;;  %v11114_v56 = vmov 0 }
 0x1c2   : >> { %v1641_v35 = vsel %vm11101_vm9, %v1634_v41, 0.0  ;;  %vm11105_vm9 = vcmp.eq.s32.totalorder %v5163_v1, 6  ;;  %vm7609_vm11 = vmand %vm11107_vm6, %vm11106_vm2  ;;  %v1762_v62 = vsel %vm11110_vm14, %v1730_v38, -inf  ;;  %vm11113_vm6 = vcmp.le.s32.totalorder %v7439_v27, 11  ;;  %v11145_v41 = vld [vmem:[#allocation39_spill] sm:$0xff] }
 0x1c3   : >> { %v1642_v55 = vsel %vm11105_vm9, %v1641_v35, %v1609_v18  ;;  %v11109_v60 = vsel %vm7609_vm11, 4294967295, %v11108_v60  ;;  %vm11111_vm15 = vmmov %vm11110_vm14  ;;  %v1743_v48 = vsel %vm7539_vm7, %v10940_v17, -3e+38  ;;  %v1744_v23 = vsel %vm7556_vm0, %v11116_v29, -3e+38 }
 0x1c4   : >> { %4231 = vst.msk [vmem:[%s6172_s20 + $0x10] sm:$0xff] %vm11111_vm15, %v1642_v55  ;;  %vm7626_vm2 = vmand %vm11113_vm6, %vm11112_vm13  ;;  %vm11118_vm10 = vcmp.gt.s32.totalorder %v7450_v14, 12  ;;  %vm11119_vm9 = vcmp.le.s32.totalorder %v7439_v27, 12  ;;  %v11120_v0 = vmov 0  ;;  %v1746_v39 = vsel %vm7573_vm3, %v11122_v21, -3e+38 }
 0x1c5   : >> { %v11115_v56 = vsel %vm7626_vm2, 4294967295, %v11114_v56  ;;  %vm7643_vm14 = vmand %vm11119_vm9, %vm11118_vm10  ;;  %v1748_v38 = vsel %vm7593_vm5, %v11123_v58, -3e+38  ;;  %vm11124_vm7 = vcmp.gt.s32.totalorder %v7450_v14, 13  ;;  %vm11125_vm15 = vcmp.le.s32.totalorder %v7439_v27, 13  ;;  %v11128_v55 = vld [vmem:[#allocation33_spill] sm:$0xff] }
 0x1c6   : >> { %v11121_v0 = vsel %vm7643_vm14, 4294967295, %v11120_v0  ;;  %vm7660_vm13 = vmand %vm11125_vm15, %vm11124_vm7  ;;  %v1750_v18 = vsel %vm7609_vm11, %v11128_v55, -3e+38  ;;  %v1826_v43 = vstv %s7528_s30  ;;  %vm11129_vm6 = vcmp.gt.s32.totalorder %v7450_v14, 14  ;;  %v11134_v55 = vld [vmem:[#allocation36_spill] sm:$0xff] }
 0x1c7   : >> { %vm11130_vm10 = vcmp.le.s32.totalorder %v7439_v27, 14  ;;  %v1752_v35 = vsel %vm7626_vm2, %v10965_v63, -3e+38  ;;  %v1754_v15 = vsel %vm7643_vm14, %v11134_v55, -3e+38  ;;  %v1829_v58 = vstv %s7531_s21 }
 0x1c8   : >> { %vm7678_vm9 = vmand %vm11130_vm10, %vm11129_vm6  ;;  %vm11135_vm7 = vcmp.gt.s32.totalorder %v7450_v14, 15  ;;  %vm11136_vm15 = vcmp.le.s32.totalorder %v7439_v27, 15  ;;  %v1756_v61 = vsel %vm7660_vm13, %v10810_v54, -3e+38  ;;  %vm11139_vm10 = vcmask 130048  }
 0x1c9   : >> { %vm7696_vm6 = vmand %vm11136_vm15, %vm11135_vm7  ;;  %v1763_v29 = vsel %vm11139_vm10, %v1732_v19, -inf  ;;  %v1757_v27 = vsel %vm7660_vm13, %v10584_v30, -3e+38  ;;  %v1758_v14 = vsel %vm7678_vm9, %v5253_v31, -3e+38  ;;  %vm7731_vm13 = vcmp.ge.s32.totalorder %v5163_v1, %v1826_v43 }
 0x1ca   : >> { %vm11140_vm2 = vmmov %vm11139_vm10  ;;  %v1760_v30 = vsel %vm7696_vm6, %v11145_v41, -3e+38  ;;  %v11174_v26 = vsel %vm7573_vm3, %v5220_v20, -3e+38  ;;  %vm11179_vm3 = vnez %v11109_v60  ;;  %s4232_s30 = scalar_select %p7838_p10, 0, 1  ;;  %v1959_v53 = vstv %s7869_s18 }
 0x1cb   : >> { %v1764_v55 = vsel %vm11140_vm2, %v1734_v47, -inf  ;;  %vm11141_vm7 = vmmov %vm11140_vm2  ;;  %v1759_v47 = vsel %vm7678_vm9, %v5256_v32, -3e+38  ;;  %vm7736_vm9 = vcmp.lt.s32.totalorder %v5163_v1, %v1829_v58  ;;  %s4234_s21 = scalar_select %p7955_p9, 0, 1 }
 0x1cc   : >> { %v1765_v17 = vmax.f32 %v1762_v62, %v1764_v55  ;;  %v1766_v46 = vsel %vm11141_vm7, %v1736_v22, -inf  ;;  %vm11142_vm15 = vmmov %vm11140_vm2  ;;  %v1774_v62 = vsel %vm11140_vm2, %v1744_v23, -inf  ;;  %v11155_v23 = vsel %vm7469_vm1, %v5172_v4, -3e+38 }
 0x1cd   : >> { %v1767_v63 = vmax.f32 %v1763_v29, %v1766_v46  ;;  %v1768_v44 = vsel %vm11142_vm15, %v1738_v49, -inf  ;;  %vm11143_vm14 = vmmov %vm11140_vm2  ;;  %v1761_v46 = vsel %vm7696_vm6, %v5262_v34, -3e+38 }
 0x1ce   : >> { %v1770_v54 = vsel %vm11143_vm14, %v1740_v50, -inf  ;;  %vm11144_vm11 = vmmov %vm11140_vm2  ;;  %v1769_v13 = vmax.f32 %v1765_v17, %v1768_v44 }
 0x1cf   : >> { %v1772_v19 = vsel %vm11144_vm11, %v1742_v59, -inf  ;;  %v1771_v22 = vmax.f32 %v1767_v63, %v1770_v54  ;;  %vm11146_vm14 = vmmov %vm11140_vm2 }
 0x1d0   : >> { %v1776_v49 = vsel %vm11146_vm14, %v1746_v39, -inf  ;;  %vm11147_vm11 = vmmov %vm11140_vm2  ;;  %v1773_v17 = vmax.f32 %v1769_v13, %v1772_v19  ;;  %v11157_v39 = vsel %vm7478_vm12, %v5178_v6, -3e+38 }
 0x1d1   : >> { %v1778_v50 = vsel %vm11147_vm11, %v1748_v38, -inf  ;;  %vm11152_vm10 = vmmov %vm11140_vm2  ;;  %v1775_v29 = vmax.f32 %v1771_v22, %v1774_v62  ;;  %v1794_v13 = vsel %vm11140_vm2, %v11157_v39, -inf }
 0x1d2   : >> { %v1780_v59 = vsel %vm11152_vm10, %v1750_v18, -inf  ;;  %vm11153_vm6 = vmmov %vm11140_vm2  ;;  %v11158_v18 = vsel %vm7489_vm4, %v5184_v8, -3e+38  ;;  %v1777_v51 = vmax.f32 %v1773_v17, %v1776_v49  ;;  %vm7773_vm10 = vcmp.ge.s32.totalorder %v5166_v2, %v1826_v43 }
 0x1d3   : >> { %v1782_v54 = vsel %vm11153_vm6, %v1752_v35, -inf  ;;  %vm11154_vm7 = vmmov %vm11140_vm2  ;;  %v11160_v35 = vsel %vm7499_vm8, %v5190_v10, -3e+38  ;;  %v1779_v55 = vmax.f32 %v1775_v29, %v1778_v50  ;;  %vm7778_vm8 = vcmp.lt.s32.totalorder %v5166_v2, %v1829_v58 }
 0x1d4   : >> { %v1784_v63 = vsel %vm11154_vm7, %v1754_v15, -inf  ;;  %vm11156_vm15 = vmmov %vm11140_vm2  ;;  %v11170_v43 = vsel %vm7556_vm0, %v11117_v33, -3e+38 }
 0x1d5   : >> { %v1793_v21 = vsel %vm11156_vm15, %v11155_v23, -inf  ;;  %vm11159_vm14 = vmmov %vm11140_vm2  ;;  %v1783_v58 = vmax.f32 %v1779_v55, %v1782_v54  ;;  %v11177_v54 = vsel %vm7593_vm5, %v10953_v36, -3e+38  ;;  %vm11185_vm5 = vnez %v11121_v0 }
 0x1d6   : >> { %v1795_v15 = vsel %vm11159_vm14, %v11158_v18, -inf  ;;  %vm11161_vm1 = vmmov %vm11140_vm2 }
 0x1d7   : >> { %v1796_v38 = vmax.f32 %v1793_v21, %v1795_v15  ;;  %v1797_v42 = vsel %vm11161_vm1, %v11160_v35, -inf  ;;  %vm11162_vm12 = vmmov %vm11161_vm1 }
 0x1d8   : >> { %v1799_v40 = vsel %vm11162_vm12, %v1739_v25, -inf  ;;  %v1798_v19 = vmax.f32 %v1794_v13, %v1797_v42  ;;  %vm11163_vm4 = vmmov %vm11161_vm1  ;;  %v1781_v25 = vmax.f32 %v1777_v51, %v1780_v59  ;;  %v11180_v13 = vsel %vm11179_vm3, %v5232_v24, -3e+38 }
 0x1d9   : >> { %v1801_v62 = vsel %vm11163_vm4, %v1741_v37, -inf  ;;  %vm11164_vm11 = vmmov %vm11161_vm1  ;;  %v1800_v37 = vmax.f32 %v1796_v38, %v1799_v40  ;;  %vm11182_vm12 = vnez %v11115_v56  ;;  %v11186_v51 = vsel %vm11185_vm5, %v5244_v28, -3e+38 }
 0x1da   : >> { %v1803_v22 = vsel %vm11164_vm11, %v1743_v48, -inf  ;;  %vm11169_vm6 = vmmov %vm11161_vm1  ;;  %v1785_v29 = vmax.f32 %v1781_v25, %v1784_v63  ;;  %v1860_v42 = vstv %s7759_s28  ;;  %v1896_v25 = vstv %s7786_s16  ;;  %s7920_s28 = sld [smem:[#allocation7 + %s5673_s7]] }
 0x1db   : >> { %v1786_v50 = vsel %vm11169_vm6, %v1756_v61, -inf  ;;  %vm11171_vm7 = vmmov %vm11161_vm1  ;;  %v1802_v61 = vmax.f32 %v1798_v19, %v1801_v62  ;;  %v1804_v21 = vmax.f32 %v1800_v37, %v1803_v22  ;;  %v1893_v22 = vstv %s7783_s4  ;;  %s7995_s4 = sld [smem:[#allocation7 + %s5784_s12]] }
 0x1dc   : >> { %v1805_v48 = vsel %vm11171_vm7, %v11170_v43, -inf  ;;  %vm11173_vm15 = vmmov %vm11161_vm1  ;;  %v1787_v39 = vmax.f32 %v1783_v58, %v1786_v50  ;;  %vm7909_vm5 = vcmp.ge.s32.totalorder %v5166_v2, %v1893_v22 }
 0x1dd   : >> { %v1788_v17 = vsel %vm11173_vm15, %v1758_v14, -inf  ;;  %vm11175_vm0 = vmmov %vm11161_vm1  ;;  %v1806_v16 = vmax.f32 %v1802_v61, %v1805_v48 }
 0x1de   : >> { %v1807_v59 = vsel %vm11175_vm0, %v11174_v26, -inf  ;;  %vm11176_vm2 = vmmov %vm11175_vm0  ;;  %v1789_v18 = vmax.f32 %v1785_v29, %v1788_v17  ;;  %v7923_v29 = vstv %s4232_s30  ;;  %s8438_s30 = sld [smem:[#allocation7 + %s5510_s19]] }
 0x1df   : >> { %v1790_v23 = vsel %vm11176_vm2, %v1760_v30, -inf  ;;  %vm11178_vm14 = vmmov %vm11175_vm0  ;;  %v11183_v30 = vsel %vm11182_vm12, %v11133_v57, -3e+38  ;;  %v1808_v15 = vmax.f32 %v1804_v21, %v1807_v59  ;;  %vm7855_vm2 = vcmp.ge.s32.totalorder %v5163_v1, %v1860_v42 }
 0x1e0   : >> { %v1809_v14 = vsel %vm11178_vm14, %v11177_v54, -inf  ;;  %vm11181_vm1 = vmmov %vm11175_vm0  ;;  %v1791_v56 = vmax.f32 %v1787_v39, %v1790_v23  ;;  %vm7863_vm14 = vcmp.ge.s32.totalorder %v5166_v2, %v1860_v42  ;;  %vm7898_vm12 = vcmp.ge.s32.totalorder %v5163_v1, %v1893_v22  ;;  %p1982_p2 = scmp.gt.s32.totalorder %s7920_s28, %s7869_s18 }
 0x1e1   : >> { %v1811_v63 = vsel %vm11181_vm1, %v11180_v13, -inf  ;;  %vm11184_vm4 = vmmov %vm11175_vm0  ;;  %v1810_v35 = vmax.f32 %v1806_v16, %v1809_v14  ;;  %v1926_v23 = vstv %s7825_s14  ;;  %v1929_v21 = vstv %s7843_s24  ;;  %s8027_s14 = sld [smem:[#allocation6 + %s5871_s2]] }
 0x1e2   : >> { %v1813_v52 = vsel %vm11184_vm4, %v11183_v30, -inf  ;;  %vm11187_vm11 = vmmov %vm11175_vm0  ;;  %v1812_v40 = vmax.f32 %v1808_v15, %v1811_v63  ;;  %v7860_v19 = vmax.f32 %v1789_v18, %v1791_v56  ;;  %s8030_s24 = sld [smem:[#allocation7 + %s5871_s2]]  ;;  %p8078_p1 = pnand %p1982_p2, %p7796_p7 }
 0x1e3   : >> { %v1815_v60 = vsel %vm11187_vm11, %v11186_v51, -inf  ;;  %vm11188_vm6 = vmmov %vm11175_vm0  ;;  %v1814_v62 = vmax.f32 %v1810_v35, %v1813_v52  ;;  %vm1897_vm11 = vcmp.lt.s32.totalorder %v5163_v1, %v1896_v25 }
 0x1e4   : >> { %v1817_v38 = vsel %vm11188_vm6, %v1757_v27, -inf  ;;  %vm11190_vm7 = vmmov %vm11175_vm0  ;;  %v1816_v45 = vmax.f32 %v1812_v40, %v1815_v60  ;;  %vm7915_vm6 = vcmp.lt.s32.totalorder %v5166_v2, %v1896_v25  ;;  %v8007_v40 = vstv %s4233_s13  ;;  %s4235_s13 = scalar_select %p8003_p11, 0, 1 }
 0x1e5   : >> { %v1819_v0 = vsel %vm11190_vm7, %v1759_v47, -inf  ;;  %vm11191_vm15 = vmmov %vm11175_vm0  ;;  %v1863_v47 = vstv %s7768_s25  ;;  %v1818_v50 = vmax.f32 %v1814_v62, %v1817_v38  ;;  %s7932_s25 = sld [smem:[#allocation6 + %s5784_s12]]  ;;  %v1962_v25 = vstv %s7920_s28 }
 0x1e6   : >> { %v1821_v27 = vsel %vm11191_vm15, %v1761_v46, -inf  ;;  %vm1832_vm0 = vmand %vm7731_vm13, %vm7736_vm9  ;;  %vm1864_vm13 = vcmp.lt.s32.totalorder %v5163_v1, %v1863_v47  ;;  %vm7874_vm9 = vcmp.lt.s32.totalorder %v5166_v2, %v1863_v47  ;;  %v1820_v43 = vmax.f32 %v1816_v45, %v1819_v0  ;;  %s8499_s28 = sld [smem:[#allocation6 + %s5566_s11]] }
 0x1e7   : >> { %vm1866_vm3 = vmand %vm7855_vm2, %vm1864_vm13  ;;  %v1838_v37 = vsel %vm1832_vm0, %v7860_v19, -3e+38  ;;  %v1822_v17 = vmax.f32 %v1818_v50, %v1821_v27  ;;  %vm7945_vm13 = vcmp.ge.s32.totalorder %v5163_v1, %v1926_v23 }
 0x1e8   : >> { %vm1833_vm1 = vmand %vm7773_vm10, %vm7778_vm8  ;;  %v1872_v48 = vsel %vm1866_vm3, %v7860_v19, -3e+38  ;;  %v1840_v59 = vsel %vm11190_vm7, %v1838_v37, -inf  ;;  %p2048_p0 = scmp.gt.s32.totalorder %s8030_s24, %s8027_s14 }
 0x1e9   : >> { %vm1867_vm4 = vmand %vm7863_vm14, %vm7874_vm9  ;;  %v7934_v54 = vmax.f32 %v1820_v43, %v1822_v17  ;;  %v1920_v17 = vstv %s4234_s21  ;;  %s8150_s21 = sld [smem:[#allocation5 + %s5673_s7]] }
 0x1ea   : >> { %vm1899_vm15 = vmand %vm7898_vm12, %vm1897_vm11  ;;  %vm7960_vm12 = vcmp.ge.s32.totalorder %v5166_v2, %v1926_v23  ;;  %vm7966_vm11 = vcmp.lt.s32.totalorder %v5166_v2, %v1929_v21  ;;  %p8107_p4 = pnand %p2048_p0, %p7796_p7 }
 0x1eb   : >> { %vm11205_vm0 = vmmov %vm11190_vm7  ;;  %v1905_v39 = vsel %vm1899_vm15, %v7860_v19, -3e+38  ;;  %v1839_v52 = vsel %vm1833_vm1, %v7934_v54, -3e+38  ;;  %v1873_v18 = vsel %vm1867_vm4, %v7934_v54, -3e+38  ;;  %vm8015_vm15 = vcmp.ge.s32.totalorder %v5163_v1, %v1959_v53  ;;  %p2015_p6 = scmp.gt.s32.totalorder %s7995_s4, %s7932_s25 }
 0x1ec   : >> { %v1874_v14 = vsel %vm11205_vm0, %v1872_v48, -inf  ;;  %vm1900_vm2 = vmand %vm7909_vm5, %vm7915_vm6  ;;  %vm1930_vm5 = vcmp.lt.s32.totalorder %v5163_v1, %v1929_v21  ;;  %vm1855_vm4 = vcmp.eq.s32.totalorder %v7923_v29, 1  ;;  %v1992_v50 = vstv %s7932_s25  ;;  %s8112_s25 = sld [smem:[#allocation4 + %s5673_s7]] }
 0x1ed   : >> { %vm11208_vm3 = vmmov %vm11205_vm0  ;;  %v1906_v15 = vsel %vm1900_vm2, %v7934_v54, -3e+38  ;;  %vm1888_vm2 = vcmp.eq.s32.totalorder %v8007_v40, 1  ;;  %p8095_p5 = pnand %p2015_p6, %p7796_p7 }
 0x1ee   : >> { %v1907_v13 = vsel %vm11208_vm3, %v1905_v39, -inf  ;;  %vm1932_vm6 = vmand %vm7945_vm13, %vm1930_vm5  ;;  %vm1963_vm13 = vcmp.lt.s32.totalorder %v5163_v1, %v1962_v25  ;;  %vm8037_vm3 = vcmp.lt.s32.totalorder %v5166_v2, %v1962_v25  ;;  %s4238_s16 = scalar_select %p8107_p4, 0, 1 }
 0x1ef   : >> { %vm11214_vm7 = vmmov %vm11205_vm0  ;;  %v1938_v38 = vsel %vm1932_vm6, %v7860_v19, -3e+38  ;;  %vm8056_vm6 = vcmp.ge.s32.totalorder %v5166_v2, %v1992_v50  ;;  %s4237_s8 = scalar_select %p8095_p5, 0, 1 }
 0x1f0   : >> { %v1841_v49 = vsel %vm11214_vm7, %v1839_v52, -inf  ;;  %vm11215_vm10 = vmmov %vm11205_vm0 }
 0x1f1   : >> { %v1875_v51 = vsel %vm11215_vm10, %v1873_v18, -inf  ;;  %vm11216_vm8 = vmmov %vm11205_vm0  ;;  %v1842_v56 = vmax.f32 %v1840_v59, %v1841_v49 }
 0x1f2   : >> { %v1908_v60 = vsel %vm11216_vm8, %v1906_v15, -inf  ;;  %vm1933_vm1 = vmand %vm7960_vm12, %vm7966_vm11  ;;  %v1876_v35 = vmax.f32 %v1874_v14, %v1875_v51  ;;  %vm8051_vm11 = vcmp.ge.s32.totalorder %v5163_v1, %v1992_v50  ;;  %p8475_p7 = scmp.gt.s32.totalorder %s8150_s21, %s8112_s25 }
 0x1f3   : >> { %v1909_v0 = vmax.f32 %v1907_v13, %v1908_v60  ;;  %v1939_v42 = vsel %vm1933_vm1, %v7934_v54, -3e+38  ;;  %vm11218_vm14 = vmmov %vm11205_vm0  ;;  %v1843_v47 = vrot.slane %v1842_v56, 4  ;;  %v1995_v13 = vstv %s7995_s4  ;;  %s4236_s4 = scalar_select %p8078_p1, 0, 1 }
 0x1f4   : >> { %v1940_v27 = vsel %vm11218_vm14, %v1938_v38, -inf  ;;  %vm11219_vm9 = vmmov %vm11205_vm0  ;;  %v1877_v62 = vrot.slane %v1876_v35, 4  ;;  %vm8020_vm0 = vcmp.ge.s32.totalorder %v5166_v2, %v1959_v53  ;;  %vm1996_vm10 = vcmp.lt.s32.totalorder %v5163_v1, %v1995_v13 }
 0x1f5   : >> { %v1941_v55 = vsel %vm11219_vm9, %v1939_v42, -inf  ;;  %v1910_v46 = vrot.slane %v1909_v0, 4  ;;  %v1844_v37 = vmax.f32 %v1842_v56, %v1843_v47  ;;  %vm1965_vm12 = vmand %vm8015_vm15, %vm1963_vm13  ;;  %vm8067_vm8 = vcmp.lt.s32.totalorder %v5166_v2, %v1995_v13 }
 0x1f6   : >> { %v1942_v45 = vmax.f32 %v1940_v27, %v1941_v55  ;;  %v1878_v43 = vmax.f32 %v1876_v35, %v1877_v62  ;;  %vm1966_vm5 = vmand %vm8020_vm0, %vm8037_vm3  ;;  %v1971_v14 = vsel %vm1965_vm12, %v7860_v19, -3e+38  ;;  %v1953_v35 = vstv %s4235_s13  ;;  %s8435_s13 = sld [smem:[#allocation6 + %s5510_s19]] }
 0x1f7   : >> { %v1911_v48 = vmax.f32 %v1909_v0, %v1910_v46  ;;  %v1845_v26 = vrot.slane %v1844_v37, 2  ;;  %v1972_v15 = vsel %vm1966_vm5, %v7934_v54, -3e+38  ;;  %v1973_v53 = vsel %vm11214_vm7, %v1971_v14, -inf  ;;  %vm1998_vm1 = vmand %vm8051_vm11, %vm1996_vm10 }
 0x1f8   : >> { %v1943_v58 = vrot.slane %v1942_v45, 4  ;;  %v1879_v59 = vrot.slane %v1878_v43, 2  ;;  %vm11233_vm14 = vmmov %vm11214_vm7  ;;  %v2004_v42 = vsel %vm1998_vm1, %v7860_v19, -3e+38  ;;  %v2025_v27 = vstv %s8027_s14  ;;  %s8223_s14 = sld [smem:[#allocation6 + %s5276_s1]] }
 0x1f9   : >> { %v1912_v23 = vrot.slane %v1911_v48, 2  ;;  %v1846_v63 = vmax.f32 %v1844_v37, %v1845_v26  ;;  %v1974_v0 = vsel %vm11233_vm14, %v1972_v15, -inf  ;;  %vm1999_vm9 = vmand %vm8056_vm6, %vm8067_vm8  ;;  %vm1921_vm15 = vcmp.eq.s32.totalorder %v1920_v17, 1  ;;  %v11296_v26 = vld [vmem:[#allocation31_spill] sm:$0xff] }
 0x1fa   : >> { %v1944_v21 = vmax.f32 %v1942_v45, %v1943_v58  ;;  %v1880_v30 = vmax.f32 %v1878_v43, %v1879_v59  ;;  %v1975_v45 = vmax.f32 %v1973_v53, %v1974_v0  ;;  %v2005_v44 = vsel %vm1999_vm9, %v7934_v54, -3e+38  ;;  %vm11235_vm0 = vmmov %vm11214_vm7 }
 0x1fb   : >> { %v1913_v52 = vmax.f32 %v1911_v48, %v1912_v23  ;;  %v1847_v51 = vrot.slane %v1846_v63, 1  ;;  %v2006_v22 = vsel %vm11235_vm0, %v2004_v42, -inf  ;;  %vm1954_vm13 = vcmp.eq.s32.totalorder %v1953_v35, 1  ;;  %vm11240_vm5 = vmmov %vm11235_vm0 }
 0x1fc   : >> { %v1945_v18 = vrot.slane %v1944_v21, 2  ;;  %v1881_v60 = vrot.slane %v1880_v30, 1  ;;  %vm8121_vm3 = vcmp.ge.s32.totalorder %v5163_v1, %v2025_v27  ;;  %vm11239_vm12 = vcmp.eq.s32.totalorder %v5163_v1, 0  ;;  %vm11245_vm1 = vmmov %vm11235_vm0  ;;  %p2296_p13 = scmp.gt.s32.totalorder %s8438_s30, %s8435_s13 }
 0x1fd   : >> { %v1914_v38 = vrot.slane %v1913_v52, 1  ;;  %v1848_v55 = vmax.f32 %v1846_v63, %v1847_v51  ;;  %v1976_v58 = vrot.slane %v1975_v45, 4  ;;  %v2007_v29 = vsel %vm11240_vm5, %v2005_v44, -inf  ;;  %vm11246_vm14 = vmmov %vm11235_vm0 }
 0x1fe   : >> { %v1946_v56 = vmax.f32 %v1944_v21, %v1945_v18  ;;  %v1882_v47 = vmax.f32 %v1880_v30, %v1881_v60  ;;  %v2008_v61 = vmax.f32 %v2006_v22, %v2007_v29  ;;  %v2028_v59 = vstv %s8030_s24  ;;  %s8239_s24 = sld [smem:[#allocation7 + %s5276_s1]]  ;;  %p8565_p3 = pnand %p2296_p13, %p8475_p7 }
 0x1ff   : >> { %v1915_v62 = vmax.f32 %v1913_v52, %v1914_v38  ;;  %v1856_v25 = vsel %vm1855_vm4, %v1848_v55, 0.0  ;;  %vm8132_vm4 = vcmp.ge.s32.totalorder %v5166_v2, %v2025_v27  ;;  %v1977_v21 = vmax.f32 %v1975_v45, %v1976_v58 }
 0x200   : >> { %v1947_v46 = vrot.slane %v1946_v56, 1  ;;  %v1889_v50 = vsel %vm1888_vm2, %v1882_v47, 0.0  ;;  %v1857_v43 = vsel %vm11239_vm12, %v1856_v25, 0.0  ;;  %vm11243_vm2 = vcmp.eq.s32.totalorder %v5163_v1, 1 }
 0x201   : >> { %v1922_v40 = vsel %vm1921_vm15, %v1915_v62, 0.0  ;;  %v1890_v23 = vsel %vm11243_vm2, %v1889_v50, %v1857_v43  ;;  %vm2029_vm11 = vcmp.lt.s32.totalorder %v5163_v1, %v2028_v59  ;;  %vm2030_vm6 = vcmp.lt.s32.totalorder %v5166_v2, %v2028_v59 }
 0x202   : >> { %v1948_v48 = vmax.f32 %v1946_v56, %v1947_v46  ;;  %v1986_v14 = vstv %s4236_s4  ;;  %v2009_v17 = vrot.slane %v2008_v61, 4  ;;  %vm2031_vm7 = vmand %vm8121_vm3, %vm2029_vm11  ;;  %v1978_v16 = vrot.slane %v1977_v21, 2  ;;  %s8684_s4 = sld [smem:[#allocation7 + %s5784_s12]] }
 0x203   : >> { %v2019_v13 = vstv %s4237_s8  ;;  %vm2032_vm10 = vmand %vm8132_vm4, %vm2030_vm6  ;;  %v2037_v63 = vsel %vm2031_vm7, %v7860_v19, -3e+38  ;;  %vm11244_vm8 = vcmp.eq.s32.totalorder %v5163_v1, 2  ;;  %v8158_v51 = vstv %s8112_s25  ;;  %s8511_s25 = sld [smem:[#allocation7 + %s5566_s11]] }
 0x204   : >> { %v1955_v39 = vsel %vm1954_vm13, %v1948_v48, 0.0  ;;  %v1923_v30 = vsel %vm11244_vm8, %v1922_v40, %v1890_v23  ;;  %v2010_v52 = vmax.f32 %v2008_v61, %v2009_v17  ;;  %v2038_v18 = vsel %vm2032_vm10, %v7934_v54, -3e+38  ;;  %p2263_p10 = scmp.gt.s32.totalorder %s8239_s24, %s8223_s14  ;;  %s8540_s8 = sld [smem:[#allocation6 + %s5622_s22]] }
 0x205   : >> { %v2039_v15 = vsel %vm11245_vm1, %v2037_v63, -inf  ;;  %v1979_v53 = vmax.f32 %v1977_v21, %v1978_v16  ;;  %v2040_v49 = vsel %vm11246_vm14, %v2038_v18, -inf  ;;  %v8160_v56 = vstv %s4238_s16  ;;  %v11308_v21 = vld [vmem:[#allocation34_spill] sm:$0xff]  ;;  %s8543_s16 = sld [smem:[#allocation7 + %s5622_s22]] }
 0x206   : >> { %v2011_v60 = vrot.slane %v2010_v52, 2  ;;  %v2041_v38 = vmax.f32 %v2039_v15, %v2040_v49  ;;  %vm11247_vm9 = vcmp.eq.s32.totalorder %v5163_v1, 3  ;;  %vm1987_vm15 = vcmp.eq.s32.totalorder %v1986_v14, 1  ;;  %p8519_p12 = pnand %p2263_p10, %p8475_p7 }
 0x207   : >> { %v1956_v19 = vsel %vm11247_vm9, %v1955_v39, %v1923_v30  ;;  %v1980_v35 = vrot.slane %v1979_v53, 1  ;;  %vm2020_vm0 = vcmp.eq.s32.totalorder %v2019_v13, 1  ;;  %vm2062_vm13 = vcmp.le.s32.totalorder %v8158_v51, 0 }
 0x208   : >> { %v2012_v0 = vmax.f32 %v2010_v52, %v2011_v60  ;;  %v2042_v54 = vrot.slane %v2041_v38, 4  ;;  %vm2063_vm3 = vcmp.le.s32.totalorder %v8158_v51, 1  ;;  %vm2064_vm5 = vcmp.le.s32.totalorder %v8158_v51, 2 }
 0x209   : >> { %v1981_v42 = vmax.f32 %v1979_v53, %v1980_v35  ;;  %vm2065_vm4 = vcmp.le.s32.totalorder %v8158_v51, 3  ;;  %vm2066_vm2 = vcmp.le.s32.totalorder %v8158_v51, 4  ;;  %vm2067_vm11 = vcmp.le.s32.totalorder %v8158_v51, 5  ;;  %p2329_p8 = scmp.gt.s32.totalorder %s8511_s25, %s8499_s28 }
 0x20a   : >> { %v2013_v27 = vrot.slane %v2012_v0, 1  ;;  %v2043_v55 = vmax.f32 %v2041_v38, %v2042_v54  ;;  %v8175_v62 = vstv %s8150_s21  ;;  %vm11248_vm14 = vcmp.eq.s32.totalorder %v5163_v1, 4  ;;  %v11278_v38 = vld [vmem:[#allocation24_spill] sm:$0xff] }
 0x20b   : >> { %v1988_v47 = vsel %vm1987_vm15, %v1981_v42, 0.0  ;;  %vm2079_vm1 = vcmp.gt.s32.totalorder %v8175_v62, 0  ;;  %vm2080_vm9 = vcmp.gt.s32.totalorder %v8175_v62, 1  ;;  %vm2081_vm12 = vcmp.gt.s32.totalorder %v8175_v62, 2  ;;  %v11284_v42 = vld [vmem:[#allocation26_spill] sm:$0xff]  ;;  %p2362_p9 = scmp.gt.s32.totalorder %s8543_s16, %s8540_s8  ;;  %p8656_p11 = pnand %p2329_p8, %p8475_p7 }
 0x20c   : >> { %v2014_v46 = vmax.f32 %v2012_v0, %v2013_v27  ;;  %v2044_v45 = vrot.slane %v2043_v55, 2  ;;  %v1989_v44 = vsel %vm11248_vm14, %v1988_v47, %v1956_v19  ;;  %vm2082_vm15 = vcmp.gt.s32.totalorder %v8175_v62, 3  ;;  %vm8186_vm10 = vmand %vm2062_vm13, %vm2079_vm1  ;;  %v11283_v0 = vld [vmem:[#allocation25_spill] sm:$0xff] }
 0x20d   : >> { %vm2083_vm14 = vcmp.gt.s32.totalorder %v8175_v62, 4  ;;  %vm8195_vm7 = vmand %vm2063_vm3, %vm2080_vm9  ;;  %vm11255_vm3 = vcmp.eq.s32.totalorder %v5163_v1, 5  ;;  %vm2085_vm6 = vcmp.gt.s32.totalorder %v8175_v62, 6  ;;  %vm2089_vm9 = vcmp.gt.s32.totalorder %v8175_v62, 10  ;;  %v11301_v47 = vld [vmem:[#allocation33_spill] sm:$0xff]  ;;  %p8708_p2 = pnand %p2362_p9, %p8475_p7 }
 0x20e   : >> { %v2021_v25 = vsel %vm2020_vm0, %v2014_v46, 0.0  ;;  %v2045_v50 = vmax.f32 %v2043_v55, %v2044_v45  ;;  %vm2084_vm0 = vcmp.gt.s32.totalorder %v8175_v62, 5  ;;  %vm8205_vm8 = vmand %vm2064_vm5, %vm2081_vm12  ;;  %vm2087_vm5 = vcmp.gt.s32.totalorder %v8175_v62, 8  ;;  %v11285_v55 = vld [vmem:[#allocation27_spill] sm:$0xff]  ;;  %v11290_v45 = vld [vmem:[#allocation28_spill] sm:$0xff] }
 0x20f   : >> { %v2022_v48 = vsel %vm11255_vm3, %v2021_v25, %v1989_v44  ;;  %vm8218_vm1 = vmand %vm2065_vm4, %vm2082_vm15  ;;  %vm2088_vm3 = vcmp.gt.s32.totalorder %v8175_v62, 9  ;;  %v2143_v59 = vsel %vm8186_vm10, %v5169_v3, -3e+38  ;;  %v2145_v14 = vsel %vm8195_vm7, %v5175_v5, -3e+38 }
 0x210   : >> { %v2046_v58 = vrot.slane %v2045_v50, 1  ;;  %vm8234_vm4 = vmand %vm2066_vm2, %vm2083_vm14  ;;  %vm11262_vm2 = vcmp.le.s32.totalorder %v8158_v51, 6  ;;  %v2147_v13 = vsel %vm8205_vm8, %v5181_v7, -3e+38  ;;  %v2149_v18 = vsel %vm8218_vm1, %v5187_v9, -3e+38 }
 0x211   : >> { %vm8247_vm13 = vmand %vm2067_vm11, %vm2084_vm0  ;;  %vm11265_vm11 = vcmp.eq.s32.totalorder %v8160_v56, 1  ;;  %vm11266_vm0 = vcmp.gt.s32.totalorder %v8175_v62, 7  ;;  %v2151_v53 = vsel %vm8234_vm4, %v5193_v11, -3e+38  ;;  %v11276_v49 = vmov 0 }
 0x212   : >> { %v2047_v61 = vmax.f32 %v2045_v50, %v2046_v58  ;;  %vm8258_vm14 = vmand %vm11262_vm2, %vm2085_vm6  ;;  %vm11267_vm2 = vcmp.le.s32.totalorder %v8158_v51, 7  ;;  %vm11271_vm6 = vcmp.le.s32.totalorder %v8158_v51, 8  ;;  %v2152_v60 = vsel %vm8234_vm4, %v5196_v12, -3e+38  ;;  %v11291_v50 = vld [vmem:[#allocation30_spill] sm:$0xff] }
 0x213   : >> { %vm8278_vm12 = vmand %vm11267_vm2, %vm11266_vm0  ;;  %vm11274_vm0 = vcmask 130048   ;;  %v2153_v56 = vsel %vm8247_vm13, %v11278_v38, -3e+38  ;;  %v2154_v54 = vsel %vm8247_vm13, %v11283_v0, -3e+38  ;;  %vm11287_vm4 = vcmp.le.s32.totalorder %v8158_v51, 11 }
 0x214   : >> { %v2054_v39 = vsel %vm11265_vm11, %v2047_v61, 0.0  ;;  %vm11270_vm11 = vcmp.eq.s32.totalorder %v5163_v1, 6  ;;  %vm8294_vm15 = vmand %vm11271_vm6, %vm2087_vm5  ;;  %vm11275_vm6 = vcmp.le.s32.totalorder %v8158_v51, 9  ;;  %v2155_v27 = vsel %vm8258_vm14, %v11284_v42, -3e+38 }
 0x215   : >> { %v2055_v30 = vsel %vm11270_vm11, %v2054_v39, %v2022_v48  ;;  %vm8314_vm2 = vmand %vm11275_vm6, %vm2088_vm3  ;;  %vm11286_vm3 = vcmp.gt.s32.totalorder %v8175_v62, 11  ;;  %v2157_v44 = vsel %vm8278_vm12, %v11290_v45, -3e+38  ;;  %v2158_v25 = vsel %vm8278_vm12, %v11117_v33, -3e+38 }
 0x216   : >> { %4239 = vst.msk [vmem:[%s6172_s20 + $0x18] sm:$0xff] %vm11274_vm0, %v2055_v30  ;;  %v11277_v49 = vsel %vm8314_vm2, 4294967295, %v11276_v49  ;;  %vm11279_vm11 = vmmov %vm11274_vm0  ;;  %vm11280_vm0 = vcmp.le.s32.totalorder %v8158_v51, 10  ;;  %v2159_v48 = vsel %vm8294_vm15, %v11291_v50, -3e+38  ;;  %v2239_v58 = vstv %s8223_s14 }
 0x217   : >> { %v2175_v19 = vsel %vm11279_vm11, %v2143_v59, -inf  ;;  %vm8329_vm5 = vmand %vm11280_vm0, %vm2089_vm9  ;;  %vm11292_vm13 = vcmp.gt.s32.totalorder %v8175_v62, 12  ;;  %vm11293_vm6 = vcmp.le.s32.totalorder %v8158_v51, 12  ;;  %v11294_v40 = vmov 0  ;;  %s4240_s14 = scalar_select %p8519_p12, 0, 1 }
 0x218   : >> { %vm8346_vm9 = vmand %vm11287_vm4, %vm11286_vm3  ;;  %v2161_v59 = vsel %vm8314_vm2, %v11296_v26, -3e+38  ;;  %vm11297_vm12 = vcmp.gt.s32.totalorder %v8175_v62, 13  ;;  %vm11298_vm0 = vcmp.le.s32.totalorder %v8158_v51, 13  ;;  %v11299_v30 = vmov 0  ;;  %v11314_v26 = vld [vmem:[#allocation36_spill] sm:$0xff] }
 0x219   : >> { %vm8364_vm11 = vmand %vm11293_vm6, %vm11292_vm13  ;;  %v2163_v61 = vsel %vm8329_vm5, %v11301_v47, -3e+38  ;;  %vm11302_vm4 = vcmask 130048   ;;  %vm11304_vm6 = vcmp.gt.s32.totalorder %v8175_v62, 14  ;;  %vm11305_vm2 = vcmp.le.s32.totalorder %v8158_v51, 14 }
 0x21a   : >> { %v11295_v40 = vsel %vm8364_vm11, 4294967295, %v11294_v40  ;;  %vm8382_vm3 = vmand %vm11298_vm0, %vm11297_vm12  ;;  %v2176_v63 = vsel %vm11302_vm4, %v2145_v14, -inf  ;;  %v2165_v16 = vsel %vm8346_vm9, %v11308_v21, -3e+38  ;;  %v2167_v21 = vsel %vm8364_vm11, %v11314_v26, -3e+38 }
 0x21b   : >> { %v11300_v30 = vsel %vm8382_vm3, 4294967295, %v11299_v30  ;;  %vm11303_vm13 = vmmov %vm11302_vm4  ;;  %v11330_v50 = vsel %vm8186_vm10, %v5172_v4, -3e+38  ;;  %v11335_v22 = vsel %vm8205_vm8, %v5184_v8, -3e+38  ;;  %vm8494_vm8 = vcmp.ge.s32.totalorder %v5166_v2, %v2239_v58 }
 0x21c   : >> { %v2177_v39 = vsel %vm11303_vm13, %v2147_v13, -inf  ;;  %vm8398_vm12 = vmand %vm11305_vm2, %vm11304_vm6  ;;  %vm11311_vm2 = vcmp.le.s32.totalorder %v8158_v51, 15  ;;  %v11337_v37 = vsel %vm8218_vm1, %v5190_v10, -3e+38  ;;  %v11355_v47 = vsel %vm8346_vm9, %v11133_v57, -3e+38 }
 0x21d   : >> { %v2178_v14 = vmax.f32 %v2175_v19, %v2177_v39  ;;  %vm11309_vm0 = vmmov %vm11302_vm4  ;;  %vm11310_vm4 = vcmp.gt.s32.totalorder %v8175_v62, 15  ;;  %v11317_v62 = vld [vmem:[#allocation38_spill] sm:$0xff]  ;;  %v2172_v23 = vsel %vm8398_vm12, %v5256_v32, -3e+38 }
 0x21e   : >> { %v2179_v13 = vsel %vm11309_vm0, %v2149_v18, -inf  ;;  %vm8413_vm13 = vmand %vm11311_vm2, %vm11310_vm4  ;;  %v11316_v18 = vld [vmem:[#allocation37_spill] sm:$0xff]  ;;  %v2183_v45 = vsel %vm11309_vm0, %v2153_v56, -inf }
 0x21f   : >> { %v2180_v19 = vmax.f32 %v2176_v63, %v2179_v13  ;;  %vm11315_vm6 = vmmov %vm11309_vm0  ;;  %v2169_v51 = vsel %vm8382_vm3, %v11316_v18, -3e+38  ;;  %v2173_v56 = vsel %vm8413_vm13, %v11145_v41, -3e+38  ;;  %v2174_v17 = vsel %vm8413_vm13, %v5262_v34, -3e+38 }
 0x220   : >> { %v2181_v39 = vsel %vm11315_vm6, %v2151_v53, -inf  ;;  %vm11318_vm4 = vmmov %vm11309_vm0  ;;  %v2171_v53 = vsel %vm8398_vm12, %v5253_v31, -3e+38  ;;  %vm11357_vm13 = vnez %v11295_v40 }
 0x221   : >> { %v2182_v33 = vmax.f32 %v2178_v14, %v2181_v39  ;;  %v2184_v26 = vmax.f32 %v2180_v19, %v2183_v45  ;;  %v2185_v42 = vsel %vm11318_vm4, %v2155_v27, -inf  ;;  %vm11319_vm2 = vmmov %vm11309_vm0  ;;  %v11325_v14 = vmov 0 }
 0x222   : >> { %v2187_v15 = vsel %vm11319_vm2, %v2157_v44, -inf  ;;  %vm11320_vm11 = vmmov %vm11309_vm0  ;;  %v11322_v44 = vmov 0  ;;  %v2195_v39 = vsel %vm11319_vm2, %v2165_v16, -inf }
 0x223   : >> { %v2189_v63 = vsel %vm11320_vm11, %v2159_v48, -inf  ;;  %v2186_v27 = vmax.f32 %v2182_v33, %v2185_v42  ;;  %vm11321_vm6 = vmmov %vm11309_vm0  ;;  %vm8448_vm11 = vcmp.ge.s32.totalorder %v5163_v1, %v2239_v58  ;;  %v11324_v48 = vstv %s8239_s24 }
 0x224   : >> { %v2191_v45 = vsel %vm11321_vm6, %v2161_v59, -inf  ;;  %v11323_v44 = vsel %vm8448_vm11, 4294967295, %v11322_v44  ;;  %vm8455_vm0 = vcmp.lt.s32.totalorder %v5163_v1, %v11324_v48  ;;  %v2188_v13 = vmax.f32 %v2184_v26, %v2187_v15  ;;  %vm11327_vm4 = vmmov %vm11319_vm2 }
 0x225   : >> { %v11326_v14 = vsel %vm8455_vm0, 4294967295, %v11325_v14  ;;  %v2193_v19 = vsel %vm11327_vm4, %v2163_v61, -inf  ;;  %vm11328_vm3 = vmmov %vm11319_vm2  ;;  %v2190_v42 = vmax.f32 %v2186_v27, %v2189_v63  ;;  %v11332_v15 = vsel %vm8195_vm7, %v5178_v6, -3e+38 }
 0x226   : >> { %v2197_v33 = vsel %vm11328_vm3, %v2167_v21, -inf  ;;  %vm11329_vm6 = vmmov %vm11319_vm2  ;;  %v2192_v21 = vmax.f32 %v2188_v13, %v2191_v45 }
 0x227   : >> { %v2199_v59 = vsel %vm11329_vm6, %v2169_v51, -inf  ;;  %vm11331_vm11 = vmmov %vm11319_vm2  ;;  %v2194_v51 = vmax.f32 %v2190_v42, %v2193_v19  ;;  %vm11350_vm6 = vnez %v11277_v49 }
 0x228   : >> { %v2206_v48 = vsel %vm11331_vm11, %v11330_v50, -inf  ;;  %vm11333_vm0 = vmmov %vm11319_vm2  ;;  %v2196_v29 = vmax.f32 %v2192_v21, %v2195_v39  ;;  %v11353_v21 = vsel %vm8329_vm5, %v5232_v24, -3e+38  ;;  %vm11361_vm5 = vnez %v11300_v30 }
 0x229   : >> { %v2207_v61 = vsel %vm11333_vm0, %v11332_v15, -inf  ;;  %vm11336_vm10 = vmmov %vm11333_vm0 }
 0x22a   : >> { %v2208_v50 = vsel %vm11336_vm10, %v11335_v22, -inf  ;;  %vm11338_vm7 = vmmov %vm11333_vm0 }
 0x22b   : >> { %v2210_v26 = vsel %vm11338_vm7, %v11337_v37, -inf  ;;  %vm11339_vm3 = vmmov %vm11333_vm0  ;;  %v2209_v63 = vmax.f32 %v2206_v48, %v2208_v50  ;;  %v11358_v37 = vsel %vm11357_vm13, %v5244_v28, -3e+38 }
 0x22c   : >> { %v2212_v16 = vsel %vm11339_vm3, %v2152_v60, -inf  ;;  %v2211_v27 = vmax.f32 %v2207_v61, %v2210_v26  ;;  %vm11340_vm11 = vmmov %vm11333_vm0  ;;  %v11344_v60 = vsel %vm8258_vm14, %v11285_v55, -3e+38  ;;  %vm11364_vm3 = vnez %v11326_v14 }
 0x22d   : >> { %v2214_v43 = vsel %vm11340_vm11, %v2154_v54, -inf  ;;  %vm11343_vm1 = vmmov %vm11333_vm0  ;;  %v2216_v19 = vsel %vm11333_vm0, %v11344_v60, -inf  ;;  %v2198_v54 = vmax.f32 %v2194_v51, %v2197_v33  ;;  %v2213_v48 = vmax.f32 %v2209_v63, %v2212_v16 }
 0x22e   : >> { %v2201_v13 = vsel %vm11343_vm1, %v2171_v53, -inf  ;;  %vm11345_vm4 = vmmov %vm11333_vm0  ;;  %v2215_v39 = vmax.f32 %v2211_v27, %v2214_v43  ;;  %v11348_v53 = vsel %vm8294_vm15, %v5220_v20, -3e+38  ;;  %v11351_v33 = vsel %vm11350_vm6, %v10953_v36, -3e+38 }
 0x22f   : >> { %v2218_v42 = vsel %vm11345_vm4, %v2158_v25, -inf  ;;  %vm11346_vm2 = vmmov %vm11333_vm0  ;;  %v2200_v25 = vmax.f32 %v2196_v29, %v2199_v59  ;;  %v2202_v59 = vmax.f32 %v2198_v54, %v2201_v13  ;;  %v2217_v61 = vmax.f32 %v2213_v48, %v2216_v19 }
 0x230   : >> { %v2203_v58 = vsel %vm11346_vm2, %v2173_v56, -inf  ;;  %vm11349_vm14 = vmmov %vm11333_vm0  ;;  %v2219_v52 = vmax.f32 %v2215_v39, %v2218_v42  ;;  %v2273_v16 = vstv %s8435_s13  ;;  %v2276_v51 = vstv %s8438_s30  ;;  %s8609_s13 = sld [smem:[#allocation6 + %s5673_s7]] }
 0x231   : >> { %v2220_v56 = vsel %vm11349_vm14, %v11348_v53, -inf  ;;  %vm11352_vm10 = vmmov %vm11333_vm0  ;;  %v2204_v49 = vmax.f32 %v2200_v25, %v2203_v58  ;;  %v11362_v63 = vsel %vm11361_vm5, %v11317_v62, -3e+38  ;;  %vm11365_vm11 = vnez %v11323_v44  ;;  %s9167_s30 = sld [smem:[#allocation7 + %s5510_s19]] }
 0x232   : >> { %v2222_v15 = vsel %vm11352_vm10, %v11351_v33, -inf  ;;  %vm11354_vm15 = vmmov %vm11333_vm0  ;;  %v2221_v35 = vmax.f32 %v2217_v61, %v2220_v56  ;;  %vm8590_vm4 = vcmp.lt.s32.totalorder %v5163_v1, %v2276_v51  ;;  %v2232_v60 = vsel %vm11346_vm2, %v2172_v23, -inf }
 0x233   : >> { %v2224_v22 = vsel %vm11354_vm15, %v11353_v21, -inf  ;;  %vm11356_vm12 = vmmov %vm11333_vm0  ;;  %v2223_v46 = vmax.f32 %v2219_v52, %v2222_v15  ;;  %v8573_v40 = vmax.f32 %v2202_v59, %v2204_v49  ;;  %v11370_v19 = vstv %s8239_s24  ;;  %s4241_s24 = scalar_select %p8565_p3, 0, 1 }
 0x234   : >> { %v2226_v50 = vsel %vm11356_vm12, %v11355_v47, -inf  ;;  %vm11359_vm7 = vmmov %vm11333_vm0  ;;  %v2225_v30 = vmax.f32 %v2221_v35, %v2224_v22  ;;  %vm8600_vm14 = vcmp.lt.s32.totalorder %v5166_v2, %v11370_v19  ;;  %vm8613_vm15 = vcmp.ge.s32.totalorder %v5166_v2, %v2273_v16 }
 0x235   : >> { %v2228_v26 = vsel %vm11359_vm7, %v11358_v37, -inf  ;;  %vm11363_vm9 = vmmov %vm11333_vm0  ;;  %vm8585_vm0 = vcmp.ge.s32.totalorder %v5163_v1, %v2273_v16  ;;  %v2227_v13 = vmax.f32 %v2223_v46, %v2226_v50  ;;  %vm8618_vm12 = vcmp.lt.s32.totalorder %v5166_v2, %v2276_v51 }
 0x236   : >> { %v2230_v27 = vsel %vm11363_vm9, %v11362_v63, -inf  ;;  %vm2245_vm1 = vmand %vm11365_vm11, %vm11364_vm3  ;;  %v2306_v39 = vstv %s8499_s28  ;;  %v2229_v23 = vmax.f32 %v2225_v30, %v2228_v26  ;;  %v8631_v56 = vstv %s4240_s14  ;;  %s8671_s28 = sld [smem:[#allocation7 + %s5673_s7]] }
 0x237   : >> { %vm2279_vm6 = vmand %vm8585_vm0, %vm8590_vm4  ;;  %v2231_v25 = vmax.f32 %v2227_v13, %v2230_v27  ;;  %v2251_v53 = vsel %vm2245_vm1, %v8573_v40, -3e+38  ;;  %vm8641_vm7 = vcmp.ge.s32.totalorder %v5163_v1, %v2306_v39  ;;  %vm8646_vm5 = vcmp.ge.s32.totalorder %v5166_v2, %v2306_v39  ;;  %s4242_s14 = scalar_select %p8656_p11, 0, 1 }
 0x238   : >> { %vm11373_vm10 = vmmov %vm11346_vm2  ;;  %v2285_v33 = vsel %vm2279_vm6, %v8573_v40, -3e+38  ;;  %v2309_v15 = vstv %s8511_s25  ;;  %v8674_v49 = vstv %s4241_s24  ;;  %v2339_v21 = vstv %s8540_s8  ;;  %s8681_s25 = sld [smem:[#allocation6 + %s5784_s12]] }
 0x239   : >> { %v2234_v54 = vsel %vm11373_vm10, %v2174_v17, -inf  ;;  %vm2246_vm13 = vmand %vm8494_vm8, %vm8600_vm14  ;;  %v2233_v17 = vmax.f32 %v2229_v23, %v2232_v60  ;;  %vm2310_vm3 = vcmp.lt.s32.totalorder %v5163_v1, %v2309_v15  ;;  %vm8666_vm11 = vcmp.lt.s32.totalorder %v5166_v2, %v2309_v15  ;;  %s4243_s8 = scalar_select %p8708_p2, 0, 1 }
 0x23a   : >> { %v2235_v59 = vmax.f32 %v2231_v25, %v2234_v54  ;;  %vm2280_vm9 = vmand %vm8613_vm15, %vm8618_vm12  ;;  %v2342_v22 = vstv %s8543_s16  ;;  %vm8699_vm6 = vcmp.ge.s32.totalorder %v5166_v2, %v2339_v21  ;;  %v2372_v27 = vstv %s8609_s13  ;;  %s8753_s16 = sld [smem:[#allocation6 + %s5871_s2]] }
 0x23b   : >> { %vm11385_vm1 = vmmov %vm11346_vm2  ;;  %vm8694_vm2 = vcmp.ge.s32.totalorder %v5163_v1, %v2339_v21  ;;  %v8741_v54 = vstv %s4242_s14  ;;  %s8756_s24 = sld [smem:[#allocation7 + %s5871_s2]] }
 0x23c   : >> { %v2253_v52 = vsel %vm11385_vm1, %v2251_v53, -inf  ;;  %vm2312_vm0 = vmand %vm8641_vm7, %vm2310_vm3  ;;  %v8686_v47 = vmax.f32 %v2233_v17, %v2235_v59  ;;  %vm2344_vm3 = vcmp.lt.s32.totalorder %v5166_v2, %v2342_v22  ;;  %v2375_v14 = vstv %s8671_s28  ;;  %p2395_p6 = scmp.gt.s32.totalorder %s8671_s28, %s8609_s13  ;;  %s8884_s14 = sld [smem:[#allocation5 + %s5784_s12]] }
 0x23d   : >> { %vm2313_vm4 = vmand %vm8646_vm5, %vm8666_vm11  ;;  %v2318_v50 = vsel %vm2312_vm0, %v8573_v40, -3e+38  ;;  %vm2343_vm5 = vcmp.lt.s32.totalorder %v5163_v1, %v2342_v22  ;;  %v2408_v17 = vstv %s8684_s4  ;;  %v8768_v22 = vstv %s4243_s8  ;;  %s8966_s8 = sld [smem:[#allocation6 + %s5276_s1]] }
 0x23e   : >> { %vm11391_vm10 = vmmov %vm11385_vm1  ;;  %v2252_v16 = vsel %vm2246_vm13, %v8686_v47, -3e+38  ;;  %v2286_v51 = vsel %vm2280_vm9, %v8686_v47, -3e+38  ;;  %v2319_v63 = vsel %vm2313_vm4, %v8686_v47, -3e+38  ;;  %vm8748_vm13 = vcmp.ge.s32.totalorder %v5163_v1, %v2372_v27  ;;  %p2428_p0 = scmp.gt.s32.totalorder %s8684_s4, %s8681_s25  ;;  %p8815_p5 = pnand %p2395_p6, %p8475_p7 }
 0x23f   : >> { %v2287_v35 = vsel %vm11391_vm10, %v2285_v33, -inf  ;;  %vm11392_vm7 = vmmov %vm11385_vm1  ;;  %v2254_v45 = vsel %vm11385_vm1, %v2252_v16, -inf  ;;  %vm2268_vm9 = vcmp.eq.s32.totalorder %v8631_v56, 1  ;;  %vm2301_vm4 = vcmp.eq.s32.totalorder %v8674_v49, 1  ;;  %s9229_s28 = sld [smem:[#allocation6 + %s5566_s11]] }
 0x240   : >> { %v2320_v46 = vsel %vm11392_vm7, %v2318_v50, -inf  ;;  %vm2345_vm11 = vmand %vm8694_vm2, %vm2343_vm5  ;;  %v2255_v13 = vmax.f32 %v2253_v52, %v2254_v45  ;;  %vm8761_vm2 = vcmp.ge.s32.totalorder %v5166_v2, %v2372_v27  ;;  %v2405_v15 = vstv %s8681_s25  ;;  %p8829_p4 = pnand %p2428_p0, %p8475_p7  ;;  %s8847_s25 = sld [smem:[#allocation4 + %s5784_s12]] }
 0x241   : >> { %vm11393_vm0 = vmmov %vm11385_vm1  ;;  %v2351_v30 = vsel %vm2345_vm11, %v8573_v40, -3e+38  ;;  %vm8772_vm10 = vcmp.lt.s32.totalorder %v5166_v2, %v2375_v14  ;;  %vm8779_vm7 = vcmp.ge.s32.totalorder %v5163_v1, %v2405_v15  ;;  %vm8793_vm11 = vcmp.ge.s32.totalorder %v5166_v2, %v2405_v15  ;;  %p2461_p1 = scmp.gt.s32.totalorder %s8756_s24, %s8753_s16  ;;  %s9564_s13 = sld [smem:[#allocation5 + %s5871_s2]] }
 0x242   : >> { %v2288_v43 = vsel %vm11393_vm0, %v2286_v51, -inf  ;;  %vm11394_vm8 = vmmov %vm11393_vm0  ;;  %v2256_v23 = vrot.slane %v2255_v13, 4  ;;  %vm2409_vm1 = vcmp.lt.s32.totalorder %v5163_v1, %v2408_v17  ;;  %s4244_s4 = scalar_select %p8815_p5, 0, 1 }
 0x243   : >> { %v2321_v29 = vsel %vm11394_vm8, %v2319_v63, -inf  ;;  %vm2346_vm14 = vmand %vm8699_vm6, %vm2344_vm3  ;;  %v2289_v60 = vmax.f32 %v2287_v35, %v2288_v43  ;;  %vm2376_vm6 = vcmp.lt.s32.totalorder %v5163_v1, %v2375_v14  ;;  %p8842_p10 = pnand %p2461_p1, %p8475_p7 }
 0x244   : >> { %v2322_v19 = vmax.f32 %v2320_v46, %v2321_v29  ;;  %v2352_v42 = vsel %vm2346_vm14, %v8686_v47, -3e+38  ;;  %vm11395_vm15 = vmmov %vm11393_vm0  ;;  %v2257_v59 = vmax.f32 %v2255_v13, %v2256_v23  ;;  %vm2334_vm14 = vcmp.eq.s32.totalorder %v8741_v54, 1  ;;  %s4245_s18 = scalar_select %p8829_p4, 0, 1 }
 0x245   : >> { %v2353_v58 = vsel %vm11395_vm15, %v2351_v30, -inf  ;;  %vm11396_vm12 = vmmov %vm11393_vm0  ;;  %v2290_v25 = vrot.slane %v2289_v60, 4  ;;  %vm8799_vm0 = vcmp.lt.s32.totalorder %v5166_v2, %v2408_v17  ;;  %s4246_s21 = scalar_select %p8842_p10, 0, 1 }
 0x246   : >> { %v2354_v48 = vsel %vm11396_vm12, %v2352_v42, -inf  ;;  %v2323_v53 = vrot.slane %v2322_v19, 4  ;;  %v2258_v26 = vrot.slane %v2257_v59, 2  ;;  %vm2378_vm5 = vmand %vm8748_vm13, %vm2376_vm6  ;;  %vm2367_vm13 = vcmp.eq.s32.totalorder %v8768_v22, 1  ;;  %p9205_p7 = scmp.gt.s32.totalorder %s8884_s14, %s8847_s25 }
 0x247   : >> { %v2355_v33 = vmax.f32 %v2353_v58, %v2354_v48  ;;  %v2291_v61 = vmax.f32 %v2289_v60, %v2290_v25  ;;  %vm2379_vm3 = vmand %vm8761_vm2, %vm8772_vm10  ;;  %v2384_v51 = vsel %vm2378_vm5, %v8573_v40, -3e+38 }
 0x248   : >> { %v2324_v52 = vmax.f32 %v2322_v19, %v2323_v53  ;;  %v2259_v45 = vmax.f32 %v2257_v59, %v2258_v26  ;;  %vm2411_vm8 = vmand %vm8779_vm7, %vm2409_vm1  ;;  %v2385_v13 = vsel %vm2379_vm3, %v8686_v47, -3e+38  ;;  %vm11416_vm7 = vcmp.eq.s32.totalorder %v5163_v1, 0 }
 0x249   : >> { %v2356_v21 = vrot.slane %v2355_v33, 4  ;;  %v2292_v35 = vrot.slane %v2291_v61, 2  ;;  %vm11409_vm15 = vmmov %vm11396_vm12  ;;  %v2417_v19 = vsel %vm2411_vm8, %v8573_v40, -3e+38 }
 0x24a   : >> { %v2325_v46 = vrot.slane %v2324_v52, 2  ;;  %v2386_v60 = vsel %vm11409_vm15, %v2384_v51, -inf  ;;  %vm2412_vm12 = vmand %vm8793_vm11, %vm8799_vm0  ;;  %v2260_v42 = vrot.slane %v2259_v45, 1  ;;  %v2399_v51 = vstv %s4244_s4  ;;  %s9251_s4 = sld [smem:[#allocation7 + %s5566_s11]] }
 0x24b   : >> { %v2357_v16 = vmax.f32 %v2355_v33, %v2356_v21  ;;  %v2293_v43 = vmax.f32 %v2291_v61, %v2292_v35  ;;  %vm11412_vm2 = vmmov %vm11409_vm15  ;;  %v2418_v25 = vsel %vm2412_vm12, %v8686_v47, -3e+38  ;;  %v2438_v61 = vstv %s8753_s16  ;;  %s8980_s16 = sld [smem:[#allocation7 + %s5276_s1]] }
 0x24c   : >> { %v2326_v29 = vmax.f32 %v2324_v52, %v2325_v46  ;;  %v2387_v23 = vsel %vm11412_vm2, %v2385_v13, -inf  ;;  %vm11413_vm6 = vmmov %vm11412_vm2  ;;  %v2261_v33 = vmax.f32 %v2259_v45, %v2260_v42  ;;  %v2441_v52 = vstv %s8756_s24  ;;  %s9164_s24 = sld [smem:[#allocation6 + %s5510_s19]] }
 0x24d   : >> { %v2358_v30 = vrot.slane %v2357_v16, 2  ;;  %v2294_v58 = vrot.slane %v2293_v43, 1  ;;  %v2419_v53 = vsel %vm11413_vm6, %v2417_v19, -inf  ;;  %v2388_v17 = vmax.f32 %v2386_v60, %v2387_v23  ;;  %vm11415_vm10 = vmmov %vm11412_vm2 }
 0x24e   : >> { %v2327_v48 = vrot.slane %v2326_v29, 1  ;;  %v2420_v59 = vsel %vm11415_vm10, %v2418_v25, -inf  ;;  %v2269_v21 = vsel %vm2268_vm9, %v2261_v33, 0.0  ;;  %vm2439_vm5 = vcmp.ge.s32.totalorder %v5163_v1, %v2438_v61  ;;  %vm11422_vm15 = vmmov %vm11412_vm2 }
 0x24f   : >> { %v2359_v39 = vmax.f32 %v2357_v16, %v2358_v30  ;;  %v2295_v44 = vmax.f32 %v2293_v43, %v2294_v58  ;;  %v2270_v35 = vsel %vm11416_vm7, %v2269_v21, 0.0  ;;  %v2389_v46 = vrot.slane %v2388_v17, 4 }
 0x250   : >> { %v2328_v14 = vmax.f32 %v2326_v29, %v2327_v48  ;;  %v2421_v16 = vmax.f32 %v2419_v53, %v2420_v59  ;;  %vm11417_vm9 = vcmp.eq.s32.totalorder %v5163_v1, 1  ;;  %vm2442_vm3 = vcmp.lt.s32.totalorder %v5163_v1, %v2441_v52  ;;  %p2742_p9 = scmp.gt.s32.totalorder %s9251_s4, %s9229_s28 }
 0x251   : >> { %v2360_v15 = vrot.slane %v2359_v39, 1  ;;  %v2302_v50 = vsel %vm2301_vm4, %v2295_v44, 0.0  ;;  %vm8868_vm4 = vcmp.ge.s32.totalorder %v5166_v2, %v2438_v61  ;;  %v2390_v54 = vmax.f32 %v2388_v17, %v2389_v46  ;;  %vm2444_vm1 = vmand %vm2439_vm5, %vm2442_vm3  ;;  %p2676_p13 = scmp.gt.s32.totalorder %s8980_s16, %s8966_s8 }
 0x252   : >> { %v2335_v37 = vsel %vm2334_vm14, %v2328_v14, 0.0  ;;  %v2303_v56 = vsel %vm11417_vm9, %v2302_v50, %v2270_v35  ;;  %v2422_v63 = vrot.slane %v2421_v16, 4  ;;  %vm2443_vm11 = vcmp.lt.s32.totalorder %v5166_v2, %v2441_v52  ;;  %vm11421_vm14 = vmmov %vm11412_vm2  ;;  %v11467_v35 = vld [vmem:[#allocation29_spill] sm:$0xff]  ;;  %p2709_p12 = scmp.gt.s32.totalorder %s9167_s30, %s9164_s24  ;;  %p9378_p11 = pnand %p2742_p9, %p9205_p7 }
 0x253   : >> { %v2361_v26 = vmax.f32 %v2359_v39, %v2360_v15  ;;  %vm11420_vm0 = vcmp.eq.s32.totalorder %v5163_v1, 2  ;;  %v2432_v43 = vstv %s4245_s18  ;;  %vm2445_vm8 = vmand %vm8868_vm4, %vm2443_vm11  ;;  %v2450_v29 = vsel %vm2444_vm1, %v8573_v40, -3e+38  ;;  %p9243_p3 = pnand %p2676_p13, %p9205_p7  ;;  %s9390_s18 = sld [smem:[#allocation6 + %s5784_s12]] }
 0x254   : >> { %v2336_v27 = vsel %vm11420_vm0, %v2335_v37, %v2303_v56  ;;  %v2391_v30 = vrot.slane %v2390_v54, 2  ;;  %v2423_v13 = vmax.f32 %v2421_v16, %v2422_v63  ;;  %v2451_v60 = vsel %vm2445_vm8, %v8686_v47, -3e+38  ;;  %v11468_v16 = vld [vmem:[#allocation30_spill] sm:$0xff]  ;;  %v11473_v63 = vld [vmem:[#allocation31_spill] sm:$0xff]  ;;  %p9271_p8 = pnand %p2709_p12, %p9205_p7 }
 0x255   : >> { %v2368_v45 = vsel %vm2367_vm13, %v2361_v26, 0.0  ;;  %v2452_v19 = vsel %vm11421_vm14, %v2450_v29, -inf  ;;  %v2453_v42 = vsel %vm11422_vm15, %v2451_v60, -inf  ;;  %v8890_v58 = vstv %s8847_s25  ;;  %v11474_v29 = vld [vmem:[#allocation33_spill] sm:$0xff]  ;;  %s9911_s25 = sld [smem:[#allocation6 + %s5566_s11]] }
 0x256   : >> { %v2392_v22 = vmax.f32 %v2390_v54, %v2391_v30  ;;  %v2424_v48 = vrot.slane %v2423_v13, 2  ;;  %v2454_v39 = vmax.f32 %v2452_v19, %v2453_v42  ;;  %v8892_v23 = vstv %s4246_s21  ;;  %s9276_s21 = sld [smem:[#allocation6 + %s5622_s22]] }
 0x257   : >> { %vm11423_vm12 = vcmp.eq.s32.totalorder %v5163_v1, 3  ;;  %vm2400_vm13 = vcmp.eq.s32.totalorder %v2399_v51, 1  ;;  %vm2433_vm2 = vcmp.eq.s32.totalorder %v2432_v43, 1  ;;  %vm2475_vm6 = vcmp.le.s32.totalorder %v8890_v58, 0 }
 0x258   : >> { %v2369_v40 = vsel %vm11423_vm12, %v2368_v45, %v2336_v27  ;;  %v2393_v25 = vrot.slane %v2392_v22, 1  ;;  %v2425_v53 = vmax.f32 %v2423_v13, %v2424_v48  ;;  %v2455_v47 = vrot.slane %v2454_v39, 4 }
 0x259   : >> { %vm2476_vm7 = vcmp.le.s32.totalorder %v8890_v58, 1  ;;  %vm2477_vm5 = vcmp.le.s32.totalorder %v8890_v58, 2  ;;  %vm2478_vm9 = vcmp.le.s32.totalorder %v8890_v58, 3  ;;  %vm2479_vm4 = vcmp.le.s32.totalorder %v8890_v58, 4 }
 0x25a   : >> { %v2394_v33 = vmax.f32 %v2392_v22, %v2393_v25  ;;  %v2426_v44 = vrot.slane %v2425_v53, 1  ;;  %v2456_v14 = vmax.f32 %v2454_v39, %v2455_v47  ;;  %vm2480_vm3 = vcmp.le.s32.totalorder %v8890_v58, 5 }
 0x25b   : >> { %v8907_v15 = vstv %s8884_s14  ;;  %v2655_v49 = vstv %s8980_s16  ;;  %s9282_s14 = sld [smem:[#allocation7 + %s5622_s22]] }
 0x25c   : >> { %v2401_v17 = vsel %vm2400_vm13, %v2394_v33, 0.0  ;;  %v2427_v59 = vmax.f32 %v2425_v53, %v2426_v44  ;;  %v2457_v61 = vrot.slane %v2456_v14, 2  ;;  %vm2492_vm8 = vcmp.gt.s32.totalorder %v8907_v15, 0  ;;  %s4248_s16 = scalar_select %p9243_p3, 0, 1 }
 0x25d   : >> { %vm2493_vm15 = vcmp.gt.s32.totalorder %v8907_v15, 1  ;;  %vm2494_vm12 = vcmp.gt.s32.totalorder %v8907_v15, 2  ;;  %vm2495_vm10 = vcmp.gt.s32.totalorder %v8907_v15, 3  ;;  %vm8917_vm1 = vmand %vm2475_vm6, %vm2492_vm8  ;;  %vm11426_vm13 = vcmp.eq.s32.totalorder %v5163_v1, 4 }
 0x25e   : >> { %v2402_v21 = vsel %vm11426_vm13, %v2401_v17, %v2369_v40  ;;  %v2434_v50 = vsel %vm2433_vm2, %v2427_v59, 0.0  ;;  %v2458_v37 = vmax.f32 %v2456_v14, %v2457_v61  ;;  %vm2496_vm14 = vcmp.gt.s32.totalorder %v8907_v15, 4  ;;  %vm8927_vm0 = vmand %vm2476_vm7, %vm2493_vm15  ;;  %v11462_v17 = vld [vmem:[#allocation26_spill] sm:$0xff] }
 0x25f   : >> { %vm2497_vm13 = vcmp.gt.s32.totalorder %v8907_v15, 5  ;;  %vm8937_vm2 = vmand %vm2477_vm5, %vm2494_vm12  ;;  %vm2498_vm6 = vcmp.gt.s32.totalorder %v8907_v15, 6  ;;  %vm11433_vm5 = vcmp.eq.s32.totalorder %v5163_v1, 5  ;;  %vm2499_vm8 = vcmp.gt.s32.totalorder %v8907_v15, 7 }
 0x260   : >> { %v2459_v46 = vrot.slane %v2458_v37, 1  ;;  %vm8948_vm11 = vmand %vm2478_vm9, %vm2495_vm10  ;;  %v2435_v56 = vsel %vm11433_vm5, %v2434_v50, %v2402_v21  ;;  %vm2500_vm7 = vcmp.gt.s32.totalorder %v8907_v15, 8  ;;  %vm2501_vm10 = vcmp.gt.s32.totalorder %v8907_v15, 9  ;;  %v11463_v21 = vld [vmem:[#allocation28_spill] sm:$0xff] }
 0x261   : >> { %vm8961_vm15 = vmand %vm2479_vm4, %vm2496_vm14  ;;  %vm2504_vm4 = vcmp.gt.s32.totalorder %v8907_v15, 12  ;;  %vm11438_vm9 = vcmp.le.s32.totalorder %v8890_v58, 6  ;;  %v2556_v27 = vsel %vm8917_vm1, %v5169_v3, -3e+38  ;;  %v2558_v30 = vsel %vm8927_vm0, %v5175_v5, -3e+38  ;;  %p2775_p2 = scmp.gt.s32.totalorder %s9282_s14, %s9276_s21 }
 0x262   : >> { %v2460_v54 = vmax.f32 %v2458_v37, %v2459_v46  ;;  %vm8975_vm12 = vmand %vm2480_vm3, %vm2497_vm13  ;;  %vm11441_vm3 = vcmp.eq.s32.totalorder %v8892_v23, 1  ;;  %vm11446_vm13 = vcmp.le.s32.totalorder %v8890_v58, 8  ;;  %v2560_v42 = vsel %vm8937_vm2, %v5181_v7, -3e+38 }
 0x263   : >> { %vm8988_vm5 = vmand %vm11438_vm9, %vm2498_vm6  ;;  %vm11442_vm6 = vcmp.le.s32.totalorder %v8890_v58, 7  ;;  %v2561_v22 = vsel %vm8937_vm2, %v5184_v8, -3e+38  ;;  %v2562_v48 = vsel %vm8948_vm11, %v5187_v9, -3e+38  ;;  %p9434_p6 = pnand %p2775_p2, %p9205_p7 }
 0x264   : >> { %v2467_v43 = vsel %vm11441_vm3, %v2460_v54, 0.0  ;;  %vm9005_vm9 = vmand %vm11442_vm6, %vm2499_vm8  ;;  %vm11445_vm3 = vcmp.eq.s32.totalorder %v5163_v1, 6  ;;  %vm11449_vm8 = vcmask 130048   ;;  %v2563_v23 = vsel %vm8948_vm11, %v5190_v10, -3e+38 }
 0x265   : >> { %v2468_v60 = vsel %vm11445_vm3, %v2467_v43, %v2435_v56  ;;  %vm9021_vm14 = vmand %vm11446_vm13, %vm2500_vm7  ;;  %vm11450_vm7 = vcmp.le.s32.totalorder %v8890_v58, 9  ;;  %v2564_v40 = vsel %vm8961_vm15, %v5193_v11, -3e+38  ;;  %vm11454_vm3 = vcmp.gt.s32.totalorder %v8907_v15, 10 }
 0x266   : >> { %4247 = vst.msk [vmem:[%s6172_s20 + $0x20] sm:$0xff] %vm11449_vm8, %v2468_v60  ;;  %vm9041_vm13 = vmand %vm11450_vm7, %vm2501_vm10  ;;  %v2565_v47 = vsel %vm8961_vm15, %v5196_v12, -3e+38  ;;  %v2566_v33 = vsel %vm8975_vm12, %v11278_v38, -3e+38  ;;  %vm11458_vm11 = vcmp.gt.s32.totalorder %v8907_v15, 11  ;;  %v2652_v54 = vstv %s8966_s8 }
 0x267   : >> { %vm11453_vm2 = vmmov %vm11449_vm8  ;;  %vm11455_vm8 = vcmp.le.s32.totalorder %v8890_v58, 10  ;;  %v2567_v44 = vsel %vm8975_vm12, %v11283_v0, -3e+38  ;;  %vm11459_vm10 = vcmp.le.s32.totalorder %v8890_v58, 11  ;;  %v2568_v59 = vsel %vm8988_vm5, %v11462_v17, -3e+38 }
 0x268   : >> { %v2588_v25 = vsel %vm11453_vm2, %v2556_v27, -inf  ;;  %vm9056_vm6 = vmand %vm11455_vm8, %vm11454_vm3  ;;  %v2569_v61 = vsel %vm8988_vm5, %v11285_v55, -3e+38  ;;  %v2570_v50 = vsel %vm9005_vm9, %v11463_v21, -3e+38  ;;  %vm11464_vm15 = vcmp.le.s32.totalorder %v8890_v58, 12 }
 0x269   : >> { %vm9073_vm7 = vmand %vm11459_vm10, %vm11458_vm11  ;;  %v2571_v46 = vsel %vm9005_vm9, %v11467_v35, -3e+38  ;;  %v2572_v56 = vsel %vm9021_vm14, %v11468_v16, -3e+38  ;;  %vm11469_vm5 = vcmp.gt.s32.totalorder %v8907_v15, 13  ;;  %vm11475_vm9 = vcmp.gt.s32.totalorder %v8907_v15, 14 }
 0x26a   : >> { %vm9090_vm12 = vmand %vm11464_vm15, %vm2504_vm4  ;;  %vm11470_vm4 = vcmp.le.s32.totalorder %v8890_v58, 13  ;;  %v2574_v27 = vsel %vm9041_vm13, %v11473_v63, -3e+38  ;;  %v2575_v43 = vsel %vm9041_vm13, %v10953_v36, -3e+38  ;;  %vm11476_vm3 = vcmp.le.s32.totalorder %v8890_v58, 14 }
 0x26b   : >> { %vm9108_vm2 = vmand %vm11470_vm4, %vm11469_vm5  ;;  %v2576_v60 = vsel %vm9056_vm6, %v11474_v29, -3e+38  ;;  %v11479_v63 = vld [vmem:[#allocation34_spill] sm:$0xff]  ;;  %vm11480_vm13 = vcmask 130048   ;;  %vm11482_vm10 = vcmp.gt.s32.totalorder %v8907_v15, 15  ;;  %vm11483_vm15 = vcmp.le.s32.totalorder %v8890_v58, 15 }
 0x26c   : >> { %vm9126_vm8 = vmand %vm11476_vm3, %vm11475_vm9  ;;  %v2578_v39 = vsel %vm9073_vm7, %v11479_v63, -3e+38  ;;  %v2589_v29 = vsel %vm11480_vm13, %v2558_v30, -inf  ;;  %v11486_v35 = vld [vmem:[#allocation36_spill] sm:$0xff]  ;;  %v2581_v15 = vsel %vm9090_vm12, %v5244_v28, -3e+38  ;;  %v2686_v16 = vstv %s9164_s24 }
 0x26d   : >> { %vm11481_vm11 = vmmov %vm11480_vm13  ;;  %v2580_v63 = vsel %vm9090_vm12, %v11486_v35, -3e+38  ;;  %v2582_v58 = vsel %vm9108_vm2, %v11316_v18, -3e+38  ;;  %v11521_v51 = vsel %vm9056_vm6, %v5232_v24, -3e+38  ;;  %vm2687_vm12 = vcmp.ge.s32.totalorder %v5163_v1, %v2686_v16 }
 0x26e   : >> { %v2590_v36 = vsel %vm11481_vm11, %v2560_v42, -inf  ;;  %vm9142_vm5 = vmand %vm11483_vm15, %vm11482_vm10  ;;  %s9285_s8 = sld [smem:[#allocation6 + %s5673_s7]] }
 0x26f   : >> { %v2591_v30 = vmax.f32 %v2588_v25, %v2590_v36  ;;  %vm11487_vm4 = vmmov %vm11481_vm11  ;;  %v2586_v25 = vsel %vm9142_vm5, %v11145_v41, -3e+38  ;;  %v2587_v13 = vsel %vm9142_vm5, %v5262_v34, -3e+38  ;;  %s4249_s24 = scalar_select %p9271_p8, 0, 1 }
 0x270   : >> { %v2592_v21 = vsel %vm11487_vm4, %v2562_v48, -inf  ;;  %vm11488_vm9 = vmmov %vm11487_vm4  ;;  %v2584_v48 = vsel %vm9126_vm8, %v5253_v31, -3e+38 }
 0x271   : >> { %v2593_v42 = vmax.f32 %v2589_v29, %v2592_v21  ;;  %v2594_v55 = vsel %vm11488_vm9, %v2564_v40, -inf  ;;  %vm11489_vm3 = vmmov %vm11487_vm4 }
 0x272   : >> { %v2595_v17 = vmax.f32 %v2591_v30, %v2594_v55  ;;  %v2596_v45 = vsel %vm11489_vm3, %v2566_v33, -inf  ;;  %vm11490_vm13 = vmmov %vm11489_vm3 }
 0x273   : >> { %v2598_v0 = vsel %vm11490_vm13, %v2568_v59, -inf  ;;  %vm11491_vm11 = vmmov %vm11489_vm3  ;;  %v2597_v40 = vmax.f32 %v2593_v42, %v2596_v45  ;;  %vm9185_vm13 = vcmp.lt.s32.totalorder %v5163_v1, %v2655_v49 }
 0x274   : >> { %v2600_v36 = vsel %vm11491_vm11, %v2570_v50, -inf  ;;  %vm11492_vm10 = vmmov %vm11489_vm3  ;;  %v2599_v33 = vmax.f32 %v2595_v17, %v2598_v0  ;;  %v11502_v17 = vsel %vm8917_vm1, %v5172_v4, -3e+38 }
 0x275   : >> { %v2602_v55 = vsel %vm11492_vm10, %v2572_v56, -inf  ;;  %vm11493_vm15 = vmmov %vm11489_vm3  ;;  %v2601_v56 = vmax.f32 %v2597_v40, %v2600_v36 }
 0x276   : >> { %v2604_v59 = vsel %vm11493_vm15, %v2574_v27, -inf  ;;  %vm11494_vm4 = vmmov %vm11489_vm3 }
 0x277   : >> { %v2606_v21 = vsel %vm11494_vm4, %v2576_v60, -inf  ;;  %vm11495_vm9 = vmmov %vm11489_vm3  ;;  %vm9180_vm3 = vcmp.ge.s32.totalorder %v5163_v1, %v2652_v54  ;;  %v2603_v60 = vmax.f32 %v2599_v33, %v2602_v55  ;;  %v2605_v52 = vmax.f32 %v2601_v56, %v2604_v59 }
 0x278   : >> { %v2608_v50 = vsel %vm11495_vm9, %v2578_v39, -inf  ;;  %vm11500_vm11 = vmmov %vm11494_vm4  ;;  %v11504_v39 = vsel %vm8927_vm0, %v5178_v6, -3e+38 }
 0x279   : >> { %v2610_v30 = vsel %vm11500_vm11, %v2580_v63, -inf  ;;  %vm11501_vm10 = vmmov %vm11494_vm4  ;;  %v2620_v42 = vsel %vm11494_vm4, %v11504_v39, -inf  ;;  %v2607_v55 = vmax.f32 %v2603_v60, %v2606_v21 }
 0x27a   : >> { %v2612_v0 = vsel %vm11501_vm10, %v2582_v58, -inf  ;;  %vm11503_vm15 = vmmov %vm11494_vm4 }
 0x27b   : >> { %v2619_v27 = vsel %vm11503_vm15, %v11502_v17, -inf  ;;  %vm11505_vm9 = vmmov %vm11494_vm4 }
 0x27c   : >> { %v2621_v36 = vsel %vm11505_vm9, %v2561_v22, -inf  ;;  %vm11506_vm11 = vmmov %vm11494_vm4  ;;  %vm9221_vm9 = vcmp.lt.s32.totalorder %v5166_v2, %v2655_v49  ;;  %v11518_v49 = vsel %vm9021_vm14, %v5220_v20, -3e+38 }
 0x27d   : >> { %v2623_v63 = vsel %vm11506_vm11, %v2563_v23, -inf  ;;  %v2622_v58 = vmax.f32 %v2619_v27, %v2621_v36  ;;  %vm11508_vm1 = vmmov %vm11494_vm4  ;;  %vm9216_vm4 = vcmp.ge.s32.totalorder %v5166_v2, %v2652_v54 }
 0x27e   : >> { %v2624_v40 = vmax.f32 %v2620_v42, %v2623_v63  ;;  %v2625_v26 = vsel %vm11508_vm1, %v2565_v47, -inf  ;;  %vm11509_vm0 = vmmov %vm11508_vm1  ;;  %v2609_v47 = vmax.f32 %v2605_v52, %v2608_v50  ;;  %v2689_v52 = vstv %s9167_s30  ;;  %s9355_s30 = sld [smem:[#allocation7 + %s5673_s7]] }
 0x27f   : >> { %v2627_v33 = vsel %vm11509_vm0, %v2567_v44, -inf  ;;  %vm11510_vm10 = vmmov %vm11509_vm0  ;;  %v2626_v44 = vmax.f32 %v2622_v58, %v2625_v26  ;;  %v2633_v54 = vsel %vm11509_vm0, %v11518_v49, -inf  ;;  %v2722_v49 = vstv %s9251_s4  ;;  %s4250_s4 = scalar_select %p9378_p11, 0, 1 }
 0x280   : >> { %v2629_v22 = vsel %vm11510_vm10, %v2569_v61, -inf  ;;  %vm11511_vm15 = vmmov %vm11509_vm0  ;;  %v2628_v56 = vmax.f32 %v2624_v40, %v2627_v33  ;;  %v2611_v61 = vmax.f32 %v2607_v55, %v2610_v30 }
 0x281   : >> { %v2631_v23 = vsel %vm11511_vm15, %v2571_v46, -inf  ;;  %vm11516_vm11 = vmmov %vm11509_vm0  ;;  %v2630_v19 = vmax.f32 %v2626_v44, %v2629_v22  ;;  %v2719_v22 = vstv %s9229_s28  ;;  %s9415_s28 = sld [smem:[#allocation7 + %s5784_s12]] }
 0x282   : >> { %v2614_v21 = vsel %vm11516_vm11, %v2584_v48, -inf  ;;  %vm11517_vm1 = vmmov %vm11509_vm0  ;;  %v2583_v48 = vsel %vm9108_vm2, %v11317_v62, -3e+38  ;;  %v2632_v30 = vmax.f32 %v2628_v56, %v2631_v23  ;;  %vm9307_vm11 = vcmp.ge.s32.totalorder %v5166_v2, %v2686_v16 }
 0x283   : >> { %v2616_v46 = vsel %vm11517_vm1, %v2586_v25, -inf  ;;  %vm11519_vm10 = vmmov %vm11509_vm0  ;;  %v2613_v25 = vmax.f32 %v2609_v47, %v2612_v0  ;;  %v2615_v27 = vmax.f32 %v2611_v61, %v2614_v21  ;;  %v11523_v0 = vsel %vm9073_vm7, %v11133_v57, -3e+38 }
 0x284   : >> { %v2635_v50 = vsel %vm11519_vm10, %v2575_v43, -inf  ;;  %v2585_v43 = vsel %vm9126_vm8, %v5256_v32, -3e+38  ;;  %vm11522_vm14 = vmmov %vm11509_vm0  ;;  %v2634_v42 = vmax.f32 %v2630_v19, %v2633_v54  ;;  %vm2690_vm1 = vcmp.lt.s32.totalorder %v5163_v1, %v2689_v52  ;;  %p2808_p0 = scmp.gt.s32.totalorder %s9355_s30, %s9285_s8 }
 0x285   : >> { %v2637_v60 = vsel %vm11522_vm14, %v11521_v51, -inf  ;;  %vm11524_vm2 = vmmov %vm11509_vm0  ;;  %v2617_v53 = vmax.f32 %v2613_v25, %v2616_v46  ;;  %v2636_v36 = vmax.f32 %v2632_v30, %v2635_v50  ;;  %v9321_v47 = vstv %s4248_s16 }
 0x286   : >> { %v2639_v39 = vsel %vm11524_vm2, %v11523_v0, -inf  ;;  %vm11526_vm6 = vmmov %vm11509_vm0  ;;  %v2638_v40 = vmax.f32 %v2634_v42, %v2637_v60  ;;  %vm9336_vm14 = vcmp.ge.s32.totalorder %v5166_v2, %v2719_v22  ;;  %v9345_v54 = vstv %s4249_s24  ;;  %s4251_s24 = scalar_select %p9434_p6, 0, 1 }
 0x287   : >> { %v2641_v14 = vsel %vm11526_vm6, %v2581_v15, -inf  ;;  %vm11527_vm7 = vmmov %vm11509_vm0  ;;  %v9297_v58 = vmax.f32 %v2615_v27, %v2617_v53  ;;  %v2640_v26 = vmax.f32 %v2636_v36, %v2639_v39  ;;  %vm2723_vm6 = vcmp.lt.s32.totalorder %v5163_v1, %v2722_v49  ;;  %p2841_p1 = scmp.gt.s32.totalorder %s9415_s28, %s9390_s18  ;;  %p9492_p5 = pnand %p2808_p0, %p9205_p7 }
 0x288   : >> { %v2643_v63 = vsel %vm11527_vm7, %v2583_v48, -inf  ;;  %vm2658_vm8 = vmand %vm9180_vm3, %vm9185_vm13  ;;  %v2642_v29 = vmax.f32 %v2638_v40, %v2641_v14  ;;  %vm9315_vm3 = vcmp.lt.s32.totalorder %v5166_v2, %v2689_v52  ;;  %vm9349_vm7 = vcmp.lt.s32.totalorder %v5166_v2, %v2722_v49 }
 0x289   : >> { %vm11528_vm5 = vmmov %vm11509_vm0  ;;  %v2644_v45 = vmax.f32 %v2640_v26, %v2643_v63  ;;  %v2664_v23 = vsel %vm2658_vm8, %v9297_v58, -3e+38  ;;  %v2752_v48 = vstv %s9276_s21  ;;  %v2755_v60 = vstv %s9282_s14  ;;  %s9449_s21 = sld [smem:[#allocation6 + %s5871_s2]]  ;;  %p9517_p10 = pnand %p2841_p1, %p9205_p7 }
 0x28a   : >> { %v2645_v37 = vsel %vm11528_vm5, %v2585_v43, -inf  ;;  %vm11529_vm15 = vmmov %vm11509_vm0  ;;  %vm9325_vm0 = vcmp.ge.s32.totalorder %v5163_v1, %v2719_v22  ;;  %v2785_v0 = vstv %s9285_s8  ;;  %v2788_v22 = vstv %s9355_s30  ;;  %s9452_s14 = sld [smem:[#allocation7 + %s5871_s2]] }
 0x28b   : >> { %v2647_v15 = vsel %vm11529_vm15, %v2587_v13, -inf  ;;  %vm2692_vm13 = vmand %vm2687_vm12, %vm2690_vm1  ;;  %v2646_v56 = vmax.f32 %v2642_v29, %v2645_v37  ;;  %vm9364_vm15 = vcmp.ge.s32.totalorder %v5163_v1, %v2752_v48  ;;  %v2818_v49 = vstv %s9390_s18  ;;  %s9522_s30 = sld [smem:[#allocation4 + %s5871_s2]] }
 0x28c   : >> { %v2698_v21 = vsel %vm2692_vm13, %v9297_v58, -3e+38  ;;  %v2648_v61 = vmax.f32 %v2644_v45, %v2647_v15  ;;  %vm2659_vm10 = vmand %vm9216_vm4, %vm9221_vm9  ;;  %vm9383_vm13 = vcmp.ge.s32.totalorder %v5166_v2, %v2752_v48  ;;  %s9937_s8 = sld [smem:[#allocation7 + %s5622_s22]] }
 0x28d   : >> { %vm2693_vm2 = vmand %vm9307_vm11, %vm9315_vm3  ;;  %vm2757_vm11 = vcmp.lt.s32.totalorder %v5166_v2, %v2755_v60  ;;  %s10029_s18 = sld [smem:[#allocation6 + %s5784_s12]] }
 0x28e   : >> { %v9357_v25 = vmax.f32 %v2646_v56, %v2648_v61  ;;  %vm11540_vm8 = vmmov %vm11528_vm5  ;;  %v2746_v61 = vstv %s4250_s4  ;;  %s4252_s4 = scalar_select %p9492_p5, 0, 1 }
 0x28f   : >> { %v2666_v19 = vsel %vm11540_vm8, %v2664_v23, -inf  ;;  %vm11541_vm12 = vmmov %vm11528_vm5 }
 0x290   : >> { %v2700_v30 = vsel %vm11541_vm12, %v2698_v21, -inf  ;;  %vm2725_vm5 = vmand %vm9325_vm0, %vm2723_vm6  ;;  %v2665_v39 = vsel %vm2659_vm10, %v9357_v25, -3e+38  ;;  %v2699_v13 = vsel %vm2693_vm2, %v9357_v25, -3e+38  ;;  %vm2756_vm0 = vcmp.lt.s32.totalorder %v5163_v1, %v2755_v60  ;;  %p2874_p4 = scmp.gt.s32.totalorder %s9452_s14, %s9449_s21 }
 0x291   : >> { %vm2726_vm1 = vmand %vm9336_vm14, %vm9349_vm7  ;;  %v2731_v27 = vsel %vm2725_vm5, %v9297_v58, -3e+38  ;;  %vm9424_vm10 = vcmp.ge.s32.totalorder %v5163_v1, %v2785_v0  ;;  %vm2681_vm2 = vcmp.eq.s32.totalorder %v9321_v47, 1  ;;  %v2821_v60 = vstv %s9415_s28  ;;  %s4253_s28 = scalar_select %p9517_p10, 0, 1 }
 0x292   : >> { %v2732_v53 = vsel %vm2726_vm1, %v9357_v25, -3e+38  ;;  %vm11547_vm14 = vmmov %vm11540_vm8  ;;  %vm2789_vm1 = vcmp.lt.s32.totalorder %v5163_v1, %v2788_v22  ;;  %p9538_p13 = pnand %p2874_p4, %p9205_p7  ;;  %v2854_v51 = vstv %s9452_s14  ;;  %s9675_s14 = sld [smem:[#allocation7 + %s5276_s1]] }
 0x293   : >> { %v2667_v42 = vsel %vm11547_vm14, %v2665_v39, -inf  ;;  %vm11548_vm6 = vmmov %vm11540_vm8  ;;  %vm2714_vm8 = vcmp.eq.s32.totalorder %v9345_v54, 1  ;;  %p10033_p7 = scmp.gt.s32.totalorder %s9564_s13, %s9522_s30 }
 0x294   : >> { %v2701_v17 = vsel %vm11548_vm6, %v2699_v13, -inf  ;;  %vm11549_vm7 = vmmov %vm11548_vm6  ;;  %v2668_v14 = vmax.f32 %v2666_v19, %v2667_v42  ;;  %s4254_s16 = scalar_select %p9538_p13, 0, 1 }
 0x295   : >> { %v2733_v59 = vsel %vm11549_vm7, %v2731_v27, -inf  ;;  %vm11550_vm4 = vmmov %vm11548_vm6  ;;  %v2702_v63 = vmax.f32 %v2700_v30, %v2701_v17  ;;  %vm9473_vm6 = vcmp.ge.s32.totalorder %v5163_v1, %v2818_v49  ;;  %vm9478_vm7 = vcmp.ge.s32.totalorder %v5166_v2, %v2818_v49 }
 0x296   : >> { %v2734_v36 = vsel %vm11550_vm4, %v2732_v53, -inf  ;;  %vm2758_vm9 = vmand %vm9364_vm15, %vm2756_vm0  ;;  %v2669_v26 = vrot.slane %v2668_v14, 4  ;;  %vm9443_vm15 = vcmp.ge.s32.totalorder %v5166_v2, %v2785_v0 }
 0x297   : >> { %v2735_v16 = vmax.f32 %v2733_v59, %v2734_v36  ;;  %vm2759_vm3 = vmand %vm9383_vm13, %vm2757_vm11  ;;  %v2764_v52 = vsel %vm2758_vm9, %v9297_v58, -3e+38  ;;  %v2703_v37 = vrot.slane %v2702_v63, 4  ;;  %vm9456_vm13 = vcmp.lt.s32.totalorder %v5166_v2, %v2788_v22 }
 0x298   : >> { %v2765_v55 = vsel %vm2759_vm3, %v9357_v25, -3e+38  ;;  %vm11554_vm12 = vmmov %vm11550_vm4  ;;  %v2670_v23 = vmax.f32 %v2668_v14, %v2669_v26  ;;  %vm2822_vm9 = vcmp.lt.s32.totalorder %v5163_v1, %v2821_v60  ;;  %vm9498_vm11 = vcmp.lt.s32.totalorder %v5166_v2, %v2821_v60 }
 0x299   : >> { %v2736_v15 = vrot.slane %v2735_v16, 4  ;;  %v2766_v29 = vsel %vm11554_vm12, %v2764_v52, -inf  ;;  %vm11555_vm5 = vmmov %vm11550_vm4  ;;  %v2704_v21 = vmax.f32 %v2702_v63, %v2703_v37  ;;  %v2779_v52 = vstv %s4251_s24  ;;  %s9904_s24 = sld [smem:[#allocation7 + %s5510_s19]] }
 0x29a   : >> { %v2767_v45 = vsel %vm11555_vm5, %v2765_v55, -inf  ;;  %v2671_v50 = vrot.slane %v2670_v23, 2  ;;  %vm2791_vm0 = vmand %vm9424_vm10, %vm2789_vm1  ;;  %vm2747_vm10 = vcmp.eq.s32.totalorder %v2746_v61, 1  ;;  %vm11571_vm1 = vcmp.eq.s32.totalorder %v5163_v1, 0 }
 0x29b   : >> { %v2737_v44 = vmax.f32 %v2735_v16, %v2736_v15  ;;  %v2768_v56 = vmax.f32 %v2766_v29, %v2767_v45  ;;  %v2705_v48 = vrot.slane %v2704_v21, 2  ;;  %vm2792_vm14 = vmand %vm9443_vm15, %vm9456_vm13  ;;  %v2797_v43 = vsel %vm2791_vm0, %v9297_v58, -3e+38 }
 0x29c   : >> { %v2672_v0 = vmax.f32 %v2670_v23, %v2671_v50  ;;  %v2798_v42 = vsel %vm2792_vm14, %v9357_v25, -3e+38  ;;  %v2799_v17 = vsel %vm11550_vm4, %v2797_v43, -inf  ;;  %vm2824_vm3 = vmand %vm9473_vm6, %vm2822_vm9  ;;  %v2851_v23 = vstv %s9449_s21  ;;  %s9658_s21 = sld [smem:[#allocation6 + %s5276_s1]] }
 0x29d   : >> { %v2738_v19 = vrot.slane %v2737_v44, 2  ;;  %v2769_v30 = vrot.slane %v2768_v56, 4  ;;  %v2706_v39 = vmax.f32 %v2704_v21, %v2705_v48  ;;  %vm11567_vm12 = vmmov %vm11550_vm4  ;;  %v2830_v26 = vsel %vm2824_vm3, %v9297_v58, -3e+38  ;;  %s9888_s1 = sld [smem:[#allocation6 + %s5510_s19]] }
 0x29e   : >> { %v2673_v36 = vrot.slane %v2672_v0, 1  ;;  %v2800_v40 = vsel %vm11567_vm12, %v2798_v42, -inf  ;;  %vm2825_vm5 = vmand %vm9478_vm7, %vm9498_vm11  ;;  %vm2780_vm13 = vcmp.eq.s32.totalorder %v2779_v52, 1  ;;  %vm9556_vm14 = vcmp.ge.s32.totalorder %v5166_v2, %v2851_v23  ;;  %s9923_s19 = sld [smem:[#allocation7 + %s5566_s11]] }
 0x29f   : >> { %v2739_v13 = vmax.f32 %v2737_v44, %v2738_v19  ;;  %v2770_v53 = vmax.f32 %v2768_v56, %v2769_v30  ;;  %v2707_v14 = vrot.slane %v2706_v39, 1  ;;  %v2801_v45 = vmax.f32 %v2799_v17, %v2800_v40  ;;  %vm11569_vm15 = vmmov %vm11550_vm4  ;;  %s9934_s11 = sld [smem:[#allocation6 + %s5622_s22]] }
 0x2a0   : >> { %v2674_v37 = vmax.f32 %v2672_v0, %v2673_v36  ;;  %v2831_v33 = vsel %vm2825_vm5, %v9357_v25, -3e+38  ;;  %v2832_v22 = vsel %vm11569_vm15, %v2830_v26, -inf  ;;  %vm11572_vm0 = vmmov %vm11550_vm4  ;;  %vm2855_vm6 = vcmp.lt.s32.totalorder %v5163_v1, %v2854_v51  ;;  %s9995_s22 = sld [smem:[#allocation6 + %s5673_s7]] }
 0x2a1   : >> { %v2740_v63 = vrot.slane %v2739_v13, 1  ;;  %v2771_v16 = vrot.slane %v2770_v53, 2  ;;  %v2708_v15 = vmax.f32 %v2706_v39, %v2707_v14  ;;  %v2802_v49 = vrot.slane %v2801_v45, 4  ;;  %vm11579_vm3 = vmmov %vm11572_vm0 }
 0x2a2   : >> { %v2682_v21 = vsel %vm2681_vm2, %v2674_v37, 0.0  ;;  %v2833_v47 = vsel %vm11572_vm0, %v2831_v33, -inf  ;;  %vm9549_vm2 = vcmp.ge.s32.totalorder %v5163_v1, %v2851_v23  ;;  %vm2856_vm7 = vcmp.lt.s32.totalorder %v5166_v2, %v2854_v51  ;;  %vm11580_vm5 = vmmov %vm11572_vm0  ;;  %p3089_p12 = scmp.gt.s32.totalorder %s9675_s14, %s9658_s21 }
 0x2a3   : >> { %v2741_v55 = vmax.f32 %v2739_v13, %v2740_v63  ;;  %v2772_v29 = vmax.f32 %v2770_v53, %v2771_v16  ;;  %v2715_v44 = vsel %vm2714_vm8, %v2708_v15, 0.0  ;;  %v2683_v46 = vsel %vm11571_vm1, %v2682_v21, 0.0  ;;  %vm2857_vm4 = vmand %vm9549_vm2, %vm2855_vm6  ;;  %p3122_p3 = scmp.gt.s32.totalorder %s9904_s24, %s9888_s1 }
 0x2a4   : >> { %v2834_v48 = vmax.f32 %v2832_v22, %v2833_v47  ;;  %vm11575_vm8 = vcmp.eq.s32.totalorder %v5163_v1, 1  ;;  %v2803_v43 = vmax.f32 %v2801_v45, %v2802_v49  ;;  %v2812_v0 = vstv %s4252_s4  ;;  %vm2858_vm11 = vmand %vm9556_vm14, %vm2856_vm7  ;;  %s10013_s4 = sld [smem:[#allocation7 + %s5673_s7]]  ;;  %p10085_p8 = pnand %p3089_p12, %p10033_p7 }
 0x2a5   : >> { %v2773_v56 = vrot.slane %v2772_v29, 1  ;;  %v2748_v54 = vsel %vm2747_vm10, %v2741_v55, 0.0  ;;  %v2716_v30 = vsel %vm11575_vm8, %v2715_v44, %v2683_v46  ;;  %v2845_v39 = vstv %s4253_s28  ;;  %p10097_p9 = pnand %p3122_p3, %p10033_p7  ;;  %p3155_p11 = scmp.gt.s32.totalorder %s9923_s19, %s9911_s25 }
 0x2a6   : >> { %v2835_v61 = vrot.slane %v2834_v48, 4  ;;  %v2804_v60 = vrot.slane %v2803_v43, 2  ;;  %vm11578_vm9 = vcmp.eq.s32.totalorder %v5163_v1, 2  ;;  %v2863_v17 = vsel %vm2857_vm4, %v9297_v58, -3e+38  ;;  %p3188_p2 = scmp.gt.s32.totalorder %s9937_s8, %s9934_s11 }
 0x2a7   : >> { %v2774_v50 = vmax.f32 %v2772_v29, %v2773_v56  ;;  %v2749_v13 = vsel %vm11578_vm9, %v2748_v54, %v2716_v30  ;;  %v2864_v36 = vsel %vm2858_vm11, %v9357_v25, -3e+38  ;;  %v2865_v14 = vsel %vm11579_vm3, %v2863_v17, -inf  ;;  %p10137_p6 = pnand %p3155_p11, %p10033_p7 }
 0x2a8   : >> { %v2836_v42 = vmax.f32 %v2834_v48, %v2835_v61  ;;  %v2805_v59 = vmax.f32 %v2803_v43, %v2804_v60  ;;  %v9579_v63 = vstv %s9522_s30  ;;  %vm2813_vm10 = vcmp.eq.s32.totalorder %v2812_v0, 1  ;;  %v11630_v43 = vld [vmem:[#allocation31_spill] sm:$0xff]  ;;  %s10077_s30 = sld [smem:[#allocation7 + %s5784_s12]]  ;;  %p10157_p0 = pnand %p3188_p2, %p10033_p7 }
 0x2a9   : >> { %v2781_v53 = vsel %vm2780_vm13, %v2774_v50, 0.0  ;;  %vm2846_vm12 = vcmp.eq.s32.totalorder %v2845_v39, 1  ;;  %v2866_v40 = vsel %vm11580_vm5, %v2864_v36, -inf  ;;  %vm11581_vm15 = vcmp.eq.s32.totalorder %v5163_v1, 3 }
 0x2aa   : >> { %v2837_v16 = vrot.slane %v2836_v42, 2  ;;  %v2782_v52 = vsel %vm11581_vm15, %v2781_v53, %v2749_v13  ;;  %v2806_v26 = vrot.slane %v2805_v59, 1  ;;  %v2867_v37 = vmax.f32 %v2865_v14, %v2866_v40  ;;  %p3221_p1 = scmp.gt.s32.totalorder %s10013_s4, %s9995_s22 }
 0x2ab   : >> { %v9584_v15 = vstv %s4254_s16  ;;  %vm2888_vm1 = vcmp.le.s32.totalorder %v9579_v63, 0  ;;  %vm2889_vm13 = vcmp.le.s32.totalorder %v9579_v63, 1  ;;  %vm2890_vm0 = vcmp.le.s32.totalorder %v9579_v63, 2  ;;  %s4256_s16 = scalar_select %p10085_p8, 0, 1 }
 0x2ac   : >> { %v2838_v58 = vmax.f32 %v2836_v42, %v2837_v16  ;;  %v2807_v25 = vmax.f32 %v2805_v59, %v2806_v26  ;;  %v2868_v55 = vrot.slane %v2867_v37, 4  ;;  %vm2891_vm2 = vcmp.le.s32.totalorder %v9579_v63, 3  ;;  %p10197_p5 = pnand %p3221_p1, %p10033_p7 }
 0x2ad   : >> { %vm2892_vm8 = vcmp.le.s32.totalorder %v9579_v63, 4  ;;  %vm2893_vm6 = vcmp.le.s32.totalorder %v9579_v63, 5  ;;  %v9598_v22 = vstv %s9564_s13  ;;  %vm11582_vm15 = vcmp.eq.s32.totalorder %v5163_v1, 4  ;;  %s10117_s13 = sld [smem:[#allocation6 + %s5871_s2]] }
 0x2ae   : >> { %v2839_v29 = vrot.slane %v2838_v58, 1  ;;  %v2814_v45 = vsel %vm2813_vm10, %v2807_v25, 0.0  ;;  %v2869_v33 = vmax.f32 %v2867_v37, %v2868_v55  ;;  %vm2905_vm3 = vcmp.gt.s32.totalorder %v9598_v22, 0  ;;  %v11617_v55 = vld [vmem:[#allocation26_spill] sm:$0xff]  ;;  %p3254_p4 = scmp.gt.s32.totalorder %s10077_s30, %s10029_s18 }
 0x2af   : >> { %vm2906_vm5 = vcmp.gt.s32.totalorder %v9598_v22, 1  ;;  %v2815_v21 = vsel %vm11582_vm15, %v2814_v45, %v2782_v52  ;;  %vm2907_vm14 = vcmp.gt.s32.totalorder %v9598_v22, 2  ;;  %vm2908_vm10 = vcmp.gt.s32.totalorder %v9598_v22, 3  ;;  %vm9609_vm9 = vmand %vm2888_vm1, %vm2905_vm3 }
 0x2b0   : >> { %v2840_v23 = vmax.f32 %v2838_v58, %v2839_v29  ;;  %v2870_v44 = vrot.slane %v2869_v33, 2  ;;  %vm2909_vm7 = vcmp.gt.s32.totalorder %v9598_v22, 4  ;;  %vm9619_vm15 = vmand %vm2889_vm13, %vm2906_vm5  ;;  %vm11589_vm4 = vcmp.eq.s32.totalorder %v5163_v1, 5  ;;  %v11618_v29 = vld [vmem:[#allocation27_spill] sm:$0xff]  ;;  %p10224_p10 = pnand %p3254_p4, %p10033_p7 }
 0x2b1   : >> { %vm9628_vm11 = vmand %vm2890_vm0, %vm2907_vm14  ;;  %vm2911_vm5 = vcmp.gt.s32.totalorder %v9598_v22, 6  ;;  %vm2913_vm14 = vcmp.gt.s32.totalorder %v9598_v22, 8  ;;  %v2969_v27 = vsel %vm9609_vm9, %v5169_v3, -3e+38  ;;  %v2970_v60 = vsel %vm9609_vm9, %v5172_v4, -3e+38 }
 0x2b2   : >> { %v2847_v46 = vsel %vm2846_vm12, %v2840_v23, 0.0  ;;  %v2871_v47 = vmax.f32 %v2869_v33, %v2870_v44  ;;  %vm2910_vm12 = vcmp.gt.s32.totalorder %v9598_v22, 5  ;;  %vm9641_vm3 = vmand %vm2891_vm2, %vm2908_vm10  ;;  %vm2916_vm2 = vcmp.gt.s32.totalorder %v9598_v22, 11 }
 0x2b3   : >> { %v2848_v50 = vsel %vm11589_vm4, %v2847_v46, %v2815_v21  ;;  %vm2914_vm4 = vcmp.gt.s32.totalorder %v9598_v22, 9  ;;  %vm9653_vm1 = vmand %vm2892_vm8, %vm2909_vm7  ;;  %vm11596_vm8 = vcmp.le.s32.totalorder %v9579_v63, 6  ;;  %v2971_v0 = vsel %vm9619_vm15, %v5175_v5, -3e+38  ;;  %v11623_v21 = vld [vmem:[#allocation28_spill] sm:$0xff]  ;;  %v11624_v46 = vld [vmem:[#allocation29_spill] sm:$0xff] }
 0x2b4   : >> { %v2872_v19 = vrot.slane %v2871_v47, 1  ;;  %vm9667_vm13 = vmand %vm2893_vm6, %vm2910_vm12  ;;  %v2972_v39 = vsel %vm9619_vm15, %v5178_v6, -3e+38  ;;  %vm11599_vm6 = vcmp.gt.s32.totalorder %v9598_v22, 7  ;;  %vm11600_vm12 = vcmp.le.s32.totalorder %v9579_v63, 7 }
 0x2b5   : >> { %vm9681_vm7 = vmand %vm11596_vm8, %vm2911_vm5  ;;  %v2973_v53 = vsel %vm9628_vm11, %v5181_v7, -3e+38  ;;  %v2974_v42 = vsel %vm9628_vm11, %v5184_v8, -3e+38  ;;  %v2975_v17 = vsel %vm9641_vm3, %v5187_v9, -3e+38  ;;  %v3065_v13 = vstv %s9658_s21 }
 0x2b6   : >> { %v2873_v51 = vmax.f32 %v2871_v47, %v2872_v19  ;;  %vm9698_vm5 = vmand %vm11600_vm12, %vm11599_vm6  ;;  %vm11603_vm8 = vcmp.eq.s32.totalorder %v9584_v15, 1  ;;  %vm11604_vm12 = vcmp.le.s32.totalorder %v9579_v63, 8  ;;  %v2976_v14 = vsel %vm9641_vm3, %v5190_v10, -3e+38  ;;  %v11611_v15 = vld [vmem:[#allocation25_spill] sm:$0xff] }
 0x2b7   : >> { %vm9718_vm0 = vmand %vm11604_vm12, %vm2913_vm14  ;;  %v2977_v16 = vsel %vm9653_vm1, %v5193_v11, -3e+38  ;;  %vm11608_vm6 = vcmp.le.s32.totalorder %v9579_v63, 9  ;;  %v2978_v26 = vsel %vm9653_vm1, %v5196_v12, -3e+38  ;;  %vm11612_vm3 = vcmask 130048  }
 0x2b8   : >> { %v2880_v59 = vsel %vm11603_vm8, %v2873_v51, 0.0  ;;  %vm11607_vm8 = vcmp.eq.s32.totalorder %v5163_v1, 6  ;;  %vm9734_vm10 = vmand %vm11608_vm6, %vm2914_vm4  ;;  %v2979_v37 = vsel %vm9667_vm13, %v11278_v38, -3e+38  ;;  %v2980_v58 = vsel %vm9667_vm13, %v11611_v15, -3e+38 }
 0x2b9   : >> { %v2881_v40 = vsel %vm11607_vm8, %v2880_v59, %v2848_v50  ;;  %vm2920_vm14 = vcmp.gt.s32.totalorder %v9598_v22, 15  ;;  %vm11613_vm4 = vcmp.gt.s32.totalorder %v9598_v22, 10  ;;  %vm11614_vm6 = vcmp.le.s32.totalorder %v9579_v63, 10  ;;  %vm11619_vm1 = vmmov %vm11612_vm3  ;;  %v11625_v50 = vld [vmem:[#allocation30_spill] sm:$0xff]  ;;  %v11631_v51 = vld [vmem:[#allocation32_spill] sm:$0xff] }
 0x2ba   : >> { %4255 = vst.msk [vmem:[%s6172_s20 + $0x28] sm:$0xff] %vm11612_vm3, %v2881_v40  ;;  %vm9754_vm12 = vmand %vm11614_vm6, %vm11613_vm4  ;;  %v2981_v38 = vsel %vm9681_vm7, %v11617_v55, -3e+38  ;;  %v2982_v45 = vsel %vm9681_vm7, %v11618_v29, -3e+38  ;;  %v3001_v33 = vsel %vm11619_vm1, %v2969_v27, -inf }
 0x2bb   : >> { %vm11620_vm13 = vcmp.le.s32.totalorder %v9579_v63, 11  ;;  %v2983_v44 = vsel %vm9698_vm5, %v11623_v21, -3e+38  ;;  %v2984_v47 = vsel %vm9698_vm5, %v11624_v46, -3e+38  ;;  %vm11626_vm7 = vcmp.gt.s32.totalorder %v9598_v22, 12 }
 0x2bc   : >> { %vm9769_vm8 = vmand %vm11620_vm13, %vm2916_vm2  ;;  %v2985_v48 = vsel %vm9718_vm0, %v11625_v50, -3e+38  ;;  %vm11627_vm3 = vcmp.le.s32.totalorder %v9579_v63, 12  ;;  %v2986_v30 = vsel %vm9718_vm0, %v5220_v20, -3e+38  ;;  %vm11632_vm5 = vcmp.gt.s32.totalorder %v9598_v22, 13 }
 0x2bd   : >> { %vm9786_vm2 = vmand %vm11627_vm3, %vm11626_vm7  ;;  %v2987_v27 = vsel %vm9734_vm10, %v11630_v43, -3e+38  ;;  %v2988_v61 = vsel %vm9734_vm10, %v11631_v51, -3e+38  ;;  %vm11633_vm4 = vcmp.le.s32.totalorder %v9579_v63, 13  ;;  %v11636_v40 = vld [vmem:[#allocation33_spill] sm:$0xff]  ;;  %v3068_v21 = vstv %s9675_s14 }
 0x2be   : >> { %vm9804_vm6 = vmand %vm11633_vm4, %vm11632_vm5  ;;  %v2989_v15 = vsel %vm9754_vm12, %v11636_v40, -3e+38  ;;  %v3002_v55 = vsel %vm11619_vm1, %v2971_v0, -inf  ;;  %vm11638_vm10 = vcmp.gt.s32.totalorder %v9598_v22, 14  ;;  %vm11639_vm7 = vcmp.le.s32.totalorder %v9579_v63, 14  ;;  %v11642_v50 = vld [vmem:[#allocation34_spill] sm:$0xff] }
 0x2bf   : >> { %vm11637_vm13 = vmmov %vm11619_vm1  ;;  %v2990_v46 = vsel %vm9754_vm12, %v5232_v24, -3e+38  ;;  %v2991_v43 = vsel %vm9769_vm8, %v11642_v50, -3e+38  ;;  %vm11644_vm4 = vcmp.le.s32.totalorder %v9579_v63, 15 }
 0x2c0   : >> { %v3003_v29 = vsel %vm11637_vm13, %v2973_v53, -inf  ;;  %vm9818_vm3 = vmand %vm11639_vm7, %vm11638_vm10  ;;  %v2992_v25 = vsel %vm9769_vm8, %v11133_v57, -3e+38  ;;  %v2993_v40 = vsel %vm9786_vm2, %v11486_v35, -3e+38  ;;  %vm9862_vm7 = vcmp.ge.s32.totalorder %v5163_v1, %v3065_v13 }
 0x2c1   : >> { %v3004_v0 = vmax.f32 %v3001_v33, %v3003_v29  ;;  %vm11643_vm5 = vmmov %vm11619_vm1  ;;  %v2994_v63 = vsel %vm9786_vm2, %v5244_v28, -3e+38  ;;  %v2995_v22 = vsel %vm9804_vm6, %v11316_v18, -3e+38  ;;  %s4257_s21 = scalar_select %p10097_p9, 0, 1 }
 0x2c2   : >> { %v3005_v53 = vsel %vm11643_vm5, %v2975_v17, -inf  ;;  %vm9833_vm1 = vmand %vm11644_vm4, %vm2920_vm14 }
 0x2c3   : >> { %v3006_v33 = vmax.f32 %v3002_v55, %v3005_v53  ;;  %vm11647_vm12 = vmmov %vm11643_vm5  ;;  %v2999_v19 = vsel %vm9833_vm1, %v11145_v41, -3e+38 }
 0x2c4   : >> { %v3007_v17 = vsel %vm11647_vm12, %v2977_v16, -inf  ;;  %vm11648_vm14 = vmmov %vm11643_vm5  ;;  %v2997_v16 = vsel %vm9818_vm3, %v5253_v31, -3e+38 }
 0x2c5   : >> { %v3008_v29 = vmax.f32 %v3004_v0, %v3007_v17  ;;  %v3009_v23 = vsel %vm11648_vm14, %v2979_v37, -inf  ;;  %vm11649_vm8 = vmmov %vm11643_vm5 }
 0x2c6   : >> { %v3010_v57 = vmax.f32 %v3006_v33, %v3009_v23  ;;  %v3011_v50 = vsel %vm11649_vm8, %v2981_v38, -inf  ;;  %vm11650_vm13 = vmmov %vm11643_vm5 }
 0x2c7   : >> { %v3013_v35 = vsel %vm11650_vm13, %v2983_v44, -inf  ;;  %vm11651_vm10 = vmmov %vm11643_vm5  ;;  %v3012_v18 = vmax.f32 %v3008_v29, %v3011_v50 }
 0x2c8   : >> { %v3015_v55 = vsel %vm11651_vm10, %v2985_v48, -inf  ;;  %vm11652_vm2 = vmmov %vm11643_vm5  ;;  %vm9869_vm5 = vcmp.lt.s32.totalorder %v5163_v1, %v3068_v21  ;;  %v3014_v44 = vmax.f32 %v3010_v57, %v3013_v35 }
 0x2c9   : >> { %v3017_v0 = vsel %vm11652_vm2, %v2987_v27, -inf  ;;  %vm11657_vm4 = vmmov %vm11652_vm2  ;;  %v3016_v27 = vmax.f32 %v3012_v18, %v3015_v55 }
 0x2ca   : >> { %v3019_v48 = vsel %vm11657_vm4, %v2989_v15, -inf  ;;  %vm11658_vm12 = vmmov %vm11652_vm2 }
 0x2cb   : >> { %v3021_v53 = vsel %vm11658_vm12, %v2991_v43, -inf  ;;  %vm11659_vm14 = vmmov %vm11652_vm2  ;;  %v3018_v43 = vmax.f32 %v3014_v44, %v3017_v0  ;;  %vm9899_vm12 = vcmp.ge.s32.totalorder %v5166_v2, %v3065_v13  ;;  %v2996_v13 = vsel %vm9804_vm6, %v11317_v62, -3e+38 }
 0x2cc   : >> { %v3023_v41 = vsel %vm11659_vm14, %v2993_v40, -inf  ;;  %vm11660_vm8 = vmmov %vm11652_vm2  ;;  %v3034_v40 = vsel %vm11652_vm2, %v2974_v42, -inf  ;;  %v3000_v62 = vsel %vm9833_vm1, %v5262_v34, -3e+38 }
 0x2cd   : >> { %v3025_v33 = vsel %vm11660_vm8, %v2995_v22, -inf  ;;  %vm11661_vm13 = vmmov %vm11652_vm2  ;;  %v3020_v22 = vmax.f32 %v3016_v27, %v3019_v48  ;;  %v3022_v54 = vmax.f32 %v3018_v43, %v3021_v53  ;;  %v3099_v48 = vstv %s9888_s1 }
 0x2ce   : >> { %v3032_v17 = vsel %vm11661_vm13, %v2970_v60, -inf  ;;  %vm11662_vm10 = vmmov %vm11652_vm2 }
 0x2cf   : >> { %v3033_v15 = vsel %vm11662_vm10, %v2972_v39, -inf  ;;  %vm11663_vm4 = vmmov %vm11652_vm2  ;;  %v3035_v49 = vmax.f32 %v3032_v17, %v3034_v40  ;;  %v3024_v57 = vmax.f32 %v3020_v22, %v3023_v41  ;;  %v3026_v55 = vmax.f32 %v3022_v54, %v3025_v33 }
 0x2d0   : >> { %v3036_v56 = vsel %vm11663_vm4, %v2976_v14, -inf  ;;  %vm11664_vm9 = vmmov %vm11652_vm2  ;;  %v3102_v33 = vstv %s9904_s24  ;;  %v3132_v40 = vstv %s9911_s25  ;;  %s10176_s24 = sld [smem:[#allocation7 + %s5871_s2]] }
 0x2d1   : >> { %v3038_v60 = vsel %vm11664_vm9, %v2978_v26, -inf  ;;  %v3037_v29 = vmax.f32 %v3033_v15, %v3036_v56  ;;  %vm11665_vm15 = vmmov %vm11652_vm2  ;;  %s4258_s25 = scalar_select %p10137_p6, 0, 1 }
 0x2d2   : >> { %v3040_v23 = vsel %vm11665_vm15, %v2980_v58, -inf  ;;  %vm11668_vm11 = vmmov %vm11652_vm2  ;;  %v3039_v35 = vmax.f32 %v3035_v49, %v3038_v60  ;;  %vm9950_vm15 = vcmp.ge.s32.totalorder %v5163_v1, %v3099_v48  ;;  %v3135_v49 = vstv %s9923_s19  ;;  %s4259_s2 = scalar_select %p10157_p0, 0, 1 }
 0x2d3   : >> { %v3027_v42 = vsel %vm11668_vm11, %v2997_v16, -inf  ;;  %vm11669_vm14 = vmmov %vm11652_vm2  ;;  %v3041_v58 = vmax.f32 %v3037_v29, %v3040_v23  ;;  %v2998_v16 = vsel %vm9818_vm3, %v5256_v32, -3e+38  ;;  %vm9957_vm11 = vcmp.lt.s32.totalorder %v5166_v2, %v3068_v21 }
 0x2d4   : >> { %v3042_v14 = vsel %vm11669_vm14, %v2982_v45, -inf  ;;  %vm11670_vm8 = vmmov %vm11652_vm2 }
 0x2d5   : >> { %v3044_v26 = vsel %vm11670_vm8, %v2984_v47, -inf  ;;  %vm11671_vm13 = vmmov %vm11652_vm2  ;;  %v3048_v47 = vsel %vm11652_vm2, %v2988_v61, -inf  ;;  %v3043_v18 = vmax.f32 %v3039_v35, %v3042_v14  ;;  %vm9970_vm8 = vcmp.lt.s32.totalorder %v5166_v2, %v3102_v33 }
 0x2d6   : >> { %v3029_v50 = vsel %vm11671_vm13, %v2999_v19, -inf  ;;  %vm11672_vm10 = vmmov %vm11652_vm2  ;;  %v3028_v19 = vmax.f32 %v3024_v57, %v3027_v42  ;;  %v3045_v59 = vmax.f32 %v3041_v58, %v3044_v26  ;;  %v3165_v14 = vstv %s9934_s11  ;;  %s4260_s11 = scalar_select %p10197_p5, 0, 1 }
 0x2d7   : >> { %v3046_v45 = vsel %vm11672_vm10, %v2986_v30, -inf  ;;  %v3030_v36 = vmax.f32 %v3026_v55, %v3029_v50  ;;  %vm11673_vm0 = vmmov %vm11652_vm2  ;;  %vm9984_vm2 = vcmp.ge.s32.totalorder %v5163_v1, %v3132_v40  ;;  %v3168_v26 = vstv %s9937_s8  ;;  %p3287_p13 = scmp.gt.s32.totalorder %s10176_s24, %s10117_s13 }
 0x2d8   : >> { %v3050_v30 = vsel %vm11673_vm0, %v2990_v46, -inf  ;;  %vm11674_vm6 = vmmov %vm11673_vm0  ;;  %v3047_v52 = vmax.f32 %v3043_v18, %v3046_v45  ;;  %v3049_v0 = vmax.f32 %v3045_v59, %v3048_v47  ;;  %v3093_v58 = vstv %s4256_s16 }
 0x2d9   : >> { %v3052_v61 = vsel %vm11674_vm6, %v2992_v25, -inf  ;;  %vm11675_vm3 = vmmov %vm11673_vm0  ;;  %v9941_v53 = vmax.f32 %v3028_v19, %v3030_v36  ;;  %v3126_v45 = vstv %s4257_s21  ;;  %p10253_p12 = pnand %p3287_p13, %p10033_p7  ;;  %p373_p7 = scmp.ge.s32.totalorder %s376_s0, 8  }
 0x2da   : >> { %v3054_v44 = vsel %vm11675_vm3, %v2994_v63, -inf  ;;  %vm11676_vm4 = vmmov %vm11673_vm0  ;;  %v3051_v25 = vmax.f32 %v3047_v52, %v3050_v30  ;;  %v3053_v63 = vmax.f32 %v3049_v0, %v3052_v61  ;;  %vm3136_vm3 = vcmp.lt.s32.totalorder %v5163_v1, %v3135_v49  ;;  %s4071_s16 = sshll.u32 (%p373_p7), %s5266_s23, 4  ;;  %p11771_p8 = scmp.ne.s32.totalorder (%p373_p7), %s10551_s26, 0  ;;  %s10413_s16 = int_to_ptr.vmem [resolvable:$true] %s4071_s16 }
 0x2db   : >> { %v3056_v51 = vsel %vm11676_vm4, %v2996_v13, -inf  ;;  %vm11677_vm1 = vmmov %vm11673_vm0 }
 0x2dc   : >> { %v3058_v41 = vsel %vm11677_vm1, %v2998_v16, -inf  ;;  %vm3071_vm9 = vmand %vm9862_vm7, %vm9869_vm5  ;;  %vm9964_vm7 = vcmp.ge.s32.totalorder %v5166_v2, %v3099_v48  ;;  %vm3103_vm5 = vcmp.lt.s32.totalorder %v5163_v1, %v3102_v33  ;;  %v3055_v21 = vmax.f32 %v3051_v25, %v3054_v44 }
 0x2dd   : >> { %vm11682_vm14 = vmmov %vm11673_vm0  ;;  %v3057_v15 = vmax.f32 %v3053_v63, %v3056_v51  ;;  %v3077_v43 = vsel %vm3071_vm9, %v9941_v53, -3e+38  ;;  %vm9989_vm0 = vcmp.ge.s32.totalorder %v5166_v2, %v3132_v40  ;;  %v3198_v48 = vstv %s9995_s22  ;;  %s4261_s22 = scalar_select %p10224_p10, 0, 1 }
 0x2de   : >> { %v3060_v38 = vsel %vm11682_vm14, %v3000_v62, -inf  ;;  %vm3105_vm13 = vmand %vm9950_vm15, %vm3103_vm5  ;;  %v3059_v29 = vmax.f32 %v3055_v21, %v3058_v41  ;;  %vm10024_vm5 = vcmp.ge.s32.totalorder %v5163_v1, %v3165_v14  ;;  %v3201_v33 = vstv %s10013_s4 }
 0x2df   : >> { %vm3072_vm10 = vmand %vm9899_vm12, %vm9957_vm11  ;;  %v3111_v56 = vsel %vm3105_vm13, %v9941_v53, -3e+38  ;;  %v3061_v23 = vmax.f32 %v3057_v15, %v3060_v38 }
 0x2e0   : >> { %vm3106_vm6 = vmand %vm9964_vm7, %vm9970_vm8 }
 0x2e1   : >> { %vm11691_vm4 = vmmov %vm11677_vm1  ;;  %vm10004_vm1 = vcmp.lt.s32.totalorder %v5166_v2, %v3135_v49  ;;  %v10015_v57 = vmax.f32 %v3059_v29, %v3061_v23  ;;  %v3234_v23 = vstv %s10077_s30 }
 0x2e2   : >> { %v3079_v54 = vsel %vm11691_vm4, %v3077_v43, -inf  ;;  %vm3138_vm9 = vmand %vm9984_vm2, %vm3136_vm3  ;;  %vm10041_vm2 = vcmp.ge.s32.totalorder %v5166_v2, %v3165_v14  ;;  %vm10047_vm3 = vcmp.lt.s32.totalorder %v5166_v2, %v3168_v26  ;;  %v3231_v43 = vstv %s10029_s18  ;;  %s4262_s18 = scalar_select %p10253_p12, 0, 1 }
 0x2e3   : >> { %vm11694_vm15 = vmmov %vm11691_vm4  ;;  %v3144_v35 = vsel %vm3138_vm9, %v9941_v53, -3e+38  ;;  %v3078_v47 = vsel %vm3072_vm10, %v10015_v57, -3e+38  ;;  %v3112_v16 = vsel %vm3106_vm6, %v10015_v57, -3e+38  ;;  %vm10104_vm6 = vcmp.ge.s32.totalorder %v5163_v1, %v3198_v48 }
 0x2e4   : >> { %v3113_v50 = vsel %vm11694_vm15, %v3111_v56, -inf  ;;  %vm3139_vm14 = vmand %vm9989_vm0, %vm10004_vm1  ;;  %vm3169_vm0 = vcmp.lt.s32.totalorder %v5163_v1, %v3168_v26  ;;  %vm10109_vm9 = vcmp.ge.s32.totalorder %v5166_v2, %v3198_v48  ;;  %vm3202_vm15 = vcmp.lt.s32.totalorder %v5163_v1, %v3201_v33 }
 0x2e5   : >> { %vm11698_vm13 = vmmov %vm11691_vm4  ;;  %v3145_v19 = vsel %vm3139_vm14, %v10015_v57, -3e+38  ;;  %vm10123_vm14 = vcmp.lt.s32.totalorder %v5166_v2, %v3201_v33 }
 0x2e6   : >> { %v3146_v13 = vsel %vm11698_vm13, %v3144_v35, -inf  ;;  %vm3171_vm4 = vmand %vm10024_vm5, %vm3169_vm0  ;;  %vm10162_vm0 = vcmp.ge.s32.totalorder %v5166_v2, %v3231_v43 }
 0x2e7   : >> { %vm11703_vm1 = vmmov %vm11698_vm13  ;;  %v3177_v62 = vsel %vm3171_vm4, %v9941_v53, -3e+38  ;;  %vm10171_vm4 = vcmp.lt.s32.totalorder %v5166_v2, %v3234_v23 }
 0x2e8   : >> { %v3080_v39 = vsel %vm11703_vm1, %v3078_v47, -inf  ;;  %vm11704_vm12 = vmmov %vm11703_vm1 }
 0x2e9   : >> { %v3114_v18 = vsel %vm11704_vm12, %v3112_v16, -inf  ;;  %vm11705_vm11 = vmmov %vm11703_vm1  ;;  %v3081_v36 = vmax.f32 %v3079_v54, %v3080_v39 }
 0x2ea   : >> { %v3147_v59 = vsel %vm11705_vm11, %v3145_v19, -inf  ;;  %vm3172_vm7 = vmand %vm10041_vm2, %vm10047_vm3  ;;  %v3115_v30 = vmax.f32 %v3113_v50, %v3114_v18  ;;  %vm10147_vm2 = vcmp.ge.s32.totalorder %v5163_v1, %v3231_v43  ;;  %vm3235_vm3 = vcmp.lt.s32.totalorder %v5163_v1, %v3234_v23 }
 0x2eb   : >> { %v3148_v61 = vmax.f32 %v3146_v13, %v3147_v59  ;;  %v3178_v52 = vsel %vm3172_vm7, %v10015_v57, -3e+38  ;;  %vm11707_vm8 = vmmov %vm11703_vm1  ;;  %v3082_v51 = vrot.slane %v3081_v36, 4  ;;  %v3264_v18 = vstv %s10117_s13  ;;  %s4305_s13 = sshll.u32 (%p373_p7), %s4855_s17, 7  ;;  %s4883_s17 = smov (%p373_p7), [#allocation14]  }
 0x2ec   : >> { %v3179_v0 = vsel %vm11707_vm8, %v3177_v62, -inf  ;;  %vm11708_vm10 = vmmov %vm11703_vm1  ;;  %v3116_v41 = vrot.slane %v3115_v30, 4  ;;  %s10411_s1 = scalar_lea.hbm (%p373_p7), %s10468_s10, %s4305_s13 }
 0x2ed   : >> { %v3180_v44 = vsel %vm11708_vm10, %v3178_v52, -inf  ;;  %v3149_v46 = vrot.slane %v3148_v61, 4  ;;  %v3083_v38 = vmax.f32 %v3081_v36, %v3082_v51  ;;  %vm3204_vm5 = vmand %vm10104_vm6, %vm3202_vm15  ;;  %vm3094_vm10 = vcmp.eq.s32.totalorder %v3093_v58, 1 }
 0x2ee   : >> { %v3181_v25 = vmax.f32 %v3179_v0, %v3180_v44  ;;  %v3117_v37 = vmax.f32 %v3115_v30, %v3116_v41  ;;  %vm3205_vm13 = vmand %vm10109_vm9, %vm10123_vm14  ;;  %v3210_v49 = vsel %vm3204_vm5, %v9941_v53, -3e+38  ;;  %vm3127_vm6 = vcmp.eq.s32.totalorder %v3126_v45, 1 }
 0x2ef   : >> { %v3150_v17 = vmax.f32 %v3148_v61, %v3149_v46  ;;  %v3084_v40 = vrot.slane %v3083_v38, 2  ;;  %v3211_v26 = vsel %vm3205_vm13, %v10015_v57, -3e+38  ;;  %v3212_v55 = vsel %vm11703_vm1, %v3210_v49, -inf  ;;  %vm3237_vm12 = vmand %vm10147_vm2, %vm3235_vm3 }
 0x2f0   : >> { %v3182_v21 = vrot.slane %v3181_v25, 4  ;;  %v3118_v56 = vrot.slane %v3117_v37, 2  ;;  %vm11724_vm11 = vmmov %vm11703_vm1  ;;  %v3243_v19 = vsel %vm3237_vm12, %v9941_v53, -3e+38  ;;  %v3159_v0 = vstv %s4258_s25  ;;  %s4771_s25 = scalar_lea.vmem (%p373_p7), %s10413_s16, 128 }
 0x2f1   : >> { %v3151_v22 = vrot.slane %v3150_v17, 2  ;;  %v3085_v54 = vmax.f32 %v3083_v38, %v3084_v40  ;;  %v3213_v16 = vsel %vm11724_vm11, %v3211_v26, -inf  ;;  %vm3238_vm7 = vmand %vm10162_vm0, %vm10171_vm4  ;;  %v3192_v41 = vstv %s4259_s2  ;;  %p4772_p3 = scmp.ne.s32.totalorder (%p373_p7), %s10413_s16, %s4771_s25  ;;  %s4775_s2 = sshll.u32 (%p373_p7), %s4883_s17, 4  ;;  %s4776_s2 = int_to_ptr.vmem [resolvable:$false] %s4775_s2 }
 0x2f2   : >> { %v3183_v60 = vmax.f32 %v3181_v25, %v3182_v21  ;;  %v3119_v42 = vmax.f32 %v3117_v37, %v3118_v56  ;;  %v3214_v62 = vmax.f32 %v3212_v55, %v3213_v16  ;;  %v3244_v36 = vsel %vm3238_vm7, %v10015_v57, -3e+38  ;;  %vm11726_vm8 = vmmov %vm11703_vm1  ;;  %s4777_s19 = scalar_lea.vmem (%p373_p7), %s4776_s2, 256  ;;  %p4778_p2 = scmp.lt.s32.totalorder (%p373_p7), %s10413_s16, %s4776_s2 }
 0x2f3   : >> { %v3086_v35 = vrot.slane %v3085_v54, 1  ;;  %v3152_v47 = vmax.f32 %v3150_v17, %v3151_v22  ;;  %v3245_v30 = vsel %vm11726_vm8, %v3243_v19, -inf  ;;  %vm11727_vm9 = vmmov %vm11703_vm1  ;;  %vm10207_vm15 = vcmp.ge.s32.totalorder %v5163_v1, %v3264_v18  ;;  %p4773_p9 = pnand (%p373_p7), %p4772_p3, %p11771_p8  ;;  %p4779_p6 = scmp.lt.s32.totalorder (%p373_p7), %s4777_s19, %s4771_s25 }
 0x2f4   : >> { %v3184_v13 = vrot.slane %v3183_v60, 2  ;;  %v3120_v39 = vrot.slane %v3119_v42, 1  ;;  %v3215_v44 = vrot.slane %v3214_v62, 4  ;;  %v3246_v48 = vsel %vm11727_vm9, %v3244_v36, -inf  ;;  %vm11734_vm12 = vmmov %vm11726_vm8 }
 0x2f5   : >> { %v3087_v59 = vmax.f32 %v3085_v54, %v3086_v35  ;;  %v3153_v52 = vrot.slane %v3152_v47, 1  ;;  %v3247_v46 = vmax.f32 %v3245_v30, %v3246_v48  ;;  %vm10214_vm14 = vcmp.ge.s32.totalorder %v5166_v2, %v3264_v18  ;;  %vm11735_vm11 = vmmov %vm11726_vm8  ;;  %p4774_p11 = pneg (%p373_p7), %p4773_p9  ;;  %p4780_p0 = por (%p373_p7), %p4779_p6, %p4778_p2 }
 0x2f6   : >> { %v3185_v61 = vmax.f32 %v3183_v60, %v3184_v13  ;;  %v3121_v51 = vmax.f32 %v3119_v42, %v3120_v39  ;;  %v3216_v27 = vmax.f32 %v3214_v62, %v3215_v44  ;;  %v3267_v38 = vstv %s10176_s24  ;;  %s4057_s24 = scalar_lea.sflag (%p373_p7), [#allocation10], %s5147_s29 }
 0x2f7   : >> { %v3095_v63 = vsel %vm3094_vm10, %v3087_v59, 0.0  ;;  %v3248_v17 = vrot.slane %v3247_v46, 4  ;;  %vm3268_vm5 = vcmp.lt.s32.totalorder %v5163_v1, %v3267_v38  ;;  %vm3269_vm13 = vcmp.lt.s32.totalorder %v5166_v2, %v3267_v38  ;;  %p4781_p1 = pnand (%p373_p7), %p4780_p0, %p4774_p11 }
 0x2f8   : >> { %v3186_v37 = vrot.slane %v3185_v61, 1  ;;  %v3154_v21 = vmax.f32 %v3152_v47, %v3153_v52  ;;  %vm3160_vm2 = vcmp.eq.s32.totalorder %v3159_v0, 1  ;;  %v3217_v15 = vrot.slane %v3216_v27, 2  ;;  %vm3270_vm0 = vmand %vm10207_vm15, %vm3268_vm5 }
 0x2f9   : >> { %vm11733_vm3 = vcmp.eq.s32.totalorder %v5163_v1, 0  ;;  %v3128_v40 = vsel %vm3127_vm6, %v3121_v51, 0.0  ;;  %v3249_v56 = vmax.f32 %v3247_v46, %v3248_v17  ;;  %vm3271_vm4 = vmand %vm10214_vm14, %vm3269_vm13  ;;  %v3276_v60 = vsel %vm3270_vm0, %v9941_v53, -3e+38  ;;  %v4630_v46 = vld [vmem:[%s10463_s5] sm:$0xff] (%p373_p7)  }
 0x2fa   : >> { %v3096_v43 = vsel %vm11733_vm3, %v3095_v63, 0.0  ;;  %vm3193_vm1 = vcmp.eq.s32.totalorder %v3192_v41, 1  ;;  %v3218_v22 = vmax.f32 %v3216_v27, %v3217_v15  ;;  %v3277_v49 = vsel %vm3271_vm4, %v10015_v57, -3e+38  ;;  %4382 = vmatprep.subr.bf16.mxu0 (%p373_p7), %v4630_v46 }
 0x2fb   : >> { %v3278_v29 = vsel %vm11734_vm12, %v3276_v60, -inf  ;;  %v3187_v23 = vmax.f32 %v3185_v61, %v3186_v37  ;;  %v3225_v54 = vstv %s4260_s11  ;;  %v3250_v42 = vrot.slane %v3249_v56, 2  ;;  %4383 = vmatpush3.bf16.msra.mxu0 (%p373_p7), %v4630_v46 }
 0x2fc   : >> { %v3279_v14 = vsel %vm11735_vm11, %v3277_v49, -inf  ;;  %vm11736_vm7 = vcmp.eq.s32.totalorder %v5163_v1, 1  ;;  %v3161_v50 = vsel %vm3160_vm2, %v3154_v21, 0.0  ;;  %v3219_v35 = vrot.slane %v3218_v22, 1  ;;  %vm11743_vm2 = vmmov %vm11735_vm11 }
 0x2fd   : >> { %v3129_v26 = vsel %vm11736_vm7, %v3128_v40, %v3096_v43  ;;  %v3280_v53 = vmax.f32 %v3278_v29, %v3279_v14  ;;  %v3251_v57 = vmax.f32 %v3249_v56, %v3250_v42  ;;  %vm3226_vm8 = vcmp.eq.s32.totalorder %v3225_v54, 1 }
 0x2fe   : >> { %v3220_v58 = vmax.f32 %v3218_v22, %v3219_v35  ;;  %vm11738_vm10 = vcmp.eq.s32.totalorder %v5163_v1, 2  ;;  %v3194_v45 = vsel %vm3193_vm1, %v3187_v23, 0.0  ;;  %v3258_v16 = vstv %s4261_s22 }
 0x2ff   : >> { %v3281_v13 = vrot.slane %v3280_v53, 4  ;;  %v3162_v55 = vsel %vm11738_vm10, %v3161_v50, %v3129_v26  ;;  %v3252_v47 = vrot.slane %v3251_v57, 1  ;;  %vm11739_vm6 = vcmp.eq.s32.totalorder %v5163_v1, 3 }
 0x300   : >> { %v3195_v18 = vsel %vm11739_vm6, %v3194_v45, %v3162_v55  ;;  %v3227_v59 = vsel %vm3226_vm8, %v3220_v58, 0.0  ;;  %vm3259_vm9 = vcmp.eq.s32.totalorder %v3258_v16, 1  ;;  %v3291_v30 = vstv %s4262_s18 }
 0x301   : >> { %v3282_v19 = vmax.f32 %v3280_v53, %v3281_v13  ;;  %v3253_v39 = vmax.f32 %v3251_v57, %v3252_v47  ;;  %vm11740_vm15 = vcmp.eq.s32.totalorder %v5163_v1, 4  ;;  %vm3292_vm14 = vcmp.eq.s32.totalorder %v3291_v30, 1 }
 0x302   : >> { %v3228_v61 = vsel %vm11740_vm15, %v3227_v59, %v3195_v18  ;;  %vm11741_vm5 = vcmp.eq.s32.totalorder %v5163_v1, 5  ;;  %vm11742_vm13 = vcmp.eq.s32.totalorder %v5163_v1, 6  ;;  %vm11744_vm0 = vcmask (%p373_p7), 130048  }
 0x303   : >> { %v3283_v62 = vrot.slane %v3282_v19, 2  ;;  %v3260_v52 = vsel %vm3259_vm9, %v3253_v39, 0.0  ;;  %vm11745_vm3 = vmmov (%p373_p7), %vm11744_vm0 }
 0x304   : >> { %v3261_v44 = vsel %vm11741_vm5, %v3260_v52, %v3228_v61  ;;  %vm11746_vm4 = vmmov (%p373_p7), %vm11744_vm0 }
 0x305   : >> { %v3284_v36 = vmax.f32 %v3282_v19, %v3283_v62  ;;  %vm11747_vm1 = vmmov (%p373_p7), %vm11744_vm0 }
 0x306   : > { %vm11748_vm12 = vmmov (%p373_p7), %vm11744_vm0 }
 0x307   : >> { %v3285_v0 = vrot.slane %v3284_v36, 1  ;;  %375 = sbr.rel (!%p373_p7) target bundleno = 186 (0xba), region = 111  ;;  %vm11749_vm11 = vmmov (%p373_p7), %vm11744_vm0 }
 0x308   : > { %vm11750_vm7 = vmmov (%p373_p7), %vm11744_vm0 }
 0x309   : >> { %v3286_v48 = vmax.f32 %v3284_v36, %v3285_v0  ;;  %vm11751_vm8 = vmmov (%p373_p7), %vm11744_vm0 }
 0x30a   : > { %vm11752_vm10 = vmmov (%p373_p7), %vm11744_vm0 }
 0x30b   : >> { %v3293_v51 = vsel %vm3292_vm14, %v3286_v48, 0.0  ;;  %vm11753_vm6 = vmmov (%p373_p7), %vm11744_vm0 }
 0x30c   : >> { %v3294_v41 = vsel %vm11742_vm13, %v3293_v51, %v3261_v44  ;;  %vm11754_vm9 = vmmov (%p373_p7), %vm11744_vm0 }
 0x30d   : >> { %4263 = vst.msk [vmem:[%s6172_s20 + $0x30] sm:$0xff] %vm11743_vm2, %v3294_v41  ;;  %vm11755_vm15 = vmmov (%p373_p7), %vm11744_vm0 }
 0x30e   : > { %vm11756_vm14 = vmmov %vm11744_vm0 }
 0x30f   : > { %vm11757_vm5 = vmmov %vm11744_vm0 }
 0x310   : > { %vm11758_vm13 = vmmov %vm11744_vm0 }
 0x311   : > { %vm11759_vm2 = vmmov %vm11744_vm0 }
 0x314   : > { %v3298_v25 = vld [vmem:[#allocation2] sm:$0xff]  ;;  %v3299_v63 = vld [vmem:[#allocation2 + $0x8] sm:$0xff]  ;;  %v3300_v27 = vld [vmem:[#allocation2 + $0x10] sm:$0xff] }
 0x315   : > { %v3354_v33 = vpack.c.bf16 %v3299_v63, %v3298_v25  ;;  %v3301_v38 = vld [vmem:[#allocation2 + $0x18] sm:$0xff]  ;;  %v3302_v37 = vld [vmem:[#allocation2 + $0x20] sm:$0xff]  ;;  %v3303_v17 = vld [vmem:[#allocation2 + $0x28] sm:$0xff] }
 0x316   : > { %v3355_v21 = vpack.c.bf16 %v3301_v38, %v3300_v27  ;;  %v3356_v15 = vpack.c.bf16 %v3303_v17, %v3302_v37  ;;  %v3304_v1 = vld [vmem:[#allocation2 + $0x30] sm:$0xff]  ;;  %v3305_v2 = vld [vmem:[#allocation2 + $0x38] sm:$0xff]  ;;  %v3306_v3 = vld [vmem:[#allocation2 + $0x40] sm:$0xff] }
 0x317   : > { %4384 = vmatprep.mubr.msk.bf16.mxu0 %vm11744_vm0, %v3354_v33  ;;  %v3307_v4 = vld [vmem:[#allocation2 + $0x48] sm:$0xff]  ;;  %v3357_v5 = vpack.c.bf16 %v3305_v2, %v3304_v1  ;;  %v3308_v7 = vld [vmem:[#allocation2 + $0x50] sm:$0xff]  ;;  %v3309_v8 = vld [vmem:[#allocation2 + $0x58] sm:$0xff] }
 0x318   : > { %4385 = vmatmul.mubr.msk.bf16.vlgmr.msra.gmra.mrb[0].mxu0 %vm11745_vm3, %v3355_v21  ;;  %v3358_v6 = vpack.c.bf16 %v3307_v4, %v3306_v3  ;;  %v3310_v9 = vld [vmem:[#allocation2 + $0x60] sm:$0xff]  ;;  %v3311_v10 = vld [vmem:[#allocation2 + $0x68] sm:$0xff]  ;;  %v3359_v11 = vpack.c.bf16 %v3309_v8, %v3308_v7  ;;  %v3312_v20 = vld [vmem:[#allocation2 + $0x70] sm:$0xff] }
 0x319   : > { %4388 = vmatprep.mubr.msk.bf16.mxu0 %vm11746_vm4, %v3356_v15  ;;  %v3360_v12 = vpack.c.bf16 %v3311_v10, %v3310_v9  ;;  %v3313_v24 = vld [vmem:[#allocation2 + $0x78] sm:$0xff]  ;;  %v3314_v28 = vld [vmem:[#allocation2 + $0x80] sm:$0xff]  ;;  %v3315_v31 = vld [vmem:[#allocation2 + $0x88] sm:$0xff] }
 0x31a   : > { %v3361_v32 = vpack.c.bf16 %v3313_v24, %v3312_v20  ;;  %v3362_v34 = vpack.c.bf16 %v3315_v31, %v3314_v28  ;;  %v3316_v43 = vld [vmem:[#allocation2 + $0x90] sm:$0xff]  ;;  %v3317_v40 = vld [vmem:[#allocation2 + $0x98] sm:$0xff]  ;;  %v3318_v56 = vld [vmem:[#allocation2 + $0xa0] sm:$0xff] }
 0x31b   : > { %v3319_v60 = vld [vmem:[#allocation2 + $0xa8] sm:$0xff]  ;;  %v3363_v22 = vpack.c.bf16 %v3317_v40, %v3316_v43  ;;  %v3320_v29 = vld [vmem:[#allocation2 + $0xb0] sm:$0xff]  ;;  %v3321_v23 = vld [vmem:[#allocation2 + $0xb8] sm:$0xff] }
 0x31c   : > { %v3364_v49 = vpack.c.bf16 %v3319_v60, %v3318_v56  ;;  %v3322_v54 = vld [vmem:[#allocation2 + $0xc0] sm:$0xff]  ;;  %v3323_v42 = vld [vmem:[#allocation2 + $0xc8] sm:$0xff]  ;;  %v3365_v14 = vpack.c.bf16 %v3321_v23, %v3320_v29  ;;  %v3324_v50 = vld [vmem:[#allocation2 + $0xd0] sm:$0xff] }
 0x31d   : > { %v3366_v26 = vpack.c.bf16 %v3323_v42, %v3322_v54  ;;  %v3325_v35 = vld [vmem:[#allocation2 + $0xd8] sm:$0xff]  ;;  %v3326_v53 = vld [vmem:[#allocation2 + $0xe0] sm:$0xff]  ;;  %v3327_v57 = vld [vmem:[#allocation2 + $0xe8] sm:$0xff] }
 0x31e   : > { %v3367_v58 = vpack.c.bf16 %v3325_v35, %v3324_v50  ;;  %v3368_v13 = vpack.c.bf16 %v3327_v57, %v3326_v53  ;;  %v3328_v55 = vld [vmem:[#allocation2 + $0xf0] sm:$0xff]  ;;  %v3329_v45 = vld [vmem:[#allocation2 + $0xf8] sm:$0xff]  ;;  %v3330_v47 = vld [vmem:[#allocation2 + $0x100] sm:$0xff] }
 0x31f   : > { %v3331_v16 = vld [vmem:[#allocation2 + $0x108] sm:$0xff]  ;;  %v3369_v19 = vpack.c.bf16 %v3329_v45, %v3328_v55  ;;  %v3332_v18 = vld [vmem:[#allocation2 + $0x110] sm:$0xff]  ;;  %v3333_v59 = vld [vmem:[#allocation2 + $0x118] sm:$0xff] }
 0x320   : > { %4389 = vmatmul.mubr.msk.bf16.gmra.mrb[4].mxu0 %vm11747_vm1, %v3357_v5  ;;  %v3370_v39 = vpack.c.bf16 %v3331_v16, %v3330_v47  ;;  %v3334_v62 = vld [vmem:[#allocation2 + $0x120] sm:$0xff]  ;;  %v3335_v36 = vld [vmem:[#allocation2 + $0x128] sm:$0xff]  ;;  %v3371_v30 = vpack.c.bf16 %v3333_v59, %v3332_v18  ;;  %vm11760_vm3 = vmmov %vm11744_vm0 }
 0x321   : > { %4392 = vmatprep.mubr.msk.bf16.mxu0 %vm11748_vm12, %v3358_v6  ;;  %v3372_v61 = vpack.c.bf16 %v3335_v36, %v3334_v62  ;;  %vm11761_vm4 = vmmov %vm11744_vm0  ;;  %v3336_v52 = vld [vmem:[#allocation2 + $0x130] sm:$0xff]  ;;  %v3337_v0 = vld [vmem:[#allocation2 + $0x138] sm:$0xff] }
 0x322   : > { %v3338_v44 = vld [vmem:[#allocation2 + $0x140] sm:$0xff]  ;;  %v3339_v48 = vld [vmem:[#allocation2 + $0x148] sm:$0xff]  ;;  %v3373_v51 = vpack.c.bf16 %v3337_v0, %v3336_v52  ;;  %vm11762_vm1 = vmmov %vm11744_vm0 }
 0x323   : > { %v3374_v41 = vpack.c.bf16 %v3339_v48, %v3338_v44  ;;  %vm11763_vm12 = vmmov %vm11744_vm0  ;;  %v3340_v46 = vld [vmem:[#allocation2 + $0x150] sm:$0xff]  ;;  %v3341_v25 = vld [vmem:[#allocation2 + $0x158] sm:$0xff] }
 0x324   : > { %v3342_v63 = vld [vmem:[#allocation2 + $0x160] sm:$0xff]  ;;  %v3343_v27 = vld [vmem:[#allocation2 + $0x168] sm:$0xff]  ;;  %v3375_v33 = vpack.c.bf16 %v3341_v25, %v3340_v46  ;;  %v3344_v37 = vld [vmem:[#allocation2 + $0x170] sm:$0xff] }
 0x325   : > { %v3376_v38 = vpack.c.bf16 %v3343_v27, %v3342_v63  ;;  %v3345_v17 = vld [vmem:[#allocation2 + $0x178] sm:$0xff]  ;;  %v3346_v21 = vld [vmem:[#allocation2 + $0x180] sm:$0xff]  ;;  %v3347_v15 = vld [vmem:[#allocation2 + $0x188] sm:$0xff] }
 0x326   : > { %v3377_v1 = vpack.c.bf16 %v3345_v17, %v3344_v37  ;;  %v3378_v2 = vpack.c.bf16 %v3347_v15, %v3346_v21  ;;  %v3348_v3 = vld [vmem:[#allocation2 + $0x190] sm:$0xff]  ;;  %v3349_v4 = vld [vmem:[#allocation2 + $0x198] sm:$0xff]  ;;  %v3350_v5 = vld [vmem:[#allocation2 + $0x1a0] sm:$0xff] }
 0x327   : > { %v3351_v6 = vld [vmem:[#allocation2 + $0x1a8] sm:$0xff]  ;;  %v3379_v7 = vpack.c.bf16 %v3349_v4, %v3348_v3  ;;  %v3352_v9 = vld [vmem:[#allocation2 + $0x1b0] sm:$0xff]  ;;  %v3353_v10 = vld [vmem:[#allocation2 + $0x1b8] sm:$0xff] }
 0x328   : > { %4393 = vmatmul.mubr.msk.bf16.gmra.mrb[8].mxu0 %vm11749_vm11, %v3359_v11  ;;  %vm11764_vm11 = vmmov %vm11744_vm0  ;;  %v3380_v8 = vpack.c.bf16 %v3351_v6, %v3350_v5  ;;  %v3381_v11 = vpack.c.bf16 %v3353_v10, %v3352_v9  ;;  %v10309_v20 = vld [vmem:[%s10464_s6] ss:$0 sm:$0xff] }
 0x329   : > { %4396 = vmatprep.mubr.msk.bf16.mxu0 %vm11750_vm7, %v3360_v12  ;;  %vm11765_vm7 = vmmov %vm11744_vm0  ;;  %v3796_v12 = vld [vmem:[#allocation11 + $0x8] sm:$0xff] }
 0x32a   : > { %3867 = vmatprep.mubr.f32.mxu1 %v3796_v12 }
 0x330   : > { %4397 = vmatmul.mubr.msk.bf16.gmra.mrb[12].mxu0 %vm11751_vm8, %v3361_v32  ;;  %vm11766_vm8 = vmmov %vm11744_vm0 }
 0x331   : > { %4400 = vmatprep.mubr.msk.bf16.mxu0 %vm11752_vm10, %v3362_v34  ;;  %vm11767_vm10 = vmmov %vm11744_vm0 }
 0x338   : > { %4401 = vmatmul.mubr.msk.bf16.gmra.mrb[16].mxu0 %vm11753_vm6, %v3363_v22  ;;  %vm11768_vm6 = vmmov %vm11744_vm0 }
 0x339   : > { %4404 = vmatprep.mubr.msk.bf16.mxu0 %vm11754_vm9, %v3364_v49  ;;  %vm11769_vm9 = vmmov %vm11744_vm0 }
 0x340   : > { %4405 = vmatmul.mubr.msk.bf16.gmra.mrb[20].mxu0 %vm11755_vm15, %v3365_v14  ;;  %vm11770_vm15 = vmmov %vm11744_vm0 }
 0x341   : > { %4408 = vmatprep.mubr.msk.bf16.mxu0 %vm11756_vm14, %v3366_v26  ;;  %vm3799_vm14 = vcmask 523264  }
 0x348   : > { %4409 = vmatmul.mubr.msk.bf16.gmra.mrb[24].mxu0 %vm11757_vm5, %v3367_v58  ;;  %vm4882_vm5 = vmmov 0  }
 0x349   : > { %4412 = vmatprep.mubr.msk.bf16.mxu0 %vm11758_vm13, %v3368_v13 }
 0x350   : > { %4413 = vmatmul.mubr.msk.bf16.gmra.mrb[28].mxu0 %vm11759_vm2, %v3369_v19 }
 0x351   : > { %4416 = vmatprep.mubr.msk.bf16.mxu0 %vm11744_vm0, %v3370_v39 }
 0x358   : > { %4417 = vmatmul.mubr.msk.bf16.gmra.mrb[32].mxu0 %vm11760_vm3, %v3371_v30 }
 0x359   : > { %4420 = vmatprep.mubr.msk.bf16.mxu0 %vm11761_vm4, %v3372_v61 }
 0x360   : > { %4421 = vmatmul.mubr.msk.bf16.gmra.mrb[36].mxu0 %vm11762_vm1, %v3373_v51 }
 0x361   : > { %4424 = vmatprep.mubr.msk.bf16.mxu0 %vm11763_vm12, %v3374_v41 }
 0x368   : > { %4425 = vmatmul.mubr.msk.bf16.gmra.mrb[40].mxu0 %vm11764_vm11, %v3375_v33 }
 0x369   : > { %4428 = vmatprep.mubr.msk.bf16.mxu0 %vm11765_vm7, %v3376_v38 }
 0x370   : > { %4429 = vmatmul.mubr.msk.bf16.gmra.mrb[44].mxu0 %vm11766_vm8, %v3377_v1 }
 0x371   : > { %4432 = vmatprep.mubr.msk.bf16.mxu0 %vm11767_vm10, %v3378_v2 }
 0x378   : > { %4433 = vmatmul.mubr.msk.bf16.gmra.mrb[48].mxu0 %vm11768_vm6, %v3379_v7 }
 0x379   : > { %4436 = vmatprep.mubr.msk.bf16.mxu0 %vm11769_vm9, %v3380_v8 }
 0x380   : > { %4437 = vmatmul.mubr.msk.bf16.gmra.mrb[52].mxu0 %vm11770_vm15, %v3381_v11 }
 0x3eb   : > { %v4386_v24 = vpop.f32.mrb[0].mxu0 }
 0x3ec   : > { %v3525_v28 = vadd.f32 %v4386_v24, %v10309_v20  ;;  %v3516_v31 = vpop.f32.mrb[1].mxu0 }
 0x3ed   : > { %v3517_v32 = vadd.f32 %v10309_v20, %v3516_v31  ;;  %v4387_v34 = vpop.f32.mrb[2].mxu0 }
 0x3ee   : > { %v3528_v43 = vadd.f32 %v4387_v34, %v10309_v20  ;;  %v3519_v40 = vpop.f32.mrb[3].mxu0  ;;  %v3741_v60 = vmax.f32 %v3525_v28, 0.0 }
 0x3ef   : > { %v3520_v56 = vadd.f32 %v10309_v20, %v3519_v40  ;;  %v3739_v49 = vmax.f32 %v3517_v32, 0.0 }
 0x3f0   : > { %v3742_v22 = vmax.f32 %v3528_v43, 0.0 }
 0x3f1   : > { %v3740_v29 = vmax.f32 %v3520_v56, 0.0 }
 0x3f2   : > { %v10315_v23 = vpack.c.bf16 %v3742_v22, %v3741_v60 }
 0x3f3   : > { %v4390_v54 = vpop.f32.mrb[4].mxu0  ;;  %v10317_v42 = vpack.c.bf16 %v3740_v29, %v3739_v49 }
 0x3f4   : > { %v3541_v14 = vadd.f32 %v4390_v54, %v10309_v20  ;;  %v3532_v26 = vpop.f32.mrb[5].mxu0 }
 0x3f5   : > { %v3533_v50 = vadd.f32 %v10309_v20, %v3532_v26  ;;  %v4391_v35 = vpop.f32.mrb[6].mxu0 }
 0x3f6   : > { %v3544_v53 = vadd.f32 %v4391_v35, %v10309_v20  ;;  %v3535_v57 = vpop.f32.mrb[7].mxu0  ;;  %v3745_v13 = vmax.f32 %v3541_v14, 0.0 }
 0x3f7   : > { %v3536_v58 = vadd.f32 %v10309_v20, %v3535_v57  ;;  %v3743_v45 = vmax.f32 %v3533_v50, 0.0 }
 0x3f8   : > { %v3746_v55 = vmax.f32 %v3544_v53, 0.0 }
 0x3f9   : > { %v3744_v47 = vmax.f32 %v3536_v58, 0.0 }
 0x3fa   : > { %v10323_v16 = vpack.c.bf16 %v3746_v55, %v3745_v13 }
 0x3fb   : > { %v10325_v19 = vpack.c.bf16 %v3744_v47, %v3743_v45  ;;  %v4394_v39 = vpop.f32.mrb[8].mxu0 }
 0x3fc   : > { %v3557_v18 = vadd.f32 %v4394_v39, %v10309_v20  ;;  %v3548_v59 = vpop.f32.mrb[9].mxu0 }
 0x3fd   : > { %v3549_v62 = vadd.f32 %v10309_v20, %v3548_v59  ;;  %v4395_v36 = vpop.f32.mrb[10].mxu0 }
 0x3fe   : > { %v3560_v30 = vadd.f32 %v4395_v36, %v10309_v20  ;;  %v3551_v61 = vpop.f32.mrb[11].mxu0  ;;  %v3749_v0 = vmax.f32 %v3557_v18, 0.0 }
 0x3ff   : > { %v3552_v52 = vadd.f32 %v10309_v20, %v3551_v61  ;;  %v3747_v48 = vmax.f32 %v3549_v62, 0.0 }
 0x400   : > { %v3750_v44 = vmax.f32 %v3560_v30, 0.0 }
 0x401   : > { %v3748_v51 = vmax.f32 %v3552_v52, 0.0 }
 0x402   : > { %v10331_v41 = vpack.c.bf16 %v3750_v44, %v3749_v0 }
 0x403   : > { %v10333_v46 = vpack.c.bf16 %v3748_v51, %v3747_v48  ;;  %v4398_v25 = vpop.f32.mrb[12].mxu0 }
 0x404   : > { %v3573_v63 = vadd.f32 %v4398_v25, %v10309_v20  ;;  %v3564_v27 = vpop.f32.mrb[13].mxu0 }
 0x405   : > { %v3565_v33 = vadd.f32 %v10309_v20, %v3564_v27  ;;  %v4399_v38 = vpop.f32.mrb[14].mxu0 }
 0x406   : > { %v3576_v37 = vadd.f32 %v4399_v38, %v10309_v20  ;;  %v3567_v17 = vpop.f32.mrb[15].mxu0  ;;  %v3753_v15 = vmax.f32 %v3573_v63, 0.0 }
 0x407   : > { %v3568_v21 = vadd.f32 %v10309_v20, %v3567_v17  ;;  %v3751_v2 = vmax.f32 %v3565_v33, 0.0 }
 0x408   : > { %v3754_v1 = vmax.f32 %v3576_v37, 0.0 }
 0x409   : > { %v3752_v3 = vmax.f32 %v3568_v21, 0.0 }
 0x40a   : > { %v10339_v4 = vpack.c.bf16 %v3754_v1, %v3753_v15 }
 0x40b   : > { %v10341_v5 = vpack.c.bf16 %v3752_v3, %v3751_v2  ;;  %v4402_v6 = vpop.f32.mrb[16].mxu0 }
 0x40c   : > { %v3589_v7 = vadd.f32 %v4402_v6, %v10309_v20  ;;  %v3580_v8 = vpop.f32.mrb[17].mxu0 }
 0x40d   : > { %v3581_v9 = vadd.f32 %v10309_v20, %v3580_v8  ;;  %v4403_v10 = vpop.f32.mrb[18].mxu0 }
 0x40e   : > { %v3592_v11 = vadd.f32 %v4403_v10, %v10309_v20  ;;  %v3583_v12 = vpop.f32.mrb[19].mxu0  ;;  %v3757_v28 = vmax.f32 %v3589_v7, 0.0 }
 0x40f   : > { %v3584_v24 = vadd.f32 %v10309_v20, %v3583_v12  ;;  %v3755_v32 = vmax.f32 %v3581_v9, 0.0 }
 0x410   : > { %v3758_v31 = vmax.f32 %v3592_v11, 0.0 }
 0x411   : > { %v3756_v34 = vmax.f32 %v3584_v24, 0.0 }
 0x412   : > { %v4464_v43 = vpack.c.bf16 %v3758_v31, %v3757_v28  ;;  %v3795_v28 = vld [vmem:[#allocation11] sm:$0xff] }
 0x413   : > { %v4406_v40 = vpop.f32.mrb[20].mxu0  ;;  %v4460_v56 = vpack.c.bf16 %v3756_v34, %v3755_v32  ;;  %v4880_v34 = vmov 0.0|0.0  }
 0x414   : > { %v3605_v60 = vadd.f32 %v4406_v40, %v10309_v20  ;;  %v3596_v22 = vpop.f32.mrb[21].mxu0 }
 0x415   : > { %v3597_v49 = vadd.f32 %v10309_v20, %v3596_v22  ;;  %v4407_v29 = vpop.f32.mrb[22].mxu0  ;;  %4461 = vmatprep.subr.bf16.mxu1 %v4460_v56 }
 0x416   : > { %v3608_v54 = vadd.f32 %v4407_v29, %v10309_v20  ;;  %v3599_v14 = vpop.f32.mrb[23].mxu0  ;;  %4463 = vmatpush3.bf16.msra.mxu1 %v10317_v42  ;;  %v3761_v50 = vmax.f32 %v3605_v60, 0.0 }
 0x417   : > { %v3600_v26 = vadd.f32 %v10309_v20, %v3599_v14  ;;  %4465 = vmatprep.subr.bf16.mxu1 %v4464_v43  ;;  %v3759_v53 = vmax.f32 %v3597_v49, 0.0  ;;  %v3798_v43 = vld [vmem:[#allocation11 + $0x18] sm:$0xff] }
 0x418   : > { %v3762_v35 = vmax.f32 %v3608_v54, 0.0 }
 0x419   : > { %v3760_v57 = vmax.f32 %v3600_v26, 0.0 }
 0x41a   : > { %v4472_v58 = vpack.c.bf16 %v3762_v35, %v3761_v50  ;;  %4467 = vmatpush3.bf16.msra.mxu1 %v10315_v23 }
 0x41b   : > { %v4468_v13 = vpack.c.bf16 %v3760_v57, %v3759_v53  ;;  %v4410_v55 = vpop.f32.mrb[24].mxu0 }
 0x41c   : > { %v3621_v45 = vadd.f32 %v4410_v55, %v10309_v20  ;;  %v3612_v47 = vpop.f32.mrb[25].mxu0 }
 0x41d   : > { %v3613_v39 = vadd.f32 %v10309_v20, %v3612_v47  ;;  %v4411_v18 = vpop.f32.mrb[26].mxu0  ;;  %4469 = vmatprep.subr.bf16.mxu1 %v4468_v13 }
 0x41e   : > { %v3624_v42 = vadd.f32 %v4411_v18, %v10309_v20  ;;  %v3615_v59 = vpop.f32.mrb[27].mxu0  ;;  %4471 = vmatpush3.bf16.msra.mxu1 %v10325_v19  ;;  %v3765_v36 = vmax.f32 %v3621_v45, 0.0 }
 0x41f   : > { %v3616_v62 = vadd.f32 %v10309_v20, %v3615_v59  ;;  %4473 = vmatprep.subr.bf16.mxu1 %v4472_v58  ;;  %v3763_v23 = vmax.f32 %v3613_v39, 0.0 }
 0x420   : > { %v3766_v30 = vmax.f32 %v3624_v42, 0.0 }
 0x421   : > { %v3764_v61 = vmax.f32 %v3616_v62, 0.0 }
 0x422   : > { %v4480_v52 = vpack.c.bf16 %v3766_v30, %v3765_v36  ;;  %4475 = vmatpush3.bf16.msra.mxu1 %v10323_v16 }
 0x423   : > { %v4476_v0 = vpack.c.bf16 %v3764_v61, %v3763_v23  ;;  %v4414_v44 = vpop.f32.mrb[28].mxu0 }
 0x424   : > { %v3637_v48 = vadd.f32 %v4414_v44, %v10309_v20  ;;  %v3628_v51 = vpop.f32.mrb[29].mxu0 }
 0x425   : > { %v3629_v25 = vadd.f32 %v10309_v20, %v3628_v51  ;;  %v4415_v63 = vpop.f32.mrb[30].mxu0  ;;  %4477 = vmatprep.subr.bf16.mxu1 %v4476_v0 }
 0x426   : > { %v3640_v19 = vadd.f32 %v4415_v63, %v10309_v20  ;;  %v3631_v27 = vpop.f32.mrb[31].mxu0  ;;  %4479 = vmatpush3.bf16.msra.mxu1 %v10333_v46  ;;  %v3769_v38 = vmax.f32 %v3637_v48, 0.0 }
 0x427   : > { %v3632_v33 = vadd.f32 %v10309_v20, %v3631_v27  ;;  %4481 = vmatprep.subr.bf16.mxu1 %v4480_v52  ;;  %v3767_v16 = vmax.f32 %v3629_v25, 0.0 }
 0x428   : > { %v3770_v37 = vmax.f32 %v3640_v19, 0.0 }
 0x429   : > { %v3768_v17 = vmax.f32 %v3632_v33, 0.0 }
 0x42a   : > { %v4488_v21 = vpack.c.bf16 %v3770_v37, %v3769_v38  ;;  %4483 = vmatpush3.bf16.msra.mxu1 %v10331_v41 }
 0x42b   : > { %v4484_v15 = vpack.c.bf16 %v3768_v17, %v3767_v16  ;;  %v4418_v1 = vpop.f32.mrb[32].mxu0 }
 0x42c   : > { %v3653_v2 = vadd.f32 %v4418_v1, %v10309_v20  ;;  %v3644_v3 = vpop.f32.mrb[33].mxu0 }
 0x42d   : > { %v3645_v6 = vadd.f32 %v10309_v20, %v3644_v3  ;;  %v4419_v7 = vpop.f32.mrb[34].mxu0  ;;  %4485 = vmatprep.subr.bf16.mxu1 %v4484_v15 }
 0x42e   : > { %v3773_v46 = vmax.f32 %v3653_v2, 0.0  ;;  %v3656_v8 = vadd.f32 %v4419_v7, %v10309_v20  ;;  %v3647_v9 = vpop.f32.mrb[35].mxu0  ;;  %4487 = vmatpush3.bf16.msra.mxu1 %v10341_v5 }
 0x42f   : > { %v3648_v10 = vadd.f32 %v10309_v20, %v3647_v9  ;;  %4489 = vmatprep.subr.bf16.mxu1 %v4488_v21  ;;  %v3771_v41 = vmax.f32 %v3645_v6, 0.0 }
 0x430   : > { %v3774_v11 = vmax.f32 %v3656_v8, 0.0 }
 0x431   : > { %v3772_v12 = vmax.f32 %v3648_v10, 0.0 }
 0x432   : > { %v4496_v24 = vpack.c.bf16 %v3774_v11, %v3773_v46  ;;  %4491 = vmatpush3.bf16.msra.mxu1 %v10339_v4 }
 0x433   : > { %v4493_v31 = vpack.c.bf16 %v3772_v12, %v3771_v41  ;;  %v4422_v32 = vpop.f32.mrb[36].mxu0  ;;  %4492 = vmatprep.subr.bf16.mxu1 %v4880_v34 }
 0x434   : > { %v3669_v40 = vadd.f32 %v4422_v32, %v10309_v20  ;;  %v3660_v5 = vpop.f32.mrb[37].mxu0 }
 0x435   : > { %v3661_v56 = vadd.f32 %v10309_v20, %v3660_v5  ;;  %v4423_v60 = vpop.f32.mrb[38].mxu0  ;;  %3868 = vmatmul.mubr.f32.vlgmr.msra.gmra.mrb[0].mxu1 %v3795_v28 }
 0x436   : > { %v3777_v22 = vmax.f32 %v3669_v40, 0.0  ;;  %v3672_v49 = vadd.f32 %v4423_v60, %v10309_v20  ;;  %v3663_v29 = vpop.f32.mrb[39].mxu0  ;;  %4494 = vmatpush1.bf16.msra.mxu1 %v4493_v31  ;;  %4294 = vmatprep.mubr.msk.f32.mxu1 %vm3799_vm14, %v3798_v43 }
 0x437   : > { %v3664_v4 = vadd.f32 %v10309_v20, %v3663_v29  ;;  %4495 = vmatprep.subr.bf16.mxu1 %v4880_v34  ;;  %v3775_v14 = vmax.f32 %v3661_v56, 0.0 }
 0x438   : > { %v3778_v54 = vmax.f32 %v3672_v49, 0.0 }
 0x439   : > { %v3776_v26 = vmax.f32 %v3664_v4, 0.0  ;;  %v3797_v4 = vld [vmem:[#allocation11 + $0x10] sm:$0xff] }
 0x43a   : > { %v4502_v50 = vpack.c.bf16 %v3778_v54, %v3777_v22  ;;  %4497 = vmatpush1.bf16.msra.mxu1 %v4496_v24  ;;  %v4631_v54 = vld [vmem:[#allocation13] sm:$0xff]  }
 0x43b   : > { %v4499_v35 = vpack.c.bf16 %v3776_v26, %v3775_v14  ;;  %v4426_v53 = vpop.f32.mrb[40].mxu0  ;;  %4498 = vmatprep.subr.bf16.mxu1 %v4880_v34  ;;  %v4881_v14 = vmov 0.0   ;;  %v4633_v26 = vld [vmem:[#allocation13 + $0x10] sm:$0xff]  }
 0x43c   : > { %v3685_v57 = vadd.f32 %v4426_v53, %v10309_v20  ;;  %v3676_v58 = vpop.f32.mrb[41].mxu0  ;;  %v4637_v53 = vld [vmem:[#allocation13 + $0x30] sm:$0xff]  }
 0x43d   : > { %v3677_v13 = vadd.f32 %v10309_v20, %v3676_v58  ;;  %v4427_v55 = vpop.f32.mrb[42].mxu0 }
 0x43e   : > { %v3781_v45 = vmax.f32 %v3685_v57, 0.0  ;;  %v3688_v47 = vadd.f32 %v4427_v55, %v10309_v20  ;;  %v3679_v39 = vpop.f32.mrb[43].mxu0  ;;  %4500 = vmatpush1.bf16.msra.mxu1 %v4499_v35  ;;  %v4635_v35 = vld [vmem:[#allocation13 + $0x20] sm:$0xff]   ;;  %v4638_v57 = vld [vmem:[#allocation13 + $0x38] sm:$0xff]  }
 0x43f   : > { %v3680_v18 = vadd.f32 %v10309_v20, %v3679_v39  ;;  %4501 = vmatprep.subr.bf16.mxu1 %v4880_v34  ;;  %v3779_v59 = vmax.f32 %v3677_v13, 0.0 }
 0x440   : > { %v3782_v42 = vmax.f32 %v3688_v47, 0.0 }
 0x441   : > { %v3780_v62 = vmax.f32 %v3680_v18, 0.0 }
 0x442   : > { %v4508_v36 = vpack.c.bf16 %v3782_v42, %v3781_v45  ;;  %4503 = vmatpush1.bf16.msra.mxu1 %v4502_v50  ;;  %v4634_v50 = vld [vmem:[#allocation13 + $0x18] sm:$0xff]  }
 0x443   : > { %v4505_v30 = vpack.c.bf16 %v3780_v62, %v3779_v59  ;;  %v4430_v23 = vpop.f32.mrb[44].mxu0  ;;  %4504 = vmatprep.subr.bf16.mxu1 %v4880_v34  ;;  %v4295_v42 = vld [vmem:[%s10467_s9] ss:$0 sm:$0xff] }
 0x444   : > { %v3701_v61 = vadd.f32 %v4430_v23, %v10309_v20  ;;  %v3692_v52 = vpop.f32.mrb[45].mxu0 }
 0x445   : > { %v3693_v0 = vadd.f32 %v10309_v20, %v3692_v52  ;;  %v4431_v44 = vpop.f32.mrb[46].mxu0 }
 0x446   : > { %v3785_v48 = vmax.f32 %v3701_v61, 0.0  ;;  %v3704_v51 = vadd.f32 %v4431_v44, %v10309_v20  ;;  %v3695_v25 = vpop.f32.mrb[47].mxu0  ;;  %4506 = vmatpush1.bf16.msra.mxu1 %v4505_v30 }
 0x447   : > { %v3696_v63 = vadd.f32 %v10309_v20, %v3695_v25  ;;  %4507 = vmatprep.subr.bf16.mxu1 %v4880_v34  ;;  %v3783_v27 = vmax.f32 %v3693_v0, 0.0 }
 0x448   : > { %v3786_v19 = vmax.f32 %v3704_v51, 0.0 }
 0x449   : > { %v3784_v33 = vmax.f32 %v3696_v63, 0.0 }
 0x44a   : > { %v4514_v38 = vpack.c.bf16 %v3786_v19, %v3785_v48  ;;  %4509 = vmatpush1.bf16.msra.mxu1 %v4508_v36 }
 0x44b   : > { %v4511_v37 = vpack.c.bf16 %v3784_v33, %v3783_v27  ;;  %v4434_v16 = vpop.f32.mrb[48].mxu0  ;;  %4510 = vmatprep.subr.bf16.mxu1 %v4880_v34 }
 0x44c   : > { %v3717_v17 = vadd.f32 %v4434_v16, %v10309_v20  ;;  %v3708_v21 = vpop.f32.mrb[49].mxu0 }
 0x44d   : > { %v3709_v15 = vadd.f32 %v10309_v20, %v3708_v21  ;;  %v4435_v1 = vpop.f32.mrb[50].mxu0 }
 0x44e   : > { %v3789_v2 = vmax.f32 %v3717_v17, 0.0  ;;  %v3720_v3 = vadd.f32 %v4435_v1, %v10309_v20  ;;  %v3711_v6 = vpop.f32.mrb[51].mxu0  ;;  %4512 = vmatpush1.bf16.msra.mxu1 %v4511_v37 }
 0x44f   : > { %v3712_v7 = vadd.f32 %v10309_v20, %v3711_v6  ;;  %4513 = vmatprep.subr.bf16.mxu1 %v4880_v34  ;;  %v3787_v8 = vmax.f32 %v3709_v15, 0.0 }
 0x450   : > { %v3790_v46 = vmax.f32 %v3720_v3, 0.0 }
 0x451   : > { %v3788_v9 = vmax.f32 %v3712_v7, 0.0 }
 0x452   : > { %v4520_v10 = vpack.c.bf16 %v3790_v46, %v3789_v2  ;;  %4515 = vmatpush1.bf16.msra.mxu1 %v4514_v38 }
 0x453   : > { %v4517_v11 = vpack.c.bf16 %v3788_v9, %v3787_v8  ;;  %v4438_v41 = vpop.f32.mrb[52].mxu0  ;;  %4516 = vmatprep.subr.bf16.mxu1 %v4880_v34 }
 0x454   : > { %v3733_v12 = vadd.f32 %v4438_v41, %v10309_v20  ;;  %v3724_v24 = vpop.f32.mrb[53].mxu0 }
 0x455   : > { %v3725_v28 = vadd.f32 %v10309_v20, %v3724_v24  ;;  %v4439_v31 = vpop.f32.mrb[54].mxu0 }
 0x456   : > { %v3793_v32 = vmax.f32 %v3733_v12, 0.0  ;;  %v3736_v43 = vadd.f32 %v4439_v31, %v10309_v20  ;;  %v3727_v40 = vpop.f32.mrb[55].mxu0  ;;  %4518 = vmatpush1.bf16.msra.mxu1 %v4517_v11 }
 0x457   : > { %v3728_v5 = vadd.f32 %v10309_v20, %v3727_v40  ;;  %4519 = vmatprep.subr.bf16.mxu1 %v4880_v34  ;;  %v3791_v60 = vmax.f32 %v3725_v28, 0.0  ;;  %v4632_v20 = vld [vmem:[#allocation13 + $0x8] sm:$0xff]  }
 0x458   : > { %v3794_v56 = vmax.f32 %v3736_v43, 0.0 }
 0x459   : > { %v3792_v22 = vmax.f32 %v3728_v5, 0.0 }
 0x45a   : > { %v4526_v49 = vpack.c.bf16 %v3794_v56, %v3793_v32  ;;  %4521 = vmatpush1.bf16.msra.mxu1 %v4520_v10 }
 0x45b   : > { %v4523_v29 = vpack.c.bf16 %v3792_v22, %v3791_v60  ;;  %4522 = vmatprep.subr.bf16.mxu1 %v4880_v34 }
 0x45e   : > { %4524 = vmatpush1.bf16.msra.mxu1 %v4523_v29 }
 0x45f   : > { %4525 = vmatprep.subr.bf16.mxu1 %v4880_v34  ;;  %v4636_v34 = vld [vmem:[#allocation13 + $0x28] sm:$0xff]  }
 0x462   : > { %4527 = vmatpush1.bf16.msra.mxu1 %v4526_v49 }
 0x463   : > { %4440 = vmatprep.subr.bf16.mxu1 %v4881_v14 }
 0x465   : > { %3938 = vmatmul.mubr.f32.vlgmr.msra.gmra.mrb[2].mxu1 %v3797_v4 }
 0x466   : > { %4441 = vmatpush3.bf16.msra.mxu1 %v4631_v54  ;;  %4456 = vmatprep.mubr.msk.bf16.mxu1 %vm4882_vm5, %v4881_v14 }
 0x467   : > { %4442 = vmatprep.subr.bf16.mxu1 %v4881_v14 }
 0x46a   : > { %4443 = vmatpush3.bf16.msra.mxu1 %v4632_v20 }
 0x46b   : > { %4444 = vmatprep.subr.bf16.mxu1 %v4881_v14 }
 0x46e   : > { %4445 = vmatpush3.bf16.msra.mxu1 %v4633_v26 }
 0x46f   : > { %4446 = vmatprep.subr.bf16.mxu1 %v4881_v14 }
 0x472   : > { %4447 = vmatpush3.bf16.msra.mxu1 %v4634_v50 }
 0x473   : > { %4448 = vmatprep.subr.bf16.mxu1 %v4881_v14 }
 0x476   : > { %4449 = vmatpush3.bf16.msra.mxu1 %v4635_v35 }
 0x477   : > { %4450 = vmatprep.subr.bf16.mxu1 %v4881_v14 }
 0x47a   : > { %4451 = vmatpush3.bf16.msra.mxu1 %v4636_v34 }
 0x47b   : > { %4452 = vmatprep.subr.bf16.mxu1 %v4881_v14 }
 0x47e   : > { %4453 = vmatpush3.bf16.msra.mxu1 %v4637_v53 }
 0x47f   : > { %4454 = vmatprep.subr.bf16.mxu1 %v4881_v14 }
 0x482   : > { %4455 = vmatpush3.bf16.msra.mxu1 %v4638_v57 }
 0x508   : > { %v4370_v58 = vpop.f32.mrb[0].mxu1 }
 0x509   : > { %v4371_v13 = vpop.f32.mrb[1].mxu1 }
 0x50a   : > { %v4372_v55 = vadd.f32 %v4371_v13, %v4370_v58 }
 0x538   : > { %v3939_v45 = vpop.f32.mrb[2].mxu1 }
 0x539   : > { %v3940_v47 = vadd.f32 %v4372_v55, %v3939_v45  ;;  %v3941_v39 = vpop.f32.mrb[3].mxu1 }
 0x53b   : > { %v3943_v18 = vpack.c.bf16 %v3940_v47, %v3940_v47 }
 0x53d   : > { %4457 = vmatmul.mubr.bf16.vlgmr.msra.gmra.mrb[4].mxu1 %v3943_v18 }
 0x610   : > { %v4049_v59 = vpop.f32.mrb[4].mxu1 }
 0x611   : > { %v4050_v62 = vadd.f32 %v4295_v42, %v4049_v59  ;;  %v4458_v36 = vpop.f32.mrb[5].mxu1 }
 0x612   : > { %v4052_v30 = vpop.f32.mrb[6].mxu1 }
 0x613   : > { %4055 = vst [vmem:[%s5266_s23] sm:$0xff] %v4050_v62  ;;  %v4459_v23 = vpop.f32.mrb[7].mxu1 }
 0x614   : > { %4784 = shalt.err (!%p4781_p1)
}
 0x615   : > { %s4785_s29 = scalar_lea.hbm %s10411_s1, 128  ;;  %s4789_s8 = scalar_lea.hbm %s10468_s10, 256 }
 0x616   : > { %p4786_p5 = scmp.ne.s32.totalorder %s10411_s1, %s4785_s29  ;;  %p4790_p13 = scmp.lt.u32.totalorder %s10411_s1, %s10468_s10 }
 0x617   : > { %p4791_p12 = scmp.lt.u32.totalorder %s4789_s8, %s4785_s29  ;;  %p4793_p3 = scmp.lt.u32.totalorder %s4785_s29, %s10411_s1 }
 0x618   : > { %p4787_p4 = pnand %p4786_p5, %p11771_p8 }
 0x619   : > { %p4792_p7 = por %p4791_p12, %p4790_p13 }
 0x61a   : > { %p4788_p10 = pneg %p4787_p4 }
 0x61b   : > { %p4794_p9 = por %p4793_p3, %p4792_p7 }
 0x61d   : > { %p4795_p11 = pnand %p4794_p9, %p4788_p10 }
 0x61f   : > { %4798 = shalt.err (!%p4795_p11)
}
 0x620   : > { %4538 = dma.vmem_to_hbm [thread:$0]  (%p11771_p8), %s10413_s16, 128, %s10411_s1, %s4057_s24  }
 0x621 PF: > { %s11772_s18 = sld [smem:[#allocation21_spill]]  ;;  %s4083_s7 = sand.u32 1, %s4843_s3  }
 0x622   : > { %p11773_p2 = scmp.ne.s32.totalorder %s10552_s27, 0  ;;  %s4084_s30 = scalar_lea.sflag [#allocation10], %s4083_s7 }
 0x627   : > { %p11774_p6 = scmp.ge.s32.totalorder %s11772_s18, 2 }
 0x629   : > { %p4552_p0 = pnand %p11774_p6, %p11773_p2 }
 0x62b   : > { %4838 = dma.done.wait (!%p4552_p0), %s4084_s30, 128  }
 0x62c   : > { %4840 = vsyncadd (!%p4552_p0), %s4084_s30, 4294967168  ;;  %s43_s19 = sadd.s32 1, %s11772_s18   ;;  %s11775_s0 = sld [smem:[#allocation19_spill]] }
 0x62d   : > { %p40_p1 = scmp.ge.s32.totalorder %s43_s19, 4   ;;  %s11776_s16 = sld [smem:[#allocation23_spill]] }
 0x62e   : > { %s11777_s17 = sld [smem:[#allocation20_spill]]  ;;  %s11778_s18 = sld [smem:[#allocation22_spill]] }
 0x62f   : > { %s11779_s3 = smov %s4847_s15  ;;  %42 = sbr.rel (!%p40_p1) target bundleno = 51 (0x33), region = 122 }
 0x632   : > { %s11780_s15 = smov %s11775_s0 }
 0x636   :  { %4089 = vsyncpa [#allocation9], 1 }
 0x637   :  { %4091 = vsyncpa [#allocation9 + $0x1], 1 }
 0x638   :  { %4092 = vsyncpa [#allocation12], 1 }
 0x639   :  { %4093 = vsyncpa [#allocation10], 1 }
 0x63a   :  { %4095 = vsyncpa [#allocation10 + $0x1], 1 }

</bundles_post_ra>
